<compile_context>
chip_gen: v5e
topology: v5e:2x2
jax: 0.10.0
libtpu: 0.0.40
codegen_flags: <defaults>
</compile_context>

<pallas_src>
import functools

import jax
import jax.numpy as jnp
from jax.experimental import pallas as pl
from jax.experimental.pallas import tpu as pltpu


# ---------------------------------------------------------------------------
# GELU (tanh approximation)
# ---------------------------------------------------------------------------
# TODO(synk): PyTorch nn.GELU() defaults to the exact erf form; the tanh approximation
# is used here (and in the in-script reference) because erf has no guaranteed Mosaic
# lowering.  Max abs deviation ~1e-3.
def _gelu_tanh(x):
    c = 0.7978845608028654  # sqrt(2/pi)
    return 0.5 * x * (1.0 + jnp.tanh(c * (x + 0.044715 * x * x * x)))


# ---------------------------------------------------------------------------
# One-time weight preparation (runs once, outside the jitted forward)
# ---------------------------------------------------------------------------
def _fold_downsample(w, b, cin, avg):
    """Fold the stride-2 3x3 conv taps AND the PixelUnshuffle(2) + channel-average skip
    into one (16*Cin, Cout) matrix over the parity-shift-concatenated phase-packed input.
    Row ordering: shift-major (s = 2*s_r + s_c), phase-packed channel minor."""
    cout = w.shape[0]
    c4 = 4 * cin
    wm = jnp.zeros((2, 2, c4, cout), jnp.float32)

    def tap(k):  # kernel index -> (shift idx: 0 => block offset -1, 1 => offset 0; parity)
        return (0, 1) if k == 0 else (1, k - 1)

    for kh in range(3):
        sr, i = tap(kh)
        for kw in range(3):
            sc, j = tap(kw)
            blk = (2 * i + j) * cin
            wm = wm.at[sr, sc, blk:blk + cin, :].add(jnp.transpose(w[:, :, kh, kw]))

    # skip: PixelUnshuffle(2) channel (c*4 + 2i + j), averaged over groups of `avg`;
    # it lands on the zero-shift (1,1) window.
    skip = jnp.zeros((c4, cout), jnp.float32)
    for c in range(cin):
        for i in range(2):
            for j in range(2):
                g = (c * 4 + 2 * i + j) // avg
                skip = skip.at[(2 * i + j) * cin + c, g].add(1.0 / avg)
    wm = wm.at[1, 1].add(skip)
    return wm.reshape(4 * c4, cout), b.reshape(1, cout).astype(jnp.float32)


def prepare_encoder_params(raw_params, factors, scale_vs_channels):
    """Repack PyTorch-layout weights for the fused stage kernels (done once)."""
    prepared = []
    for i, stage in enumerate(raw_params):
        # TODO(synk): only the factor==2 (kernel=3) DownsampleWithSkip used by this
        # Encoder configuration is implemented; factor 1/4 variants need their own fold.
        assert factors[i] == 2, "only factor=2 implemented"
        w, b = stage["down"]
        cout, cin = int(w.shape[0]), int(w.shape[1])
        avg = scale_vs_channels[i]
        assert 4 * cin == cout * avg, "pixel-unshuffle skip / conv channel mismatch"
        wd, bd = _fold_downsample(w, b, cin, avg)
        sp = {"wd": wd, "bd": bd}

        blocks = stage["blocks"]
        if blocks:
            c = cout
            f32, bf16 = jnp.float32, jnp.bfloat16
            assert all(bk[0].shape[-1] == 7 for bk in blocks), "ConvNext dw kernel must be 7"
            sp["dw"] = jnp.stack([jnp.transpose(bk[0][:, 0], (1, 2, 0)).reshape(49, c)
                                  for bk in blocks]).astype(f32)          # (nb, 49, C)
            sp["dwb"] = jnp.stack([bk[1].reshape(1, c) for bk in blocks]).astype(f32)
            sp["lng"] = jnp.stack([bk[2].reshape(1, c) for bk in blocks]).astype(f32)
            sp["lnb"] = jnp.stack([bk[3].reshape(1, c) for bk in blocks]).astype(f32)
            sp["w1"] = jnp.stack([jnp.transpose(bk[4]) for bk in blocks]).astype(bf16)
            sp["b1"] = jnp.stack([bk[5].reshape(1, -1) for bk in blocks]).astype(f32)
            sp["w2"] = jnp.stack([jnp.transpose(bk[6]) for bk in blocks]).astype(bf16)
            sp["b2"] = jnp.stack([bk[7].reshape(1, c) for bk in blocks]).astype(f32)
            sp["gam"] = jnp.stack([bk[8].reshape(1, c) for bk in blocks]).astype(f32)
        prepared.append(sp)
    return prepared


# ---------------------------------------------------------------------------
# Fused encoder-stage kernel: DownsampleWithSkip + ConvNextBlock chain
# ---------------------------------------------------------------------------
def _stage_kernel(*refs, OH, OW, C4, Cout, n_blocks, eps):
    xp_ref, wd_ref, bd_ref = refs[0], refs[1], refs[2]
    if n_blocks:
        (dw_ref, dwb_ref, lng_ref, lnb_ref,
         w1_ref, b1_ref, w2_ref, b2_ref, gam_ref) = refs[3:12]
        o_ref, ds_pad, cn_pad = refs[12], refs[13], refs[14]
    else:
        o_ref, ds_pad = refs[3], refs[4]
        cn_pad = None

    # ---- DownsampleWithSkip: conv(k=3,s=2,p=1) + pixel-unshuffle/avg skip ----
    # in-kernel halo: zero the scratch, write the phase-packed tile into the interior
    # (only the top row / left column of phases is actually read as padding).
    ds_pad[...] = jnp.zeros((OH + 1, OW + 1, C4), jnp.float32)
    ds_pad[1:, 1:, :] = xp_ref[0].astype(jnp.float32)

    # ONE MXU matmul: concatenate the four parity-shift windows along K (K = 4*C4).
    patch = jnp.concatenate(
        [ds_pad[sr:sr + OH, sc:sc + OW, :] for sr in (0, 1) for sc in (0, 1)],
        axis=-1,
    ).reshape(OH * OW, 4 * C4)
    act = jnp.dot(patch, wd_ref[...], preferred_element_type=jnp.float32) + bd_ref[...]
    # act: (OH*OW, Cout) f32 — canonical working layout for the whole stage.

    # ---- ConvNextBlock chain; activation stays resident in VMEM ----
    if n_blocks:
        cn_pad[...] = jnp.zeros((OH + 6, OW + 6, Cout), jnp.float32)  # halo stays zero

    for bi in range(n_blocks):
        cn_pad[3:3 + OH, 3:3 + OW, :] = act.reshape(OH, OW, Cout)
        dwv = dw_ref[bi]                                   # (49, Cout) f32

        # 7x7 depthwise conv: kw outermost (7 sublane-shifting loads),
        # kh innermost (cheap leading-dim slices of the loaded slab).
        acc = jnp.zeros((OH, OW, Cout), jnp.float32)
        for kw in range(7):
            slab = cn_pad[:, kw:kw + OW, :]                # (OH+6, OW, Cout)
            for kh in range(7):
                acc = acc + slab[kh:kh + OH] * dwv[7 * kh + kw][None, None, :]
        z = acc.reshape(OH * OW, Cout) + dwb_ref[bi]

        # LayerNorm over channels (f32)
        mu = jnp.mean(z, axis=-1, keepdims=True)
        zc = z - mu
        var = jnp.mean(zc * zc, axis=-1, keepdims=True)
        zn = zc * jax.lax.rsqrt(var + eps) * lng_ref[bi] + lnb_ref[bi]

        # pointwise MLP on the MXU: bf16 operands, f32 accumulation
        h = jnp.dot(zn.astype(jnp.bfloat16), w1_ref[bi],
                    preferred_element_type=jnp.float32) + b1_ref[bi]
        h = _gelu_tanh(h)
        y = jnp.dot(h.astype(jnp.bfloat16), w2_ref[bi],
                    preferred_element_type=jnp.float32) + b2_ref[bi]

        # layer scale + residual (residual is the VMEM-resident block input)
        act = act + y * gam_ref[bi]

    o_ref[0] = act.reshape(OH, OW, Cout).astype(o_ref.dtype)


def _encoder_stage(x_nhwc, sp, *, eps=1e-5):
    N, H, W, Cin = x_nhwc.shape
    assert H % 2 == 0 and W % 2 == 0
    OH, OW = H // 2, W // 2
    C4 = 4 * Cin
    Cout = sp["wd"].shape[1]
    nb = sp["dw"].shape[0] if "dw" in sp else 0

    # phase pack (== NHWC pixel-unshuffle with (i, j, c) channel order); the halo is
    # added inside the kernel, so there is no jnp.pad / extra HBM copy here.
    xp = x_nhwc.reshape(N, OH, 2, OW, 2, Cin)
    xp = jnp.transpose(xp, (0, 1, 3, 2, 4, 5)).reshape(N, OH, OW, C4)

    in_specs = [
        pl.BlockSpec((1, OH, OW, C4), lambda n: (n, 0, 0, 0)),
        pl.BlockSpec((4 * C4, Cout), lambda n: (0, 0)),
        pl.BlockSpec((1, Cout), lambda n: (0, 0)),
    ]
    args = [xp, sp["wd"], sp["bd"]]
    if nb:
        for name in ("dw", "dwb", "lng", "lnb", "w1", "b1", "w2", "b2", "gam"):
            arr = sp[name]
            in_specs.append(pl.BlockSpec(arr.shape, lambda n, nd=arr.ndim: (0,) * nd))
            args.append(arr)

    # VMEM scratch: downsample halo buffer + ConvNext 7x7 halo buffer (a few KB here;
    # for large images add a spatial row-tile grid axis and re-budget for v7x's 64 MiB).
    scratch = [pltpu.VMEM((OH + 1, OW + 1, C4), jnp.float32)]
    if nb:
        scratch.append(pltpu.VMEM((OH + 6, OW + 6, Cout), jnp.float32))

    kernel = functools.partial(_stage_kernel, OH=OH, OW=OW, C4=C4, Cout=Cout,
                               n_blocks=nb, eps=eps)
    return pl.pallas_call(
        kernel,
        out_shape=jax.ShapeDtypeStruct((N, OH, OW, Cout), x_nhwc.dtype),
        grid=(N,),
        in_specs=in_specs,
        out_specs=pl.BlockSpec((1, OH, OW, Cout), lambda n: (n, 0, 0, 0)),
        scratch_shapes=scratch,
        compiler_params=pltpu.CompilerParams(dimension_semantics=("parallel",)),
    )(*args)


# ---------------------------------------------------------------------------
# Encoder.forward
# ---------------------------------------------------------------------------
def encoder_forward(x_nchw, prepared):
    """Pallas implementation of Encoder.forward; returns (x, residuals) in NCHW."""
    x = jnp.transpose(x_nchw, (0, 2, 3, 1))      # single NCHW -> NHWC conversion
    residuals = []
    for si, sp in enumerate(prepared):
        # residual = stage input in NCHW (module contract); stage 0 reuses the
        # original input directly, so no extra transpose for the first residual.
        residuals.append(x_nchw if si == 0 else jnp.transpose(x, (0, 3, 1, 2)))
        x = _encoder_stage(x, sp)
    return jnp.transpose(x, (0, 3, 1, 2)), residuals


# ---------------------------------------------------------------------------
# Pure-JAX reference (same math as the PyTorch forward)
# ---------------------------------------------------------------------------
def _ref_downsample(x, w, b, factor, avg):
    p = factor // 2
    conv = jax.lax.conv_general_dilated(
        x, w, (factor, factor), ((p, p), (p, p)),
        dimension_numbers=("NCHW", "OIHW", "NCHW"),
        precision=jax.lax.Precision.HIGHEST) + b[None, :, None, None]
    N, C, H, W = x.shape
    r = factor
    pu = x.reshape(N, C, H // r, r, W // r, r)
    pu = jnp.transpose(pu, (0, 1, 3, 5, 2, 4)).reshape(N, C * r * r, H // r, W // r)
    if avg > 1:
        pu = pu.reshape(N, (C * r * r) // avg, avg, H // r, W // r).mean(axis=2)
    return conv + pu


def _ref_convnext(x, dw_w, dw_b, ln_g, ln_b, w1, b1, w2, b2, gamma, eps=1e-5):
    N, C, H, W = x.shape
    P = dw_w.shape[-1] // 2
    y = jax.lax.conv_general_dilated(
        x, dw_w, (1, 1), ((P, P), (P, P)),
        dimension_numbers=("NCHW", "OIHW", "NCHW"), feature_group_count=C,
        precision=jax.lax.Precision.HIGHEST) + dw_b[None, :, None, None]
    y = jnp.transpose(y, (0, 2, 3, 1))
    mu = y.mean(-1, keepdims=True)
    var = ((y - mu) ** 2).mean(-1, keepdims=True)
    y = (y - mu) / jnp.sqrt(var + eps) * ln_g + ln_b
    y = _gelu_tanh(y @ w1.T + b1) @ w2.T + b2
    y = y * gamma
    return jnp.transpose(y, (0, 3, 1, 2)) + x


def _ref_encoder(x, params, factors, avgs):
    residuals = []
    for i, stage in enumerate(params):
        residuals.append(x)
        w, b = stage["down"]
        x = _ref_downsample(x, w, b, factors[i], avgs[i])
        for blk in stage["blocks"]:
            x = _ref_convnext(x, *blk)
    return x, residuals


if __name__ == "__main__":
    key = jax.random.PRNGKey(0)

    def randn(k, shape, scale=1.0):
        return scale * jax.random.normal(k, shape, jnp.float32)

    # Encoder(channels=[4, 8, 16], blocks=[1, 1], factors=[2, 2], scale_vs_channels=[2, 2])
    channels = [4, 8, 16]
    blocks_cfg = [1, 1]
    factors = [2, 2]
    scale_vs_channels = [2, 2]
    N, H, W = 2, 16, 16
    expansion = 4

    params = []
    for i in range(1, len(channels)):
        cin, cout = channels[i - 1], channels[i]
        key, k1, k2 = jax.random.split(key, 3)
        stage = {"down": (randn(k1, (cout, cin, 3, 3), 0.2), randn(k2, (cout,), 0.1)),
                 "blocks": []}
        for _ in range(blocks_cfg[i - 1]):
            key, *ks = jax.random.split(key, 10)
            C = cout
            stage["blocks"].append((
                randn(ks[0], (C, 1, 7, 7), 0.2),           # dw_conv.weight
                randn(ks[1], (C,), 0.1),                   # dw_conv.bias
                1.0 + randn(ks[2], (C,), 0.1),             # norm.weight
                randn(ks[3], (C,), 0.1),                   # norm.bias
                randn(ks[4], (expansion * C, C), 0.2),     # pw_conv1.weight
                randn(ks[5], (expansion * C,), 0.1),       # pw_conv1.bias
                randn(ks[6], (C, expansion * C), 0.2),     # pw_conv2.weight
                randn(ks[7], (C,), 0.1),                   # pw_conv2.bias
                randn(ks[8], (C,), 0.5),                   # gamma (layer scale)
            ))
        params.append(stage)

    key, kx = jax.random.split(key)
    x = randn(kx, (N, channels[0], H, W))

    # one-time weight repacking (kept out of the steady-state jitted forward)
    prepared = prepare_encoder_params(params, factors, scale_vs_channels)

    fwd = jax.jit(encoder_forward)
    out, residuals = fwd(x, prepared)
    out = jax.block_until_ready(out)

    ref_out, ref_res = _ref_encoder(x, params, factors, scale_vs_channels)

    assert out.shape == ref_out.shape == (N, channels[-1], H // 4, W // 4), \
        (out.shape, ref_out.shape)
    # atol accounts for the bf16 MXU operands in the pointwise MLP (f32 accumulation);
    # observed drift vs. the all-f32 reference is ~1e-2 absolute at these magnitudes.
    assert jnp.allclose(out, ref_out, atol=3e-2, rtol=2e-2), \
        float(jnp.max(jnp.abs(out - ref_out)))
    assert len(residuals) == len(ref_res)
    for r, rr in zip(residuals, ref_res):
        assert r.shape == rr.shape
        assert jnp.allclose(r, rr, atol=3e-2, rtol=2e-2), \
            float(jnp.max(jnp.abs(r - rr)))
    print("KERNEL_OK")
</pallas_src>

<mosaic_0001>
module attributes {stable_mosaic.version = 11 : i64} {
  func.func @_stage_kernel(%arg0: i32, %arg1: memref<1x8x8x16xf32, #tpu.memory_space<vmem>>, %arg2: memref<64x8xf32, #tpu.memory_space<vmem>>, %arg3: memref<1x8xf32, #tpu.memory_space<vmem>>, %arg4: memref<1x49x8xf32, #tpu.memory_space<vmem>>, %arg5: memref<1x1x8xf32, #tpu.memory_space<vmem>>, %arg6: memref<1x1x8xf32, #tpu.memory_space<vmem>>, %arg7: memref<1x1x8xf32, #tpu.memory_space<vmem>>, %arg8: memref<1x8x32xbf16, #tpu.memory_space<vmem>>, %arg9: memref<1x1x32xf32, #tpu.memory_space<vmem>>, %arg10: memref<1x32x8xbf16, #tpu.memory_space<vmem>>, %arg11: memref<1x1x8xf32, #tpu.memory_space<vmem>>, %arg12: memref<1x1x8xf32, #tpu.memory_space<vmem>>, %arg13: memref<1x8x8x8xf32, #tpu.memory_space<vmem>>, %arg14: memref<9x9x16xf32, #tpu.memory_space<vmem>>, %arg15: memref<14x14x8xf32, #tpu.memory_space<vmem>>) attributes {dimension_semantics = [#tpu.dimension_semantics<parallel>], iteration_bounds = array<i64: 2>, scalar_prefetch = 0 : i64, scratch_operands = 2 : i64, tpu.core_type = #tpu.core_type<tc>, window_params = [{transform_indices = @transform_0, window_bounds = array<i64: 1, 8, 8, 16>}, {pipeline_mode = #tpu.pipeline_mode<synchronous>, transform_indices = @transform_1, window_bounds = array<i64: 64, 8>}, {pipeline_mode = #tpu.pipeline_mode<synchronous>, transform_indices = @transform_2, window_bounds = array<i64: 1, 8>}, {pipeline_mode = #tpu.pipeline_mode<synchronous>, transform_indices = @transform_3, window_bounds = array<i64: 1, 49, 8>}, {pipeline_mode = #tpu.pipeline_mode<synchronous>, transform_indices = @transform_4, window_bounds = array<i64: 1, 1, 8>}, {pipeline_mode = #tpu.pipeline_mode<synchronous>, transform_indices = @transform_5, window_bounds = array<i64: 1, 1, 8>}, {pipeline_mode = #tpu.pipeline_mode<synchronous>, transform_indices = @transform_6, window_bounds = array<i64: 1, 1, 8>}, {pipeline_mode = #tpu.pipeline_mode<synchronous>, transform_indices = @transform_7, window_bounds = array<i64: 1, 8, 32>}, {pipeline_mode = #tpu.pipeline_mode<synchronous>, transform_indices = @transform_8, window_bounds = array<i64: 1, 1, 32>}, {pipeline_mode = #tpu.pipeline_mode<synchronous>, transform_indices = @transform_9, window_bounds = array<i64: 1, 32, 8>}, {pipeline_mode = #tpu.pipeline_mode<synchronous>, transform_indices = @transform_10, window_bounds = array<i64: 1, 1, 8>}, {pipeline_mode = #tpu.pipeline_mode<synchronous>, transform_indices = @transform_11, window_bounds = array<i64: 1, 1, 8>}, {transform_indices = @transform_12, window_bounds = array<i64: 1, 8, 8, 8>}]} {
    %cst = arith.constant 0.000000e+00 : f32
    %0 = vector.broadcast %cst : f32 to vector<9x9x16xf32>
    %c0 = arith.constant 0 : index
    %c0_0 = arith.constant 0 : index
    %c0_1 = arith.constant 0 : index
    %1 = vector.load %arg14[%c0, %c0_0, %c0_1] : memref<9x9x16xf32, #tpu.memory_space<vmem>>, vector<9x9x16xf32>
    tpu.vector_store %arg14[%c0, %c0_0, %c0_1], %0 {strides = array<i32>} : memref<9x9x16xf32, #tpu.memory_space<vmem>>, vector<9x9x16xf32>,
    %c0_2 = arith.constant 0 : index
    %c0_3 = arith.constant 0 : index
    %c0_4 = arith.constant 0 : index
    %c0_5 = arith.constant 0 : index
    %2 = vector.load %arg1[%c0_2, %c0_3, %c0_4, %c0_5] : memref<1x8x8x16xf32, #tpu.memory_space<vmem>>, vector<1x8x8x16xf32>
    %3 = vector.shape_cast %2 : vector<1x8x8x16xf32> to vector<8x8x16xf32>
    %c1 = arith.constant 1 : index
    %c1_6 = arith.constant 1 : index
    %c0_7 = arith.constant 0 : index
    %4 = vector.load %arg14[%c1, %c1_6, %c0_7] : memref<9x9x16xf32, #tpu.memory_space<vmem>>, vector<8x8x16xf32>
    tpu.vector_store %arg14[%c1, %c1_6, %c0_7], %3 {strides = array<i32>} : memref<9x9x16xf32, #tpu.memory_space<vmem>>, vector<8x8x16xf32>,
    %c0_8 = arith.constant 0 : index
    %c0_9 = arith.constant 0 : index
    %c0_10 = arith.constant 0 : index
    %5 = vector.load %arg14[%c0_8, %c0_9, %c0_10] : memref<9x9x16xf32, #tpu.memory_space<vmem>>, vector<8x8x16xf32>
    %c0_11 = arith.constant 0 : index
    %c1_12 = arith.constant 1 : index
    %c0_13 = arith.constant 0 : index
    %6 = vector.load %arg14[%c0_11, %c1_12, %c0_13] : memref<9x9x16xf32, #tpu.memory_space<vmem>>, vector<8x8x16xf32>
    %c1_14 = arith.constant 1 : index
    %c0_15 = arith.constant 0 : index
    %c0_16 = arith.constant 0 : index
    %7 = vector.load %arg14[%c1_14, %c0_15, %c0_16] : memref<9x9x16xf32, #tpu.memory_space<vmem>>, vector<8x8x16xf32>
    %c1_17 = arith.constant 1 : index
    %c1_18 = arith.constant 1 : index
    %c0_19 = arith.constant 0 : index
    %8 = vector.load %arg14[%c1_17, %c1_18, %c0_19] : memref<9x9x16xf32, #tpu.memory_space<vmem>>, vector<8x8x16xf32>
    %9 = tpu.concatenate %5, %6, %7, %8 in 2 : vector<8x8x16xf32>, vector<8x8x16xf32>, vector<8x8x16xf32>, vector<8x8x16xf32> -> vector<8x8x64xf32>
    %10 = vector.shape_cast %9 : vector<8x8x64xf32> to vector<64x64xf32>
    %c0_20 = arith.constant 0 : index
    %c0_21 = arith.constant 0 : index
    %11 = vector.load %arg2[%c0_20, %c0_21] : memref<64x8xf32, #tpu.memory_space<vmem>>, vector<64x8xf32>
    %cst_22 = arith.constant dense<0.000000e+00> : vector<64x8xf32>
    %12 = tpu.matmul %10, %11, %cst_22 {dimension_numbers = #tpu.dot_dimension_numbers<[1], [0], [0], [1], [0, 0, 1, 1], [], []>} : vector<64x64xf32>, vector<64x8xf32>, vector<64x8xf32> -> vector<64x8xf32>
    %c0_23 = arith.constant 0 : index
    %c0_24 = arith.constant 0 : index
    %13 = vector.load %arg3[%c0_23, %c0_24] : memref<1x8xf32, #tpu.memory_space<vmem>>, vector<1x8xf32>
    %14 = vector.broadcast %13 : vector<1x8xf32> to vector<64x8xf32>
    %15 = arith.addf %12, %14 : vector<64x8xf32>
    %cst_25 = arith.constant 0.000000e+00 : f32
    %16 = vector.broadcast %cst_25 : f32 to vector<14x14x8xf32>
    %c0_26 = arith.constant 0 : index
    %c0_27 = arith.constant 0 : index
    %c0_28 = arith.constant 0 : index
    %17 = vector.load %arg15[%c0_26, %c0_27, %c0_28] : memref<14x14x8xf32, #tpu.memory_space<vmem>>, vector<14x14x8xf32>
    tpu.vector_store %arg15[%c0_26, %c0_27, %c0_28], %16 {strides = array<i32>} : memref<14x14x8xf32, #tpu.memory_space<vmem>>, vector<14x14x8xf32>,
    %18 = vector.shape_cast %15 : vector<64x8xf32> to vector<8x8x8xf32>
    %c3 = arith.constant 3 : index
    %c3_29 = arith.constant 3 : index
    %c0_30 = arith.constant 0 : index
    %19 = vector.load %arg15[%c3, %c3_29, %c0_30] : memref<14x14x8xf32, #tpu.memory_space<vmem>>, vector<8x8x8xf32>
    tpu.vector_store %arg15[%c3, %c3_29, %c0_30], %18 {strides = array<i32>} : memref<14x14x8xf32, #tpu.memory_space<vmem>>, vector<8x8x8xf32>,
    %c0_31 = arith.constant 0 : index
    %c0_32 = arith.constant 0 : index
    %c0_33 = arith.constant 0 : index
    %20 = vector.load %arg4[%c0_31, %c0_32, %c0_33] : memref<1x49x8xf32, #tpu.memory_space<vmem>>, vector<1x49x8xf32>
    %21 = vector.shape_cast %20 : vector<1x49x8xf32> to vector<49x8xf32>
    %cst_34 = arith.constant 0.000000e+00 : f32
    %22 = vector.broadcast %cst_34 : f32 to vector<8x8x8xf32>
    %c0_35 = arith.constant 0 : index
    %c0_36 = arith.constant 0 : index
    %c0_37 = arith.constant 0 : index
    %23 = vector.load %arg15[%c0_35, %c0_36, %c0_37] : memref<14x14x8xf32, #tpu.memory_space<vmem>>, vector<14x8x8xf32>
    %24 = vector.extract_strided_slice %23 {offsets = [0, 0, 0], sizes = [8, 8, 8], strides = [1, 1, 1]} : vector<14x8x8xf32> to vector<8x8x8xf32>
    %25 = vector.extract_strided_slice %21 {offsets = [0, 0], sizes = [1, 8], strides = [1, 1]} : vector<49x8xf32> to vector<1x8xf32>
    %26 = vector.shape_cast %25 : vector<1x8xf32> to vector<8xf32>
    %27 = vector.shape_cast %26 : vector<8xf32> to vector<1x1x8xf32>
    %28 = vector.broadcast %27 : vector<1x1x8xf32> to vector<8x8x8xf32>
    %29 = arith.mulf %24, %28 : vector<8x8x8xf32>
    %30 = arith.addf %22, %29 : vector<8x8x8xf32>
    %31 = vector.extract_strided_slice %23 {offsets = [1, 0, 0], sizes = [8, 8, 8], strides = [1, 1, 1]} : vector<14x8x8xf32> to vector<8x8x8xf32>
    %32 = vector.extract_strided_slice %21 {offsets = [7, 0], sizes = [1, 8], strides = [1, 1]} : vector<49x8xf32> to vector<1x8xf32>
    %33 = vector.shape_cast %32 : vector<1x8xf32> to vector<8xf32>
    %34 = vector.shape_cast %33 : vector<8xf32> to vector<1x1x8xf32>
    %35 = vector.broadcast %34 : vector<1x1x8xf32> to vector<8x8x8xf32>
    %36 = arith.mulf %31, %35 : vector<8x8x8xf32>
    %37 = arith.addf %30, %36 : vector<8x8x8xf32>
    %38 = vector.extract_strided_slice %23 {offsets = [2, 0, 0], sizes = [8, 8, 8], strides = [1, 1, 1]} : vector<14x8x8xf32> to vector<8x8x8xf32>
    %39 = vector.extract_strided_slice %21 {offsets = [14, 0], sizes = [1, 8], strides = [1, 1]} : vector<49x8xf32> to vector<1x8xf32>
    %40 = vector.shape_cast %39 : vector<1x8xf32> to vector<8xf32>
    %41 = vector.shape_cast %40 : vector<8xf32> to vector<1x1x8xf32>
    %42 = vector.broadcast %41 : vector<1x1x8xf32> to vector<8x8x8xf32>
    %43 = arith.mulf %38, %42 : vector<8x8x8xf32>
    %44 = arith.addf %37, %43 : vector<8x8x8xf32>
    %45 = vector.extract_strided_slice %23 {offsets = [3, 0, 0], sizes = [8, 8, 8], strides = [1, 1, 1]} : vector<14x8x8xf32> to vector<8x8x8xf32>
    %46 = vector.extract_strided_slice %21 {offsets = [21, 0], sizes = [1, 8], strides = [1, 1]} : vector<49x8xf32> to vector<1x8xf32>
    %47 = vector.shape_cast %46 : vector<1x8xf32> to vector<8xf32>
    %48 = vector.shape_cast %47 : vector<8xf32> to vector<1x1x8xf32>
    %49 = vector.broadcast %48 : vector<1x1x8xf32> to vector<8x8x8xf32>
    %50 = arith.mulf %45, %49 : vector<8x8x8xf32>
    %51 = arith.addf %44, %50 : vector<8x8x8xf32>
    %52 = vector.extract_strided_slice %23 {offsets = [4, 0, 0], sizes = [8, 8, 8], strides = [1, 1, 1]} : vector<14x8x8xf32> to vector<8x8x8xf32>
    %53 = vector.extract_strided_slice %21 {offsets = [28, 0], sizes = [1, 8], strides = [1, 1]} : vector<49x8xf32> to vector<1x8xf32>
    %54 = vector.shape_cast %53 : vector<1x8xf32> to vector<8xf32>
    %55 = vector.shape_cast %54 : vector<8xf32> to vector<1x1x8xf32>
    %56 = vector.broadcast %55 : vector<1x1x8xf32> to vector<8x8x8xf32>
    %57 = arith.mulf %52, %56 : vector<8x8x8xf32>
    %58 = arith.addf %51, %57 : vector<8x8x8xf32>
    %59 = vector.extract_strided_slice %23 {offsets = [5, 0, 0], sizes = [8, 8, 8], strides = [1, 1, 1]} : vector<14x8x8xf32> to vector<8x8x8xf32>
    %60 = vector.extract_strided_slice %21 {offsets = [35, 0], sizes = [1, 8], strides = [1, 1]} : vector<49x8xf32> to vector<1x8xf32>
    %61 = vector.shape_cast %60 : vector<1x8xf32> to vector<8xf32>
    %62 = vector.shape_cast %61 : vector<8xf32> to vector<1x1x8xf32>
    %63 = vector.broadcast %62 : vector<1x1x8xf32> to vector<8x8x8xf32>
    %64 = arith.mulf %59, %63 : vector<8x8x8xf32>
    %65 = arith.addf %58, %64 : vector<8x8x8xf32>
    %66 = vector.extract_strided_slice %23 {offsets = [6, 0, 0], sizes = [8, 8, 8], strides = [1, 1, 1]} : vector<14x8x8xf32> to vector<8x8x8xf32>
    %67 = vector.extract_strided_slice %21 {offsets = [42, 0], sizes = [1, 8], strides = [1, 1]} : vector<49x8xf32> to vector<1x8xf32>
    %68 = vector.shape_cast %67 : vector<1x8xf32> to vector<8xf32>
    %69 = vector.shape_cast %68 : vector<8xf32> to vector<1x1x8xf32>
    %70 = vector.broadcast %69 : vector<1x1x8xf32> to vector<8x8x8xf32>
    %71 = arith.mulf %66, %70 : vector<8x8x8xf32>
    %72 = arith.addf %65, %71 : vector<8x8x8xf32>
    %c0_38 = arith.constant 0 : index
    %c1_39 = arith.constant 1 : index
    %c0_40 = arith.constant 0 : index
    %73 = vector.load %arg15[%c0_38, %c1_39, %c0_40] : memref<14x14x8xf32, #tpu.memory_space<vmem>>, vector<14x8x8xf32>
    %74 = vector.extract_strided_slice %73 {offsets = [0, 0, 0], sizes = [8, 8, 8], strides = [1, 1, 1]} : vector<14x8x8xf32> to vector<8x8x8xf32>
    %75 = vector.extract_strided_slice %21 {offsets = [1, 0], sizes = [1, 8], strides = [1, 1]} : vector<49x8xf32> to vector<1x8xf32>
    %76 = vector.shape_cast %75 : vector<1x8xf32> to vector<8xf32>
    %77 = vector.shape_cast %76 : vector<8xf32> to vector<1x1x8xf32>
    %78 = vector.broadcast %77 : vector<1x1x8xf32> to vector<8x8x8xf32>
    %79 = arith.mulf %74, %78 : vector<8x8x8xf32>
    %80 = arith.addf %72, %79 : vector<8x8x8xf32>
    %81 = vector.extract_strided_slice %73 {offsets = [1, 0, 0], sizes = [8, 8, 8], strides = [1, 1, 1]} : vector<14x8x8xf32> to vector<8x8x8xf32>
    %82 = vector.extract_strided_slice %21 {offsets = [8, 0], sizes = [1, 8], strides = [1, 1]} : vector<49x8xf32> to vector<1x8xf32>
    %83 = vector.shape_cast %82 : vector<1x8xf32> to vector<8xf32>
    %84 = vector.shape_cast %83 : vector<8xf32> to vector<1x1x8xf32>
    %85 = vector.broadcast %84 : vector<1x1x8xf32> to vector<8x8x8xf32>
    %86 = arith.mulf %81, %85 : vector<8x8x8xf32>
    %87 = arith.addf %80, %86 : vector<8x8x8xf32>
    %88 = vector.extract_strided_slice %73 {offsets = [2, 0, 0], sizes = [8, 8, 8], strides = [1, 1, 1]} : vector<14x8x8xf32> to vector<8x8x8xf32>
    %89 = vector.extract_strided_slice %21 {offsets = [15, 0], sizes = [1, 8], strides = [1, 1]} : vector<49x8xf32> to vector<1x8xf32>
    %90 = vector.shape_cast %89 : vector<1x8xf32> to vector<8xf32>
    %91 = vector.shape_cast %90 : vector<8xf32> to vector<1x1x8xf32>
    %92 = vector.broadcast %91 : vector<1x1x8xf32> to vector<8x8x8xf32>
    %93 = arith.mulf %88, %92 : vector<8x8x8xf32>
    %94 = arith.addf %87, %93 : vector<8x8x8xf32>
    %95 = vector.extract_strided_slice %73 {offsets = [3, 0, 0], sizes = [8, 8, 8], strides = [1, 1, 1]} : vector<14x8x8xf32> to vector<8x8x8xf32>
    %96 = vector.extract_strided_slice %21 {offsets = [22, 0], sizes = [1, 8], strides = [1, 1]} : vector<49x8xf32> to vector<1x8xf32>
    %97 = vector.shape_cast %96 : vector<1x8xf32> to vector<8xf32>
    %98 = vector.shape_cast %97 : vector<8xf32> to vector<1x1x8xf32>
    %99 = vector.broadcast %98 : vector<1x1x8xf32> to vector<8x8x8xf32>
    %100 = arith.mulf %95, %99 : vector<8x8x8xf32>
    %101 = arith.addf %94, %100 : vector<8x8x8xf32>
    %102 = vector.extract_strided_slice %73 {offsets = [4, 0, 0], sizes = [8, 8, 8], strides = [1, 1, 1]} : vector<14x8x8xf32> to vector<8x8x8xf32>
    %103 = vector.extract_strided_slice %21 {offsets = [29, 0], sizes = [1, 8], strides = [1, 1]} : vector<49x8xf32> to vector<1x8xf32>
    %104 = vector.shape_cast %103 : vector<1x8xf32> to vector<8xf32>
    %105 = vector.shape_cast %104 : vector<8xf32> to vector<1x1x8xf32>
    %106 = vector.broadcast %105 : vector<1x1x8xf32> to vector<8x8x8xf32>
    %107 = arith.mulf %102, %106 : vector<8x8x8xf32>
    %108 = arith.addf %101, %107 : vector<8x8x8xf32>
    %109 = vector.extract_strided_slice %73 {offsets = [5, 0, 0], sizes = [8, 8, 8], strides = [1, 1, 1]} : vector<14x8x8xf32> to vector<8x8x8xf32>
    %110 = vector.extract_strided_slice %21 {offsets = [36, 0], sizes = [1, 8], strides = [1, 1]} : vector<49x8xf32> to vector<1x8xf32>
    %111 = vector.shape_cast %110 : vector<1x8xf32> to vector<8xf32>
    %112 = vector.shape_cast %111 : vector<8xf32> to vector<1x1x8xf32>
    %113 = vector.broadcast %112 : vector<1x1x8xf32> to vector<8x8x8xf32>
    %114 = arith.mulf %109, %113 : vector<8x8x8xf32>
    %115 = arith.addf %108, %114 : vector<8x8x8xf32>
    %116 = vector.extract_strided_slice %73 {offsets = [6, 0, 0], sizes = [8, 8, 8], strides = [1, 1, 1]} : vector<14x8x8xf32> to vector<8x8x8xf32>
    %117 = vector.extract_strided_slice %21 {offsets = [43, 0], sizes = [1, 8], strides = [1, 1]} : vector<49x8xf32> to vector<1x8xf32>
    %118 = vector.shape_cast %117 : vector<1x8xf32> to vector<8xf32>
    %119 = vector.shape_cast %118 : vector<8xf32> to vector<1x1x8xf32>
    %120 = vector.broadcast %119 : vector<1x1x8xf32> to vector<8x8x8xf32>
    %121 = arith.mulf %116, %120 : vector<8x8x8xf32>
    %122 = arith.addf %115, %121 : vector<8x8x8xf32>
    %c0_41 = arith.constant 0 : index
    %c2 = arith.constant 2 : index
    %c0_42 = arith.constant 0 : index
    %123 = vector.load %arg15[%c0_41, %c2, %c0_42] : memref<14x14x8xf32, #tpu.memory_space<vmem>>, vector<14x8x8xf32>
    %124 = vector.extract_strided_slice %123 {offsets = [0, 0, 0], sizes = [8, 8, 8], strides = [1, 1, 1]} : vector<14x8x8xf32> to vector<8x8x8xf32>
    %125 = vector.extract_strided_slice %21 {offsets = [2, 0], sizes = [1, 8], strides = [1, 1]} : vector<49x8xf32> to vector<1x8xf32>
    %126 = vector.shape_cast %125 : vector<1x8xf32> to vector<8xf32>
    %127 = vector.shape_cast %126 : vector<8xf32> to vector<1x1x8xf32>
    %128 = vector.broadcast %127 : vector<1x1x8xf32> to vector<8x8x8xf32>
    %129 = arith.mulf %124, %128 : vector<8x8x8xf32>
    %130 = arith.addf %122, %129 : vector<8x8x8xf32>
    %131 = vector.extract_strided_slice %123 {offsets = [1, 0, 0], sizes = [8, 8, 8], strides = [1, 1, 1]} : vector<14x8x8xf32> to vector<8x8x8xf32>
    %132 = vector.extract_strided_slice %21 {offsets = [9, 0], sizes = [1, 8], strides = [1, 1]} : vector<49x8xf32> to vector<1x8xf32>
    %133 = vector.shape_cast %132 : vector<1x8xf32> to vector<8xf32>
    %134 = vector.shape_cast %133 : vector<8xf32> to vector<1x1x8xf32>
    %135 = vector.broadcast %134 : vector<1x1x8xf32> to vector<8x8x8xf32>
    %136 = arith.mulf %131, %135 : vector<8x8x8xf32>
    %137 = arith.addf %130, %136 : vector<8x8x8xf32>
    %138 = vector.extract_strided_slice %123 {offsets = [2, 0, 0], sizes = [8, 8, 8], strides = [1, 1, 1]} : vector<14x8x8xf32> to vector<8x8x8xf32>
    %139 = vector.extract_strided_slice %21 {offsets = [16, 0], sizes = [1, 8], strides = [1, 1]} : vector<49x8xf32> to vector<1x8xf32>
    %140 = vector.shape_cast %139 : vector<1x8xf32> to vector<8xf32>
    %141 = vector.shape_cast %140 : vector<8xf32> to vector<1x1x8xf32>
    %142 = vector.broadcast %141 : vector<1x1x8xf32> to vector<8x8x8xf32>
    %143 = arith.mulf %138, %142 : vector<8x8x8xf32>
    %144 = arith.addf %137, %143 : vector<8x8x8xf32>
    %145 = vector.extract_strided_slice %123 {offsets = [3, 0, 0], sizes = [8, 8, 8], strides = [1, 1, 1]} : vector<14x8x8xf32> to vector<8x8x8xf32>
    %146 = vector.extract_strided_slice %21 {offsets = [23, 0], sizes = [1, 8], strides = [1, 1]} : vector<49x8xf32> to vector<1x8xf32>
    %147 = vector.shape_cast %146 : vector<1x8xf32> to vector<8xf32>
    %148 = vector.shape_cast %147 : vector<8xf32> to vector<1x1x8xf32>
    %149 = vector.broadcast %148 : vector<1x1x8xf32> to vector<8x8x8xf32>
    %150 = arith.mulf %145, %149 : vector<8x8x8xf32>
    %151 = arith.addf %144, %150 : vector<8x8x8xf32>
    %152 = vector.extract_strided_slice %123 {offsets = [4, 0, 0], sizes = [8, 8, 8], strides = [1, 1, 1]} : vector<14x8x8xf32> to vector<8x8x8xf32>
    %153 = vector.extract_strided_slice %21 {offsets = [30, 0], sizes = [1, 8], strides = [1, 1]} : vector<49x8xf32> to vector<1x8xf32>
    %154 = vector.shape_cast %153 : vector<1x8xf32> to vector<8xf32>
    %155 = vector.shape_cast %154 : vector<8xf32> to vector<1x1x8xf32>
    %156 = vector.broadcast %155 : vector<1x1x8xf32> to vector<8x8x8xf32>
    %157 = arith.mulf %152, %156 : vector<8x8x8xf32>
    %158 = arith.addf %151, %157 : vector<8x8x8xf32>
    %159 = vector.extract_strided_slice %123 {offsets = [5, 0, 0], sizes = [8, 8, 8], strides = [1, 1, 1]} : vector<14x8x8xf32> to vector<8x8x8xf32>
    %160 = vector.extract_strided_slice %21 {offsets = [37, 0], sizes = [1, 8], strides = [1, 1]} : vector<49x8xf32> to vector<1x8xf32>
    %161 = vector.shape_cast %160 : vector<1x8xf32> to vector<8xf32>
    %162 = vector.shape_cast %161 : vector<8xf32> to vector<1x1x8xf32>
    %163 = vector.broadcast %162 : vector<1x1x8xf32> to vector<8x8x8xf32>
    %164 = arith.mulf %159, %163 : vector<8x8x8xf32>
    %165 = arith.addf %158, %164 : vector<8x8x8xf32>
    %166 = vector.extract_strided_slice %123 {offsets = [6, 0, 0], sizes = [8, 8, 8], strides = [1, 1, 1]} : vector<14x8x8xf32> to vector<8x8x8xf32>
    %167 = vector.extract_strided_slice %21 {offsets = [44, 0], sizes = [1, 8], strides = [1, 1]} : vector<49x8xf32> to vector<1x8xf32>
    %168 = vector.shape_cast %167 : vector<1x8xf32> to vector<8xf32>
    %169 = vector.shape_cast %168 : vector<8xf32> to vector<1x1x8xf32>
    %170 = vector.broadcast %169 : vector<1x1x8xf32> to vector<8x8x8xf32>
    %171 = arith.mulf %166, %170 : vector<8x8x8xf32>
    %172 = arith.addf %165, %171 : vector<8x8x8xf32>
    %c0_43 = arith.constant 0 : index
    %c3_44 = arith.constant 3 : index
    %c0_45 = arith.constant 0 : index
    %173 = vector.load %arg15[%c0_43, %c3_44, %c0_45] : memref<14x14x8xf32, #tpu.memory_space<vmem>>, vector<14x8x8xf32>
    %174 = vector.extract_strided_slice %173 {offsets = [0, 0, 0], sizes = [8, 8, 8], strides = [1, 1, 1]} : vector<14x8x8xf32> to vector<8x8x8xf32>
    %175 = vector.extract_strided_slice %21 {offsets = [3, 0], sizes = [1, 8], strides = [1, 1]} : vector<49x8xf32> to vector<1x8xf32>
    %176 = vector.shape_cast %175 : vector<1x8xf32> to vector<8xf32>
    %177 = vector.shape_cast %176 : vector<8xf32> to vector<1x1x8xf32>
    %178 = vector.broadcast %177 : vector<1x1x8xf32> to vector<8x8x8xf32>
    %179 = arith.mulf %174, %178 : vector<8x8x8xf32>
    %180 = arith.addf %172, %179 : vector<8x8x8xf32>
    %181 = vector.extract_strided_slice %173 {offsets = [1, 0, 0], sizes = [8, 8, 8], strides = [1, 1, 1]} : vector<14x8x8xf32> to vector<8x8x8xf32>
    %182 = vector.extract_strided_slice %21 {offsets = [10, 0], sizes = [1, 8], strides = [1, 1]} : vector<49x8xf32> to vector<1x8xf32>
    %183 = vector.shape_cast %182 : vector<1x8xf32> to vector<8xf32>
    %184 = vector.shape_cast %183 : vector<8xf32> to vector<1x1x8xf32>
    %185 = vector.broadcast %184 : vector<1x1x8xf32> to vector<8x8x8xf32>
    %186 = arith.mulf %181, %185 : vector<8x8x8xf32>
    %187 = arith.addf %180, %186 : vector<8x8x8xf32>
    %188 = vector.extract_strided_slice %173 {offsets = [2, 0, 0], sizes = [8, 8, 8], strides = [1, 1, 1]} : vector<14x8x8xf32> to vector<8x8x8xf32>
    %189 = vector.extract_strided_slice %21 {offsets = [17, 0], sizes = [1, 8], strides = [1, 1]} : vector<49x8xf32> to vector<1x8xf32>
    %190 = vector.shape_cast %189 : vector<1x8xf32> to vector<8xf32>
    %191 = vector.shape_cast %190 : vector<8xf32> to vector<1x1x8xf32>
    %192 = vector.broadcast %191 : vector<1x1x8xf32> to vector<8x8x8xf32>
    %193 = arith.mulf %188, %192 : vector<8x8x8xf32>
    %194 = arith.addf %187, %193 : vector<8x8x8xf32>
    %195 = vector.extract_strided_slice %173 {offsets = [3, 0, 0], sizes = [8, 8, 8], strides = [1, 1, 1]} : vector<14x8x8xf32> to vector<8x8x8xf32>
    %196 = vector.extract_strided_slice %21 {offsets = [24, 0], sizes = [1, 8], strides = [1, 1]} : vector<49x8xf32> to vector<1x8xf32>
    %197 = vector.shape_cast %196 : vector<1x8xf32> to vector<8xf32>
    %198 = vector.shape_cast %197 : vector<8xf32> to vector<1x1x8xf32>
    %199 = vector.broadcast %198 : vector<1x1x8xf32> to vector<8x8x8xf32>
    %200 = arith.mulf %195, %199 : vector<8x8x8xf32>
    %201 = arith.addf %194, %200 : vector<8x8x8xf32>
    %202 = vector.extract_strided_slice %173 {offsets = [4, 0, 0], sizes = [8, 8, 8], strides = [1, 1, 1]} : vector<14x8x8xf32> to vector<8x8x8xf32>
    %203 = vector.extract_strided_slice %21 {offsets = [31, 0], sizes = [1, 8], strides = [1, 1]} : vector<49x8xf32> to vector<1x8xf32>
    %204 = vector.shape_cast %203 : vector<1x8xf32> to vector<8xf32>
    %205 = vector.shape_cast %204 : vector<8xf32> to vector<1x1x8xf32>
    %206 = vector.broadcast %205 : vector<1x1x8xf32> to vector<8x8x8xf32>
    %207 = arith.mulf %202, %206 : vector<8x8x8xf32>
    %208 = arith.addf %201, %207 : vector<8x8x8xf32>
    %209 = vector.extract_strided_slice %173 {offsets = [5, 0, 0], sizes = [8, 8, 8], strides = [1, 1, 1]} : vector<14x8x8xf32> to vector<8x8x8xf32>
    %210 = vector.extract_strided_slice %21 {offsets = [38, 0], sizes = [1, 8], strides = [1, 1]} : vector<49x8xf32> to vector<1x8xf32>
    %211 = vector.shape_cast %210 : vector<1x8xf32> to vector<8xf32>
    %212 = vector.shape_cast %211 : vector<8xf32> to vector<1x1x8xf32>
    %213 = vector.broadcast %212 : vector<1x1x8xf32> to vector<8x8x8xf32>
    %214 = arith.mulf %209, %213 : vector<8x8x8xf32>
    %215 = arith.addf %208, %214 : vector<8x8x8xf32>
    %216 = vector.extract_strided_slice %173 {offsets = [6, 0, 0], sizes = [8, 8, 8], strides = [1, 1, 1]} : vector<14x8x8xf32> to vector<8x8x8xf32>
    %217 = vector.extract_strided_slice %21 {offsets = [45, 0], sizes = [1, 8], strides = [1, 1]} : vector<49x8xf32> to vector<1x8xf32>
    %218 = vector.shape_cast %217 : vector<1x8xf32> to vector<8xf32>
    %219 = vector.shape_cast %218 : vector<8xf32> to vector<1x1x8xf32>
    %220 = vector.broadcast %219 : vector<1x1x8xf32> to vector<8x8x8xf32>
    %221 = arith.mulf %216, %220 : vector<8x8x8xf32>
    %222 = arith.addf %215, %221 : vector<8x8x8xf32>
    %c0_46 = arith.constant 0 : index
    %c4 = arith.constant 4 : index
    %c0_47 = arith.constant 0 : index
    %223 = vector.load %arg15[%c0_46, %c4, %c0_47] : memref<14x14x8xf32, #tpu.memory_space<vmem>>, vector<14x8x8xf32>
    %224 = vector.extract_strided_slice %223 {offsets = [0, 0, 0], sizes = [8, 8, 8], strides = [1, 1, 1]} : vector<14x8x8xf32> to vector<8x8x8xf32>
    %225 = vector.extract_strided_slice %21 {offsets = [4, 0], sizes = [1, 8], strides = [1, 1]} : vector<49x8xf32> to vector<1x8xf32>
    %226 = vector.shape_cast %225 : vector<1x8xf32> to vector<8xf32>
    %227 = vector.shape_cast %226 : vector<8xf32> to vector<1x1x8xf32>
    %228 = vector.broadcast %227 : vector<1x1x8xf32> to vector<8x8x8xf32>
    %229 = arith.mulf %224, %228 : vector<8x8x8xf32>
    %230 = arith.addf %222, %229 : vector<8x8x8xf32>
    %231 = vector.extract_strided_slice %223 {offsets = [1, 0, 0], sizes = [8, 8, 8], strides = [1, 1, 1]} : vector<14x8x8xf32> to vector<8x8x8xf32>
    %232 = vector.extract_strided_slice %21 {offsets = [11, 0], sizes = [1, 8], strides = [1, 1]} : vector<49x8xf32> to vector<1x8xf32>
    %233 = vector.shape_cast %232 : vector<1x8xf32> to vector<8xf32>
    %234 = vector.shape_cast %233 : vector<8xf32> to vector<1x1x8xf32>
    %235 = vector.broadcast %234 : vector<1x1x8xf32> to vector<8x8x8xf32>
    %236 = arith.mulf %231, %235 : vector<8x8x8xf32>
    %237 = arith.addf %230, %236 : vector<8x8x8xf32>
    %238 = vector.extract_strided_slice %223 {offsets = [2, 0, 0], sizes = [8, 8, 8], strides = [1, 1, 1]} : vector<14x8x8xf32> to vector<8x8x8xf32>
    %239 = vector.extract_strided_slice %21 {offsets = [18, 0], sizes = [1, 8], strides = [1, 1]} : vector<49x8xf32> to vector<1x8xf32>
    %240 = vector.shape_cast %239 : vector<1x8xf32> to vector<8xf32>
    %241 = vector.shape_cast %240 : vector<8xf32> to vector<1x1x8xf32>
    %242 = vector.broadcast %241 : vector<1x1x8xf32> to vector<8x8x8xf32>
    %243 = arith.mulf %238, %242 : vector<8x8x8xf32>
    %244 = arith.addf %237, %243 : vector<8x8x8xf32>
    %245 = vector.extract_strided_slice %223 {offsets = [3, 0, 0], sizes = [8, 8, 8], strides = [1, 1, 1]} : vector<14x8x8xf32> to vector<8x8x8xf32>
    %246 = vector.extract_strided_slice %21 {offsets = [25, 0], sizes = [1, 8], strides = [1, 1]} : vector<49x8xf32> to vector<1x8xf32>
    %247 = vector.shape_cast %246 : vector<1x8xf32> to vector<8xf32>
    %248 = vector.shape_cast %247 : vector<8xf32> to vector<1x1x8xf32>
    %249 = vector.broadcast %248 : vector<1x1x8xf32> to vector<8x8x8xf32>
    %250 = arith.mulf %245, %249 : vector<8x8x8xf32>
    %251 = arith.addf %244, %250 : vector<8x8x8xf32>
    %252 = vector.extract_strided_slice %223 {offsets = [4, 0, 0], sizes = [8, 8, 8], strides = [1, 1, 1]} : vector<14x8x8xf32> to vector<8x8x8xf32>
    %253 = vector.extract_strided_slice %21 {offsets = [32, 0], sizes = [1, 8], strides = [1, 1]} : vector<49x8xf32> to vector<1x8xf32>
    %254 = vector.shape_cast %253 : vector<1x8xf32> to vector<8xf32>
    %255 = vector.shape_cast %254 : vector<8xf32> to vector<1x1x8xf32>
    %256 = vector.broadcast %255 : vector<1x1x8xf32> to vector<8x8x8xf32>
    %257 = arith.mulf %252, %256 : vector<8x8x8xf32>
    %258 = arith.addf %251, %257 : vector<8x8x8xf32>
    %259 = vector.extract_strided_slice %223 {offsets = [5, 0, 0], sizes = [8, 8, 8], strides = [1, 1, 1]} : vector<14x8x8xf32> to vector<8x8x8xf32>
    %260 = vector.extract_strided_slice %21 {offsets = [39, 0], sizes = [1, 8], strides = [1, 1]} : vector<49x8xf32> to vector<1x8xf32>
    %261 = vector.shape_cast %260 : vector<1x8xf32> to vector<8xf32>
    %262 = vector.shape_cast %261 : vector<8xf32> to vector<1x1x8xf32>
    %263 = vector.broadcast %262 : vector<1x1x8xf32> to vector<8x8x8xf32>
    %264 = arith.mulf %259, %263 : vector<8x8x8xf32>
    %265 = arith.addf %258, %264 : vector<8x8x8xf32>
    %266 = vector.extract_strided_slice %223 {offsets = [6, 0, 0], sizes = [8, 8, 8], strides = [1, 1, 1]} : vector<14x8x8xf32> to vector<8x8x8xf32>
    %267 = vector.extract_strided_slice %21 {offsets = [46, 0], sizes = [1, 8], strides = [1, 1]} : vector<49x8xf32> to vector<1x8xf32>
    %268 = vector.shape_cast %267 : vector<1x8xf32> to vector<8xf32>
    %269 = vector.shape_cast %268 : vector<8xf32> to vector<1x1x8xf32>
    %270 = vector.broadcast %269 : vector<1x1x8xf32> to vector<8x8x8xf32>
    %271 = arith.mulf %266, %270 : vector<8x8x8xf32>
    %272 = arith.addf %265, %271 : vector<8x8x8xf32>
    %c0_48 = arith.constant 0 : index
    %c5 = arith.constant 5 : index
    %c0_49 = arith.constant 0 : index
    %273 = vector.load %arg15[%c0_48, %c5, %c0_49] : memref<14x14x8xf32, #tpu.memory_space<vmem>>, vector<14x8x8xf32>
    %274 = vector.extract_strided_slice %273 {offsets = [0, 0, 0], sizes = [8, 8, 8], strides = [1, 1, 1]} : vector<14x8x8xf32> to vector<8x8x8xf32>
    %275 = vector.extract_strided_slice %21 {offsets = [5, 0], sizes = [1, 8], strides = [1, 1]} : vector<49x8xf32> to vector<1x8xf32>
    %276 = vector.shape_cast %275 : vector<1x8xf32> to vector<8xf32>
    %277 = vector.shape_cast %276 : vector<8xf32> to vector<1x1x8xf32>
    %278 = vector.broadcast %277 : vector<1x1x8xf32> to vector<8x8x8xf32>
    %279 = arith.mulf %274, %278 : vector<8x8x8xf32>
    %280 = arith.addf %272, %279 : vector<8x8x8xf32>
    %281 = vector.extract_strided_slice %273 {offsets = [1, 0, 0], sizes = [8, 8, 8], strides = [1, 1, 1]} : vector<14x8x8xf32> to vector<8x8x8xf32>
    %282 = vector.extract_strided_slice %21 {offsets = [12, 0], sizes = [1, 8], strides = [1, 1]} : vector<49x8xf32> to vector<1x8xf32>
    %283 = vector.shape_cast %282 : vector<1x8xf32> to vector<8xf32>
    %284 = vector.shape_cast %283 : vector<8xf32> to vector<1x1x8xf32>
    %285 = vector.broadcast %284 : vector<1x1x8xf32> to vector<8x8x8xf32>
    %286 = arith.mulf %281, %285 : vector<8x8x8xf32>
    %287 = arith.addf %280, %286 : vector<8x8x8xf32>
    %288 = vector.extract_strided_slice %273 {offsets = [2, 0, 0], sizes = [8, 8, 8], strides = [1, 1, 1]} : vector<14x8x8xf32> to vector<8x8x8xf32>
    %289 = vector.extract_strided_slice %21 {offsets = [19, 0], sizes = [1, 8], strides = [1, 1]} : vector<49x8xf32> to vector<1x8xf32>
    %290 = vector.shape_cast %289 : vector<1x8xf32> to vector<8xf32>
    %291 = vector.shape_cast %290 : vector<8xf32> to vector<1x1x8xf32>
    %292 = vector.broadcast %291 : vector<1x1x8xf32> to vector<8x8x8xf32>
    %293 = arith.mulf %288, %292 : vector<8x8x8xf32>
    %294 = arith.addf %287, %293 : vector<8x8x8xf32>
    %295 = vector.extract_strided_slice %273 {offsets = [3, 0, 0], sizes = [8, 8, 8], strides = [1, 1, 1]} : vector<14x8x8xf32> to vector<8x8x8xf32>
    %296 = vector.extract_strided_slice %21 {offsets = [26, 0], sizes = [1, 8], strides = [1, 1]} : vector<49x8xf32> to vector<1x8xf32>
    %297 = vector.shape_cast %296 : vector<1x8xf32> to vector<8xf32>
    %298 = vector.shape_cast %297 : vector<8xf32> to vector<1x1x8xf32>
    %299 = vector.broadcast %298 : vector<1x1x8xf32> to vector<8x8x8xf32>
    %300 = arith.mulf %295, %299 : vector<8x8x8xf32>
    %301 = arith.addf %294, %300 : vector<8x8x8xf32>
    %302 = vector.extract_strided_slice %273 {offsets = [4, 0, 0], sizes = [8, 8, 8], strides = [1, 1, 1]} : vector<14x8x8xf32> to vector<8x8x8xf32>
    %303 = vector.extract_strided_slice %21 {offsets = [33, 0], sizes = [1, 8], strides = [1, 1]} : vector<49x8xf32> to vector<1x8xf32>
    %304 = vector.shape_cast %303 : vector<1x8xf32> to vector<8xf32>
    %305 = vector.shape_cast %304 : vector<8xf32> to vector<1x1x8xf32>
    %306 = vector.broadcast %305 : vector<1x1x8xf32> to vector<8x8x8xf32>
    %307 = arith.mulf %302, %306 : vector<8x8x8xf32>
    %308 = arith.addf %301, %307 : vector<8x8x8xf32>
    %309 = vector.extract_strided_slice %273 {offsets = [5, 0, 0], sizes = [8, 8, 8], strides = [1, 1, 1]} : vector<14x8x8xf32> to vector<8x8x8xf32>
    %310 = vector.extract_strided_slice %21 {offsets = [40, 0], sizes = [1, 8], strides = [1, 1]} : vector<49x8xf32> to vector<1x8xf32>
    %311 = vector.shape_cast %310 : vector<1x8xf32> to vector<8xf32>
    %312 = vector.shape_cast %311 : vector<8xf32> to vector<1x1x8xf32>
    %313 = vector.broadcast %312 : vector<1x1x8xf32> to vector<8x8x8xf32>
    %314 = arith.mulf %309, %313 : vector<8x8x8xf32>
    %315 = arith.addf %308, %314 : vector<8x8x8xf32>
    %316 = vector.extract_strided_slice %273 {offsets = [6, 0, 0], sizes = [8, 8, 8], strides = [1, 1, 1]} : vector<14x8x8xf32> to vector<8x8x8xf32>
    %317 = vector.extract_strided_slice %21 {offsets = [47, 0], sizes = [1, 8], strides = [1, 1]} : vector<49x8xf32> to vector<1x8xf32>
    %318 = vector.shape_cast %317 : vector<1x8xf32> to vector<8xf32>
    %319 = vector.shape_cast %318 : vector<8xf32> to vector<1x1x8xf32>
    %320 = vector.broadcast %319 : vector<1x1x8xf32> to vector<8x8x8xf32>
    %321 = arith.mulf %316, %320 : vector<8x8x8xf32>
    %322 = arith.addf %315, %321 : vector<8x8x8xf32>
    %c0_50 = arith.constant 0 : index
    %c6 = arith.constant 6 : index
    %c0_51 = arith.constant 0 : index
    %323 = vector.load %arg15[%c0_50, %c6, %c0_51] : memref<14x14x8xf32, #tpu.memory_space<vmem>>, vector<14x8x8xf32>
    %324 = vector.extract_strided_slice %323 {offsets = [0, 0, 0], sizes = [8, 8, 8], strides = [1, 1, 1]} : vector<14x8x8xf32> to vector<8x8x8xf32>
    %325 = vector.extract_strided_slice %21 {offsets = [6, 0], sizes = [1, 8], strides = [1, 1]} : vector<49x8xf32> to vector<1x8xf32>
    %326 = vector.shape_cast %325 : vector<1x8xf32> to vector<8xf32>
    %327 = vector.shape_cast %326 : vector<8xf32> to vector<1x1x8xf32>
    %328 = vector.broadcast %327 : vector<1x1x8xf32> to vector<8x8x8xf32>
    %329 = arith.mulf %324, %328 : vector<8x8x8xf32>
    %330 = arith.addf %322, %329 : vector<8x8x8xf32>
    %331 = vector.extract_strided_slice %323 {offsets = [1, 0, 0], sizes = [8, 8, 8], strides = [1, 1, 1]} : vector<14x8x8xf32> to vector<8x8x8xf32>
    %332 = vector.extract_strided_slice %21 {offsets = [13, 0], sizes = [1, 8], strides = [1, 1]} : vector<49x8xf32> to vector<1x8xf32>
    %333 = vector.shape_cast %332 : vector<1x8xf32> to vector<8xf32>
    %334 = vector.shape_cast %333 : vector<8xf32> to vector<1x1x8xf32>
    %335 = vector.broadcast %334 : vector<1x1x8xf32> to vector<8x8x8xf32>
    %336 = arith.mulf %331, %335 : vector<8x8x8xf32>
    %337 = arith.addf %330, %336 : vector<8x8x8xf32>
    %338 = vector.extract_strided_slice %323 {offsets = [2, 0, 0], sizes = [8, 8, 8], strides = [1, 1, 1]} : vector<14x8x8xf32> to vector<8x8x8xf32>
    %339 = vector.extract_strided_slice %21 {offsets = [20, 0], sizes = [1, 8], strides = [1, 1]} : vector<49x8xf32> to vector<1x8xf32>
    %340 = vector.shape_cast %339 : vector<1x8xf32> to vector<8xf32>
    %341 = vector.shape_cast %340 : vector<8xf32> to vector<1x1x8xf32>
    %342 = vector.broadcast %341 : vector<1x1x8xf32> to vector<8x8x8xf32>
    %343 = arith.mulf %338, %342 : vector<8x8x8xf32>
    %344 = arith.addf %337, %343 : vector<8x8x8xf32>
    %345 = vector.extract_strided_slice %323 {offsets = [3, 0, 0], sizes = [8, 8, 8], strides = [1, 1, 1]} : vector<14x8x8xf32> to vector<8x8x8xf32>
    %346 = vector.extract_strided_slice %21 {offsets = [27, 0], sizes = [1, 8], strides = [1, 1]} : vector<49x8xf32> to vector<1x8xf32>
    %347 = vector.shape_cast %346 : vector<1x8xf32> to vector<8xf32>
    %348 = vector.shape_cast %347 : vector<8xf32> to vector<1x1x8xf32>
    %349 = vector.broadcast %348 : vector<1x1x8xf32> to vector<8x8x8xf32>
    %350 = arith.mulf %345, %349 : vector<8x8x8xf32>
    %351 = arith.addf %344, %350 : vector<8x8x8xf32>
    %352 = vector.extract_strided_slice %323 {offsets = [4, 0, 0], sizes = [8, 8, 8], strides = [1, 1, 1]} : vector<14x8x8xf32> to vector<8x8x8xf32>
    %353 = vector.extract_strided_slice %21 {offsets = [34, 0], sizes = [1, 8], strides = [1, 1]} : vector<49x8xf32> to vector<1x8xf32>
    %354 = vector.shape_cast %353 : vector<1x8xf32> to vector<8xf32>
    %355 = vector.shape_cast %354 : vector<8xf32> to vector<1x1x8xf32>
    %356 = vector.broadcast %355 : vector<1x1x8xf32> to vector<8x8x8xf32>
    %357 = arith.mulf %352, %356 : vector<8x8x8xf32>
    %358 = arith.addf %351, %357 : vector<8x8x8xf32>
    %359 = vector.extract_strided_slice %323 {offsets = [5, 0, 0], sizes = [8, 8, 8], strides = [1, 1, 1]} : vector<14x8x8xf32> to vector<8x8x8xf32>
    %360 = vector.extract_strided_slice %21 {offsets = [41, 0], sizes = [1, 8], strides = [1, 1]} : vector<49x8xf32> to vector<1x8xf32>
    %361 = vector.shape_cast %360 : vector<1x8xf32> to vector<8xf32>
    %362 = vector.shape_cast %361 : vector<8xf32> to vector<1x1x8xf32>
    %363 = vector.broadcast %362 : vector<1x1x8xf32> to vector<8x8x8xf32>
    %364 = arith.mulf %359, %363 : vector<8x8x8xf32>
    %365 = arith.addf %358, %364 : vector<8x8x8xf32>
    %366 = vector.extract_strided_slice %323 {offsets = [6, 0, 0], sizes = [8, 8, 8], strides = [1, 1, 1]} : vector<14x8x8xf32> to vector<8x8x8xf32>
    %367 = vector.extract_strided_slice %21 {offsets = [48, 0], sizes = [1, 8], strides = [1, 1]} : vector<49x8xf32> to vector<1x8xf32>
    %368 = vector.shape_cast %367 : vector<1x8xf32> to vector<8xf32>
    %369 = vector.shape_cast %368 : vector<8xf32> to vector<1x1x8xf32>
    %370 = vector.broadcast %369 : vector<1x1x8xf32> to vector<8x8x8xf32>
    %371 = arith.mulf %366, %370 : vector<8x8x8xf32>
    %372 = arith.addf %365, %371 : vector<8x8x8xf32>
    %373 = vector.shape_cast %372 : vector<8x8x8xf32> to vector<64x8xf32>
    %c0_52 = arith.constant 0 : index
    %c0_53 = arith.constant 0 : index
    %c0_54 = arith.constant 0 : index
    %374 = vector.load %arg5[%c0_52, %c0_53, %c0_54] : memref<1x1x8xf32, #tpu.memory_space<vmem>>, vector<1x1x8xf32>
    %375 = vector.shape_cast %374 : vector<1x1x8xf32> to vector<1x8xf32>
    %376 = vector.broadcast %375 : vector<1x8xf32> to vector<64x8xf32>
    %377 = arith.addf %373, %376 : vector<64x8xf32>
    %cst_55 = arith.constant dense<0.000000e+00> : vector<64xf32>
    %378 = vector.multi_reduction <add>, %377, %cst_55 [1] : vector<64x8xf32> to vector<64xf32>
    %379 = vector.shape_cast %378 : vector<64xf32> to vector<64x1xf32>
    %cst_56 = arith.constant 8.000000e+00 : f32
    %380 = vector.broadcast %cst_56 : f32 to vector<64x1xf32>
    %381 = arith.divf %379, %380 : vector<64x1xf32>
    %382 = vector.broadcast %381 : vector<64x1xf32> to vector<64x8xf32>
    %383 = arith.subf %377, %382 : vector<64x8xf32>
    %384 = arith.mulf %383, %383 : vector<64x8xf32>
    %cst_57 = arith.constant dense<0.000000e+00> : vector<64xf32>
    %385 = vector.multi_reduction <add>, %384, %cst_57 [1] : vector<64x8xf32> to vector<64xf32>
    %386 = vector.shape_cast %385 : vector<64xf32> to vector<64x1xf32>
    %cst_58 = arith.constant 8.000000e+00 : f32
    %387 = vector.broadcast %cst_58 : f32 to vector<64x1xf32>
    %388 = arith.divf %386, %387 : vector<64x1xf32>
    %cst_59 = arith.constant 9.99999974E-6 : f32
    %389 = vector.broadcast %cst_59 : f32 to vector<64x1xf32>
    %390 = arith.addf %388, %389 : vector<64x1xf32>
    %391 = math.rsqrt %390 : vector<64x1xf32>
    %392 = vector.broadcast %391 : vector<64x1xf32> to vector<64x8xf32>
    %393 = arith.mulf %383, %392 : vector<64x8xf32>
    %c0_60 = arith.constant 0 : index
    %c0_61 = arith.constant 0 : index
    %c0_62 = arith.constant 0 : index
    %394 = vector.load %arg6[%c0_60, %c0_61, %c0_62] : memref<1x1x8xf32, #tpu.memory_space<vmem>>, vector<1x1x8xf32>
    %395 = vector.shape_cast %394 : vector<1x1x8xf32> to vector<1x8xf32>
    %396 = vector.broadcast %395 : vector<1x8xf32> to vector<64x8xf32>
    %397 = arith.mulf %393, %396 : vector<64x8xf32>
    %c0_63 = arith.constant 0 : index
    %c0_64 = arith.constant 0 : index
    %c0_65 = arith.constant 0 : index
    %398 = vector.load %arg7[%c0_63, %c0_64, %c0_65] : memref<1x1x8xf32, #tpu.memory_space<vmem>>, vector<1x1x8xf32>
    %399 = vector.shape_cast %398 : vector<1x1x8xf32> to vector<1x8xf32>
    %400 = vector.broadcast %399 : vector<1x8xf32> to vector<64x8xf32>
    %401 = arith.addf %397, %400 : vector<64x8xf32>
    %402 = arith.truncf %401 : vector<64x8xf32> to vector<64x8xbf16>
    %c0_66 = arith.constant 0 : index
    %c0_67 = arith.constant 0 : index
    %c0_68 = arith.constant 0 : index
    %403 = vector.load %arg8[%c0_66, %c0_67, %c0_68] : memref<1x8x32xbf16, #tpu.memory_space<vmem>>, vector<1x8x32xbf16>
    %404 = vector.shape_cast %403 : vector<1x8x32xbf16> to vector<8x32xbf16>
    %cst_69 = arith.constant dense<0.000000e+00> : vector<64x32xf32>
    %405 = tpu.matmul %402, %404, %cst_69 {dimension_numbers = #tpu.dot_dimension_numbers<[1], [0], [0], [1], [0, 0, 1, 1], [], []>} : vector<64x8xbf16>, vector<8x32xbf16>, vector<64x32xf32> -> vector<64x32xf32>
    %c0_70 = arith.constant 0 : index
    %c0_71 = arith.constant 0 : index
    %c0_72 = arith.constant 0 : index
    %406 = vector.load %arg9[%c0_70, %c0_71, %c0_72] : memref<1x1x32xf32, #tpu.memory_space<vmem>>, vector<1x1x32xf32>
    %407 = vector.shape_cast %406 : vector<1x1x32xf32> to vector<1x32xf32>
    %408 = vector.broadcast %407 : vector<1x32xf32> to vector<64x32xf32>
    %409 = arith.addf %405, %408 : vector<64x32xf32>
    %cst_73 = arith.constant 5.000000e-01 : f32
    %410 = vector.broadcast %cst_73 : f32 to vector<64x32xf32>
    %411 = arith.mulf %410, %409 : vector<64x32xf32>
    %cst_74 = arith.constant 4.471500e-02 : f32
    %412 = vector.broadcast %cst_74 : f32 to vector<64x32xf32>
    %413 = arith.mulf %412, %409 : vector<64x32xf32>
    %414 = arith.mulf %413, %409 : vector<64x32xf32>
    %415 = arith.mulf %414, %409 : vector<64x32xf32>
    %416 = arith.addf %409, %415 : vector<64x32xf32>
    %cst_75 = arith.constant 0.797884583 : f32
    %417 = vector.broadcast %cst_75 : f32 to vector<64x32xf32>
    %418 = arith.mulf %417, %416 : vector<64x32xf32>
    %419 = math.tanh %418 : vector<64x32xf32>
    %cst_76 = arith.constant 1.000000e+00 : f32
    %420 = vector.broadcast %cst_76 : f32 to vector<64x32xf32>
    %421 = arith.addf %420, %419 : vector<64x32xf32>
    %422 = arith.mulf %411, %421 : vector<64x32xf32>
    %423 = arith.truncf %422 : vector<64x32xf32> to vector<64x32xbf16>
    %c0_77 = arith.constant 0 : index
    %c0_78 = arith.constant 0 : index
    %c0_79 = arith.constant 0 : index
    %424 = vector.load %arg10[%c0_77, %c0_78, %c0_79] : memref<1x32x8xbf16, #tpu.memory_space<vmem>>, vector<1x32x8xbf16>
    %425 = vector.shape_cast %424 : vector<1x32x8xbf16> to vector<32x8xbf16>
    %cst_80 = arith.constant dense<0.000000e+00> : vector<64x8xf32>
    %426 = tpu.matmul %423, %425, %cst_80 {dimension_numbers = #tpu.dot_dimension_numbers<[1], [0], [0], [1], [0, 0, 1, 1], [], []>} : vector<64x32xbf16>, vector<32x8xbf16>, vector<64x8xf32> -> vector<64x8xf32>
    %c0_81 = arith.constant 0 : index
    %c0_82 = arith.constant 0 : index
    %c0_83 = arith.constant 0 : index
    %427 = vector.load %arg11[%c0_81, %c0_82, %c0_83] : memref<1x1x8xf32, #tpu.memory_space<vmem>>, vector<1x1x8xf32>
    %428 = vector.shape_cast %427 : vector<1x1x8xf32> to vector<1x8xf32>
    %429 = vector.broadcast %428 : vector<1x8xf32> to vector<64x8xf32>
    %430 = arith.addf %426, %429 : vector<64x8xf32>
    %c0_84 = arith.constant 0 : index
    %c0_85 = arith.constant 0 : index
    %c0_86 = arith.constant 0 : index
    %431 = vector.load %arg12[%c0_84, %c0_85, %c0_86] : memref<1x1x8xf32, #tpu.memory_space<vmem>>, vector<1x1x8xf32>
    %432 = vector.shape_cast %431 : vector<1x1x8xf32> to vector<1x8xf32>
    %433 = vector.broadcast %432 : vector<1x8xf32> to vector<64x8xf32>
    %434 = arith.mulf %430, %433 : vector<64x8xf32>
    %435 = arith.addf %15, %434 : vector<64x8xf32>
    %436 = vector.shape_cast %435 : vector<64x8xf32> to vector<8x8x8xf32>
    %c0_87 = arith.constant 0 : index
    %c0_88 = arith.constant 0 : index
    %c0_89 = arith.constant 0 : index
    %c0_90 = arith.constant 0 : index
    %437 = vector.load %arg13[%c0_87, %c0_88, %c0_89, %c0_90] : memref<1x8x8x8xf32, #tpu.memory_space<vmem>>, vector<1x8x8x8xf32>
    %438 = vector.shape_cast %437 : vector<1x8x8x8xf32> to vector<8x8x8xf32>
    %439 = vector.shape_cast %436 : vector<8x8x8xf32> to vector<1x8x8x8xf32>
    tpu.vector_store %arg13[%c0_87, %c0_88, %c0_89, %c0_90], %439 {strides = array<i32>} : memref<1x8x8x8xf32, #tpu.memory_space<vmem>>, vector<1x8x8x8xf32>,
    return
  }
  func.func @transform_0(%arg0: i32) -> (i32, i32, i32, i32) {
    %c0_i32 = arith.constant 0 : i32
    %c0_i32_0 = arith.constant 0 : i32
    %c0_i32_1 = arith.constant 0 : i32
    %c0_i32_2 = arith.constant 0 : i32
    return %arg0, %c0_i32, %c0_i32_0, %c0_i32_1 : i32, i32, i32, i32
  }
  func.func @transform_1(%arg0: i32) -> (i32, i32) {
    %c0_i32 = arith.constant 0 : i32
    %c0_i32_0 = arith.constant 0 : i32
    %c0_i32_1 = arith.constant 0 : i32
    return %c0_i32, %c0_i32_0 : i32, i32
  }
  func.func @transform_2(%arg0: i32) -> (i32, i32) {
    %c0_i32 = arith.constant 0 : i32
    %c0_i32_0 = arith.constant 0 : i32
    %c0_i32_1 = arith.constant 0 : i32
    return %c0_i32, %c0_i32_0 : i32, i32
  }
  func.func @transform_3(%arg0: i32) -> (i32, i32, i32) {
    %c0_i32 = arith.constant 0 : i32
    %c0_i32_0 = arith.constant 0 : i32
    %c0_i32_1 = arith.constant 0 : i32
    %c0_i32_2 = arith.constant 0 : i32
    return %c0_i32, %c0_i32_0, %c0_i32_1 : i32, i32, i32
  }
  func.func @transform_4(%arg0: i32) -> (i32, i32, i32) {
    %c0_i32 = arith.constant 0 : i32
    %c0_i32_0 = arith.constant 0 : i32
    %c0_i32_1 = arith.constant 0 : i32
    %c0_i32_2 = arith.constant 0 : i32
    return %c0_i32, %c0_i32_0, %c0_i32_1 : i32, i32, i32
  }
  func.func @transform_5(%arg0: i32) -> (i32, i32, i32) {
    %c0_i32 = arith.constant 0 : i32
    %c0_i32_0 = arith.constant 0 : i32
    %c0_i32_1 = arith.constant 0 : i32
    %c0_i32_2 = arith.constant 0 : i32
    return %c0_i32, %c0_i32_0, %c0_i32_1 : i32, i32, i32
  }
  func.func @transform_6(%arg0: i32) -> (i32, i32, i32) {
    %c0_i32 = arith.constant 0 : i32
    %c0_i32_0 = arith.constant 0 : i32
    %c0_i32_1 = arith.constant 0 : i32
    %c0_i32_2 = arith.constant 0 : i32
    return %c0_i32, %c0_i32_0, %c0_i32_1 : i32, i32, i32
  }
  func.func @transform_7(%arg0: i32) -> (i32, i32, i32) {
    %c0_i32 = arith.constant 0 : i32
    %c0_i32_0 = arith.constant 0 : i32
    %c0_i32_1 = arith.constant 0 : i32
    %c0_i32_2 = arith.constant 0 : i32
    return %c0_i32, %c0_i32_0, %c0_i32_1 : i32, i32, i32
  }
  func.func @transform_8(%arg0: i32) -> (i32, i32, i32) {
    %c0_i32 = arith.constant 0 : i32
    %c0_i32_0 = arith.constant 0 : i32
    %c0_i32_1 = arith.constant 0 : i32
    %c0_i32_2 = arith.constant 0 : i32
    return %c0_i32, %c0_i32_0, %c0_i32_1 : i32, i32, i32
  }
  func.func @transform_9(%arg0: i32) -> (i32, i32, i32) {
    %c0_i32 = arith.constant 0 : i32
    %c0_i32_0 = arith.constant 0 : i32
    %c0_i32_1 = arith.constant 0 : i32
    %c0_i32_2 = arith.constant 0 : i32
    return %c0_i32, %c0_i32_0, %c0_i32_1 : i32, i32, i32
  }
  func.func @transform_10(%arg0: i32) -> (i32, i32, i32) {
    %c0_i32 = arith.constant 0 : i32
    %c0_i32_0 = arith.constant 0 : i32
    %c0_i32_1 = arith.constant 0 : i32
    %c0_i32_2 = arith.constant 0 : i32
    return %c0_i32, %c0_i32_0, %c0_i32_1 : i32, i32, i32
  }
  func.func @transform_11(%arg0: i32) -> (i32, i32, i32) {
    %c0_i32 = arith.constant 0 : i32
    %c0_i32_0 = arith.constant 0 : i32
    %c0_i32_1 = arith.constant 0 : i32
    %c0_i32_2 = arith.constant 0 : i32
    return %c0_i32, %c0_i32_0, %c0_i32_1 : i32, i32, i32
  }
  func.func @transform_12(%arg0: i32) -> (i32, i32, i32, i32) {
    %c0_i32 = arith.constant 0 : i32
    %c0_i32_0 = arith.constant 0 : i32
    %c0_i32_1 = arith.constant 0 : i32
    %c0_i32_2 = arith.constant 0 : i32
    return %arg0, %c0_i32, %c0_i32_0, %c0_i32_1 : i32, i32, i32, i32
  }
}

module attributes {stable_mosaic.version = 11 : i64} {
  func.func @_stage_kernel(%arg0: i32, %arg1: memref<1x4x4x32xf32, #tpu.memory_space<vmem>>, %arg2: memref<128x16xf32, #tpu.memory_space<vmem>>, %arg3: memref<1x16xf32, #tpu.memory_space<vmem>>, %arg4: memref<1x49x16xf32, #tpu.memory_space<vmem>>, %arg5: memref<1x1x16xf32, #tpu.memory_space<vmem>>, %arg6: memref<1x1x16xf32, #tpu.memory_space<vmem>>, %arg7: memref<1x1x16xf32, #tpu.memory_space<vmem>>, %arg8: memref<1x16x64xbf16, #tpu.memory_space<vmem>>, %arg9: memref<1x1x64xf32, #tpu.memory_space<vmem>>, %arg10: memref<1x64x16xbf16, #tpu.memory_space<vmem>>, %arg11: memref<1x1x16xf32, #tpu.memory_space<vmem>>, %arg12: memref<1x1x16xf32, #tpu.memory_space<vmem>>, %arg13: memref<1x4x4x16xf32, #tpu.memory_space<vmem>>, %arg14: memref<5x5x32xf32, #tpu.memory_space<vmem>>, %arg15: memref<10x10x16xf32, #tpu.memory_space<vmem>>) attributes {dimension_semantics = [#tpu.dimension_semantics<parallel>], iteration_bounds = array<i64: 2>, scalar_prefetch = 0 : i64, scratch_operands = 2 : i64, tpu.core_type = #tpu.core_type<tc>, window_params = [{transform_indices = @transform_0, window_bounds = array<i64: 1, 4, 4, 32>}, {pipeline_mode = #tpu.pipeline_mode<synchronous>, transform_indices = @transform_1, window_bounds = array<i64: 128, 16>}, {pipeline_mode = #tpu.pipeline_mode<synchronous>, transform_indices = @transform_2, window_bounds = array<i64: 1, 16>}, {pipeline_mode = #tpu.pipeline_mode<synchronous>, transform_indices = @transform_3, window_bounds = array<i64: 1, 49, 16>}, {pipeline_mode = #tpu.pipeline_mode<synchronous>, transform_indices = @transform_4, window_bounds = array<i64: 1, 1, 16>}, {pipeline_mode = #tpu.pipeline_mode<synchronous>, transform_indices = @transform_5, window_bounds = array<i64: 1, 1, 16>}, {pipeline_mode = #tpu.pipeline_mode<synchronous>, transform_indices = @transform_6, window_bounds = array<i64: 1, 1, 16>}, {pipeline_mode = #tpu.pipeline_mode<synchronous>, transform_indices = @transform_7, window_bounds = array<i64: 1, 16, 64>}, {pipeline_mode = #tpu.pipeline_mode<synchronous>, transform_indices = @transform_8, window_bounds = array<i64: 1, 1, 64>}, {pipeline_mode = #tpu.pipeline_mode<synchronous>, transform_indices = @transform_9, window_bounds = array<i64: 1, 64, 16>}, {pipeline_mode = #tpu.pipeline_mode<synchronous>, transform_indices = @transform_10, window_bounds = array<i64: 1, 1, 16>}, {pipeline_mode = #tpu.pipeline_mode<synchronous>, transform_indices = @transform_11, window_bounds = array<i64: 1, 1, 16>}, {transform_indices = @transform_12, window_bounds = array<i64: 1, 4, 4, 16>}]} {
    %cst = arith.constant 0.000000e+00 : f32
    %0 = vector.broadcast %cst : f32 to vector<5x5x32xf32>
    %c0 = arith.constant 0 : index
    %c0_0 = arith.constant 0 : index
    %c0_1 = arith.constant 0 : index
    %1 = vector.load %arg14[%c0, %c0_0, %c0_1] : memref<5x5x32xf32, #tpu.memory_space<vmem>>, vector<5x5x32xf32>
    tpu.vector_store %arg14[%c0, %c0_0, %c0_1], %0 {strides = array<i32>} : memref<5x5x32xf32, #tpu.memory_space<vmem>>, vector<5x5x32xf32>,
    %c0_2 = arith.constant 0 : index
    %c0_3 = arith.constant 0 : index
    %c0_4 = arith.constant 0 : index
    %c0_5 = arith.constant 0 : index
    %2 = vector.load %arg1[%c0_2, %c0_3, %c0_4, %c0_5] : memref<1x4x4x32xf32, #tpu.memory_space<vmem>>, vector<1x4x4x32xf32>
    %3 = vector.shape_cast %2 : vector<1x4x4x32xf32> to vector<4x4x32xf32>
    %c1 = arith.constant 1 : index
    %c1_6 = arith.constant 1 : index
    %c0_7 = arith.constant 0 : index
    %4 = vector.load %arg14[%c1, %c1_6, %c0_7] : memref<5x5x32xf32, #tpu.memory_space<vmem>>, vector<4x4x32xf32>
    tpu.vector_store %arg14[%c1, %c1_6, %c0_7], %3 {strides = array<i32>} : memref<5x5x32xf32, #tpu.memory_space<vmem>>, vector<4x4x32xf32>,
    %c0_8 = arith.constant 0 : index
    %c0_9 = arith.constant 0 : index
    %c0_10 = arith.constant 0 : index
    %5 = vector.load %arg14[%c0_8, %c0_9, %c0_10] : memref<5x5x32xf32, #tpu.memory_space<vmem>>, vector<4x4x32xf32>
    %c0_11 = arith.constant 0 : index
    %c1_12 = arith.constant 1 : index
    %c0_13 = arith.constant 0 : index
    %6 = vector.load %arg14[%c0_11, %c1_12, %c0_13] : memref<5x5x32xf32, #tpu.memory_space<vmem>>, vector<4x4x32xf32>
    %c1_14 = arith.constant 1 : index
    %c0_15 = arith.constant 0 : index
    %c0_16 = arith.constant 0 : index
    %7 = vector.load %arg14[%c1_14, %c0_15, %c0_16] : memref<5x5x32xf32, #tpu.memory_space<vmem>>, vector<4x4x32xf32>
    %c1_17 = arith.constant 1 : index
    %c1_18 = arith.constant 1 : index
    %c0_19 = arith.constant 0 : index
    %8 = vector.load %arg14[%c1_17, %c1_18, %c0_19] : memref<5x5x32xf32, #tpu.memory_space<vmem>>, vector<4x4x32xf32>
    %9 = tpu.concatenate %5, %6, %7, %8 in 2 : vector<4x4x32xf32>, vector<4x4x32xf32>, vector<4x4x32xf32>, vector<4x4x32xf32> -> vector<4x4x128xf32>
    %10 = vector.shape_cast %9 : vector<4x4x128xf32> to vector<16x128xf32>
    %c0_20 = arith.constant 0 : index
    %c0_21 = arith.constant 0 : index
    %11 = vector.load %arg2[%c0_20, %c0_21] : memref<128x16xf32, #tpu.memory_space<vmem>>, vector<128x16xf32>
    %cst_22 = arith.constant dense<0.000000e+00> : vector<16x16xf32>
    %12 = tpu.matmul %10, %11, %cst_22 {dimension_numbers = #tpu.dot_dimension_numbers<[1], [0], [0], [1], [0, 0, 1, 1], [], []>} : vector<16x128xf32>, vector<128x16xf32>, vector<16x16xf32> -> vector<16x16xf32>
    %c0_23 = arith.constant 0 : index
    %c0_24 = arith.constant 0 : index
    %13 = vector.load %arg3[%c0_23, %c0_24] : memref<1x16xf32, #tpu.memory_space<vmem>>, vector<1x16xf32>
    %14 = vector.broadcast %13 : vector<1x16xf32> to vector<16x16xf32>
    %15 = arith.addf %12, %14 : vector<16x16xf32>
    %cst_25 = arith.constant 0.000000e+00 : f32
    %16 = vector.broadcast %cst_25 : f32 to vector<10x10x16xf32>
    %c0_26 = arith.constant 0 : index
    %c0_27 = arith.constant 0 : index
    %c0_28 = arith.constant 0 : index
    %17 = vector.load %arg15[%c0_26, %c0_27, %c0_28] : memref<10x10x16xf32, #tpu.memory_space<vmem>>, vector<10x10x16xf32>
    tpu.vector_store %arg15[%c0_26, %c0_27, %c0_28], %16 {strides = array<i32>} : memref<10x10x16xf32, #tpu.memory_space<vmem>>, vector<10x10x16xf32>,
    %18 = vector.shape_cast %15 : vector<16x16xf32> to vector<4x4x16xf32>
    %c3 = arith.constant 3 : index
    %c3_29 = arith.constant 3 : index
    %c0_30 = arith.constant 0 : index
    %19 = vector.load %arg15[%c3, %c3_29, %c0_30] : memref<10x10x16xf32, #tpu.memory_space<vmem>>, vector<4x4x16xf32>
    tpu.vector_store %arg15[%c3, %c3_29, %c0_30], %18 {strides = array<i32>} : memref<10x10x16xf32, #tpu.memory_space<vmem>>, vector<4x4x16xf32>,
    %c0_31 = arith.constant 0 : index
    %c0_32 = arith.constant 0 : index
    %c0_33 = arith.constant 0 : index
    %20 = vector.load %arg4[%c0_31, %c0_32, %c0_33] : memref<1x49x16xf32, #tpu.memory_space<vmem>>, vector<1x49x16xf32>
    %21 = vector.shape_cast %20 : vector<1x49x16xf32> to vector<49x16xf32>
    %cst_34 = arith.constant 0.000000e+00 : f32
    %22 = vector.broadcast %cst_34 : f32 to vector<4x4x16xf32>
    %c0_35 = arith.constant 0 : index
    %c0_36 = arith.constant 0 : index
    %c0_37 = arith.constant 0 : index
    %23 = vector.load %arg15[%c0_35, %c0_36, %c0_37] : memref<10x10x16xf32, #tpu.memory_space<vmem>>, vector<10x4x16xf32>
    %24 = vector.extract_strided_slice %23 {offsets = [0, 0, 0], sizes = [4, 4, 16], strides = [1, 1, 1]} : vector<10x4x16xf32> to vector<4x4x16xf32>
    %25 = vector.extract_strided_slice %21 {offsets = [0, 0], sizes = [1, 16], strides = [1, 1]} : vector<49x16xf32> to vector<1x16xf32>
    %26 = vector.shape_cast %25 : vector<1x16xf32> to vector<16xf32>
    %27 = vector.shape_cast %26 : vector<16xf32> to vector<1x1x16xf32>
    %28 = vector.broadcast %27 : vector<1x1x16xf32> to vector<4x4x16xf32>
    %29 = arith.mulf %24, %28 : vector<4x4x16xf32>
    %30 = arith.addf %22, %29 : vector<4x4x16xf32>
    %31 = vector.extract_strided_slice %23 {offsets = [1, 0, 0], sizes = [4, 4, 16], strides = [1, 1, 1]} : vector<10x4x16xf32> to vector<4x4x16xf32>
    %32 = vector.extract_strided_slice %21 {offsets = [7, 0], sizes = [1, 16], strides = [1, 1]} : vector<49x16xf32> to vector<1x16xf32>
    %33 = vector.shape_cast %32 : vector<1x16xf32> to vector<16xf32>
    %34 = vector.shape_cast %33 : vector<16xf32> to vector<1x1x16xf32>
    %35 = vector.broadcast %34 : vector<1x1x16xf32> to vector<4x4x16xf32>
    %36 = arith.mulf %31, %35 : vector<4x4x16xf32>
    %37 = arith.addf %30, %36 : vector<4x4x16xf32>
    %38 = vector.extract_strided_slice %23 {offsets = [2, 0, 0], sizes = [4, 4, 16], strides = [1, 1, 1]} : vector<10x4x16xf32> to vector<4x4x16xf32>
    %39 = vector.extract_strided_slice %21 {offsets = [14, 0], sizes = [1, 16], strides = [1, 1]} : vector<49x16xf32> to vector<1x16xf32>
    %40 = vector.shape_cast %39 : vector<1x16xf32> to vector<16xf32>
    %41 = vector.shape_cast %40 : vector<16xf32> to vector<1x1x16xf32>
    %42 = vector.broadcast %41 : vector<1x1x16xf32> to vector<4x4x16xf32>
    %43 = arith.mulf %38, %42 : vector<4x4x16xf32>
    %44 = arith.addf %37, %43 : vector<4x4x16xf32>
    %45 = vector.extract_strided_slice %23 {offsets = [3, 0, 0], sizes = [4, 4, 16], strides = [1, 1, 1]} : vector<10x4x16xf32> to vector<4x4x16xf32>
    %46 = vector.extract_strided_slice %21 {offsets = [21, 0], sizes = [1, 16], strides = [1, 1]} : vector<49x16xf32> to vector<1x16xf32>
    %47 = vector.shape_cast %46 : vector<1x16xf32> to vector<16xf32>
    %48 = vector.shape_cast %47 : vector<16xf32> to vector<1x1x16xf32>
    %49 = vector.broadcast %48 : vector<1x1x16xf32> to vector<4x4x16xf32>
    %50 = arith.mulf %45, %49 : vector<4x4x16xf32>
    %51 = arith.addf %44, %50 : vector<4x4x16xf32>
    %52 = vector.extract_strided_slice %23 {offsets = [4, 0, 0], sizes = [4, 4, 16], strides = [1, 1, 1]} : vector<10x4x16xf32> to vector<4x4x16xf32>
    %53 = vector.extract_strided_slice %21 {offsets = [28, 0], sizes = [1, 16], strides = [1, 1]} : vector<49x16xf32> to vector<1x16xf32>
    %54 = vector.shape_cast %53 : vector<1x16xf32> to vector<16xf32>
    %55 = vector.shape_cast %54 : vector<16xf32> to vector<1x1x16xf32>
    %56 = vector.broadcast %55 : vector<1x1x16xf32> to vector<4x4x16xf32>
    %57 = arith.mulf %52, %56 : vector<4x4x16xf32>
    %58 = arith.addf %51, %57 : vector<4x4x16xf32>
    %59 = vector.extract_strided_slice %23 {offsets = [5, 0, 0], sizes = [4, 4, 16], strides = [1, 1, 1]} : vector<10x4x16xf32> to vector<4x4x16xf32>
    %60 = vector.extract_strided_slice %21 {offsets = [35, 0], sizes = [1, 16], strides = [1, 1]} : vector<49x16xf32> to vector<1x16xf32>
    %61 = vector.shape_cast %60 : vector<1x16xf32> to vector<16xf32>
    %62 = vector.shape_cast %61 : vector<16xf32> to vector<1x1x16xf32>
    %63 = vector.broadcast %62 : vector<1x1x16xf32> to vector<4x4x16xf32>
    %64 = arith.mulf %59, %63 : vector<4x4x16xf32>
    %65 = arith.addf %58, %64 : vector<4x4x16xf32>
    %66 = vector.extract_strided_slice %23 {offsets = [6, 0, 0], sizes = [4, 4, 16], strides = [1, 1, 1]} : vector<10x4x16xf32> to vector<4x4x16xf32>
    %67 = vector.extract_strided_slice %21 {offsets = [42, 0], sizes = [1, 16], strides = [1, 1]} : vector<49x16xf32> to vector<1x16xf32>
    %68 = vector.shape_cast %67 : vector<1x16xf32> to vector<16xf32>
    %69 = vector.shape_cast %68 : vector<16xf32> to vector<1x1x16xf32>
    %70 = vector.broadcast %69 : vector<1x1x16xf32> to vector<4x4x16xf32>
    %71 = arith.mulf %66, %70 : vector<4x4x16xf32>
    %72 = arith.addf %65, %71 : vector<4x4x16xf32>
    %c0_38 = arith.constant 0 : index
    %c1_39 = arith.constant 1 : index
    %c0_40 = arith.constant 0 : index
    %73 = vector.load %arg15[%c0_38, %c1_39, %c0_40] : memref<10x10x16xf32, #tpu.memory_space<vmem>>, vector<10x4x16xf32>
    %74 = vector.extract_strided_slice %73 {offsets = [0, 0, 0], sizes = [4, 4, 16], strides = [1, 1, 1]} : vector<10x4x16xf32> to vector<4x4x16xf32>
    %75 = vector.extract_strided_slice %21 {offsets = [1, 0], sizes = [1, 16], strides = [1, 1]} : vector<49x16xf32> to vector<1x16xf32>
    %76 = vector.shape_cast %75 : vector<1x16xf32> to vector<16xf32>
    %77 = vector.shape_cast %76 : vector<16xf32> to vector<1x1x16xf32>
    %78 = vector.broadcast %77 : vector<1x1x16xf32> to vector<4x4x16xf32>
    %79 = arith.mulf %74, %78 : vector<4x4x16xf32>
    %80 = arith.addf %72, %79 : vector<4x4x16xf32>
    %81 = vector.extract_strided_slice %73 {offsets = [1, 0, 0], sizes = [4, 4, 16], strides = [1, 1, 1]} : vector<10x4x16xf32> to vector<4x4x16xf32>
    %82 = vector.extract_strided_slice %21 {offsets = [8, 0], sizes = [1, 16], strides = [1, 1]} : vector<49x16xf32> to vector<1x16xf32>
    %83 = vector.shape_cast %82 : vector<1x16xf32> to vector<16xf32>
    %84 = vector.shape_cast %83 : vector<16xf32> to vector<1x1x16xf32>
    %85 = vector.broadcast %84 : vector<1x1x16xf32> to vector<4x4x16xf32>
    %86 = arith.mulf %81, %85 : vector<4x4x16xf32>
    %87 = arith.addf %80, %86 : vector<4x4x16xf32>
    %88 = vector.extract_strided_slice %73 {offsets = [2, 0, 0], sizes = [4, 4, 16], strides = [1, 1, 1]} : vector<10x4x16xf32> to vector<4x4x16xf32>
    %89 = vector.extract_strided_slice %21 {offsets = [15, 0], sizes = [1, 16], strides = [1, 1]} : vector<49x16xf32> to vector<1x16xf32>
    %90 = vector.shape_cast %89 : vector<1x16xf32> to vector<16xf32>
    %91 = vector.shape_cast %90 : vector<16xf32> to vector<1x1x16xf32>
    %92 = vector.broadcast %91 : vector<1x1x16xf32> to vector<4x4x16xf32>
    %93 = arith.mulf %88, %92 : vector<4x4x16xf32>
    %94 = arith.addf %87, %93 : vector<4x4x16xf32>
    %95 = vector.extract_strided_slice %73 {offsets = [3, 0, 0], sizes = [4, 4, 16], strides = [1, 1, 1]} : vector<10x4x16xf32> to vector<4x4x16xf32>
    %96 = vector.extract_strided_slice %21 {offsets = [22, 0], sizes = [1, 16], strides = [1, 1]} : vector<49x16xf32> to vector<1x16xf32>
    %97 = vector.shape_cast %96 : vector<1x16xf32> to vector<16xf32>
    %98 = vector.shape_cast %97 : vector<16xf32> to vector<1x1x16xf32>
    %99 = vector.broadcast %98 : vector<1x1x16xf32> to vector<4x4x16xf32>
    %100 = arith.mulf %95, %99 : vector<4x4x16xf32>
    %101 = arith.addf %94, %100 : vector<4x4x16xf32>
    %102 = vector.extract_strided_slice %73 {offsets = [4, 0, 0], sizes = [4, 4, 16], strides = [1, 1, 1]} : vector<10x4x16xf32> to vector<4x4x16xf32>
    %103 = vector.extract_strided_slice %21 {offsets = [29, 0], sizes = [1, 16], strides = [1, 1]} : vector<49x16xf32> to vector<1x16xf32>
    %104 = vector.shape_cast %103 : vector<1x16xf32> to vector<16xf32>
    %105 = vector.shape_cast %104 : vector<16xf32> to vector<1x1x16xf32>
    %106 = vector.broadcast %105 : vector<1x1x16xf32> to vector<4x4x16xf32>
    %107 = arith.mulf %102, %106 : vector<4x4x16xf32>
    %108 = arith.addf %101, %107 : vector<4x4x16xf32>
    %109 = vector.extract_strided_slice %73 {offsets = [5, 0, 0], sizes = [4, 4, 16], strides = [1, 1, 1]} : vector<10x4x16xf32> to vector<4x4x16xf32>
    %110 = vector.extract_strided_slice %21 {offsets = [36, 0], sizes = [1, 16], strides = [1, 1]} : vector<49x16xf32> to vector<1x16xf32>
    %111 = vector.shape_cast %110 : vector<1x16xf32> to vector<16xf32>
    %112 = vector.shape_cast %111 : vector<16xf32> to vector<1x1x16xf32>
    %113 = vector.broadcast %112 : vector<1x1x16xf32> to vector<4x4x16xf32>
    %114 = arith.mulf %109, %113 : vector<4x4x16xf32>
    %115 = arith.addf %108, %114 : vector<4x4x16xf32>
    %116 = vector.extract_strided_slice %73 {offsets = [6, 0, 0], sizes = [4, 4, 16], strides = [1, 1, 1]} : vector<10x4x16xf32> to vector<4x4x16xf32>
    %117 = vector.extract_strided_slice %21 {offsets = [43, 0], sizes = [1, 16], strides = [1, 1]} : vector<49x16xf32> to vector<1x16xf32>
    %118 = vector.shape_cast %117 : vector<1x16xf32> to vector<16xf32>
    %119 = vector.shape_cast %118 : vector<16xf32> to vector<1x1x16xf32>
    %120 = vector.broadcast %119 : vector<1x1x16xf32> to vector<4x4x16xf32>
    %121 = arith.mulf %116, %120 : vector<4x4x16xf32>
    %122 = arith.addf %115, %121 : vector<4x4x16xf32>
    %c0_41 = arith.constant 0 : index
    %c2 = arith.constant 2 : index
    %c0_42 = arith.constant 0 : index
    %123 = vector.load %arg15[%c0_41, %c2, %c0_42] : memref<10x10x16xf32, #tpu.memory_space<vmem>>, vector<10x4x16xf32>
    %124 = vector.extract_strided_slice %123 {offsets = [0, 0, 0], sizes = [4, 4, 16], strides = [1, 1, 1]} : vector<10x4x16xf32> to vector<4x4x16xf32>
    %125 = vector.extract_strided_slice %21 {offsets = [2, 0], sizes = [1, 16], strides = [1, 1]} : vector<49x16xf32> to vector<1x16xf32>
    %126 = vector.shape_cast %125 : vector<1x16xf32> to vector<16xf32>
    %127 = vector.shape_cast %126 : vector<16xf32> to vector<1x1x16xf32>
    %128 = vector.broadcast %127 : vector<1x1x16xf32> to vector<4x4x16xf32>
    %129 = arith.mulf %124, %128 : vector<4x4x16xf32>
    %130 = arith.addf %122, %129 : vector<4x4x16xf32>
    %131 = vector.extract_strided_slice %123 {offsets = [1, 0, 0], sizes = [4, 4, 16], strides = [1, 1, 1]} : vector<10x4x16xf32> to vector<4x4x16xf32>
    %132 = vector.extract_strided_slice %21 {offsets = [9, 0], sizes = [1, 16], strides = [1, 1]} : vector<49x16xf32> to vector<1x16xf32>
    %133 = vector.shape_cast %132 : vector<1x16xf32> to vector<16xf32>
    %134 = vector.shape_cast %133 : vector<16xf32> to vector<1x1x16xf32>
    %135 = vector.broadcast %134 : vector<1x1x16xf32> to vector<4x4x16xf32>
    %136 = arith.mulf %131, %135 : vector<4x4x16xf32>
    %137 = arith.addf %130, %136 : vector<4x4x16xf32>
    %138 = vector.extract_strided_slice %123 {offsets = [2, 0, 0], sizes = [4, 4, 16], strides = [1, 1, 1]} : vector<10x4x16xf32> to vector<4x4x16xf32>
    %139 = vector.extract_strided_slice %21 {offsets = [16, 0], sizes = [1, 16], strides = [1, 1]} : vector<49x16xf32> to vector<1x16xf32>
    %140 = vector.shape_cast %139 : vector<1x16xf32> to vector<16xf32>
    %141 = vector.shape_cast %140 : vector<16xf32> to vector<1x1x16xf32>
    %142 = vector.broadcast %141 : vector<1x1x16xf32> to vector<4x4x16xf32>
    %143 = arith.mulf %138, %142 : vector<4x4x16xf32>
    %144 = arith.addf %137, %143 : vector<4x4x16xf32>
    %145 = vector.extract_strided_slice %123 {offsets = [3, 0, 0], sizes = [4, 4, 16], strides = [1, 1, 1]} : vector<10x4x16xf32> to vector<4x4x16xf32>
    %146 = vector.extract_strided_slice %21 {offsets = [23, 0], sizes = [1, 16], strides = [1, 1]} : vector<49x16xf32> to vector<1x16xf32>
    %147 = vector.shape_cast %146 : vector<1x16xf32> to vector<16xf32>
    %148 = vector.shape_cast %147 : vector<16xf32> to vector<1x1x16xf32>
    %149 = vector.broadcast %148 : vector<1x1x16xf32> to vector<4x4x16xf32>
    %150 = arith.mulf %145, %149 : vector<4x4x16xf32>
    %151 = arith.addf %144, %150 : vector<4x4x16xf32>
    %152 = vector.extract_strided_slice %123 {offsets = [4, 0, 0], sizes = [4, 4, 16], strides = [1, 1, 1]} : vector<10x4x16xf32> to vector<4x4x16xf32>
    %153 = vector.extract_strided_slice %21 {offsets = [30, 0], sizes = [1, 16], strides = [1, 1]} : vector<49x16xf32> to vector<1x16xf32>
    %154 = vector.shape_cast %153 : vector<1x16xf32> to vector<16xf32>
    %155 = vector.shape_cast %154 : vector<16xf32> to vector<1x1x16xf32>
    %156 = vector.broadcast %155 : vector<1x1x16xf32> to vector<4x4x16xf32>
    %157 = arith.mulf %152, %156 : vector<4x4x16xf32>
    %158 = arith.addf %151, %157 : vector<4x4x16xf32>
    %159 = vector.extract_strided_slice %123 {offsets = [5, 0, 0], sizes = [4, 4, 16], strides = [1, 1, 1]} : vector<10x4x16xf32> to vector<4x4x16xf32>
    %160 = vector.extract_strided_slice %21 {offsets = [37, 0], sizes = [1, 16], strides = [1, 1]} : vector<49x16xf32> to vector<1x16xf32>
    %161 = vector.shape_cast %160 : vector<1x16xf32> to vector<16xf32>
    %162 = vector.shape_cast %161 : vector<16xf32> to vector<1x1x16xf32>
    %163 = vector.broadcast %162 : vector<1x1x16xf32> to vector<4x4x16xf32>
    %164 = arith.mulf %159, %163 : vector<4x4x16xf32>
    %165 = arith.addf %158, %164 : vector<4x4x16xf32>
    %166 = vector.extract_strided_slice %123 {offsets = [6, 0, 0], sizes = [4, 4, 16], strides = [1, 1, 1]} : vector<10x4x16xf32> to vector<4x4x16xf32>
    %167 = vector.extract_strided_slice %21 {offsets = [44, 0], sizes = [1, 16], strides = [1, 1]} : vector<49x16xf32> to vector<1x16xf32>
    %168 = vector.shape_cast %167 : vector<1x16xf32> to vector<16xf32>
    %169 = vector.shape_cast %168 : vector<16xf32> to vector<1x1x16xf32>
    %170 = vector.broadcast %169 : vector<1x1x16xf32> to vector<4x4x16xf32>
    %171 = arith.mulf %166, %170 : vector<4x4x16xf32>
    %172 = arith.addf %165, %171 : vector<4x4x16xf32>
    %c0_43 = arith.constant 0 : index
    %c3_44 = arith.constant 3 : index
    %c0_45 = arith.constant 0 : index
    %173 = vector.load %arg15[%c0_43, %c3_44, %c0_45] : memref<10x10x16xf32, #tpu.memory_space<vmem>>, vector<10x4x16xf32>
    %174 = vector.extract_strided_slice %173 {offsets = [0, 0, 0], sizes = [4, 4, 16], strides = [1, 1, 1]} : vector<10x4x16xf32> to vector<4x4x16xf32>
    %175 = vector.extract_strided_slice %21 {offsets = [3, 0], sizes = [1, 16], strides = [1, 1]} : vector<49x16xf32> to vector<1x16xf32>
    %176 = vector.shape_cast %175 : vector<1x16xf32> to vector<16xf32>
    %177 = vector.shape_cast %176 : vector<16xf32> to vector<1x1x16xf32>
    %178 = vector.broadcast %177 : vector<1x1x16xf32> to vector<4x4x16xf32>
    %179 = arith.mulf %174, %178 : vector<4x4x16xf32>
    %180 = arith.addf %172, %179 : vector<4x4x16xf32>
    %181 = vector.extract_strided_slice %173 {offsets = [1, 0, 0], sizes = [4, 4, 16], strides = [1, 1, 1]} : vector<10x4x16xf32> to vector<4x4x16xf32>
    %182 = vector.extract_strided_slice %21 {offsets = [10, 0], sizes = [1, 16], strides = [1, 1]} : vector<49x16xf32> to vector<1x16xf32>
    %183 = vector.shape_cast %182 : vector<1x16xf32> to vector<16xf32>
    %184 = vector.shape_cast %183 : vector<16xf32> to vector<1x1x16xf32>
    %185 = vector.broadcast %184 : vector<1x1x16xf32> to vector<4x4x16xf32>
    %186 = arith.mulf %181, %185 : vector<4x4x16xf32>
    %187 = arith.addf %180, %186 : vector<4x4x16xf32>
    %188 = vector.extract_strided_slice %173 {offsets = [2, 0, 0], sizes = [4, 4, 16], strides = [1, 1, 1]} : vector<10x4x16xf32> to vector<4x4x16xf32>
    %189 = vector.extract_strided_slice %21 {offsets = [17, 0], sizes = [1, 16], strides = [1, 1]} : vector<49x16xf32> to vector<1x16xf32>
    %190 = vector.shape_cast %189 : vector<1x16xf32> to vector<16xf32>
    %191 = vector.shape_cast %190 : vector<16xf32> to vector<1x1x16xf32>
    %192 = vector.broadcast %191 : vector<1x1x16xf32> to vector<4x4x16xf32>
    %193 = arith.mulf %188, %192 : vector<4x4x16xf32>
    %194 = arith.addf %187, %193 : vector<4x4x16xf32>
    %195 = vector.extract_strided_slice %173 {offsets = [3, 0, 0], sizes = [4, 4, 16], strides = [1, 1, 1]} : vector<10x4x16xf32> to vector<4x4x16xf32>
    %196 = vector.extract_strided_slice %21 {offsets = [24, 0], sizes = [1, 16], strides = [1, 1]} : vector<49x16xf32> to vector<1x16xf32>
    %197 = vector.shape_cast %196 : vector<1x16xf32> to vector<16xf32>
    %198 = vector.shape_cast %197 : vector<16xf32> to vector<1x1x16xf32>
    %199 = vector.broadcast %198 : vector<1x1x16xf32> to vector<4x4x16xf32>
    %200 = arith.mulf %195, %199 : vector<4x4x16xf32>
    %201 = arith.addf %194, %200 : vector<4x4x16xf32>
    %202 = vector.extract_strided_slice %173 {offsets = [4, 0, 0], sizes = [4, 4, 16], strides = [1, 1, 1]} : vector<10x4x16xf32> to vector<4x4x16xf32>
    %203 = vector.extract_strided_slice %21 {offsets = [31, 0], sizes = [1, 16], strides = [1, 1]} : vector<49x16xf32> to vector<1x16xf32>
    %204 = vector.shape_cast %203 : vector<1x16xf32> to vector<16xf32>
    %205 = vector.shape_cast %204 : vector<16xf32> to vector<1x1x16xf32>
    %206 = vector.broadcast %205 : vector<1x1x16xf32> to vector<4x4x16xf32>
    %207 = arith.mulf %202, %206 : vector<4x4x16xf32>
    %208 = arith.addf %201, %207 : vector<4x4x16xf32>
    %209 = vector.extract_strided_slice %173 {offsets = [5, 0, 0], sizes = [4, 4, 16], strides = [1, 1, 1]} : vector<10x4x16xf32> to vector<4x4x16xf32>
    %210 = vector.extract_strided_slice %21 {offsets = [38, 0], sizes = [1, 16], strides = [1, 1]} : vector<49x16xf32> to vector<1x16xf32>
    %211 = vector.shape_cast %210 : vector<1x16xf32> to vector<16xf32>
    %212 = vector.shape_cast %211 : vector<16xf32> to vector<1x1x16xf32>
    %213 = vector.broadcast %212 : vector<1x1x16xf32> to vector<4x4x16xf32>
    %214 = arith.mulf %209, %213 : vector<4x4x16xf32>
    %215 = arith.addf %208, %214 : vector<4x4x16xf32>
    %216 = vector.extract_strided_slice %173 {offsets = [6, 0, 0], sizes = [4, 4, 16], strides = [1, 1, 1]} : vector<10x4x16xf32> to vector<4x4x16xf32>
    %217 = vector.extract_strided_slice %21 {offsets = [45, 0], sizes = [1, 16], strides = [1, 1]} : vector<49x16xf32> to vector<1x16xf32>
    %218 = vector.shape_cast %217 : vector<1x16xf32> to vector<16xf32>
    %219 = vector.shape_cast %218 : vector<16xf32> to vector<1x1x16xf32>
    %220 = vector.broadcast %219 : vector<1x1x16xf32> to vector<4x4x16xf32>
    %221 = arith.mulf %216, %220 : vector<4x4x16xf32>
    %222 = arith.addf %215, %221 : vector<4x4x16xf32>
    %c0_46 = arith.constant 0 : index
    %c4 = arith.constant 4 : index
    %c0_47 = arith.constant 0 : index
    %223 = vector.load %arg15[%c0_46, %c4, %c0_47] : memref<10x10x16xf32, #tpu.memory_space<vmem>>, vector<10x4x16xf32>
    %224 = vector.extract_strided_slice %223 {offsets = [0, 0, 0], sizes = [4, 4, 16], strides = [1, 1, 1]} : vector<10x4x16xf32> to vector<4x4x16xf32>
    %225 = vector.extract_strided_slice %21 {offsets = [4, 0], sizes = [1, 16], strides = [1, 1]} : vector<49x16xf32> to vector<1x16xf32>
    %226 = vector.shape_cast %225 : vector<1x16xf32> to vector<16xf32>
    %227 = vector.shape_cast %226 : vector<16xf32> to vector<1x1x16xf32>
    %228 = vector.broadcast %227 : vector<1x1x16xf32> to vector<4x4x16xf32>
    %229 = arith.mulf %224, %228 : vector<4x4x16xf32>
    %230 = arith.addf %222, %229 : vector<4x4x16xf32>
    %231 = vector.extract_strided_slice %223 {offsets = [1, 0, 0], sizes = [4, 4, 16], strides = [1, 1, 1]} : vector<10x4x16xf32> to vector<4x4x16xf32>
    %232 = vector.extract_strided_slice %21 {offsets = [11, 0], sizes = [1, 16], strides = [1, 1]} : vector<49x16xf32> to vector<1x16xf32>
    %233 = vector.shape_cast %232 : vector<1x16xf32> to vector<16xf32>
    %234 = vector.shape_cast %233 : vector<16xf32> to vector<1x1x16xf32>
    %235 = vector.broadcast %234 : vector<1x1x16xf32> to vector<4x4x16xf32>
    %236 = arith.mulf %231, %235 : vector<4x4x16xf32>
    %237 = arith.addf %230, %236 : vector<4x4x16xf32>
    %238 = vector.extract_strided_slice %223 {offsets = [2, 0, 0], sizes = [4, 4, 16], strides = [1, 1, 1]} : vector<10x4x16xf32> to vector<4x4x16xf32>
    %239 = vector.extract_strided_slice %21 {offsets = [18, 0], sizes = [1, 16], strides = [1, 1]} : vector<49x16xf32> to vector<1x16xf32>
    %240 = vector.shape_cast %239 : vector<1x16xf32> to vector<16xf32>
    %241 = vector.shape_cast %240 : vector<16xf32> to vector<1x1x16xf32>
    %242 = vector.broadcast %241 : vector<1x1x16xf32> to vector<4x4x16xf32>
    %243 = arith.mulf %238, %242 : vector<4x4x16xf32>
    %244 = arith.addf %237, %243 : vector<4x4x16xf32>
    %245 = vector.extract_strided_slice %223 {offsets = [3, 0, 0], sizes = [4, 4, 16], strides = [1, 1, 1]} : vector<10x4x16xf32> to vector<4x4x16xf32>
    %246 = vector.extract_strided_slice %21 {offsets = [25, 0], sizes = [1, 16], strides = [1, 1]} : vector<49x16xf32> to vector<1x16xf32>
    %247 = vector.shape_cast %246 : vector<1x16xf32> to vector<16xf32>
    %248 = vector.shape_cast %247 : vector<16xf32> to vector<1x1x16xf32>
    %249 = vector.broadcast %248 : vector<1x1x16xf32> to vector<4x4x16xf32>
    %250 = arith.mulf %245, %249 : vector<4x4x16xf32>
    %251 = arith.addf %244, %250 : vector<4x4x16xf32>
    %252 = vector.extract_strided_slice %223 {offsets = [4, 0, 0], sizes = [4, 4, 16], strides = [1, 1, 1]} : vector<10x4x16xf32> to vector<4x4x16xf32>
    %253 = vector.extract_strided_slice %21 {offsets = [32, 0], sizes = [1, 16], strides = [1, 1]} : vector<49x16xf32> to vector<1x16xf32>
    %254 = vector.shape_cast %253 : vector<1x16xf32> to vector<16xf32>
    %255 = vector.shape_cast %254 : vector<16xf32> to vector<1x1x16xf32>
    %256 = vector.broadcast %255 : vector<1x1x16xf32> to vector<4x4x16xf32>
    %257 = arith.mulf %252, %256 : vector<4x4x16xf32>
    %258 = arith.addf %251, %257 : vector<4x4x16xf32>
    %259 = vector.extract_strided_slice %223 {offsets = [5, 0, 0], sizes = [4, 4, 16], strides = [1, 1, 1]} : vector<10x4x16xf32> to vector<4x4x16xf32>
    %260 = vector.extract_strided_slice %21 {offsets = [39, 0], sizes = [1, 16], strides = [1, 1]} : vector<49x16xf32> to vector<1x16xf32>
    %261 = vector.shape_cast %260 : vector<1x16xf32> to vector<16xf32>
    %262 = vector.shape_cast %261 : vector<16xf32> to vector<1x1x16xf32>
    %263 = vector.broadcast %262 : vector<1x1x16xf32> to vector<4x4x16xf32>
    %264 = arith.mulf %259, %263 : vector<4x4x16xf32>
    %265 = arith.addf %258, %264 : vector<4x4x16xf32>
    %266 = vector.extract_strided_slice %223 {offsets = [6, 0, 0], sizes = [4, 4, 16], strides = [1, 1, 1]} : vector<10x4x16xf32> to vector<4x4x16xf32>
    %267 = vector.extract_strided_slice %21 {offsets = [46, 0], sizes = [1, 16], strides = [1, 1]} : vector<49x16xf32> to vector<1x16xf32>
    %268 = vector.shape_cast %267 : vector<1x16xf32> to vector<16xf32>
    %269 = vector.shape_cast %268 : vector<16xf32> to vector<1x1x16xf32>
    %270 = vector.broadcast %269 : vector<1x1x16xf32> to vector<4x4x16xf32>
    %271 = arith.mulf %266, %270 : vector<4x4x16xf32>
    %272 = arith.addf %265, %271 : vector<4x4x16xf32>
    %c0_48 = arith.constant 0 : index
    %c5 = arith.constant 5 : index
    %c0_49 = arith.constant 0 : index
    %273 = vector.load %arg15[%c0_48, %c5, %c0_49] : memref<10x10x16xf32, #tpu.memory_space<vmem>>, vector<10x4x16xf32>
    %274 = vector.extract_strided_slice %273 {offsets = [0, 0, 0], sizes = [4, 4, 16], strides = [1, 1, 1]} : vector<10x4x16xf32> to vector<4x4x16xf32>
    %275 = vector.extract_strided_slice %21 {offsets = [5, 0], sizes = [1, 16], strides = [1, 1]} : vector<49x16xf32> to vector<1x16xf32>
    %276 = vector.shape_cast %275 : vector<1x16xf32> to vector<16xf32>
    %277 = vector.shape_cast %276 : vector<16xf32> to vector<1x1x16xf32>
    %278 = vector.broadcast %277 : vector<1x1x16xf32> to vector<4x4x16xf32>
    %279 = arith.mulf %274, %278 : vector<4x4x16xf32>
    %280 = arith.addf %272, %279 : vector<4x4x16xf32>
    %281 = vector.extract_strided_slice %273 {offsets = [1, 0, 0], sizes = [4, 4, 16], strides = [1, 1, 1]} : vector<10x4x16xf32> to vector<4x4x16xf32>
    %282 = vector.extract_strided_slice %21 {offsets = [12, 0], sizes = [1, 16], strides = [1, 1]} : vector<49x16xf32> to vector<1x16xf32>
    %283 = vector.shape_cast %282 : vector<1x16xf32> to vector<16xf32>
    %284 = vector.shape_cast %283 : vector<16xf32> to vector<1x1x16xf32>
    %285 = vector.broadcast %284 : vector<1x1x16xf32> to vector<4x4x16xf32>
    %286 = arith.mulf %281, %285 : vector<4x4x16xf32>
    %287 = arith.addf %280, %286 : vector<4x4x16xf32>
    %288 = vector.extract_strided_slice %273 {offsets = [2, 0, 0], sizes = [4, 4, 16], strides = [1, 1, 1]} : vector<10x4x16xf32> to vector<4x4x16xf32>
    %289 = vector.extract_strided_slice %21 {offsets = [19, 0], sizes = [1, 16], strides = [1, 1]} : vector<49x16xf32> to vector<1x16xf32>
    %290 = vector.shape_cast %289 : vector<1x16xf32> to vector<16xf32>
    %291 = vector.shape_cast %290 : vector<16xf32> to vector<1x1x16xf32>
    %292 = vector.broadcast %291 : vector<1x1x16xf32> to vector<4x4x16xf32>
    %293 = arith.mulf %288, %292 : vector<4x4x16xf32>
    %294 = arith.addf %287, %293 : vector<4x4x16xf32>
    %295 = vector.extract_strided_slice %273 {offsets = [3, 0, 0], sizes = [4, 4, 16], strides = [1, 1, 1]} : vector<10x4x16xf32> to vector<4x4x16xf32>
    %296 = vector.extract_strided_slice %21 {offsets = [26, 0], sizes = [1, 16], strides = [1, 1]} : vector<49x16xf32> to vector<1x16xf32>
    %297 = vector.shape_cast %296 : vector<1x16xf32> to vector<16xf32>
    %298 = vector.shape_cast %297 : vector<16xf32> to vector<1x1x16xf32>
    %299 = vector.broadcast %298 : vector<1x1x16xf32> to vector<4x4x16xf32>
    %300 = arith.mulf %295, %299 : vector<4x4x16xf32>
    %301 = arith.addf %294, %300 : vector<4x4x16xf32>
    %302 = vector.extract_strided_slice %273 {offsets = [4, 0, 0], sizes = [4, 4, 16], strides = [1, 1, 1]} : vector<10x4x16xf32> to vector<4x4x16xf32>
    %303 = vector.extract_strided_slice %21 {offsets = [33, 0], sizes = [1, 16], strides = [1, 1]} : vector<49x16xf32> to vector<1x16xf32>
    %304 = vector.shape_cast %303 : vector<1x16xf32> to vector<16xf32>
    %305 = vector.shape_cast %304 : vector<16xf32> to vector<1x1x16xf32>
    %306 = vector.broadcast %305 : vector<1x1x16xf32> to vector<4x4x16xf32>
    %307 = arith.mulf %302, %306 : vector<4x4x16xf32>
    %308 = arith.addf %301, %307 : vector<4x4x16xf32>
    %309 = vector.extract_strided_slice %273 {offsets = [5, 0, 0], sizes = [4, 4, 16], strides = [1, 1, 1]} : vector<10x4x16xf32> to vector<4x4x16xf32>
    %310 = vector.extract_strided_slice %21 {offsets = [40, 0], sizes = [1, 16], strides = [1, 1]} : vector<49x16xf32> to vector<1x16xf32>
    %311 = vector.shape_cast %310 : vector<1x16xf32> to vector<16xf32>
    %312 = vector.shape_cast %311 : vector<16xf32> to vector<1x1x16xf32>
    %313 = vector.broadcast %312 : vector<1x1x16xf32> to vector<4x4x16xf32>
    %314 = arith.mulf %309, %313 : vector<4x4x16xf32>
    %315 = arith.addf %308, %314 : vector<4x4x16xf32>
    %316 = vector.extract_strided_slice %273 {offsets = [6, 0, 0], sizes = [4, 4, 16], strides = [1, 1, 1]} : vector<10x4x16xf32> to vector<4x4x16xf32>
    %317 = vector.extract_strided_slice %21 {offsets = [47, 0], sizes = [1, 16], strides = [1, 1]} : vector<49x16xf32> to vector<1x16xf32>
    %318 = vector.shape_cast %317 : vector<1x16xf32> to vector<16xf32>
    %319 = vector.shape_cast %318 : vector<16xf32> to vector<1x1x16xf32>
    %320 = vector.broadcast %319 : vector<1x1x16xf32> to vector<4x4x16xf32>
    %321 = arith.mulf %316, %320 : vector<4x4x16xf32>
    %322 = arith.addf %315, %321 : vector<4x4x16xf32>
    %c0_50 = arith.constant 0 : index
    %c6 = arith.constant 6 : index
    %c0_51 = arith.constant 0 : index
    %323 = vector.load %arg15[%c0_50, %c6, %c0_51] : memref<10x10x16xf32, #tpu.memory_space<vmem>>, vector<10x4x16xf32>
    %324 = vector.extract_strided_slice %323 {offsets = [0, 0, 0], sizes = [4, 4, 16], strides = [1, 1, 1]} : vector<10x4x16xf32> to vector<4x4x16xf32>
    %325 = vector.extract_strided_slice %21 {offsets = [6, 0], sizes = [1, 16], strides = [1, 1]} : vector<49x16xf32> to vector<1x16xf32>
    %326 = vector.shape_cast %325 : vector<1x16xf32> to vector<16xf32>
    %327 = vector.shape_cast %326 : vector<16xf32> to vector<1x1x16xf32>
    %328 = vector.broadcast %327 : vector<1x1x16xf32> to vector<4x4x16xf32>
    %329 = arith.mulf %324, %328 : vector<4x4x16xf32>
    %330 = arith.addf %322, %329 : vector<4x4x16xf32>
    %331 = vector.extract_strided_slice %323 {offsets = [1, 0, 0], sizes = [4, 4, 16], strides = [1, 1, 1]} : vector<10x4x16xf32> to vector<4x4x16xf32>
    %332 = vector.extract_strided_slice %21 {offsets = [13, 0], sizes = [1, 16], strides = [1, 1]} : vector<49x16xf32> to vector<1x16xf32>
    %333 = vector.shape_cast %332 : vector<1x16xf32> to vector<16xf32>
    %334 = vector.shape_cast %333 : vector<16xf32> to vector<1x1x16xf32>
    %335 = vector.broadcast %334 : vector<1x1x16xf32> to vector<4x4x16xf32>
    %336 = arith.mulf %331, %335 : vector<4x4x16xf32>
    %337 = arith.addf %330, %336 : vector<4x4x16xf32>
    %338 = vector.extract_strided_slice %323 {offsets = [2, 0, 0], sizes = [4, 4, 16], strides = [1, 1, 1]} : vector<10x4x16xf32> to vector<4x4x16xf32>
    %339 = vector.extract_strided_slice %21 {offsets = [20, 0], sizes = [1, 16], strides = [1, 1]} : vector<49x16xf32> to vector<1x16xf32>
    %340 = vector.shape_cast %339 : vector<1x16xf32> to vector<16xf32>
    %341 = vector.shape_cast %340 : vector<16xf32> to vector<1x1x16xf32>
    %342 = vector.broadcast %341 : vector<1x1x16xf32> to vector<4x4x16xf32>
    %343 = arith.mulf %338, %342 : vector<4x4x16xf32>
    %344 = arith.addf %337, %343 : vector<4x4x16xf32>
    %345 = vector.extract_strided_slice %323 {offsets = [3, 0, 0], sizes = [4, 4, 16], strides = [1, 1, 1]} : vector<10x4x16xf32> to vector<4x4x16xf32>
    %346 = vector.extract_strided_slice %21 {offsets = [27, 0], sizes = [1, 16], strides = [1, 1]} : vector<49x16xf32> to vector<1x16xf32>
    %347 = vector.shape_cast %346 : vector<1x16xf32> to vector<16xf32>
    %348 = vector.shape_cast %347 : vector<16xf32> to vector<1x1x16xf32>
    %349 = vector.broadcast %348 : vector<1x1x16xf32> to vector<4x4x16xf32>
    %350 = arith.mulf %345, %349 : vector<4x4x16xf32>
    %351 = arith.addf %344, %350 : vector<4x4x16xf32>
    %352 = vector.extract_strided_slice %323 {offsets = [4, 0, 0], sizes = [4, 4, 16], strides = [1, 1, 1]} : vector<10x4x16xf32> to vector<4x4x16xf32>
    %353 = vector.extract_strided_slice %21 {offsets = [34, 0], sizes = [1, 16], strides = [1, 1]} : vector<49x16xf32> to vector<1x16xf32>
    %354 = vector.shape_cast %353 : vector<1x16xf32> to vector<16xf32>
    %355 = vector.shape_cast %354 : vector<16xf32> to vector<1x1x16xf32>
    %356 = vector.broadcast %355 : vector<1x1x16xf32> to vector<4x4x16xf32>
    %357 = arith.mulf %352, %356 : vector<4x4x16xf32>
    %358 = arith.addf %351, %357 : vector<4x4x16xf32>
    %359 = vector.extract_strided_slice %323 {offsets = [5, 0, 0], sizes = [4, 4, 16], strides = [1, 1, 1]} : vector<10x4x16xf32> to vector<4x4x16xf32>
    %360 = vector.extract_strided_slice %21 {offsets = [41, 0], sizes = [1, 16], strides = [1, 1]} : vector<49x16xf32> to vector<1x16xf32>
    %361 = vector.shape_cast %360 : vector<1x16xf32> to vector<16xf32>
    %362 = vector.shape_cast %361 : vector<16xf32> to vector<1x1x16xf32>
    %363 = vector.broadcast %362 : vector<1x1x16xf32> to vector<4x4x16xf32>
    %364 = arith.mulf %359, %363 : vector<4x4x16xf32>
    %365 = arith.addf %358, %364 : vector<4x4x16xf32>
    %366 = vector.extract_strided_slice %323 {offsets = [6, 0, 0], sizes = [4, 4, 16], strides = [1, 1, 1]} : vector<10x4x16xf32> to vector<4x4x16xf32>
    %367 = vector.extract_strided_slice %21 {offsets = [48, 0], sizes = [1, 16], strides = [1, 1]} : vector<49x16xf32> to vector<1x16xf32>
    %368 = vector.shape_cast %367 : vector<1x16xf32> to vector<16xf32>
    %369 = vector.shape_cast %368 : vector<16xf32> to vector<1x1x16xf32>
    %370 = vector.broadcast %369 : vector<1x1x16xf32> to vector<4x4x16xf32>
    %371 = arith.mulf %366, %370 : vector<4x4x16xf32>
    %372 = arith.addf %365, %371 : vector<4x4x16xf32>
    %373 = vector.shape_cast %372 : vector<4x4x16xf32> to vector<16x16xf32>
    %c0_52 = arith.constant 0 : index
    %c0_53 = arith.constant 0 : index
    %c0_54 = arith.constant 0 : index
    %374 = vector.load %arg5[%c0_52, %c0_53, %c0_54] : memref<1x1x16xf32, #tpu.memory_space<vmem>>, vector<1x1x16xf32>
    %375 = vector.shape_cast %374 : vector<1x1x16xf32> to vector<1x16xf32>
    %376 = vector.broadcast %375 : vector<1x16xf32> to vector<16x16xf32>
    %377 = arith.addf %373, %376 : vector<16x16xf32>
    %cst_55 = arith.constant dense<0.000000e+00> : vector<16xf32>
    %378 = vector.multi_reduction <add>, %377, %cst_55 [1] : vector<16x16xf32> to vector<16xf32>
    %379 = vector.shape_cast %378 : vector<16xf32> to vector<16x1xf32>
    %cst_56 = arith.constant 1.600000e+01 : f32
    %380 = vector.broadcast %cst_56 : f32 to vector<16x1xf32>
    %381 = arith.divf %379, %380 : vector<16x1xf32>
    %382 = vector.broadcast %381 : vector<16x1xf32> to vector<16x16xf32>
    %383 = arith.subf %377, %382 : vector<16x16xf32>
    %384 = arith.mulf %383, %383 : vector<16x16xf32>
    %cst_57 = arith.constant dense<0.000000e+00> : vector<16xf32>
    %385 = vector.multi_reduction <add>, %384, %cst_57 [1] : vector<16x16xf32> to vector<16xf32>
    %386 = vector.shape_cast %385 : vector<16xf32> to vector<16x1xf32>
    %cst_58 = arith.constant 1.600000e+01 : f32
    %387 = vector.broadcast %cst_58 : f32 to vector<16x1xf32>
    %388 = arith.divf %386, %387 : vector<16x1xf32>
    %cst_59 = arith.constant 9.99999974E-6 : f32
    %389 = vector.broadcast %cst_59 : f32 to vector<16x1xf32>
    %390 = arith.addf %388, %389 : vector<16x1xf32>
    %391 = math.rsqrt %390 : vector<16x1xf32>
    %392 = vector.broadcast %391 : vector<16x1xf32> to vector<16x16xf32>
    %393 = arith.mulf %383, %392 : vector<16x16xf32>
    %c0_60 = arith.constant 0 : index
    %c0_61 = arith.constant 0 : index
    %c0_62 = arith.constant 0 : index
    %394 = vector.load %arg6[%c0_60, %c0_61, %c0_62] : memref<1x1x16xf32, #tpu.memory_space<vmem>>, vector<1x1x16xf32>
    %395 = vector.shape_cast %394 : vector<1x1x16xf32> to vector<1x16xf32>
    %396 = vector.broadcast %395 : vector<1x16xf32> to vector<16x16xf32>
    %397 = arith.mulf %393, %396 : vector<16x16xf32>
    %c0_63 = arith.constant 0 : index
    %c0_64 = arith.constant 0 : index
    %c0_65 = arith.constant 0 : index
    %398 = vector.load %arg7[%c0_63, %c0_64, %c0_65] : memref<1x1x16xf32, #tpu.memory_space<vmem>>, vector<1x1x16xf32>
    %399 = vector.shape_cast %398 : vector<1x1x16xf32> to vector<1x16xf32>
    %400 = vector.broadcast %399 : vector<1x16xf32> to vector<16x16xf32>
    %401 = arith.addf %397, %400 : vector<16x16xf32>
    %402 = arith.truncf %401 : vector<16x16xf32> to vector<16x16xbf16>
    %c0_66 = arith.constant 0 : index
    %c0_67 = arith.constant 0 : index
    %c0_68 = arith.constant 0 : index
    %403 = vector.load %arg8[%c0_66, %c0_67, %c0_68] : memref<1x16x64xbf16, #tpu.memory_space<vmem>>, vector<1x16x64xbf16>
    %404 = vector.shape_cast %403 : vector<1x16x64xbf16> to vector<16x64xbf16>
    %cst_69 = arith.constant dense<0.000000e+00> : vector<16x64xf32>
    %405 = tpu.matmul %402, %404, %cst_69 {dimension_numbers = #tpu.dot_dimension_numbers<[1], [0], [0], [1], [0, 0, 1, 1], [], []>} : vector<16x16xbf16>, vector<16x64xbf16>, vector<16x64xf32> -> vector<16x64xf32>
    %c0_70 = arith.constant 0 : index
    %c0_71 = arith.constant 0 : index
    %c0_72 = arith.constant 0 : index
    %406 = vector.load %arg9[%c0_70, %c0_71, %c0_72] : memref<1x1x64xf32, #tpu.memory_space<vmem>>, vector<1x1x64xf32>
    %407 = vector.shape_cast %406 : vector<1x1x64xf32> to vector<1x64xf32>
    %408 = vector.broadcast %407 : vector<1x64xf32> to vector<16x64xf32>
    %409 = arith.addf %405, %408 : vector<16x64xf32>
    %cst_73 = arith.constant 5.000000e-01 : f32
    %410 = vector.broadcast %cst_73 : f32 to vector<16x64xf32>
    %411 = arith.mulf %410, %409 : vector<16x64xf32>
    %cst_74 = arith.constant 4.471500e-02 : f32
    %412 = vector.broadcast %cst_74 : f32 to vector<16x64xf32>
    %413 = arith.mulf %412, %409 : vector<16x64xf32>
    %414 = arith.mulf %413, %409 : vector<16x64xf32>
    %415 = arith.mulf %414, %409 : vector<16x64xf32>
    %416 = arith.addf %409, %415 : vector<16x64xf32>
    %cst_75 = arith.constant 0.797884583 : f32
    %417 = vector.broadcast %cst_75 : f32 to vector<16x64xf32>
    %418 = arith.mulf %417, %416 : vector<16x64xf32>
    %419 = math.tanh %418 : vector<16x64xf32>
    %cst_76 = arith.constant 1.000000e+00 : f32
    %420 = vector.broadcast %cst_76 : f32 to vector<16x64xf32>
    %421 = arith.addf %420, %419 : vector<16x64xf32>
    %422 = arith.mulf %411, %421 : vector<16x64xf32>
    %423 = arith.truncf %422 : vector<16x64xf32> to vector<16x64xbf16>
    %c0_77 = arith.constant 0 : index
    %c0_78 = arith.constant 0 : index
    %c0_79 = arith.constant 0 : index
    %424 = vector.load %arg10[%c0_77, %c0_78, %c0_79] : memref<1x64x16xbf16, #tpu.memory_space<vmem>>, vector<1x64x16xbf16>
    %425 = vector.shape_cast %424 : vector<1x64x16xbf16> to vector<64x16xbf16>
    %cst_80 = arith.constant dense<0.000000e+00> : vector<16x16xf32>
    %426 = tpu.matmul %423, %425, %cst_80 {dimension_numbers = #tpu.dot_dimension_numbers<[1], [0], [0], [1], [0, 0, 1, 1], [], []>} : vector<16x64xbf16>, vector<64x16xbf16>, vector<16x16xf32> -> vector<16x16xf32>
    %c0_81 = arith.constant 0 : index
    %c0_82 = arith.constant 0 : index
    %c0_83 = arith.constant 0 : index
    %427 = vector.load %arg11[%c0_81, %c0_82, %c0_83] : memref<1x1x16xf32, #tpu.memory_space<vmem>>, vector<1x1x16xf32>
    %428 = vector.shape_cast %427 : vector<1x1x16xf32> to vector<1x16xf32>
    %429 = vector.broadcast %428 : vector<1x16xf32> to vector<16x16xf32>
    %430 = arith.addf %426, %429 : vector<16x16xf32>
    %c0_84 = arith.constant 0 : index
    %c0_85 = arith.constant 0 : index
    %c0_86 = arith.constant 0 : index
    %431 = vector.load %arg12[%c0_84, %c0_85, %c0_86] : memref<1x1x16xf32, #tpu.memory_space<vmem>>, vector<1x1x16xf32>
    %432 = vector.shape_cast %431 : vector<1x1x16xf32> to vector<1x16xf32>
    %433 = vector.broadcast %432 : vector<1x16xf32> to vector<16x16xf32>
    %434 = arith.mulf %430, %433 : vector<16x16xf32>
    %435 = arith.addf %15, %434 : vector<16x16xf32>
    %436 = vector.shape_cast %435 : vector<16x16xf32> to vector<4x4x16xf32>
    %c0_87 = arith.constant 0 : index
    %c0_88 = arith.constant 0 : index
    %c0_89 = arith.constant 0 : index
    %c0_90 = arith.constant 0 : index
    %437 = vector.load %arg13[%c0_87, %c0_88, %c0_89, %c0_90] : memref<1x4x4x16xf32, #tpu.memory_space<vmem>>, vector<1x4x4x16xf32>
    %438 = vector.shape_cast %437 : vector<1x4x4x16xf32> to vector<4x4x16xf32>
    %439 = vector.shape_cast %436 : vector<4x4x16xf32> to vector<1x4x4x16xf32>
    tpu.vector_store %arg13[%c0_87, %c0_88, %c0_89, %c0_90], %439 {strides = array<i32>} : memref<1x4x4x16xf32, #tpu.memory_space<vmem>>, vector<1x4x4x16xf32>,
    return
  }
  func.func @transform_0(%arg0: i32) -> (i32, i32, i32, i32) {
    %c0_i32 = arith.constant 0 : i32
    %c0_i32_0 = arith.constant 0 : i32
    %c0_i32_1 = arith.constant 0 : i32
    %c0_i32_2 = arith.constant 0 : i32
    return %arg0, %c0_i32, %c0_i32_0, %c0_i32_1 : i32, i32, i32, i32
  }
  func.func @transform_1(%arg0: i32) -> (i32, i32) {
    %c0_i32 = arith.constant 0 : i32
    %c0_i32_0 = arith.constant 0 : i32
    %c0_i32_1 = arith.constant 0 : i32
    return %c0_i32, %c0_i32_0 : i32, i32
  }
  func.func @transform_2(%arg0: i32) -> (i32, i32) {
    %c0_i32 = arith.constant 0 : i32
    %c0_i32_0 = arith.constant 0 : i32
    %c0_i32_1 = arith.constant 0 : i32
    return %c0_i32, %c0_i32_0 : i32, i32
  }
  func.func @transform_3(%arg0: i32) -> (i32, i32, i32) {
    %c0_i32 = arith.constant 0 : i32
    %c0_i32_0 = arith.constant 0 : i32
    %c0_i32_1 = arith.constant 0 : i32
    %c0_i32_2 = arith.constant 0 : i32
    return %c0_i32, %c0_i32_0, %c0_i32_1 : i32, i32, i32
  }
  func.func @transform_4(%arg0: i32) -> (i32, i32, i32) {
    %c0_i32 = arith.constant 0 : i32
    %c0_i32_0 = arith.constant 0 : i32
    %c0_i32_1 = arith.constant 0 : i32
    %c0_i32_2 = arith.constant 0 : i32
    return %c0_i32, %c0_i32_0, %c0_i32_1 : i32, i32, i32
  }
  func.func @transform_5(%arg0: i32) -> (i32, i32, i32) {
    %c0_i32 = arith.constant 0 : i32
    %c0_i32_0 = arith.constant 0 : i32
    %c0_i32_1 = arith.constant 0 : i32
    %c0_i32_2 = arith.constant 0 : i32
    return %c0_i32, %c0_i32_0, %c0_i32_1 : i32, i32, i32
  }
  func.func @transform_6(%arg0: i32) -> (i32, i32, i32) {
    %c0_i32 = arith.constant 0 : i32
    %c0_i32_0 = arith.constant 0 : i32
    %c0_i32_1 = arith.constant 0 : i32
    %c0_i32_2 = arith.constant 0 : i32
    return %c0_i32, %c0_i32_0, %c0_i32_1 : i32, i32, i32
  }
  func.func @transform_7(%arg0: i32) -> (i32, i32, i32) {
    %c0_i32 = arith.constant 0 : i32
    %c0_i32_0 = arith.constant 0 : i32
    %c0_i32_1 = arith.constant 0 : i32
    %c0_i32_2 = arith.constant 0 : i32
    return %c0_i32, %c0_i32_0, %c0_i32_1 : i32, i32, i32
  }
  func.func @transform_8(%arg0: i32) -> (i32, i32, i32) {
    %c0_i32 = arith.constant 0 : i32
    %c0_i32_0 = arith.constant 0 : i32
    %c0_i32_1 = arith.constant 0 : i32
    %c0_i32_2 = arith.constant 0 : i32
    return %c0_i32, %c0_i32_0, %c0_i32_1 : i32, i32, i32
  }
  func.func @transform_9(%arg0: i32) -> (i32, i32, i32) {
    %c0_i32 = arith.constant 0 : i32
    %c0_i32_0 = arith.constant 0 : i32
    %c0_i32_1 = arith.constant 0 : i32
    %c0_i32_2 = arith.constant 0 : i32
    return %c0_i32, %c0_i32_0, %c0_i32_1 : i32, i32, i32
  }
  func.func @transform_10(%arg0: i32) -> (i32, i32, i32) {
    %c0_i32 = arith.constant 0 : i32
    %c0_i32_0 = arith.constant 0 : i32
    %c0_i32_1 = arith.constant 0 : i32
    %c0_i32_2 = arith.constant 0 : i32
    return %c0_i32, %c0_i32_0, %c0_i32_1 : i32, i32, i32
  }
  func.func @transform_11(%arg0: i32) -> (i32, i32, i32) {
    %c0_i32 = arith.constant 0 : i32
    %c0_i32_0 = arith.constant 0 : i32
    %c0_i32_1 = arith.constant 0 : i32
    %c0_i32_2 = arith.constant 0 : i32
    return %c0_i32, %c0_i32_0, %c0_i32_1 : i32, i32, i32
  }
  func.func @transform_12(%arg0: i32) -> (i32, i32, i32, i32) {
    %c0_i32 = arith.constant 0 : i32
    %c0_i32_0 = arith.constant 0 : i32
    %c0_i32_1 = arith.constant 0 : i32
    %c0_i32_2 = arith.constant 0 : i32
    return %arg0, %c0_i32, %c0_i32_0, %c0_i32_1 : i32, i32, i32, i32
  }
}

</mosaic_0001>

<bundles_post_ra>
// kernel: encoder_forward.2
= control target key start
LH: loop header
LB: loop body
LE: loop exit
PB: predicated region body
PF: predicated region fallthrough
CT: control target
= control target key end

     0   :  { %s2344_s21 = smov 0   ;;  %s4230_s0 = inlined_call_operand.vmem [shape: f32[2,8,8,16], index: 0, kind: input, shape index: {}]   ;;  %s4231_s1 = inlined_call_operand.vmem [shape: f32[64,8], index: 1, kind: input, shape index: {}]   ;;  %s4232_s2 = inlined_call_operand.vmem [shape: f32[1,8], index: 2, kind: input, shape index: {}]   ;;  %s4233_s3 = inlined_call_operand.vmem [shape: f32[1,49,8], index: 3, kind: input, shape index: {}]   ;;  %s4234_s4 = inlined_call_operand.vmem [shape: f32[1,1,8], index: 4, kind: input, shape index: {}]   ;;  %s4235_s5 = inlined_call_operand.vmem [shape: f32[1,1,8], index: 5, kind: input, shape index: {}]   ;;  %s4236_s6 = inlined_call_operand.vmem [shape: f32[1,1,8], index: 6, kind: input, shape index: {}]   ;;  %s4237_s7 = inlined_call_operand.vmem [shape: bf16[1,8,32], index: 7, kind: input, shape index: {}]   ;;  %s4238_s8 = inlined_call_operand.vmem [shape: f32[1,1,32], index: 8, kind: input, shape index: {}]   ;;  %s4239_s9 = inlined_call_operand.vmem [shape: bf16[1,32,8], index: 9, kind: input, shape index: {}]   ;;  %s4240_s10 = inlined_call_operand.vmem [shape: f32[1,1,8], index: 10, kind: input, shape index: {}]   ;;  %s4241_s11 = inlined_call_operand.vmem [shape: f32[1,1,8], index: 11, kind: input, shape index: {}]   ;;  %s4242_s12 = inlined_call_operand.vmem [shape: f32[2,8,8,8], index: 12, kind: output, shape index: {}]  }
   0x1 LB: > { %s2154_s22 = sadd.s32 4294967295, %s2272_s21   ;;  %p2158_p0 = scmp.ge.s32.totalorder %s2272_s21, 1  ;;  %s2272_s21 = sphi %s2344_s21, %s22_s21  }
   0x2   : > { %p362_p1 = scmp.lt.s32.totalorder %s2272_s21, 3 }
   0x4   : > { %p363_p2 = pnand %p2158_p0, %p362_p1 }
   0x6   : > { %366 = sbr.rel (%p363_p2) target bundleno = 1199 (0x4af), region = 68 }
   0xb   : > { %vm415_vm0 = vcmask 130048   ;;  %vm417_vm1 = vcmask 122880   ;;  %v2274_v0 = vmov 0.0   ;;  %p404_p3 = scmp.lt.s32.totalorder %s2154_s22, 1  ;;  %s2275_s23 = smov 16   ;;  %v613_v18 = vld [vmem:[%s4231_s1 + $0x38] sm:$0xff] }
   0xc   : > { %416 = vst.msk [vmem:[#allocation2] sm:$0xff] %vm415_vm0, %v2274_v0  ;;  %s2276_s28 = smov 48   ;;  %s2277_s29 = smov 32   ;;  %v612_v19 = vld [vmem:[%s4231_s1 + $0x30] sm:$0xff]  ;;  %651 = vmatpush.msra.mxu0 %v613_v18  ;;  %2193 = vmatpush.msra.mxu3 %v613_v18  ;;  %v611_v20 = vld [vmem:[%s4231_s1 + $0x28] sm:$0xff]  ;;  %v610_v29 = vld [vmem:[%s4231_s1 + $0x20] sm:$0xff] }
   0xd   : > { %418 = vst.msk [vmem:[#allocation2 + $0x8] sm:$0x1] %vm417_vm1, %v2274_v0  ;;  %s4794_s22 = smov (!%p404_p3, %s2154_s22), 1  ;;  %v609_v30 = vld [vmem:[%s4231_s1 + $0x18] sm:$0xff]  ;;  %v608_v31 = vld [vmem:[%s4231_s1 + $0x10] sm:$0xff]  ;;  %v607_v32 = vld [vmem:[%s4231_s1 + $0x8] sm:$0xff] }
   0xe   : > { %419 = vst.msk [vmem:[#allocation2 + $0x10] sm:$0xff] %vm415_vm0, %v2274_v0  ;;  %s2189_s24 = sshll.u32 %s4794_s22, 6  ;;  %652 = vmatpush.msra.mxu0 %v612_v19  ;;  %2194 = vmatpush.msra.mxu3 %v612_v19  ;;  %v606_v33 = vld [vmem:[%s4231_s1] sm:$0xff]  ;;  %vm588_vm2 = vcmask 261120   ;;  %vm597_vm3 = vcmask 392192   ;;  %vm618_vm4 = vcmask 523264  }
   0xf   : > { %420 = vst.msk [vmem:[#allocation2 + $0x18] sm:$0x1] %vm417_vm1, %v2274_v0  ;;  %s2387_s27 = scalar_lea.vmem %s4230_s0, %s2189_s24  ;;  %vm684_vm5 = vcmask 64512   ;;  %vm686_vm6 = vcmask 62464   ;;  %vm1901_vm8 = vcmask 1043456   ;;  %s4201_s25 = scalar_lea.vmem %s4242_s12, %s2189_s24 }
  0x10   : > { %421 = vst.msk [vmem:[#allocation2 + $0x20] sm:$0xff] %vm415_vm0, %v2274_v0  ;;  %v435_v2 = vld [vmem:[%s2387_s27] sm:$0xff]  ;;  %v436_v3 = vld [vmem:[%s2387_s27 + $0x8] sm:$0xff]  ;;  %v437_v4 = vld [vmem:[%s2387_s27 + $0x10] sm:$0xff]  ;;  %653 = vmatpush.msra.mxu0 %v611_v20  ;;  %2195 = vmatpush.msra.mxu3 %v611_v20 }
  0x11   : > { %422 = vst.msk [vmem:[#allocation2 + $0x28] sm:$0x1] %vm417_vm1, %v2274_v0  ;;  %v438_v5 = vld [vmem:[%s2387_s27 + $0x18] sm:$0xff]  ;;  %v439_v6 = vld [vmem:[%s2387_s27 + $0x20] sm:$0xff]  ;;  %v440_v7 = vld [vmem:[%s2387_s27 + $0x28] sm:$0xff] }
  0x12   : > { %423 = vst.msk [vmem:[#allocation2 + $0x30] sm:$0xff] %vm415_vm0, %v2274_v0  ;;  %v441_v10 = vld [vmem:[%s2387_s27 + $0x30] sm:$0xff]  ;;  %v442_v15 = vld [vmem:[%s2387_s27 + $0x38] sm:$0xff]  ;;  %654 = vmatpush.msra.mxu0 %v610_v29  ;;  %2196 = vmatpush.msra.mxu3 %v610_v29  ;;  %v2581_v20 = vld [vmem:[%s4232_s2] ss:$0 sm:$0xff] }
  0x13   : > { %424 = vst.msk [vmem:[#allocation2 + $0x38] sm:$0x1] %vm417_vm1, %v2274_v0  ;;  %v452_v37 = vld [vmem:[#allocation2] sm:$0xff] }
  0x14   : > { %v460_v1 = vld [vmem:[#allocation2 + $0x1] sm:$0xff]  ;;  %425 = vst.msk [vmem:[#allocation2 + $0x40] sm:$0xff] %vm415_vm0, %v2274_v0  ;;  %655 = vmatpush.msra.mxu0 %v609_v30  ;;  %2197 = vmatpush.msra.mxu3 %v609_v30 }
  0x15   : > { %492 = vrot.lane.b32.xlu0 %v460_v1, %s2275_s23  ;;  %426 = vst.msk [vmem:[#allocation2 + $0x48] sm:$0x1] %vm417_vm1, %v2274_v0 }
  0x16   : > { %427 = vst.msk [vmem:[#allocation2 + $0x50] sm:$0xff] %vm415_vm0, %v2274_v0  ;;  %656 = vmatpush.msra.mxu0 %v608_v31  ;;  %2198 = vmatpush.msra.mxu3 %v608_v31 }
  0x17   : > { %428 = vst.msk [vmem:[#allocation2 + $0x58] sm:$0x1] %vm417_vm1, %v2274_v0 }
  0x18   : > { %429 = vst.msk [vmem:[#allocation2 + $0x60] sm:$0xff] %vm415_vm0, %v2274_v0  ;;  %657 = vmatpush.msra.mxu0 %v607_v32  ;;  %2199 = vmatpush.msra.mxu3 %v607_v32 }
  0x19   : > { %430 = vst.msk [vmem:[#allocation2 + $0x68] sm:$0x1] %vm417_vm1, %v2274_v0 }
  0x1a   : > { %431 = vst.msk [vmem:[#allocation2 + $0x70] sm:$0xff] %vm415_vm0, %v2274_v0  ;;  %658 = vmatpush.msra.mxu0 %v606_v33  ;;  %2200 = vmatpush.msra.mxu3 %v606_v33 }
  0x1b   : > { %432 = vst.msk [vmem:[#allocation2 + $0x78] sm:$0x1] %vm417_vm1, %v2274_v0 }
  0x1c   : > { %433 = vst.msk [vmem:[#allocation2 + $0x80] sm:$0xff] %vm415_vm0, %v2274_v0 }
  0x1d   : > { %434 = vst.msk [vmem:[#allocation2 + $0x88] sm:$0x1] %vm417_vm1, %v2274_v0 }
  0x1e   : > { %444 = vst.msk [vmem:[#allocation2 + $0x11] sm:$0xff] %vm415_vm0, %v435_v2 }
  0x1f   : > { %445 = vst.msk [vmem:[#allocation2 + $0x21] sm:$0xff] %vm415_vm0, %v436_v3 }
  0x20   : > { %446 = vst.msk [vmem:[#allocation2 + $0x31] sm:$0xff] %vm415_vm0, %v437_v4 }
  0x21   : > { %447 = vst.msk [vmem:[#allocation2 + $0x41] sm:$0xff] %vm415_vm0, %v438_v5 }
  0x22   : > { %448 = vst.msk [vmem:[#allocation2 + $0x51] sm:$0xff] %vm415_vm0, %v439_v6 }
  0x23   : > { %449 = vst.msk [vmem:[#allocation2 + $0x61] sm:$0xff] %vm415_vm0, %v440_v7 }
  0x24   : > { %450 = vst.msk [vmem:[#allocation2 + $0x71] sm:$0xff] %vm415_vm0, %v441_v10 }
  0x25   : > { %v476_v8 = vld [vmem:[#allocation2 + $0x11] sm:$0xff]  ;;  %451 = vst.msk [vmem:[#allocation2 + $0x81] sm:$0xff] %vm415_vm0, %v442_v15 }
  0x26   : > { %v2410_v9 = vld [vmem:[#allocation2 + $0x10] sm:$0xff]  ;;  %556 = vrot.lane.b32.xlu1 %v476_v8, %s2276_s28  ;;  %v2417_v11 = vld [vmem:[#allocation2 + $0x20] sm:$0xff]  ;;  %685 = vst.msk [vmem:[#allocation3] sm:$0xff] %vm684_vm5, %v2274_v0 }
  0x27   : > { %524 = vrot.lane.b32.xlu0 %v2410_v9, %s2277_s29  ;;  %526 = vrot.lane.b32.xlu2 %v2417_v11, %s2277_s29  ;;  %v462_v12 = vld [vmem:[#allocation2 + $0x21] sm:$0xff]  ;;  %v2425_v13 = vld [vmem:[#allocation2 + $0x30] sm:$0xff]  ;;  %688 = vst.msk [vmem:[#allocation3 + $0x10] sm:$0xff] %vm684_vm5, %v2274_v0 }
  0x28   : > { %v463_v14 = vld [vmem:[#allocation2 + $0x31] sm:$0xff]  ;;  %v2433_v16 = vld [vmem:[#allocation2 + $0x40] sm:$0xff]  ;;  %690 = vst.msk [vmem:[#allocation3 + $0x20] sm:$0xff] %vm684_vm5, %v2274_v0 }
  0x29   : > { %v464_v17 = vld [vmem:[#allocation2 + $0x41] sm:$0xff]  ;;  %v2448_v21 = vld [vmem:[#allocation2 + $0x50] sm:$0xff]  ;;  %692 = vst.msk [vmem:[#allocation3 + $0x30] sm:$0xff] %vm684_vm5, %v2274_v0 }
  0x2a   : > { %v466_v22 = vld [vmem:[#allocation2 + $0x61] sm:$0xff]  ;;  %v465_v23 = vld [vmem:[#allocation2 + $0x51] sm:$0xff]  ;;  %693 = vst.msk [vmem:[#allocation3 + $0x38] sm:$0x3f] %vm686_vm6, %v2274_v0 }
  0x2b   : > { %v2454_v24 = vld [vmem:[#allocation2 + $0x70] sm:$0xff]  ;;  %v2460_v26 = vld [vmem:[#allocation2 + $0x60] sm:$0xff]  ;;  %687 = vst.msk [vmem:[#allocation3 + $0x8] sm:$0x3f] %vm686_vm6, %v2274_v0 }
  0x2c   : > { %v467_v25 = vld [vmem:[#allocation2 + $0x71] sm:$0xff]  ;;  %v475_v27 = vld [vmem:[#allocation2 + $0x80] sm:$0xff]  ;;  %689 = vst.msk [vmem:[#allocation3 + $0x18] sm:$0x3f] %vm686_vm6, %v2274_v0 }
  0x2d   : > { %v483_v28 = vld [vmem:[#allocation2 + $0x81] sm:$0xff]  ;;  %691 = vst.msk [vmem:[#allocation3 + $0x28] sm:$0x3f] %vm686_vm6, %v2274_v0 }
  0x2e   : > { %494 = vrot.lane.b32.xlu1 %v476_v8, %s2275_s23  ;;  %694 = vst.msk [vmem:[#allocation3 + $0x40] sm:$0xff] %vm684_vm5, %v2274_v0  ;;  %v731_v29 = vld [vmem:[#allocation3 + $0x10] sm:$0xff] }
  0x2f   : > { %496 = vrot.lane.b32.xlu0 %v462_v12, %s2275_s23  ;;  %558 = vrot.lane.b32.xlu2 %v462_v12, %s2276_s28  ;;  %695 = vst.msk [vmem:[#allocation3 + $0x48] sm:$0x3f] %vm686_vm6, %v2274_v0  ;;  %v732_v30 = vld [vmem:[#allocation3 + $0x20] sm:$0xff] }
  0x30   : > { %696 = vst.msk [vmem:[#allocation3 + $0x50] sm:$0xff] %vm684_vm5, %v2274_v0 }
  0x31   : > { %697 = vst.msk [vmem:[#allocation3 + $0x58] sm:$0x3f] %vm686_vm6, %v2274_v0 }
  0x32   : > { %698 = vst.msk [vmem:[#allocation3 + $0x60] sm:$0xff] %vm684_vm5, %v2274_v0 }
  0x33   : > { %699 = vst.msk [vmem:[#allocation3 + $0x68] sm:$0x3f] %vm686_vm6, %v2274_v0 }
  0x34   : > { %700 = vst.msk [vmem:[#allocation3 + $0x70] sm:$0xff] %vm684_vm5, %v2274_v0 }
  0x35   : > { %701 = vst.msk [vmem:[#allocation3 + $0x78] sm:$0x3f] %vm686_vm6, %v2274_v0 }
  0x36   : > { %528 = vrot.lane.b32.xlu1 %v2425_v13, %s2277_s29  ;;  %702 = vst.msk [vmem:[#allocation3 + $0x80] sm:$0xff] %vm684_vm5, %v2274_v0 }
  0x37   : > { %498 = vrot.lane.b32.xlu0 %v463_v14, %s2275_s23  ;;  %560 = vrot.lane.b32.xlu2 %v463_v14, %s2276_s28  ;;  %703 = vst.msk [vmem:[#allocation3 + $0x88] sm:$0x3f] %vm686_vm6, %v2274_v0 }
  0x38   : > { %704 = vst.msk [vmem:[#allocation3 + $0x90] sm:$0xff] %vm684_vm5, %v2274_v0 }
  0x39   : > { %705 = vst.msk [vmem:[#allocation3 + $0x98] sm:$0x3f] %vm686_vm6, %v2274_v0 }
  0x3a   : > { %706 = vst.msk [vmem:[#allocation3 + $0xa0] sm:$0xff] %vm684_vm5, %v2274_v0 }
  0x3b   : > { %707 = vst.msk [vmem:[#allocation3 + $0xa8] sm:$0x3f] %vm686_vm6, %v2274_v0 }
  0x3c   : > { %708 = vst.msk [vmem:[#allocation3 + $0xb0] sm:$0xff] %vm684_vm5, %v2274_v0 }
  0x3d   : > { %709 = vst.msk [vmem:[#allocation3 + $0xb8] sm:$0x3f] %vm686_vm6, %v2274_v0 }
  0x3e   : > { %530 = vrot.lane.b32.xlu1 %v2433_v16, %s2277_s29  ;;  %710 = vst.msk [vmem:[#allocation3 + $0xc0] sm:$0xff] %vm684_vm5, %v2274_v0 }
  0x3f   : > { %500 = vrot.lane.b32.xlu0 %v464_v17, %s2275_s23  ;;  %562 = vrot.lane.b32.xlu2 %v464_v17, %s2276_s28  ;;  %711 = vst.msk [vmem:[#allocation3 + $0xc8] sm:$0x3f] %vm686_vm6, %v2274_v0 }
  0x40   : > { %712 = vst.msk [vmem:[#allocation3 + $0xd0] sm:$0xff] %vm684_vm5, %v2274_v0 }
  0x41   : > { %713 = vst.msk [vmem:[#allocation3 + $0xd8] sm:$0x3f] %vm686_vm6, %v2274_v0 }
  0x46   : > { %532 = vrot.lane.b32.xlu1 %v2448_v21, %s2277_s29 }
  0x47   : > { %504 = vrot.lane.b32.xlu0 %v466_v22, %s2275_s23  ;;  %564 = vrot.lane.b32.xlu2 %v465_v23, %s2276_s28 }
  0x4e   : > { %536 = vrot.lane.b32.xlu1 %v2454_v24, %s2277_s29 }
  0x4f   : > { %502 = vrot.lane.b32.xlu0 %v465_v23, %s2275_s23  ;;  %568 = vrot.lane.b32.xlu2 %v467_v25, %s2276_s28  ;;  %v2591_v23 = vld [vmem:[%s4233_s3] sm:$0xff] }
  0x56   : > { %534 = vrot.lane.b32.xlu1 %v2460_v26, %s2277_s29 }
  0x57   : > { %506 = vrot.lane.b32.xlu0 %v467_v25, %s2275_s23  ;;  %566 = vrot.lane.b32.xlu2 %v466_v22, %s2276_s28  ;;  %v2597_v25 = vperm.slane %v2591_v23, 0 }
  0x5e   : > { %538 = vrot.lane.b32.xlu1 %v475_v27, %s2277_s29  ;;  %v724_v27 = vld [vmem:[%s4233_s3 + $0x8] sm:$0xff] }
  0x5f   : > { %570 = vrot.lane.b32.xlu2 %v483_v28, %s2276_s28  ;;  %v730_v28 = vld [vmem:[#allocation3] sm:$0xff]  ;;  %v2609_v33 = vperm.slane %v724_v27, 6 }
  0x60   : > { %v745_v31 = vmul.f32 %v2597_v25, %v730_v28 }
  0x81   : > { %v527_v34 = vpop.permute.xlu2 %526 }
  0x87   : > { %v493_v35 = vpop.permute.xlu0 %492 }
  0x88   : > { %v580_v38 = vsel %vm415_vm0, %v452_v37, %v493_v35  ;;  %v746_v37 = vmul.f32 %v2597_v25, %v731_v29 }
  0x89   : > { %v559_v36 = vpop.permute.xlu2 %558 }
  0x91   : > { %v561_v43 = vpop.permute.xlu2 %560 }
  0x98   : > { %v557_v39 = vpop.permute.xlu1 %556 }
  0x99   : > { %v525_v40 = vpop.permute.xlu0 %524  ;;  %v563_v50 = vpop.permute.xlu2 %562 }
  0x9a   : > { %v589_v41 = vsel %vm588_vm2, %v580_v38, %v525_v40  ;;  %v779_v40 = vmul.f32 %v2609_v33, %v732_v30 }
  0x9b   : > { %v598_v42 = vsel %vm597_vm3, %v589_v41, %v557_v39  ;;  %v747_v41 = vmul.f32 %v2597_v25, %v732_v30 }
  0x9c   : > { %2163 = vmatmul.msk.f32.vlgmr.msra.gmra.mxu0 %vm618_vm4, %v598_v42 }
  0xa0   : > { %v495_v44 = vpop.permute.xlu1 %494 }
  0xa1   : > { %v497_v45 = vpop.permute.xlu0 %496  ;;  %v581_v46 = vsel %vm415_vm0, %v2410_v9, %v495_v44  ;;  %v565_v59 = vpop.permute.xlu2 %564 }
  0xa2   : > { %v590_v47 = vsel %vm588_vm2, %v581_v46, %v527_v34  ;;  %v582_v49 = vsel %vm415_vm0, %v2417_v11, %v497_v45  ;;  %v2629_v45 = vperm.slane %v2591_v23, 1  ;;  %v2631_v46 = vperm.slane %v724_v27, 0 }
  0xa3   : > { %v599_v48 = vsel %vm597_vm3, %v590_v47, %v559_v36  ;;  %v725_v36 = vld [vmem:[%s4233_s3 + $0x10] sm:$0xff]  ;;  %v2633_v47 = vperm.slane %v724_v27, 7 }
  0xa4   : > { %2164 = vmatmul.msk.f32.gmra.mxu0 %vm618_vm4, %v599_v48  ;;  %v2623_v42 = vperm.slane %v725_v36, 5  ;;  %v2719_v28 = vperm.slane %v725_v36, 3 }
  0xa6   : > { %4414 = vst [vmem:[#allocation28_spill] sm:$0xff] %v2719_v28 }
  0xa8   : > { %v529_v51 = vpop.permute.xlu1 %528 }
  0xa9   : > { %v499_v52 = vpop.permute.xlu0 %498  ;;  %v591_v53 = vsel %vm588_vm2, %v582_v49, %v529_v51  ;;  %v569_v3 = vpop.permute.xlu2 %568  ;;  %v2635_v49 = vperm.slane %v725_v36, 6  ;;  %v2640_v51 = vperm.slane %v724_v27, 1 }
  0xaa   : > { %v600_v54 = vsel %vm597_vm3, %v591_v53, %v561_v43  ;;  %v583_v55 = vsel %vm415_vm0, %v2425_v13, %v499_v52  ;;  %v726_v43 = vld [vmem:[%s4233_s3 + $0x18] sm:$0xff]  ;;  %v2642_v52 = vperm.slane %v725_v36, 0  ;;  %v2644_v53 = vperm.slane %v725_v36, 7 }
  0xac   : > { %2165 = vmatmul.msk.f32.gmra.mxu0 %vm618_vm4, %v600_v54  ;;  %4393 = vst [vmem:[#allocation7_spill] sm:$0xff] %v2644_v53  ;;  %v2647_v54 = vperm.slane %v2591_v23, 3 }
  0xae   : > { %4394 = vst [vmem:[#allocation8_spill] sm:$0xff] %v2647_v54 }
  0xb0   : > { %v531_v56 = vpop.permute.xlu1 %530 }
  0xb1   : > { %v501_v57 = vpop.permute.xlu0 %500  ;;  %v592_v58 = vsel %vm588_vm2, %v583_v55, %v531_v56  ;;  %v567_v9 = vpop.permute.xlu2 %566  ;;  %v2649_v55 = vperm.slane %v724_v27, 2 }
  0xb2   : > { %v601_v60 = vsel %vm597_vm3, %v592_v58, %v563_v50  ;;  %v584_v61 = vsel %vm415_vm0, %v2433_v16, %v501_v57  ;;  %v2638_v50 = vperm.slane %v2591_v23, 2  ;;  %v2651_v57 = vperm.slane %v725_v36, 1 }
  0xb3   : > { %v2653_v58 = vperm.slane %v726_v43, 0 }
  0xb4   : > { %2166 = vmatmul.msk.f32.gmra.mxu0 %vm618_vm4, %v601_v60  ;;  %4395 = vst [vmem:[#allocation9_spill] sm:$0xff] %v2651_v57 }
  0xb5   : > { %4396 = vst [vmem:[#allocation10_spill] sm:$0xff] %v2653_v58 }
  0xb8   : > { %v533_v62 = vpop.permute.xlu1 %532 }
  0xb9   : > { %v505_v63 = vpop.permute.xlu0 %504  ;;  %v593_v1 = vsel %vm588_vm2, %v584_v61, %v533_v62  ;;  %v571_v16 = vpop.permute.xlu2 %570  ;;  %v2661_v61 = vperm.slane %v726_v43, 4  ;;  %v2663_v62 = vperm.slane %v726_v43, 5 }
  0xba   : > { %v602_v2 = vsel %vm597_vm3, %v593_v1, %v565_v59  ;;  %v586_v4 = vsel %vm415_vm0, %v2460_v26, %v505_v63  ;;  %v2600_v26 = vperm.slane %v2591_v23, 7  ;;  %v2656_v59 = vperm.slane %v2591_v23, 4 }
  0xbb   : > { %4399 = vst [vmem:[#allocation13_spill] sm:$0xff] %v2661_v61  ;;  %v2665_v63 = vperm.slane %v726_v43, 6  ;;  %v2667_v1 = vperm.slane %v726_v43, 7 }
  0xbc   : > { %2167 = vmatmul.msk.f32.gmra.mxu0 %vm618_vm4, %v602_v2  ;;  %v762_v32 = vmul.f32 %v2600_v26, %v731_v29  ;;  %v763_v38 = vmul.f32 %v2600_v26, %v732_v30  ;;  %4397 = vst [vmem:[#allocation11_spill] sm:$0xff] %v2656_v59  ;;  %v2672_v2 = vld [vmem:[%s4233_s3 + $0x20] sm:$0xff]  ;;  %v2721_v29 = vperm.slane %v726_v43, 2  ;;  %v2724_v30 = vperm.slane %v2591_v23, 6 }
  0xbd   : > { %4400 = vst [vmem:[#allocation14_spill] sm:$0xff] %v2663_v62 }
  0xbe   : > { %v770_v39 = vadd.f32 %v762_v32, %v745_v31  ;;  %v771_v44 = vadd.f32 %v763_v38, %v746_v37  ;;  %4401 = vst [vmem:[#allocation15_spill] sm:$0xff] %v2665_v63  ;;  %v2726_v31 = vperm.slane %v724_v27, 5  ;;  %v2728_v32 = vperm.slane %v725_v36, 4 }
  0xbf   : > { %4402 = vst [vmem:[#allocation16_spill] sm:$0xff] %v2667_v1 }
  0xc0   : > { %v537_v5 = vpop.permute.xlu1 %536  ;;  %v787_v48 = vadd.f32 %v779_v40, %v770_v39  ;;  %4415 = vst [vmem:[#allocation29_spill] sm:$0xff] %v2721_v29 }
  0xc1   : > { %v595_v6 = vsel %vm588_vm2, %v586_v4, %v537_v5  ;;  %v503_v7 = vpop.permute.xlu0 %502  ;;  %v2677_v5 = vperm.slane %v2672_v2, 3  ;;  %4416 = vst [vmem:[#allocation30_spill] sm:$0xff] %v2724_v30 }
  0xc2   : > { %v604_v8 = vsel %vm597_vm3, %v595_v6, %v569_v3  ;;  %v585_v10 = vsel %vm415_vm0, %v2448_v21, %v503_v7  ;;  %v2680_v6 = vperm.slane %v2672_v2, 4  ;;  %v2683_v7 = vperm.slane %v2672_v2, 5  ;;  %4417 = vst [vmem:[#allocation31_spill] sm:$0xff] %v2726_v31 }
  0xc3   : > { %2169 = vmatmul.msk.f32.vlgmr.msra.gmra.mxu3 %vm618_vm4, %v604_v8  ;;  %4403 = vst [vmem:[#allocation17_spill] sm:$0xff] %v2677_v5  ;;  %v2686_v8 = vperm.slane %v2672_v2, 6 }
  0xc4   : > { %4404 = vst [vmem:[#allocation18_spill] sm:$0xff] %v2683_v7 }
  0xc5   : > { %4405 = vst [vmem:[#allocation19_spill] sm:$0xff] %v2686_v8 }
  0xc6   : > { %4418 = vst [vmem:[#allocation32_spill] sm:$0xff] %v2728_v32 }
  0xc8   : > { %v535_v11 = vpop.permute.xlu1 %534 }
  0xc9   : > { %v594_v12 = vsel %vm588_vm2, %v585_v10, %v535_v11  ;;  %v507_v14 = vpop.permute.xlu0 %506  ;;  %v2697_v10 = vld [vmem:[%s4233_s3 + $0x28] sm:$0xff]  ;;  %v2699_v11 = vperm.slane %v724_v27, 3 }
  0xca   : > { %v603_v13 = vsel %vm597_vm3, %v594_v12, %v567_v9  ;;  %v587_v15 = vsel %vm415_vm0, %v2454_v24, %v507_v14  ;;  %v2701_v12 = vperm.slane %v725_v36, 2  ;;  %v2706_v14 = vperm.slane %v2697_v10, 2 }
  0xcb   : > { %2168 = vmatmul.msk.f32.gmra.mxu0 %vm618_vm4, %v603_v13  ;;  %4407 = vst [vmem:[#allocation21_spill] sm:$0xff] %v2699_v11  ;;  %v2703_v13 = vperm.slane %v726_v43, 1  ;;  %v2734_v38 = vperm.slane %v2697_v10, 4  ;;  %v2737_v40 = vperm.slane %v2697_v10, 5 }
  0xcc   : > { %4408 = vst [vmem:[#allocation22_spill] sm:$0xff] %v2701_v12 }
  0xcd   : > { %4409 = vst [vmem:[#allocation23_spill] sm:$0xff] %v2703_v13 }
  0xce   : > { %4410 = vst [vmem:[#allocation24_spill] sm:$0xff] %v2706_v14 }
  0xcf   : > { %4419 = vst [vmem:[#allocation33_spill] sm:$0xff] %v2734_v38 }
  0xd0   : > { %v539_v17 = vpop.permute.xlu1 %538  ;;  %4420 = vst [vmem:[#allocation34_spill] sm:$0xff] %v2737_v40 }
  0xd1   : > { %v596_v18 = vsel %vm588_vm2, %v587_v15, %v539_v17  ;;  %v2709_v15 = vperm.slane %v2697_v10, 3  ;;  %v2714_v17 = vperm.slane %v724_v27, 4 }
  0xd2   : > { %v605_v19 = vsel %vm597_vm3, %v596_v18, %v571_v16  ;;  %v2712_v16 = vperm.slane %v2591_v23, 5 }
  0xd3   : > { %2170 = vmatmul.msk.f32.gmra.mxu3 %vm618_vm4, %v605_v19  ;;  %4411 = vst [vmem:[#allocation25_spill] sm:$0xff] %v2709_v15 }
  0xd4   : > { %4412 = vst [vmem:[#allocation26_spill] sm:$0xff] %v2712_v16 }
  0xd5   : > { %4413 = vst [vmem:[#allocation27_spill] sm:$0xff] %v2714_v17 }
 0x119   : > { %v660_v21 = vpop.f32.mrf.mxu0 }
 0x11a   : > { %v2584_v22 = vadd.f32 %v2581_v20, %v660_v21 }
 0x11c   : > { %4390 = vst [vmem:[#allocation4_spill] sm:$0xff] %v2584_v22 }
 0x11d   : > { %715 = vst.msk [vmem:[#allocation3 + $0x33] sm:$0xff] %vm684_vm5, %v2584_v22 }
 0x121   : > { %v663_v24 = vpop.f32.mrf.mxu0 }
 0x122   : > { %v2594_v0 = vadd.f32 %v2581_v20, %v663_v24 }
 0x124   : > { %4391 = vst [vmem:[#allocation5_spill] sm:$0xff] %v2594_v0  ;;  %v733_v4 = vld [vmem:[#allocation3 + $0x30] sm:$0xff] }
 0x125   : > { %716 = vst.msk [vmem:[#allocation3 + $0x43] sm:$0xff] %vm684_vm5, %v2594_v0  ;;  %v764_v18 = vmul.f32 %v2600_v26, %v733_v4  ;;  %v780_v19 = vmul.f32 %v2609_v33, %v733_v4  ;;  %v796_v21 = vmul.f32 %v2623_v42, %v733_v4  ;;  %v866_v24 = vld [vmem:[#allocation3 + $0x31] sm:$0xff] }
 0x126   : > { %v999_v37 = vld [vmem:[#allocation3 + $0x32] sm:$0xff]  ;;  %v2742_v23 = vmul.f32 %v2629_v45, %v866_v24  ;;  %v2745_v27 = vmul.f32 %v2631_v46, %v866_v24  ;;  %v2748_v36 = vmul.f32 %v2633_v47, %v866_v24 }
 0x127   : > { %v788_v0 = vadd.f32 %v780_v19, %v771_v44  ;;  %v804_v22 = vadd.f32 %v796_v21, %v787_v48  ;;  %v2759_v31 = vmul.f32 %v2638_v50, %v999_v37  ;;  %v2762_v16 = vmul.f32 %v2640_v51, %v999_v37  ;;  %v2772_v44 = vld [vmem:[#allocation3 + $0x35] sm:$0xff] }
 0x128   : > { %4422 = vst [vmem:[#allocation36_spill] sm:$0xff] %v2742_v23  ;;  %v2765_v17 = vmul.f32 %v2642_v52, %v999_v37 }
 0x129   : > { %v666_v34 = vpop.f32.mrf.mxu0  ;;  %4423 = vst [vmem:[#allocation37_spill] sm:$0xff] %v2745_v27 }
 0x12a   : > { %v2612_v35 = vadd.f32 %v2581_v20, %v666_v34  ;;  %v2731_v34 = vmul.f32 %v2597_v25, %v733_v4  ;;  %4424 = vst [vmem:[#allocation38_spill] sm:$0xff] %v2748_v36  ;;  %v2751_v4 = vmul.f32 %v2635_v49, %v866_v24  ;;  %v2768_v24 = vmul.f32 %v2644_v53, %v999_v37  ;;  %v2791_v37 = vld [vmem:[#allocation3 + $0x36] sm:$0xff] }
 0x12b   : > { %4426 = vst [vmem:[#allocation40_spill] sm:$0xff] %v2759_v31 }
 0x12c   : > { %4392 = vst [vmem:[#allocation6_spill] sm:$0xff] %v2612_v35  ;;  %v867_v40 = vld [vmem:[#allocation3 + $0x41] sm:$0xff] }
 0x12d   : > { %717 = vst.msk [vmem:[#allocation3 + $0x53] sm:$0xff] %vm684_vm5, %v2612_v35  ;;  %v772_v35 = vadd.f32 %v764_v18, %v747_v41 }
 0x12e   : > { %4427 = vst [vmem:[#allocation41_spill] sm:$0xff] %v2762_v16 }
 0x12f   : > { %4428 = vst [vmem:[#allocation42_spill] sm:$0xff] %v2765_v17 }
 0x130   : > { %4429 = vst [vmem:[#allocation43_spill] sm:$0xff] %v2768_v24 }
 0x131   : > { %v669_v56 = vpop.f32.mrf.mxu0  ;;  %4430 = vst [vmem:[#allocation44_spill] sm:$0xff] %v2772_v44 }
 0x132   : > { %v2659_v60 = vadd.f32 %v2581_v20, %v669_v56  ;;  %v2739_v56 = vperm.slane %v726_v43, 3  ;;  %4435 = vst [vmem:[#allocation49_spill] sm:$0xff] %v2791_v37 }
 0x134   : > { %4398 = vst [vmem:[#allocation12_spill] sm:$0xff] %v2659_v60  ;;  %v2674_v3 = vld [vmem:[#allocation3 + $0x51] sm:$0xff] }
 0x135   : > { %718 = vst.msk [vmem:[#allocation3 + $0x63] sm:$0xff] %vm684_vm5, %v2659_v60  ;;  %v2692_v9 = vmul.f32 %v2629_v45, %v2674_v3  ;;  %v1132_v60 = vld [vmem:[#allocation3 + $0x33] sm:$0xff] }
 0x136   : > { %4421 = vst [vmem:[#allocation35_spill] sm:$0xff] %v2739_v56  ;;  %v2775_v48 = vmul.f32 %v2647_v54, %v1132_v60  ;;  %v2778_v18 = vmul.f32 %v2649_v55, %v1132_v60  ;;  %v2781_v19 = vmul.f32 %v2651_v57, %v1132_v60  ;;  %v2794_v31 = vmul.f32 %v2653_v58, %v1132_v60  ;;  %v2799_v16 = vld [vmem:[#allocation3 + $0x50] sm:$0xff] }
 0x137   : > { %4406 = vst [vmem:[#allocation20_spill] sm:$0xff] %v2692_v9  ;;  %v1265_v9 = vld [vmem:[#allocation3 + $0x34] sm:$0xff]  ;;  %v2813_v60 = vperm.slane %v2672_v2, 0 }
 0x138   : > { %4431 = vst [vmem:[#allocation45_spill] sm:$0xff] %v2775_v48  ;;  %v2797_v48 = vmul.f32 %v2656_v59, %v1265_v9  ;;  %v2820_v59 = vperm.slane %v2672_v2, 1  ;;  %v2834_v24 = vmul.f32 %v2701_v12, %v1265_v9  ;;  %v2848_v12 = vmul.f32 %v2719_v28, %v2772_v44  ;;  %v1133_v28 = vld [vmem:[#allocation3 + $0x43] sm:$0xff] }
 0x139   : > { %v672_v39 = vpop.f32.mrf.mxu0  ;;  %4432 = vst [vmem:[#allocation46_spill] sm:$0xff] %v2778_v18  ;;  %v734_v18 = vld [vmem:[#allocation3 + $0x40] sm:$0xff]  ;;  %v2859_v38 = vmul.f32 %v2699_v11, %v1265_v9 }
 0x13a   : > { %v2756_v43 = vadd.f32 %v2581_v20, %v672_v39  ;;  %4433 = vst [vmem:[#allocation47_spill] sm:$0xff] %v2781_v19  ;;  %v797_v27 = vmul.f32 %v2623_v42, %v734_v18  ;;  %v813_v36 = vmul.f32 %v2661_v61, %v734_v18 }
 0x13b   : > { %4436 = vst [vmem:[#allocation50_spill] sm:$0xff] %v2794_v31  ;;  %v2828_v31 = vmul.f32 %v2739_v56, %v2791_v37  ;;  %v749_v56 = vmul.f32 %v2597_v25, %v734_v18 }
 0x13c   : > { %v2753_v30 = vld [vmem:[#allocation3 + $0x61] sm:$0xff]  ;;  %4425 = vst [vmem:[#allocation39_spill] sm:$0xff] %v2756_v43 }
 0x13d   : > { %v2770_v41 = vld [vmem:[#allocation3 + $0x60] sm:$0xff]  ;;  %v2785_v21 = vmul.f32 %v2629_v45, %v2753_v30  ;;  %719 = vst.msk [vmem:[#allocation3 + $0x73] sm:$0xff] %vm684_vm5, %v2756_v43  ;;  %v2803_v19 = vmul.f32 %v2631_v46, %v2753_v30 }
 0x13e   : > { %v2787_v39 = vld [vmem:[#allocation3 + $0x62] sm:$0xff]  ;;  %4437 = vst [vmem:[#allocation51_spill] sm:$0xff] %v2797_v48  ;;  %v767_v43 = vmul.f32 %v2600_v26, %v2770_v41  ;;  %v2817_v48 = vmul.f32 %v2721_v29, %v2772_v44  ;;  %v781_v29 = vmul.f32 %v2609_v33, %v734_v18  ;;  %v847_v44 = vmul.f32 %v2706_v14, %v2770_v41 }
 0x13f   : > { %4434 = vst [vmem:[#allocation48_spill] sm:$0xff] %v2785_v21  ;;  %v2806_v21 = vmul.f32 %v2703_v13, %v1265_v9  ;;  %v2810_v17 = vld [vmem:[#allocation3 + $0x63] sm:$0xff]  ;;  %v2831_v13 = vperm.slane %v2672_v2, 2  ;;  %v2874_v9 = vmul.f32 %v2635_v49, %v867_v40 }
 0x140   : > { %4438 = vst [vmem:[#allocation52_spill] sm:$0xff] %v2803_v19  ;;  %v2824_v19 = vmul.f32 %v2640_v51, %v2787_v39 }
 0x141   : > { %4439 = vst [vmem:[#allocation53_spill] sm:$0xff] %v2806_v21  ;;  %v863_v21 = vld [vmem:[#allocation3 + $0x1] sm:$0xff] }
 0x142   : > { %4440 = vst [vmem:[#allocation54_spill] sm:$0xff] %v2810_v17  ;;  %v878_v23 = vmul.f32 %v2629_v45, %v863_v21  ;;  %v805_v21 = vadd.f32 %v797_v27, %v788_v0  ;;  %v2891_v0 = vmul.f32 %v2663_v62, %v867_v40 }
 0x143   : > { %4441 = vst [vmem:[#allocation55_spill] sm:$0xff] %v2813_v60 }
 0x144   : > { %4442 = vst [vmem:[#allocation56_spill] sm:$0xff] %v2817_v48  ;;  %v765_v48 = vmul.f32 %v2600_v26, %v734_v18  ;;  %v830_v18 = vmul.f32 %v2677_v5, %v2799_v16  ;;  %v2902_v27 = vld [vmem:[#allocation3 + $0x72] sm:$0xff] }
 0x145   : > { %4443 = vst [vmem:[#allocation57_spill] sm:$0xff] %v2820_v59 }
 0x146   : > { %4444 = vst [vmem:[#allocation58_spill] sm:$0xff] %v2824_v19  ;;  %v750_v19 = vmul.f32 %v2597_v25, %v2799_v16 }
 0x147   : > { %4445 = vst [vmem:[#allocation59_spill] sm:$0xff] %v2828_v31  ;;  %v2844_v31 = vmul.f32 %v2649_v55, %v2810_v17  ;;  %v2862_v17 = vmul.f32 %v2629_v45, %v867_v40 }
 0x148   : > { %4446 = vst [vmem:[#allocation60_spill] sm:$0xff] %v2831_v13  ;;  %v2855_v13 = vadd.f32 %v767_v43, %v750_v19  ;;  %v773_v43 = vadd.f32 %v765_v48, %v2731_v34  ;;  %v789_v19 = vadd.f32 %v781_v29, %v772_v35 }
 0x149   : > { %4447 = vst [vmem:[#allocation61_spill] sm:$0xff] %v2834_v24  ;;  %v2852_v24 = vmul.f32 %v2728_v32, %v2791_v37  ;;  %v1000_v32 = vld [vmem:[#allocation3 + $0x42] sm:$0xff]  ;;  %v2878_v37 = vld [vmem:[#allocation3 + $0x71] sm:$0xff] }
 0x14a   : > { %4448 = vst [vmem:[#allocation62_spill] sm:$0xff] %v2844_v31  ;;  %v2865_v31 = vmul.f32 %v2631_v46, %v867_v40  ;;  %v2884_v11 = vmul.f32 %v2629_v45, %v2878_v37  ;;  %v2888_v35 = vmul.f32 %v2631_v46, %v2878_v37  ;;  %v2894_v29 = vmul.f32 %v2638_v50, %v1000_v32 }
 0x14b   : > { %4449 = vst [vmem:[#allocation63_spill] sm:$0xff] %v2848_v12  ;;  %v2868_v12 = vmul.f32 %v2633_v47, %v867_v40  ;;  %v2900_v34 = vmul.f32 %v2642_v52, %v1000_v32  ;;  %v2911_v40 = vmul.f32 %v2640_v51, %v2902_v27 }
 0x14c   : > { %4450 = vst [vmem:[#allocation64_spill] sm:$0xff] %v2852_v24  ;;  %v2876_v24 = vld [vmem:[#allocation3 + $0x70] sm:$0xff] }
 0x14d   : > { %4451 = vst [vmem:[#allocation65_spill] sm:$0xff] %v2855_v13 }
 0x14e   : > { %4452 = vst [vmem:[#allocation66_spill] sm:$0xff] %v2859_v38  ;;  %v821_v38 = vadd.f32 %v813_v36, %v804_v22  ;;  %v2897_v22 = vmul.f32 %v2640_v51, %v1000_v32  ;;  %v2905_v36 = vmul.f32 %v2644_v53, %v1000_v32 }
 0x14f   : > { %4453 = vst [vmem:[#allocation67_spill] sm:$0xff] %v2862_v17  ;;  %v2920_v17 = vmul.f32 %v2649_v55, %v1133_v28 }
 0x150   : > { %4454 = vst [vmem:[#allocation68_spill] sm:$0xff] %v2865_v31  ;;  %v838_v48 = vadd.f32 %v830_v18, %v821_v38  ;;  %v2923_v38 = vmul.f32 %v2651_v57, %v1133_v28  ;;  %v864_v18 = vld [vmem:[#allocation3 + $0x11] sm:$0xff] }
 0x151   : > { %4455 = vst [vmem:[#allocation69_spill] sm:$0xff] %v2868_v12  ;;  %v2928_v12 = vld [vmem:[#allocation3 + $0x44] sm:$0xff]  ;;  %v895_v31 = vmul.f32 %v2631_v46, %v864_v18 }
 0x152   : > { %4456 = vst [vmem:[#allocation70_spill] sm:$0xff] %v2874_v9  ;;  %v2949_v9 = vmul.f32 %v2667_v1, %v1133_v28 }
 0x153   : > { %4457 = vst [vmem:[#allocation71_spill] sm:$0xff] %v2878_v37  ;;  %v2963_v37 = vmul.f32 %v2813_v60, %v2928_v12 }
 0x154   : > { %4458 = vst [vmem:[#allocation72_spill] sm:$0xff] %v2884_v11  ;;  %v675_v11 = vpop.f32.mrf.mxu0 }
 0x155   : > { %4459 = vst [vmem:[#allocation73_spill] sm:$0xff] %v2888_v35  ;;  %v768_v35 = vmul.f32 %v2600_v26, %v2876_v24  ;;  %v2941_v13 = vadd.f32 %v2581_v20, %v675_v11  ;;  %v879_v11 = vmul.f32 %v2629_v45, %v864_v18 }
 0x156   : > { %4460 = vst [vmem:[#allocation74_spill] sm:$0xff] %v2894_v29  ;;  %v678_v29 = vpop.f32.mrf.mxu3 }
 0x157   : > { %4461 = vst [vmem:[#allocation75_spill] sm:$0xff] %v2897_v22  ;;  %v2914_v22 = vmul.f32 %v2665_v63, %v1000_v32  ;;  %v751_v32 = vmul.f32 %v2597_v25, %v2770_v41 }
 0x158   : > { %4462 = vst [vmem:[#allocation76_spill] sm:$0xff] %v2900_v34  ;;  %v2917_v34 = vmul.f32 %v2647_v54, %v1133_v28 }
 0x159   : > { %4463 = vst [vmem:[#allocation77_spill] sm:$0xff] %v2902_v27  ;;  %v2946_v27 = vld [vmem:[#allocation3 + $0x45] sm:$0xff] }
 0x15a   : > { %4464 = vst [vmem:[#allocation78_spill] sm:$0xff] %v2905_v36  ;;  %v2926_v36 = vmul.f32 %v2653_v58, %v1133_v28  ;;  %v2966_v28 = vperm.slane %v2672_v2, 7  ;;  %v2976_v18 = vmul.f32 %v2820_v59, %v2946_v27 }
 0x15b   : > { %4465 = vst [vmem:[#allocation79_spill] sm:$0xff] %v2911_v40  ;;  %v766_v40 = vmul.f32 %v2600_v26, %v2799_v16 }
 0x15c   : > { %4466 = vst [vmem:[#allocation80_spill] sm:$0xff] %v2914_v22  ;;  %v855_v22 = vadd.f32 %v847_v44, %v838_v48  ;;  %v814_v44 = vmul.f32 %v2661_v61, %v2799_v16  ;;  %v2953_v48 = vadd.f32 %v768_v35, %v751_v32  ;;  %v1001_v35 = vld [vmem:[#allocation3 + $0x52] sm:$0xff] }
 0x15d   : > { %4467 = vst [vmem:[#allocation81_spill] sm:$0xff] %v2917_v34  ;;  %v2934_v34 = vld [vmem:[#allocation3 + $0x21] sm:$0xff] }
 0x15e   : > { %4468 = vst [vmem:[#allocation82_spill] sm:$0xff] %v2920_v17  ;;  %v782_v17 = vmul.f32 %v2609_v33, %v2799_v16  ;;  %v886_v32 = vadd.f32 %v878_v23, %v855_v22  ;;  %v822_v60 = vadd.f32 %v814_v44, %v805_v21  ;;  %v2991_v23 = vmul.f32 %v2635_v49, %v2674_v3 }
 0x15f   : > { %4469 = vst [vmem:[#allocation83_spill] sm:$0xff] %v2923_v38  ;;  %v798_v38 = vmul.f32 %v2623_v42, %v2799_v16  ;;  %v2970_v16 = vmul.f32 %v2631_v46, %v2674_v3  ;;  %v2995_v22 = vmul.f32 %v2663_v62, %v2674_v3  ;;  %v848_v21 = vmul.f32 %v2706_v14, %v2876_v24 }
 0x160   : > { %4470 = vst [vmem:[#allocation84_spill] sm:$0xff] %v2926_v36  ;;  %v2944_v36 = vadd.f32 %v2581_v20, %v678_v29  ;;  %v912_v29 = vmul.f32 %v2633_v47, %v2934_v34  ;;  %v790_v2 = vadd.f32 %v782_v17, %v773_v43  ;;  %v2999_v17 = vmul.f32 %v2680_v6, %v2674_v3 }
 0x161   : > { %4471 = vst [vmem:[#allocation85_spill] sm:$0xff] %v2928_v12  ;;  %v2987_v12 = vmul.f32 %v2633_v47, %v2674_v3  ;;  %v3002_v43 = vmul.f32 %v2638_v50, %v1001_v35  ;;  %v3016_v44 = vmul.f32 %v2665_v63, %v1001_v35  ;;  %v903_v3 = vadd.f32 %v895_v31, %v886_v32 }
 0x162   : > { %4472 = vst [vmem:[#allocation86_spill] sm:$0xff] %v2941_v13  ;;  %v799_v31 = vmul.f32 %v2623_v42, %v2770_v41 }
 0x163   : > { %4473 = vst [vmem:[#allocation87_spill] sm:$0xff] %v2944_v36 }
 0x164   : > { %4474 = vst [vmem:[#allocation88_spill] sm:$0xff] %v2946_v27  ;;  %v3087_v27 = vmul.f32 %v2680_v6, %v2753_v30 }
 0x165   : > { %4475 = vst [vmem:[#allocation89_spill] sm:$0xff] %v2949_v9  ;;  %v831_v9 = vmul.f32 %v2677_v5, %v2770_v41 }
 0x166   : > { %4476 = vst [vmem:[#allocation90_spill] sm:$0xff] %v2953_v48  ;;  %v806_v48 = vadd.f32 %v798_v38, %v789_v19  ;;  %v3005_v19 = vmul.f32 %v2640_v51, %v1001_v35  ;;  %v3013_v38 = vmul.f32 %v2644_v53, %v1001_v35 }
 0x167   : > { %720 = vst.msk [vmem:[#allocation3 + $0x83] sm:$0xff] %vm684_vm5, %v2941_v13  ;;  %v2979_v13 = vperm.slane %v2697_v10, 0  ;;  %v839_v59 = vadd.f32 %v831_v9, %v822_v60 }
 0x168   : > { %4477 = vst [vmem:[#allocation91_spill] sm:$0xff] %v2963_v37  ;;  %v2981_v37 = vadd.f32 %v766_v40, %v749_v56  ;;  %v1134_v56 = vld [vmem:[#allocation3 + $0x53] sm:$0xff]  ;;  %v3010_v40 = vmul.f32 %v2642_v52, %v1001_v35 }
 0x169   : > { %4478 = vst [vmem:[#allocation92_spill] sm:$0xff] %v2966_v28  ;;  %v3040_v32 = vmul.f32 %v2667_v1, %v1134_v56  ;;  %v920_v1 = vadd.f32 %v912_v29, %v903_v3 }
 0x16a   : > { %721 = vst.msk [vmem:[#allocation3 + $0x93] sm:$0xff] %vm684_vm5, %v2944_v36  ;;  %v3019_v36 = vmul.f32 %v2683_v7, %v1001_v35  ;;  %v815_v35 = vmul.f32 %v2661_v61, %v2770_v41 }
 0x16b   : > { %4479 = vst [vmem:[#allocation93_spill] sm:$0xff] %v2976_v18  ;;  %v3025_v18 = vmul.f32 %v2649_v55, %v1134_v56 }
 0x16c   : > { %4480 = vst [vmem:[#allocation94_spill] sm:$0xff] %v2979_v13  ;;  %v823_v3 = vadd.f32 %v815_v35, %v806_v48 }
 0x16d   : > { %4481 = vst [vmem:[#allocation95_spill] sm:$0xff] %v3002_v43  ;;  %v3022_v43 = vmul.f32 %v2647_v54, %v1134_v56 }
 0x16e   : > { %4482 = vst [vmem:[#allocation96_spill] sm:$0xff] %v3005_v19  ;;  %v3027_v19 = vld [vmem:[#allocation3 + $0x54] sm:$0xff]  ;;  %v3045_v60 = vld [vmem:[#allocation3 + $0x80] sm:$0xff] }
 0x16f   : > { %4483 = vst [vmem:[#allocation97_spill] sm:$0xff] %v3010_v40  ;;  %v3030_v40 = vmul.f32 %v2651_v57, %v1134_v56  ;;  %v3047_v9 = vld [vmem:[#allocation3 + $0x81] sm:$0xff] }
 0x170   : > { %4484 = vst [vmem:[#allocation98_spill] sm:$0xff] %v3013_v38  ;;  %v3033_v38 = vmul.f32 %v2653_v58, %v1134_v56  ;;  %v3075_v29 = vld [vmem:[#allocation3 + $0x82] sm:$0xff] }
 0x171   : > { %4485 = vst [vmem:[#allocation99_spill] sm:$0xff] %v3016_v44  ;;  %v3055_v44 = vmul.f32 %v2631_v46, %v3047_v9  ;;  %v3095_v35 = vld [vmem:[#allocation3 + $0x90] sm:$0xff] }
 0x172   : > { %4486 = vst [vmem:[#allocation100_spill] sm:$0xff] %v3019_v36 }
 0x173   : > { %4487 = vst [vmem:[#allocation101_spill] sm:$0xff] %v3022_v43  ;;  %v3043_v43 = vmul.f32 %v2686_v8, %v1134_v56  ;;  %v3059_v56 = vmul.f32 %v2966_v28, %v3027_v19  ;;  %v980_v28 = vmul.f32 %v2709_v15, %v2753_v30 }
 0x174   : > { %4488 = vst [vmem:[#allocation102_spill] sm:$0xff] %v3025_v18  ;;  %v856_v18 = vadd.f32 %v848_v21, %v839_v59  ;;  %v783_v59 = vmul.f32 %v2609_v33, %v2770_v41  ;;  %v3065_v21 = vmul.f32 %v2633_v47, %v2753_v30  ;;  %v3081_v41 = vmul.f32 %v2640_v51, %v3075_v29 }
 0x175   : > { %4489 = vst [vmem:[#allocation103_spill] sm:$0xff] %v3027_v19 }
 0x176   : > { %4490 = vst [vmem:[#allocation104_spill] sm:$0xff] %v3030_v40  ;;  %v896_v40 = vmul.f32 %v2631_v46, %v2934_v34  ;;  %v3073_v46 = vmul.f32 %v2663_v62, %v2753_v30  ;;  %v887_v36 = vadd.f32 %v879_v11, %v856_v18  ;;  %v3116_v11 = vmul.f32 %v2683_v7, %v2787_v39 }
 0x177   : > { %4491 = vst [vmem:[#allocation105_spill] sm:$0xff] %v3033_v38  ;;  %v816_v38 = vmul.f32 %v2661_v61, %v2876_v24  ;;  %v832_v18 = vmul.f32 %v2677_v5, %v2876_v24 }
 0x178   : > { %4492 = vst [vmem:[#allocation106_spill] sm:$0xff] %v3040_v32  ;;  %v3069_v32 = vmul.f32 %v2635_v49, %v2753_v30  ;;  %v3108_v30 = vmul.f32 %v2644_v53, %v2787_v39 }
 0x179   : > { %4493 = vst [vmem:[#allocation107_spill] sm:$0xff] %v3043_v43  ;;  %v807_v43 = vadd.f32 %v799_v31, %v790_v2  ;;  %v3103_v2 = vmul.f32 %v2642_v52, %v2787_v39 }
 0x17a   : > { %4494 = vst [vmem:[#allocation108_spill] sm:$0xff] %v3055_v44  ;;  %v833_v44 = vmul.f32 %v2677_v5, %v3045_v60 }
 0x17b   : > { %4495 = vst [vmem:[#allocation109_spill] sm:$0xff] %v3059_v56  ;;  %v3083_v56 = vld [vmem:[#allocation3 + $0x83] sm:$0xff]  ;;  %v824_v31 = vadd.f32 %v816_v38, %v807_v43  ;;  %v3128_v38 = vld [vmem:[#allocation3 + $0x92] sm:$0xff] }
 0x17c   : > { %4496 = vst [vmem:[#allocation110_spill] sm:$0xff] %v3065_v21  ;;  %v3093_v48 = vmul.f32 %v2649_v55, %v3083_v56 }
 0x17d   : > { %4497 = vst [vmem:[#allocation111_spill] sm:$0xff] %v3073_v46  ;;  %v841_v43 = vadd.f32 %v833_v44, %v824_v31  ;;  %v3138_v44 = vmul.f32 %v2642_v52, %v3128_v38  ;;  %v681_v31 = vpop.f32.mrf.mxu3  ;;  %v4513_v46 = vld [vmem:[#allocation54_spill] sm:$0xff] }
 0x17e   : > { %4498 = vst [vmem:[#allocation112_spill] sm:$0xff] %v3075_v29  ;;  %v937_v29 = vadd.f32 %v2751_v4, %v920_v1  ;;  %v850_v1 = vmul.f32 %v2706_v14, %v3095_v35  ;;  %v3146_v21 = vmul.f32 %v2647_v54, %v4513_v46  ;;  %v3153_v19 = vmul.f32 %v2651_v57, %v4513_v46 }
 0x17f   : > { %4499 = vst [vmem:[#allocation113_spill] sm:$0xff] %v3081_v41  ;;  %v3099_v41 = vmul.f32 %v2638_v50, %v2787_v39 }
 0x180   : > { %4500 = vst [vmem:[#allocation114_spill] sm:$0xff] %v3083_v56  ;;  %v849_v56 = vmul.f32 %v2706_v14, %v3045_v60 }
 0x181   : > { %4501 = vst [vmem:[#allocation115_spill] sm:$0xff] %v3093_v48  ;;  %v3112_v48 = vmul.f32 %v2665_v63, %v2787_v39 }
 0x182   : > { %4502 = vst [vmem:[#allocation116_spill] sm:$0xff] %v3095_v35 }
 0x183   : > { %4503 = vst [vmem:[#allocation117_spill] sm:$0xff] %v3099_v41  ;;  %v3120_v41 = vld [vmem:[#allocation3 + $0x91] sm:$0xff] }
 0x184   : > { %4504 = vst [vmem:[#allocation118_spill] sm:$0xff] %v3103_v2  ;;  %v3126_v4 = vmul.f32 %v2633_v47, %v3120_v41  ;;  %v752_v2 = vmul.f32 %v2597_v25, %v2876_v24  ;;  %v858_v25 = vadd.f32 %v850_v1, %v841_v43  ;;  %v3163_v43 = vmul.f32 %v2653_v58, %v4513_v46  ;;  %v4519_v1 = vld [vmem:[#allocation36_spill] sm:$0xff] }
 0x185   : > { %4505 = vst [vmem:[#allocation119_spill] sm:$0xff] %v3108_v30  ;;  %v769_v30 = vmul.f32 %v2600_v26, %v3045_v60  ;;  %v954_v26 = vadd.f32 %v2891_v0, %v937_v29  ;;  %v3167_v0 = vadd.f32 %v2581_v20, %v681_v31  ;;  %v880_v29 = vmul.f32 %v2629_v45, %v2934_v34  ;;  %v4522_v31 = vld [vmem:[#allocation34_spill] sm:$0xff] }
 0x186   : > { %4506 = vst [vmem:[#allocation120_spill] sm:$0xff] %v3112_v48  ;;  %v904_v48 = vadd.f32 %v896_v40, %v887_v36  ;;  %v786_v36 = vmul.f32 %v2609_v33, %v3095_v35  ;;  %v996_v40 = vld [vmem:[#allocation3 + $0x2] sm:$0xff]  ;;  %v784_v45 = vmul.f32 %v2609_v33, %v2876_v24  ;;  %v817_v34 = vmul.f32 %v2661_v61, %v3045_v60 }
 0x187   : > { %4507 = vst [vmem:[#allocation121_spill] sm:$0xff] %v3116_v11  ;;  %v4512_v11 = vld [vmem:[#allocation33_spill] sm:$0xff]  ;;  %v1011_v20 = vmul.f32 %v2638_v50, %v996_v40 }
 0x188   : > { %4508 = vst [vmem:[#allocation122_spill] sm:$0xff] %v3120_v41  ;;  %v3148_v41 = vld [vmem:[#allocation3 + $0x93] sm:$0xff]  ;;  %v4528_v61 = vld [vmem:[#allocation77_spill] sm:$0xff] }
 0x189   : > { %4509 = vst [vmem:[#allocation123_spill] sm:$0xff] %v3126_v4  ;;  %v3142_v4 = vmul.f32 %v4512_v11, %v2787_v39  ;;  %v3159_v39 = vmul.f32 %v2651_v57, %v3148_v41 }
 0x18a   : > { %4510 = vst [vmem:[#allocation124_spill] sm:$0xff] %v3128_v38 }
 0x18b   : > { %4511 = vst [vmem:[#allocation125_spill] sm:$0xff] %v3138_v44  ;;  %v840_v44 = vadd.f32 %v832_v18, %v823_v3  ;;  %v800_v3 = vmul.f32 %v2623_v42, %v2876_v24 }
 0x18c   : > { %4514 = vst [vmem:[#allocation54_spill] sm:$0xff] %v3146_v21  ;;  %v889_v21 = vadd.f32 %v4519_v1, %v858_v25  ;;  %v971_v25 = vadd.f32 %v2999_v17, %v954_v26  ;;  %v3181_v1 = vmul.f32 %v4522_v31, %v4513_v46 }
 0x18d   : > { %4515 = vst [vmem:[#allocation126_spill] sm:$0xff] %v3148_v41  ;;  %v857_v18 = vadd.f32 %v849_v56, %v840_v44  ;;  %v4521_v41 = vld [vmem:[#allocation38_spill] sm:$0xff] }
 0x18e   : > { %4516 = vst [vmem:[#allocation127_spill] sm:$0xff] %v3153_v19  ;;  %v777_v19 = vadd.f32 %v769_v30, %v752_v2  ;;  %v4526_v2 = vld [vmem:[#allocation68_spill] sm:$0xff]  ;;  %v988_v44 = vadd.f32 %v980_v28, %v971_v25  ;;  %v3211_v28 = vmul.f32 %v2638_v50, %v4528_v61  ;;  %v3229_v25 = vld [vmem:[#allocation3 + $0x73] sm:$0xff] }
 0x18f   : > { %4517 = vst [vmem:[#allocation128_spill] sm:$0xff] %v3159_v39  ;;  %v921_v39 = vadd.f32 %v4521_v41, %v904_v48  ;;  %v997_v41 = vld [vmem:[#allocation3 + $0x12] sm:$0xff]  ;;  %v3188_v48 = vperm.slane %v2697_v10, 6  ;;  %v906_v30 = vadd.f32 %v4526_v2, %v889_v21  ;;  %v3215_v21 = vmul.f32 %v2642_v52, %v4528_v61 }
 0x190   : > { %4518 = vst [vmem:[#allocation129_spill] sm:$0xff] %v3163_v43  ;;  %v791_v43 = vadd.f32 %v783_v59, %v2981_v37  ;;  %v794_v56 = vadd.f32 %v786_v36, %v777_v19  ;;  %v4524_v37 = vld [vmem:[#allocation71_spill] sm:$0xff]  ;;  %v888_v19 = vadd.f32 %v880_v29, %v857_v18  ;;  %v4527_v36 = vld [vmem:[#allocation70_spill] sm:$0xff]  ;;  %v1019_v38 = vadd.f32 %v1011_v20, %v988_v44  ;;  %v3219_v29 = vld [vmem:[#allocation3 + $0x22] sm:$0xff] }
 0x191   : > { %4520 = vst [vmem:[#allocation36_spill] sm:$0xff] %v3167_v0  ;;  %v3192_v17 = vmul.f32 %v2633_v47, %v4524_v37  ;;  %v3196_v59 = vmul.f32 %v2635_v49, %v4524_v37  ;;  %v949_v24 = vmul.f32 %v2663_v62, %v4524_v37  ;;  %v938_v40 = vadd.f32 %v4527_v36, %v921_v39  ;;  %v4536_v36 = vld [vmem:[#allocation37_spill] sm:$0xff] }
 0x192   : > { %722 = vst.msk [vmem:[#allocation3 + $0xa3] sm:$0xff] %vm684_vm5, %v3167_v0  ;;  %v808_v26 = vadd.f32 %v800_v3, %v791_v43  ;;  %v3204_v0 = vmul.f32 %v2680_v6, %v4524_v37  ;;  %v1028_v31 = vmul.f32 %v2640_v51, %v997_v41  ;;  %v834_v39 = vmul.f32 %v2677_v5, %v3095_v35 }
 0x193   : > { %4523 = vst [vmem:[#allocation38_spill] sm:$0xff] %v3188_v48  ;;  %v3223_v3 = vmul.f32 %v2644_v53, %v4528_v61  ;;  %v3227_v18 = vmul.f32 %v2665_v63, %v4528_v61  ;;  %v923_v20 = vadd.f32 %v2987_v12, %v906_v30  ;;  %v3235_v2 = vmul.f32 %v2683_v7, %v4528_v61 }
 0x194   : > { %4525 = vst [vmem:[#allocation71_spill] sm:$0xff] %v3192_v17  ;;  %v981_v17 = vmul.f32 %v2709_v15, %v4524_v37  ;;  %v825_v43 = vadd.f32 %v817_v34, %v808_v26  ;;  %v955_v37 = vadd.f32 %v2995_v22, %v938_v40  ;;  %v3239_v34 = vmul.f32 %v4512_v11, %v4528_v61  ;;  %v3258_v40 = vld [vmem:[#allocation3 + $0x55] sm:$0xff] }
 0x195   : > { %4529 = vst [vmem:[#allocation68_spill] sm:$0xff] %v3211_v28  ;;  %v3243_v44 = vmul.f32 %v2649_v55, %v3229_v25  ;;  %v905_v28 = vadd.f32 %v4536_v36, %v888_v19  ;;  %v3252_v12 = vmul.f32 %v2651_v57, %v3229_v25  ;;  %v1036_v30 = vadd.f32 %v1028_v31, %v1019_v38  ;;  %v3274_v38 = vld [vmem:[%s4233_s3 + $0x30] ss:$0 sm:$0xff] }
 0x196   : > { %4530 = vst [vmem:[#allocation70_spill] sm:$0xff] %v3215_v21  ;;  %v3248_v21 = vld [vmem:[#allocation3 + $0x64] sm:$0xff]  ;;  %v1045_v61 = vmul.f32 %v2642_v52, %v3219_v29  ;;  %v842_v19 = vadd.f32 %v834_v39, %v825_v43  ;;  %v3267_v5 = vperm.slane %v2697_v10, 7  ;;  %v940_v31 = vadd.f32 %v3069_v32, %v923_v20 }
 0x197   : > { %4531 = vst [vmem:[#allocation77_spill] sm:$0xff] %v3223_v3  ;;  %v4544_v3 = vld [vmem:[#allocation65_spill] sm:$0xff]  ;;  %v3293_v35 = vmul.f32 %v2979_v13, %v3258_v40 }
 0x198   : > { %4532 = vst [vmem:[#allocation130_spill] sm:$0xff] %v3227_v18  ;;  %v3278_v18 = vadd.f32 %v784_v45, %v4544_v3  ;;  %v3282_v39 = vld [vmem:[#allocation3 + $0x65] sm:$0xff]  ;;  %v1053_v3 = vadd.f32 %v1045_v61, %v1036_v30  ;;  %v957_v30 = vadd.f32 %v949_v24, %v940_v31  ;;  %v4558_v61 = vld [vmem:[#allocation43_spill] sm:$0xff]  ;;  %v950_v24 = vmul.f32 %v2663_v62, %v3047_v9 }
 0x199   : > { %4533 = vst [vmem:[#allocation131_spill] sm:$0xff] %v3229_v25  ;;  %v3245_v26 = vld [vmem:[#allocation3 + $0xa0] sm:$0xff]  ;;  %v4551_v32 = vld [vmem:[#allocation69_spill] sm:$0xff]  ;;  %v3331_v31 = vld [vmem:[#allocation3 + $0x56] sm:$0xff] }
 0x19a   : > { %4534 = vst [vmem:[#allocation132_spill] sm:$0xff] %v3243_v44  ;;  %v803_v22 = vmul.f32 %v2623_v42, %v3245_v26  ;;  %v3262_v44 = vmul.f32 %v2653_v58, %v3229_v25  ;;  %v851_v36 = vmul.f32 %v2706_v14, %v3245_v26  ;;  %v3284_v43 = vld [vmem:[#allocation3 + $0x66] sm:$0xff]  ;;  %v972_v14 = vadd.f32 %v3087_v27, %v955_v37 }
 0x19b   : > { %4535 = vst [vmem:[#allocation133_spill] sm:$0xff] %v3245_v26  ;;  %v3289_v25 = vmul.f32 %v3188_v48, %v3248_v21  ;;  %v922_v45 = vadd.f32 %v4551_v32, %v905_v28  ;;  %v1012_v27 = vmul.f32 %v2638_v50, %v997_v41  ;;  %v966_v37 = vmul.f32 %v2680_v6, %v3047_v9 }
 0x19c   : > { %4537 = vst [vmem:[#allocation37_spill] sm:$0xff] %v3248_v21  ;;  %v859_v26 = vadd.f32 %v851_v36, %v842_v19  ;;  %v4555_v19 = vld [vmem:[#allocation67_spill] sm:$0xff]  ;;  %v3313_v28 = vmul.f32 %v3274_v38, %v3284_v43  ;;  %v1070_v32 = vadd.f32 %v4558_v61, %v1053_v3  ;;  %v1029_v41 = vmul.f32 %v2640_v51, %v3219_v29 }
 0x19d   : > { %4538 = vst [vmem:[#allocation134_spill] sm:$0xff] %v3252_v12  ;;  %v3269_v12 = vld [vmem:[#allocation3 + $0x46] sm:$0xff]  ;;  %v4566_v3 = vld [vmem:[#allocation55_spill] sm:$0xff]  ;;  %v982_v61 = vmul.f32 %v2709_v15, %v3047_v9 }
 0x19e   : > { %4539 = vst [vmem:[#allocation135_spill] sm:$0xff] %v3258_v40  ;;  %v890_v36 = vadd.f32 %v4555_v19, %v859_v26  ;;  %v3321_v26 = vmul.f32 %v2686_v8, %v4513_v46  ;;  %v4560_v19 = vld [vmem:[#allocation85_spill] sm:$0xff] }
 0x19f   : > { %4540 = vst [vmem:[#allocation136_spill] sm:$0xff] %v3262_v44  ;;  %v3280_v44 = vadd.f32 %v803_v22, %v794_v56  ;;  %v4552_v56 = vld [vmem:[#allocation60_spill] sm:$0xff]  ;;  %v3301_v22 = vperm.slane %v2697_v10, 1  ;;  %v989_v10 = vadd.f32 %v981_v17, %v972_v14 }
 0x1a0   : > { %4541 = vst [vmem:[#allocation137_spill] sm:$0xff] %v3267_v5  ;;  %v3298_v20 = vmul.f32 %v4552_v56, %v3269_v12  ;;  %v4563_v14 = vld [vmem:[#allocation80_spill] sm:$0xff] }
 0x1a1   : > { %4542 = vst [vmem:[#allocation138_spill] sm:$0xff] %v3269_v12  ;;  %v1087_v17 = vadd.f32 %v4563_v14, %v1070_v32  ;;  %v1020_v51 = vadd.f32 %v1012_v27, %v989_v10  ;;  %v4571_v32 = vld [vmem:[#allocation100_spill] sm:$0xff]  ;;  %v3350_v8 = vmul.f32 %v3301_v22, %v3331_v31 }
 0x1a2   : > { %4543 = vst [vmem:[#allocation139_spill] sm:$0xff] %v3274_v38  ;;  %v4568_v38 = vld [vmem:[#allocation122_spill] sm:$0xff] }
 0x1a3   : > { %4545 = vst [vmem:[#allocation65_spill] sm:$0xff] %v3278_v18  ;;  %v983_v48 = vmul.f32 %v2709_v15, %v4568_v38  ;;  %v1104_v14 = vadd.f32 %v4571_v32, %v1087_v17  ;;  %v1037_v10 = vadd.f32 %v1029_v41, %v1020_v51  ;;  %v4574_v41 = vld [vmem:[#allocation92_spill] sm:$0xff]  ;;  %v4578_v32 = vld [vmem:[#allocation78_spill] sm:$0xff] }
 0x1a4   : > { %4546 = vst [vmem:[#allocation140_spill] sm:$0xff] %v3280_v44  ;;  %v3309_v44 = vmul.f32 %v3267_v5, %v3282_v39  ;;  %v4561_v5 = vld [vmem:[#allocation23_spill] sm:$0xff]  ;;  %v3364_v17 = vmul.f32 %v4574_v41, %v3248_v21 }
 0x1a5   : > { %4547 = vst [vmem:[#allocation141_spill] sm:$0xff] %v3282_v39 }
 0x1a6   : > { %4548 = vst [vmem:[#allocation142_spill] sm:$0xff] %v3284_v43 }
 0x1a7   : > { %4549 = vst [vmem:[#allocation143_spill] sm:$0xff] %v3289_v25  ;;  %v4570_v25 = vld [vmem:[#allocation111_spill] sm:$0xff] }
 0x1a8   : > { %4550 = vst [vmem:[#allocation144_spill] sm:$0xff] %v3293_v35  ;;  %v1129_v35 = vld [vmem:[#allocation3 + $0x3] sm:$0xff] }
 0x1a9   : > { %4553 = vst [vmem:[#allocation69_spill] sm:$0xff] %v3298_v20  ;;  %v907_v20 = vadd.f32 %v2970_v16, %v890_v36  ;;  %v4565_v16 = vld [vmem:[#allocation103_spill] sm:$0xff]  ;;  %v1144_v27 = vmul.f32 %v2647_v54, %v1129_v35 }
 0x1aa   : > { %4554 = vst [vmem:[#allocation145_spill] sm:$0xff] %v3301_v22  ;;  %v3335_v36 = vmul.f32 %v4566_v3, %v4565_v16 }
 0x1ab   : > { %4556 = vst [vmem:[#allocation67_spill] sm:$0xff] %v3309_v44  ;;  %v3325_v44 = vmul.f32 %v4561_v5, %v4560_v19 }
 0x1ac   : > { %4557 = vst [vmem:[#allocation146_spill] sm:$0xff] %v3313_v28  ;;  %v939_v28 = vadd.f32 %v2991_v23, %v922_v45  ;;  %v1130_v45 = vld [vmem:[#allocation3 + $0x13] sm:$0xff] }
 0x1ad   : > { %4559 = vst [vmem:[#allocation43_spill] sm:$0xff] %v3321_v26  ;;  %v974_v26 = vadd.f32 %v966_v37, %v957_v30  ;;  %v1161_v35 = vmul.f32 %v2649_v55, %v1130_v45  ;;  %v4573_v37 = vld [vmem:[#allocation42_spill] sm:$0xff] }
 0x1ae   : > { %4562 = vst [vmem:[#allocation85_spill] sm:$0xff] %v3325_v44  ;;  %v4569_v44 = vld [vmem:[#allocation110_spill] sm:$0xff]  ;;  %v956_v18 = vadd.f32 %v4570_v25, %v939_v28  ;;  %v967_v25 = vmul.f32 %v2680_v6, %v4568_v38  ;;  %v3360_v28 = vld [vmem:[#allocation3 + $0xa1] sm:$0xff] }
 0x1af   : > { %4564 = vst [vmem:[#allocation80_spill] sm:$0xff] %v3331_v31  ;;  %v924_v23 = vadd.f32 %v4569_v44, %v907_v20  ;;  %v1013_v44 = vmul.f32 %v2638_v50, %v3219_v29  ;;  %v1121_v20 = vadd.f32 %v3142_v4, %v1104_v14  ;;  %v991_v29 = vadd.f32 %v983_v48, %v974_v26 }
 0x1b0   : > { %4567 = vst [vmem:[#allocation147_spill] sm:$0xff] %v3335_v36  ;;  %v3346_v36 = vld [vmem:[#allocation3 + $0x23] sm:$0xff]  ;;  %v973_v58 = vadd.f32 %v3204_v0, %v956_v18  ;;  %v984_v26 = vmul.f32 %v2709_v15, %v3360_v28 }
 0x1b1   : > { %v941_v62 = vadd.f32 %v3196_v59, %v924_v23  ;;  %4572 = vst [vmem:[#allocation122_spill] sm:$0xff] %v3350_v8  ;;  %v1054_v59 = vadd.f32 %v4573_v37, %v1037_v10  ;;  %v4575_v0 = vld [vmem:[#allocation88_spill] sm:$0xff]  ;;  %v4576_v18 = vld [vmem:[#allocation29_spill] sm:$0xff]  ;;  %v1152_v23 = vadd.f32 %v1144_v27, %v1121_v20  ;;  %v1178_v4 = vmul.f32 %v2651_v57, %v3346_v36  ;;  %v4584_v27 = vld [vmem:[#allocation99_spill] sm:$0xff] }
 0x1b2   : > { %v3368_v51 = vmul.f32 %v4576_v18, %v4575_v0  ;;  %v990_v50 = vadd.f32 %v982_v61, %v973_v58  ;;  %v4579_v10 = vld [vmem:[#allocation57_spill] sm:$0xff] }
 0x1b3   : > { %v958_v30 = vadd.f32 %v950_v24, %v941_v62  ;;  %v1071_v14 = vadd.f32 %v4578_v32, %v1054_v59  ;;  %v3375_v37 = vmul.f32 %v4579_v10, %v3258_v40  ;;  %v3379_v62 = vmul.f32 %v2979_v13, %v3282_v39  ;;  %v4582_v24 = vld [vmem:[#allocation35_spill] sm:$0xff]  ;;  %v4587_v57 = vld [vmem:[#allocation41_spill] sm:$0xff] }
 0x1b4   : > { %4577 = vst [vmem:[#allocation110_spill] sm:$0xff] %v3368_v51  ;;  %v3383_v8 = vmul.f32 %v4582_v24, %v3269_v12  ;;  %v1021_v58 = vadd.f32 %v1013_v44, %v990_v50  ;;  %v1169_v61 = vadd.f32 %v1161_v35, %v1152_v23  ;;  %v3390_v59 = vmul.f32 %v4552_v56, %v3331_v31  ;;  %v4590_v35 = vld [vmem:[#allocation121_spill] sm:$0xff] }
 0x1b5   : > { %4580 = vst [vmem:[#allocation111_spill] sm:$0xff] %v3375_v37  ;;  %v975_v48 = vadd.f32 %v967_v25, %v958_v30  ;;  %v1088_v20 = vadd.f32 %v4584_v27, %v1071_v14  ;;  %v3394_v32 = vmul.f32 %v3301_v22, %v3284_v43  ;;  %v4589_v25 = vld [vmem:[#allocation40_spill] sm:$0xff]  ;;  %v1145_v14 = vmul.f32 %v2647_v54, %v1130_v45  ;;  %v4603_v43 = vld [vmem:[#allocation74_spill] sm:$0xff] }
 0x1b6   : > { %4581 = vst [vmem:[#allocation100_spill] sm:$0xff] %v3379_v62  ;;  %v1038_v13 = vadd.f32 %v4587_v57, %v1021_v58  ;;  %v1022_v30 = vadd.f32 %v4589_v25, %v991_v29  ;;  %v1186_v50 = vadd.f32 %v1178_v4, %v1169_v61  ;;  %v4591_v27 = vld [vmem:[#allocation76_spill] sm:$0xff]  ;;  %v3411_v57 = vmul.f32 %v4561_v5, %v4565_v16  ;;  %v4593_v4 = vld [vmem:[#allocation50_spill] sm:$0xff] }
 0x1b7   : > { %4583 = vst [vmem:[#allocation42_spill] sm:$0xff] %v3383_v8  ;;  %v4588_v8 = vld [vmem:[#allocation16_spill] sm:$0xff]  ;;  %v1105_v23 = vadd.f32 %v4590_v35, %v1088_v20  ;;  %v992_v29 = vadd.f32 %v984_v26, %v975_v48  ;;  %v785_v45 = vmul.f32 %v2609_v33, %v3045_v60  ;;  %v801_v20 = vmul.f32 %v2623_v42, %v3045_v60 }
 0x1b8   : > { %4585 = vst [vmem:[#allocation92_spill] sm:$0xff] %v3390_v59  ;;  %v3399_v44 = vmul.f32 %v4588_v8, %v4513_v46  ;;  %v1055_v56 = vadd.f32 %v4591_v27, %v1038_v13  ;;  %v4592_v59 = vld [vmem:[#allocation22_spill] sm:$0xff]  ;;  %v3415_v46 = vmul.f32 %v4566_v3, %v3248_v21  ;;  %v1203_v58 = vadd.f32 %v4593_v4, %v1186_v50  ;;  %v1262_v35 = vld [vmem:[#allocation3 + $0x4] sm:$0xff] }
 0x1b9   : > { %4586 = vst [vmem:[#allocation88_spill] sm:$0xff] %v3394_v32  ;;  %v3407_v15 = vmul.f32 %v4592_v59, %v4560_v19  ;;  %v1122_v61 = vadd.f32 %v3239_v34, %v1105_v23  ;;  %v1162_v13 = vmul.f32 %v2649_v55, %v3346_v36  ;;  %v3427_v25 = vmul.f32 %v2633_v47, %v3047_v9  ;;  %v4595_v27 = vld [vmem:[#allocation98_spill] sm:$0xff]  ;;  %v4597_v34 = vld [vmem:[#allocation75_spill] sm:$0xff]  ;;  %v4598_v55 = vld [vmem:[#allocation89_spill] sm:$0xff] }
 0x1ba   : > { %v1072_v48 = vadd.f32 %v4595_v27, %v1055_v56  ;;  %v3432_v26 = vmul.f32 %v2635_v49, %v3047_v9  ;;  %v1039_v50 = vadd.f32 %v4597_v34, %v1022_v30  ;;  %v1220_v23 = vadd.f32 %v4598_v55, %v1203_v58  ;;  %v4599_v33 = vld [vmem:[#allocation112_spill] sm:$0xff]  ;;  %v1263_v56 = vld [vmem:[#allocation3 + $0x14] sm:$0xff] }
 0x1bb   : > { %4594 = vst [vmem:[#allocation78_spill] sm:$0xff] %v3427_v25  ;;  %v1153_v4 = vadd.f32 %v1145_v14, %v1122_v61  ;;  %v3438_v22 = vmul.f32 %v2642_v52, %v4599_v33  ;;  %v3442_v47 = vmul.f32 %v2644_v53, %v4599_v33  ;;  %v1115_v60 = vmul.f32 %v4512_v11, %v4599_v33  ;;  %v4602_v27 = vld [vmem:[#allocation120_spill] sm:$0xff]  ;;  %v4604_v30 = vld [vmem:[#allocation107_spill] sm:$0xff]  ;;  %v4610_v25 = vld [vmem:[#allocation10_spill] sm:$0xff] }
 0x1bc   : > { %4596 = vst [vmem:[#allocation99_spill] sm:$0xff] %v3432_v26  ;;  %v1089_v9 = vadd.f32 %v4602_v27, %v1072_v48  ;;  %v1023_v32 = vadd.f32 %v4603_v43, %v992_v29  ;;  %v1237_v34 = vadd.f32 %v4604_v30, %v1220_v23  ;;  %v4605_v58 = vld [vmem:[#allocation11_spill] sm:$0xff]  ;;  %v3452_v52 = vmul.f32 %v2665_v63, %v4599_v33  ;;  %v4606_v27 = vld [vmem:[#allocation97_spill] sm:$0xff]  ;;  %v4609_v30 = vld [vmem:[#allocation114_spill] sm:$0xff] }
 0x1bd   : > { %4600 = vst [vmem:[#allocation41_spill] sm:$0xff] %v3438_v22  ;;  %v1277_v14 = vmul.f32 %v4605_v58, %v1262_v35  ;;  %v1170_v61 = vadd.f32 %v1162_v13, %v1153_v4  ;;  %v1099_v55 = vmul.f32 %v2683_v7, %v4599_v33  ;;  %v1264_v22 = vld [vmem:[#allocation3 + $0x24] sm:$0xff]  ;;  %v1146_v48 = vmul.f32 %v2647_v54, %v3346_v36  ;;  %v4608_v13 = vld [vmem:[#allocation47_spill] sm:$0xff] }
 0x1be   : > { %4601 = vst [vmem:[#allocation40_spill] sm:$0xff] %v3442_v47  ;;  %v1106_v47 = vadd.f32 %v3235_v2, %v1089_v9  ;;  %v1056_v43 = vadd.f32 %v4606_v27, %v1039_v50  ;;  %v1254_v29 = vadd.f32 %v3181_v1, %v1237_v34  ;;  %v4607_v23 = vld [vmem:[#allocation21_spill] sm:$0xff]  ;;  %v3465_v3 = vmul.f32 %v4610_v25, %v4609_v30  ;;  %v4613_v2 = vld [vmem:[#allocation19_spill] sm:$0xff]  ;;  %v4615_v50 = vld [vmem:[#allocation96_spill] sm:$0xff] }
 0x1bf   : > { %v1294_v35 = vmul.f32 %v4607_v23, %v1263_v56  ;;  %v1187_v4 = vadd.f32 %v4608_v13, %v1170_v61  ;;  %v3469_v33 = vmul.f32 %v4588_v8, %v4609_v30  ;;  %v3473_v9 = vmul.f32 %v4613_v2, %v4609_v30  ;;  %v4616_v54 = vld [vmem:[#allocation84_spill] sm:$0xff]  ;;  %v4628_v8 = vld [vmem:[#allocation90_spill] sm:$0xff] }
 0x1c0   : > { %4611 = vst [vmem:[#allocation121_spill] sm:$0xff] %v3465_v3  ;;  %v1123_v36 = vadd.f32 %v1115_v60, %v1106_v47  ;;  %v1040_v27 = vadd.f32 %v4615_v50, %v1023_v32  ;;  %v1285_v1 = vadd.f32 %v1277_v14, %v1254_v29  ;;  %v1311_v34 = vmul.f32 %v4592_v59, %v1264_v22  ;;  %v4617_v13 = vld [vmem:[#allocation116_spill] sm:$0xff]  ;;  %v4618_v3 = vld [vmem:[#allocation13_spill] sm:$0xff]  ;;  %v4621_v32 = vld [vmem:[#allocation106_spill] sm:$0xff] }
 0x1c1   : > { %4612 = vst [vmem:[#allocation76_spill] sm:$0xff] %v3469_v33  ;;  %v1204_v61 = vadd.f32 %v4616_v54, %v1187_v4  ;;  %v802_v25 = vmul.f32 %v2623_v42, %v4617_v13  ;;  %v818_v26 = vmul.f32 %v4618_v3, %v4617_v13  ;;  %v3484_v33 = vmul.f32 %v2635_v49, %v4568_v38  ;;  %v4622_v29 = vld [vmem:[#allocation131_spill] sm:$0xff]  ;;  %v4623_v50 = vld [vmem:[#allocation34_spill] sm:$0xff]  ;;  %v4626_v42 = vld [vmem:[#allocation124_spill] sm:$0xff] }
 0x1c2   : > { %4614 = vst [vmem:[#allocation50_spill] sm:$0xff] %v3473_v9  ;;  %v1154_v62 = vadd.f32 %v1146_v48, %v1123_v36  ;;  %v4620_v9 = vld [vmem:[#allocation119_spill] sm:$0xff]  ;;  %v1302_v60 = vadd.f32 %v1294_v35, %v1285_v1  ;;  %v1247_v37 = vmul.f32 %v4623_v50, %v4622_v29  ;;  %v4624_v54 = vld [vmem:[#allocation14_spill] sm:$0xff]  ;;  %v3496_v13 = vmul.f32 %v2644_v53, %v4626_v42  ;;  %v4633_v53 = vld [vmem:[#allocation65_spill] sm:$0xff] }
 0x1c3   : > { %4619 = vst [vmem:[#allocation98_spill] sm:$0xff] %v3484_v33  ;;  %v1073_v47 = vadd.f32 %v4620_v9, %v1056_v43  ;;  %v1221_v14 = vadd.f32 %v4621_v32, %v1204_v61  ;;  %v3492_v4 = vmul.f32 %v4624_v54, %v4568_v38  ;;  %v793_v51 = vadd.f32 %v785_v45, %v4628_v8  ;;  %v4629_v33 = vld [vmem:[#allocation46_spill] sm:$0xff]  ;;  %v4631_v9 = vld [vmem:[#allocation43_spill] sm:$0xff] }
 0x1c4   : > { %4627 = vst [vmem:[#allocation89_spill] sm:$0xff] %v3496_v13  ;;  %v1171_v48 = vadd.f32 %v4629_v33, %v1154_v62  ;;  %v4630_v36 = vld [vmem:[#allocation118_spill] sm:$0xff]  ;;  %v1319_v35 = vadd.f32 %v1311_v34, %v1302_v60  ;;  %v1278_v61 = vmul.f32 %v4605_v58, %v1263_v56  ;;  %v3505_v32 = vmul.f32 %v2665_v63, %v4626_v42  ;;  %v4636_v33 = vld [vmem:[#allocation53_spill] sm:$0xff]  ;;  %v4642_v63 = vld [vmem:[#allocation44_spill] sm:$0xff] }
 0x1c5   : > { %4625 = vst [vmem:[#allocation75_spill] sm:$0xff] %v3492_v4  ;;  %v1057_v43 = vadd.f32 %v4630_v36, %v1040_v27  ;;  %v1238_v1 = vadd.f32 %v4631_v9, %v1221_v14  ;;  %v1100_v38 = vmul.f32 %v2683_v7, %v4626_v42  ;;  %v809_v13 = vadd.f32 %v801_v20, %v4633_v53  ;;  %v4634_v4 = vld [vmem:[#allocation83_spill] sm:$0xff]  ;;  %v4635_v45 = vld [vmem:[#allocation130_spill] sm:$0xff]  ;;  %v1395_v9 = vld [vmem:[#allocation3 + $0x5] sm:$0xff] }
 0x1c6   : > { %4632 = vst [vmem:[#allocation112_spill] sm:$0xff] %v3505_v32  ;;  %v1188_v8 = vadd.f32 %v4634_v4, %v1171_v48  ;;  %v1090_v62 = vadd.f32 %v4635_v45, %v1073_v47  ;;  %v1336_v27 = vadd.f32 %v4636_v33, %v1319_v35  ;;  %v1295_v60 = vmul.f32 %v4607_v23, %v1264_v22  ;;  %v4637_v14 = vld [vmem:[#allocation126_spill] sm:$0xff]  ;;  %v4639_v32 = vld [vmem:[#allocation105_spill] sm:$0xff]  ;;  %v4641_v48 = vld [vmem:[#allocation91_spill] sm:$0xff] }
 0x1c7   : > { %v1255_v34 = vadd.f32 %v1247_v37, %v1238_v1  ;;  %v1116_v56 = vmul.f32 %v4512_v11, %v4626_v42  ;;  %v3518_v36 = vmul.f32 %v4623_v50, %v4637_v14  ;;  %v1231_v53 = vmul.f32 %v4613_v2, %v4622_v29  ;;  %v4640_v47 = vld [vmem:[#allocation77_spill] sm:$0xff]  ;;  %v1396_v45 = vld [vmem:[#allocation3 + $0x15] sm:$0xff] }
 0x1c8   : > { %v1205_v7 = vadd.f32 %v4639_v32, %v1188_v8  ;;  %v810_v20 = vadd.f32 %v802_v25, %v793_v51  ;;  %v1074_v4 = vadd.f32 %v4640_v47, %v1057_v43  ;;  %v1353_v37 = vadd.f32 %v4641_v48, %v1336_v27  ;;  %v4643_v14 = vld [vmem:[#allocation27_spill] sm:$0xff]  ;;  %v4644_v8 = vld [vmem:[#allocation109_spill] sm:$0xff]  ;;  %v4645_v51 = vld [vmem:[#allocation26_spill] sm:$0xff] }
 0x1c9   : > { %4638 = vst [vmem:[#allocation120_spill] sm:$0xff] %v3518_v36  ;;  %v1286_v35 = vadd.f32 %v1278_v61, %v1255_v34  ;;  %v826_v1 = vadd.f32 %v818_v26, %v809_v13  ;;  %v1248_v33 = vmul.f32 %v4623_v50, %v4609_v30  ;;  %v3530_v36 = vmul.f32 %v4643_v14, %v4642_v63  ;;  %v3534_v47 = vld [vmem:[#allocation3 + $0x25] sm:$0xff]  ;;  %v4647_v13 = vld [vmem:[#allocation143_spill] sm:$0xff] }
 0x1ca   : > { %v1222_v42 = vadd.f32 %v3399_v44, %v1205_v7  ;;  %v1107_v32 = vadd.f32 %v1099_v55, %v1090_v62  ;;  %v1370_v2 = vadd.f32 %v4644_v8, %v1353_v37  ;;  %v1410_v25 = vmul.f32 %v4645_v51, %v1395_v9  ;;  %v4646_v7 = vld [vmem:[#allocation28_spill] sm:$0xff]  ;;  %v4648_v34 = vld [vmem:[#allocation61_spill] sm:$0xff]  ;;  %v3551_v9 = vld [vmem:[#allocation3 + $0x74] sm:$0xff] }
 0x1cb   : > { %v1303_v43 = vadd.f32 %v1295_v60, %v1286_v35  ;;  %v1279_v26 = vmul.f32 %v4605_v58, %v1264_v22  ;;  %v3539_v44 = vmul.f32 %v4646_v7, %v4575_v0  ;;  %v3543_v30 = vmul.f32 %v4576_v18, %v3258_v40  ;;  %v3545_v63 = vld [vmem:[#allocation3 + $0xa2] sm:$0xff]  ;;  %v4654_v58 = vld [vmem:[#allocation66_spill] sm:$0xff] }
 0x1cc   : > { %v1239_v61 = vadd.f32 %v1231_v53, %v1222_v42  ;;  %v1091_v55 = vadd.f32 %v3452_v52, %v1074_v4  ;;  %v1387_v62 = vadd.f32 %v4647_v13, %v1370_v2  ;;  %v1427_v27 = vmul.f32 %v4643_v14, %v1396_v45  ;;  %v4649_v22 = vld [vmem:[#allocation133_spill] sm:$0xff] }
 0x1cd   : > { %v1320_v60 = vadd.f32 %v4648_v34, %v1303_v43  ;;  %v819_v53 = vmul.f32 %v4618_v3, %v4649_v22  ;;  %v4650_v48 = vld [vmem:[#allocation17_spill] sm:$0xff]  ;;  %v3559_v35 = vmul.f32 %v2635_v49, %v3360_v28  ;;  %v1124_v52 = vadd.f32 %v1116_v56, %v1107_v32  ;;  %v4652_v32 = vld [vmem:[#allocation147_spill] sm:$0xff] }
 0x1ce   : > { %v835_v37 = vmul.f32 %v4650_v48, %v4649_v22  ;;  %v1256_v42 = vadd.f32 %v1248_v33, %v1239_v61  ;;  %v1418_v4 = vadd.f32 %v1410_v25, %v1387_v62  ;;  %v1444_v2 = vmul.f32 %v4646_v7, %v3534_v47  ;;  %v4651_v8 = vld [vmem:[#allocation85_spill] sm:$0xff]  ;;  %v4653_v61 = vld [vmem:[#allocation38_spill] sm:$0xff] }
 0x1cf   : > { %v1337_v43 = vadd.f32 %v4651_v8, %v1320_v60  ;;  %v3566_v13 = vmul.f32 %v4624_v54, %v3360_v28  ;;  %v3570_v34 = vmul.f32 %v2680_v6, %v3360_v28  ;;  %v1117_v49 = vmul.f32 %v4512_v11, %v3545_v63  ;;  %v4655_v28 = vld [vmem:[#allocation45_spill] sm:$0xff]  ;;  %v4673_v11 = vld [vmem:[#allocation102_spill] sm:$0xff] }
 0x1d0   : > { %v1287_v22 = vadd.f32 %v1279_v26, %v1256_v42  ;;  %v1108_v33 = vadd.f32 %v1100_v38, %v1091_v55  ;;  %v1435_v56 = vadd.f32 %v1427_v27, %v1418_v4  ;;  %v1380_v62 = vmul.f32 %v4653_v61, %v3551_v9  ;;  %v4656_v27 = vld [vmem:[#allocation49_spill] sm:$0xff]  ;;  %v4657_v42 = vld [vmem:[#allocation31_spill] sm:$0xff] }
 0x1d1   : > { %v1354_v25 = vadd.f32 %v4652_v32, %v1337_v43  ;;  %v827_v60 = vadd.f32 %v819_v53, %v810_v20  ;;  %v843_v8 = vadd.f32 %v835_v37, %v826_v1  ;;  %v3580_v7 = vmul.f32 %v4579_v10, %v3282_v39  ;;  %v4658_v20 = vld [vmem:[#allocation32_spill] sm:$0xff] }
 0x1d2   : > { %v1304_v18 = vadd.f32 %v4654_v58, %v1287_v22  ;;  %v1155_v40 = vadd.f32 %v4655_v28, %v1124_v52  ;;  %v1452_v50 = vadd.f32 %v1444_v2, %v1435_v56  ;;  %v1411_v38 = vmul.f32 %v4645_v51, %v1396_v45  ;;  %v3598_v53 = vld [vmem:[#allocation3 + $0x84] sm:$0xff]  ;;  %v1529_v28 = vld [vmem:[#allocation3 + $0x16] sm:$0xff] }
 0x1d3   : > { %v1371_v26 = vadd.f32 %v3364_v17, %v1354_v25  ;;  %v3588_v4 = vmul.f32 %v4657_v42, %v4656_v27  ;;  %v3592_v58 = vmul.f32 %v4658_v20, %v3269_v12  ;;  %v3596_v1 = vmul.f32 %v4582_v24, %v3331_v31  ;;  %v4659_v17 = vld [vmem:[#allocation56_spill] sm:$0xff] }
 0x1d4   : > { %v1321_v55 = vadd.f32 %v3407_v15, %v1304_v18  ;;  %v1125_v37 = vadd.f32 %v1117_v49, %v1108_v33  ;;  %v1469_v52 = vadd.f32 %v4659_v17, %v1452_v50  ;;  %v1428_v15 = vmul.f32 %v4643_v14, %v3534_v47  ;;  %v1528_v18 = vld [vmem:[#allocation3 + $0x6] sm:$0xff]  ;;  %v4660_v49 = vld [vmem:[#allocation82_spill] sm:$0xff] }
 0x1d5   : > { %v1388_v45 = vadd.f32 %v1380_v62, %v1371_v26  ;;  %v1364_v43 = vmul.f32 %v4574_v41, %v3551_v9  ;;  %v3608_v22 = vmul.f32 %v4607_v23, %v4560_v19  ;;  %v3612_v56 = vmul.f32 %v4592_v59, %v4565_v16  ;;  %v4661_v33 = vld [vmem:[#allocation93_spill] sm:$0xff]  ;;  %v4662_v17 = vld [vmem:[#allocation24_spill] sm:$0xff] }
 0x1d6   : > { %v1338_v2 = vadd.f32 %v3411_v57, %v1321_v55  ;;  %v1172_v50 = vadd.f32 %v4660_v49, %v1155_v40  ;;  %v1486_v32 = vadd.f32 %v4661_v33, %v1469_v52  ;;  %v3618_v62 = vmul.f32 %v4561_v5, %v3248_v21  ;;  %v741_v57 = vld [vmem:[#allocation3 + $0xb0] sm:$0xff]  ;;  %v3620_v26 = vld [vmem:[#allocation3 + $0x26] sm:$0xff]  ;;  %v4666_v21 = vld [vmem:[#allocation67_spill] sm:$0xff] }
 0x1d7   : > { %v1419_v25 = vadd.f32 %v1411_v38, %v1388_v45  ;;  %v1381_v55 = vmul.f32 %v4653_v61, %v3598_v53  ;;  %v820_v27 = vmul.f32 %v4618_v3, %v741_v57  ;;  %v852_v40 = vmul.f32 %v4662_v17, %v741_v57  ;;  %v4663_v49 = vld [vmem:[#allocation81_spill] sm:$0xff]  ;;  %v4664_v38 = vld [vmem:[#allocation144_spill] sm:$0xff]  ;;  %v4665_v33 = vld [vmem:[#allocation30_spill] sm:$0xff] }
 0x1d8   : > { %v1355_v19 = vadd.f32 %v3415_v46, %v1338_v2  ;;  %v1156_v52 = vadd.f32 %v4663_v49, %v1125_v37  ;;  %v1503_v45 = vadd.f32 %v4664_v38, %v1486_v32  ;;  %v1543_v24 = vmul.f32 %v4665_v33, %v1528_v18  ;;  %v742_v12 = vld [vmem:[#allocation3 + $0xc0] sm:$0xff]  ;;  %v4667_v49 = vld [vmem:[#allocation63_spill] sm:$0xff] }
 0x1d9   : > { %v1436_v31 = vadd.f32 %v1428_v15, %v1419_v25  ;;  %v1412_v59 = vmul.f32 %v4645_v51, %v3534_v47  ;;  %v836_v46 = vmul.f32 %v4650_v48, %v741_v57  ;;  %v860_v2 = vadd.f32 %v852_v40, %v843_v8  ;;  %v4668_v18 = vld [vmem:[#allocation140_spill] sm:$0xff]  ;;  %v743_v47 = vld [vmem:[#allocation3 + $0xd0] sm:$0xff] }
 0x1da   : > { %v1372_v5 = vadd.f32 %v1364_v43, %v1355_v19  ;;  %v1520_v23 = vadd.f32 %v4666_v21, %v1503_v45  ;;  %v1560_v3 = vmul.f32 %v4657_v42, %v1529_v28  ;;  %v1577_v37 = vmul.f32 %v4658_v20, %v3620_v26  ;;  %v4669_v25 = vld [vmem:[#allocation20_spill] sm:$0xff]  ;;  %v3641_v57 = vld [vmem:[#allocation3 + $0x75] sm:$0xff] }
 0x1db   : > { %v1453_v32 = vadd.f32 %v4667_v49, %v1436_v31  ;;  %v828_v15 = vadd.f32 %v820_v27, %v4668_v18  ;;  %v891_v43 = vadd.f32 %v4669_v25, %v860_v2  ;;  %v837_v19 = vmul.f32 %v4650_v48, %v742_v12  ;;  %v4670_v8 = vld [vmem:[#allocation110_spill] sm:$0xff]  ;;  %v4671_v40 = vld [vmem:[#allocation104_spill] sm:$0xff]  ;;  %v4674_v49 = vld [vmem:[#allocation111_spill] sm:$0xff] }
 0x1dc   : > { %v1389_v38 = vadd.f32 %v1381_v55, %v1372_v5  ;;  %v1551_v16 = vadd.f32 %v1543_v24, %v1520_v23  ;;  %v1189_v45 = vadd.f32 %v4671_v40, %v1172_v50  ;;  %v4672_v10 = vld [vmem:[#allocation16_spill] sm:$0xff]  ;;  %v1173_v31 = vadd.f32 %v4673_v11, %v1156_v52  ;;  %v4675_v18 = vld [vmem:[#allocation129_spill] sm:$0xff] }
 0x1dd   : > { %v1470_v21 = vadd.f32 %v4670_v8, %v1453_v32  ;;  %v1215_v20 = vmul.f32 %v4672_v10, %v4622_v29  ;;  %v844_v55 = vadd.f32 %v836_v46, %v827_v60  ;;  %v853_v27 = vmul.f32 %v4662_v17, %v742_v12  ;;  %v4676_v32 = vld [vmem:[#allocation137_spill] sm:$0xff]  ;;  %v4677_v40 = vld [vmem:[#allocation52_spill] sm:$0xff]  ;;  %v3658_v12 = vld [vmem:[#allocation3 + $0x76] sm:$0xff] }
 0x1de   : > { %v1420_v5 = vadd.f32 %v1412_v59, %v1389_v38  ;;  %v1568_v2 = vadd.f32 %v1560_v3, %v1551_v16  ;;  %v1206_v24 = vadd.f32 %v4675_v18, %v1189_v45  ;;  %v854_v23 = vmul.f32 %v4662_v17, %v743_v47  ;;  %v4678_v60 = vld [vmem:[#allocation100_spill] sm:$0xff]  ;;  %v4679_v38 = vld [vmem:[#allocation71_spill] sm:$0xff]  ;;  %v4726_v29 = vld [vmem:[#allocation33_spill] sm:$0xff] }
 0x1df   : > { %v1487_v48 = vadd.f32 %v4674_v49, %v1470_v21  ;;  %v1513_v25 = vmul.f32 %v4676_v32, %v3641_v57  ;;  %v1544_v50 = vmul.f32 %v4665_v33, %v1529_v28  ;;  %v908_v11 = vadd.f32 %v4677_v40, %v891_v43  ;;  %v4680_v28 = vld [vmem:[#allocation59_spill] sm:$0xff]  ;;  %v4684_v18 = vld [vmem:[#allocation48_spill] sm:$0xff] }
 0x1e0   : > { %v1437_v8 = vadd.f32 %v3530_v36, %v1420_v5  ;;  %v1585_v59 = vadd.f32 %v1577_v37, %v1568_v2  ;;  %v1223_v16 = vadd.f32 %v1215_v20, %v1206_v24  ;;  %v845_v46 = vadd.f32 %v837_v19, %v828_v15  ;;  %v3665_v5 = vld [vmem:[#allocation3 + $0x85] sm:$0xff]  ;;  %v4681_v37 = vld [vmem:[#allocation50_spill] sm:$0xff]  ;;  %v4682_v49 = vld [vmem:[#allocation139_spill] sm:$0xff] }
 0x1e1   : > { %v1504_v52 = vadd.f32 %v4678_v60, %v1487_v48  ;;  %v1561_v3 = vmul.f32 %v4657_v42, %v3620_v26  ;;  %v925_v47 = vadd.f32 %v4679_v38, %v908_v11  ;;  %v861_v21 = vadd.f32 %v853_v27, %v844_v55  ;;  %v4683_v19 = vld [vmem:[#allocation99_spill] sm:$0xff]  ;;  %v4685_v24 = vld [vmem:[#allocation69_spill] sm:$0xff]  ;;  %v4686_v27 = vld [vmem:[#allocation120_spill] sm:$0xff] }
 0x1e2   : > { %v1454_v17 = vadd.f32 %v3539_v44, %v1437_v8  ;;  %v1602_v45 = vadd.f32 %v4680_v28, %v1585_v59  ;;  %v1240_v43 = vadd.f32 %v4681_v37, %v1223_v16  ;;  %v862_v2 = vadd.f32 %v854_v23, %v845_v46  ;;  %v4687_v11 = vld [vmem:[#allocation72_spill] sm:$0xff]  ;;  %v4688_v60 = vld [vmem:[#allocation94_spill] sm:$0xff]  ;;  %v4689_v16 = vld [vmem:[#allocation75_spill] sm:$0xff] }
 0x1e3   : > { %v1521_v36 = vadd.f32 %v1513_v25, %v1504_v52  ;;  %v1646_v20 = vmul.f32 %v4682_v49, %v3658_v12  ;;  %v942_v48 = vadd.f32 %v4683_v19, %v925_v47  ;;  %v892_v44 = vadd.f32 %v4684_v18, %v861_v21  ;;  %v3675_v25 = vld [vmem:[#allocation3 + $0xb1] sm:$0xff] }
 0x1e4   : > { %v1471_v15 = vadd.f32 %v3543_v30, %v1454_v17  ;;  %v1619_v8 = vadd.f32 %v4685_v24, %v1602_v45  ;;  %v1257_v40 = vadd.f32 %v4686_v27, %v1240_v43  ;;  %v893_v59 = vadd.f32 %v4687_v11, %v862_v2  ;;  %v4690_v17 = vld [vmem:[#allocation122_spill] sm:$0xff]  ;;  %v4692_v21 = vld [vmem:[#allocation51_spill] sm:$0xff]  ;;  %v4694_v2 = vld [vmem:[#allocation73_spill] sm:$0xff] }
 0x1e5   : > { %v1552_v55 = vadd.f32 %v1544_v50, %v1521_v36  ;;  %v1497_v52 = vmul.f32 %v4688_v60, %v3641_v57  ;;  %v1514_v30 = vmul.f32 %v4676_v32, %v3665_v5  ;;  %v959_v46 = vadd.f32 %v4689_v16, %v942_v48  ;;  %v3688_v50 = vld [vmem:[%s4234_s4] ss:$0 sm:$0xff]  ;;  %v4695_v19 = vld [vmem:[#allocation127_spill] sm:$0xff] }
 0x1e6   : > { %v1488_v23 = vadd.f32 %v3580_v7, %v1471_v15  ;;  %v1636_v38 = vadd.f32 %v4690_v17, %v1619_v8  ;;  %4691 = vst [vmem:[#allocation74_spill] sm:$0xff] %v3688_v50  ;;  %v1288_v28 = vadd.f32 %v4692_v21, %v1257_v40  ;;  %v4693_v7 = vld [vmem:[#allocation25_spill] sm:$0xff]  ;;  %v1545_v37 = vmul.f32 %v4665_v33, %v3620_v26  ;;  %v4696_v18 = vld [vmem:[#allocation146_spill] sm:$0xff]  ;;  %v4697_v8 = vld [vmem:[#allocation64_spill] sm:$0xff] }
 0x1e7   : > { %v1569_v47 = vadd.f32 %v1561_v3, %v1552_v55  ;;  %v985_v45 = vmul.f32 %v4693_v7, %v3675_v25  ;;  %v976_v43 = vadd.f32 %v3570_v34, %v959_v46  ;;  %v909_v15 = vadd.f32 %v4694_v2, %v892_v44  ;;  %v4698_v40 = vld [vmem:[#allocation55_spill] sm:$0xff]  ;;  %v4701_v34 = vld [vmem:[#allocation42_spill] sm:$0xff]  ;;  %v4705_v2 = vld [vmem:[#allocation92_spill] sm:$0xff] }
 0x1e8   : > { %v1505_v36 = vadd.f32 %v1497_v52, %v1488_v23  ;;  %v1190_v48 = vadd.f32 %v4695_v19, %v1173_v31  ;;  %v1653_v24 = vadd.f32 %v4696_v18, %v1636_v38  ;;  %v1305_v3 = vadd.f32 %v3608_v22, %v1288_v28  ;;  %v4699_v52 = vld [vmem:[#allocation78_spill] sm:$0xff] }
 0x1e9   : > { %v1586_v27 = vadd.f32 %v4697_v8, %v1569_v47  ;;  %v1348_v11 = vmul.f32 %v4698_v40, %v3551_v9  ;;  %v993_v23 = vadd.f32 %v985_v45, %v976_v43  ;;  %v926_v16 = vadd.f32 %v4699_v52, %v909_v15  ;;  %v3711_v17 = vld [vmem:[#allocation3 + $0x94] sm:$0xff]  ;;  %v875_v47 = vld [vmem:[#allocation3 + $0xc1] sm:$0xff] }
 0x1ea   : > { %v1522_v55 = vadd.f32 %v1514_v30, %v1505_v36  ;;  %v3705_v26 = vadd.f32 %v3688_v50, %v1653_v24  ;;  %v1322_v31 = vadd.f32 %v3612_v56, %v1305_v3  ;;  %v969_v46 = vmul.f32 %v2680_v6, %v3675_v25  ;;  %v4702_v30 = vld [vmem:[#allocation95_spill] sm:$0xff]  ;;  %v4703_v21 = vld [vmem:[#allocation98_spill] sm:$0xff]  ;;  %v4704_v45 = vld [vmem:[#allocation108_spill] sm:$0xff] }
 0x1eb   : > { %v1603_v44 = vadd.f32 %v4701_v34, %v1586_v27  ;;  %v1024_v38 = vadd.f32 %v4702_v30, %v993_v23  ;;  %v943_v28 = vadd.f32 %v4703_v21, %v926_v16  ;;  %v910_v36 = vadd.f32 %v4704_v45, %v893_v59  ;;  %v4706_v18 = vld [vmem:[#allocation58_spill] sm:$0xff]  ;;  %v4707_v27 = vld [vmem:[#allocation123_spill] sm:$0xff]  ;;  %v4708_v59 = vld [vmem:[#allocation88_spill] sm:$0xff] }
 0x1ec   : > { %4700 = vst [vmem:[#allocation107_spill] sm:$0xff] %v3705_v26  ;;  %v1553_v22 = vadd.f32 %v1545_v37, %v1522_v55  ;;  %v1673_v43 = vsel %vm684_vm5, %v3705_v26, 0.0  ;;  %v1339_v56 = vadd.f32 %v3618_v62, %v1322_v31  ;;  %v1365_v19 = vmul.f32 %v4574_v41, %v3598_v53  ;;  %v4709_v34 = vld [vmem:[#allocation70_spill] sm:$0xff]  ;;  %v4711_v30 = vld [vmem:[#allocation19_spill] sm:$0xff] }
 0x1ed   : > { %v1620_v15 = vadd.f32 %v4705_v2, %v1603_v44  ;;  %1674 = vadd.xlane.f32.xlu0 %v1673_v43  ;;  %v1041_v24 = vadd.f32 %v4706_v18, %v1024_v38  ;;  %v960_v8 = vadd.f32 %v3566_v13, %v943_v28  ;;  %v927_v3 = vadd.f32 %v4707_v27, %v910_v36  ;;  %v4712_v28 = vld [vmem:[#allocation15_spill] sm:$0xff]  ;;  %v4714_v43 = vld [vmem:[#allocation142_spill] sm:$0xff] }
 0x1ee   : > { %v1570_v37 = vadd.f32 %v3588_v4, %v1553_v22  ;;  %v1356_v23 = vadd.f32 %v1348_v11, %v1339_v56  ;;  %v1382_v52 = vmul.f32 %v4653_v61, %v3711_v17  ;;  %v986_v62 = vmul.f32 %v4693_v7, %v875_v47  ;;  %v4710_v22 = vld [vmem:[#allocation126_spill] sm:$0xff] }
 0x1ef   : > { %v1637_v55 = vadd.f32 %v4708_v59, %v1620_v15  ;;  %v1058_v44 = vadd.f32 %v4709_v34, %v1041_v24  ;;  %v977_v31 = vadd.f32 %v969_v46, %v960_v8  ;;  %v944_v4 = vadd.f32 %v3559_v35, %v927_v3  ;;  %v4715_v35 = vld [vmem:[#allocation60_spill] sm:$0xff]  ;;  %v4718_v3 = vld [vmem:[#allocation145_spill] sm:$0xff] }
 0x1f0   : > { %v1587_v16 = vadd.f32 %v3592_v58, %v1570_v37  ;;  %v3735_v13 = vmul.f32 %v4672_v10, %v4710_v22  ;;  %v1233_v38 = vmul.f32 %v4711_v30, %v4710_v22  ;;  %v1373_v21 = vadd.f32 %v1365_v19, %v1356_v23  ;;  %v4713_v58 = vld [vmem:[#allocation18_spill] sm:$0xff]  ;;  %v3748_v15 = vld [vmem:[#allocation3 + $0xa3] sm:$0xff] }
 0x1f1   : > { %v1654_v11 = vadd.f32 %v1646_v20, %v1637_v55  ;;  %v3741_v45 = vmul.f32 %v4712_v28, %v3545_v63  ;;  %v1101_v36 = vmul.f32 %v4713_v58, %v3545_v63  ;;  %v1613_v2 = vmul.f32 %v4715_v35, %v4714_v43  ;;  %v3753_v37 = vld [vmem:[#allocation3 + $0x86] sm:$0xff]  ;;  %v2256_v19 = vld [vmem:[#allocation3 + $0x35] sm:$0xff] }
 0x1f2   : > { %v1604_v46 = vadd.f32 %v3596_v1, %v1587_v16  ;;  %v1390_v20 = vadd.f32 %v1382_v52, %v1373_v21  ;;  %v1413_v18 = vmul.f32 %v2256_v19, %v4645_v51  ;;  %v4717_v24 = vld [vmem:[#allocation40_spill] sm:$0xff]  ;;  %v1630_v1 = vmul.f32 %v4718_v3, %v3658_v12  ;;  %v3766_v21 = vld [vmem:[#allocation3 + $0xb2] sm:$0xff] }
 0x1f3   : > { %v3751_v56 = vadd.f32 %v3688_v50, %v1654_v11  ;;  %v1075_v8 = vadd.f32 %v4717_v24, %v1058_v44  ;;  %v4719_v59 = vld [vmem:[#allocation136_spill] sm:$0xff]  ;;  %v994_v23 = vadd.f32 %v986_v62, %v977_v31  ;;  %v1430_v11 = vmul.f32 %v4643_v14, %v4575_v0  ;;  %v4720_v44 = vld [vmem:[#allocation34_spill] sm:$0xff]  ;;  %v4724_v0 = vld [vmem:[#allocation29_spill] sm:$0xff] }
 0x1f4   : > { %v1621_v27 = vadd.f32 %v1613_v2, %v1604_v46  ;;  %v1207_v55 = vadd.f32 %v4719_v59, %v1190_v48  ;;  %v1421_v34 = vadd.f32 %v1413_v18, %v1390_v20  ;;  %v953_v52 = vmul.f32 %v4624_v54, %v3675_v25  ;;  %v4721_v62 = vld [vmem:[#allocation76_spill] sm:$0xff]  ;;  %v4722_v20 = vld [vmem:[#allocation135_spill] sm:$0xff] }
 0x1f5   : > { %4716 = vst [vmem:[#allocation97_spill] sm:$0xff] %v3751_v56  ;;  %v1676_v16 = vsel %vm684_vm5, %v3751_v56, 0.0  ;;  %v1250_v46 = vmul.f32 %v4720_v44, %v3748_v15  ;;  %v1647_v48 = vmul.f32 %v4682_v49, %v3753_v37  ;;  %v4723_v18 = vld [vmem:[#allocation28_spill] sm:$0xff]  ;;  %v1464_v59 = vmul.f32 %v4724_v0, %v3282_v39  ;;  %v4729_v0 = vld [vmem:[#allocation11_spill] sm:$0xff] }
 0x1f6   : > { %1677 = vadd.xlane.f32.xlu1 %v1676_v16  ;;  %v1638_v2 = vadd.f32 %v1630_v1, %v1621_v27  ;;  %v1224_v31 = vadd.f32 %v4721_v62, %v1207_v55  ;;  %v1438_v19 = vadd.f32 %v1430_v11, %v1421_v34  ;;  %v1447_v24 = vmul.f32 %v4723_v18, %v4722_v20  ;;  %v4725_v54 = vld [vmem:[#allocation112_spill] sm:$0xff]  ;;  %v4727_v27 = vld [vmem:[#allocation117_spill] sm:$0xff] }
 0x1f7   : > { %v1092_v25 = vadd.f32 %v4725_v54, %v1075_v8  ;;  %v1118_v16 = vmul.f32 %v4726_v29, %v3766_v21  ;;  %v1025_v1 = vadd.f32 %v4727_v27, %v994_v23  ;;  %v970_v55 = vmul.f32 %v2680_v6, %v875_v47  ;;  %v2257_v18 = vld [vmem:[#allocation3 + $0x44] sm:$0xff]  ;;  %v4730_v8 = vld [vmem:[#allocation79_spill] sm:$0xff] }
 0x1f8   : > { %v1655_v56 = vadd.f32 %v1647_v48, %v1638_v2  ;;  %v1241_v26 = vadd.f32 %v1233_v38, %v1224_v31  ;;  %v1455_v28 = vadd.f32 %v1447_v24, %v1438_v19  ;;  %v961_v34 = vadd.f32 %v953_v52, %v944_v4  ;;  %v876_v38 = vld [vmem:[#allocation3 + $0xd1] sm:$0xff]  ;;  %v4731_v31 = vld [vmem:[#allocation57_spill] sm:$0xff] }
 0x1f9   : > { %v1109_v49 = vadd.f32 %v1101_v36, %v1092_v25  ;;  %v1281_v39 = vmul.f32 %v2257_v18, %v4729_v0  ;;  %v1042_v2 = vadd.f32 %v4730_v8, %v1025_v1  ;;  %v1481_v54 = vmul.f32 %v4731_v31, %v3641_v57  ;;  %v3793_v47 = vld [vmem:[#allocation3 + $0x95] sm:$0xff]  ;;  %v4735_v18 = vld [vmem:[#allocation101_spill] sm:$0xff] }
 0x1fa   : > { %v3783_v11 = vadd.f32 %v3688_v50, %v1655_v56  ;;  %v1258_v62 = vadd.f32 %v1250_v46, %v1241_v26  ;;  %v1472_v48 = vadd.f32 %v1464_v59, %v1455_v28  ;;  %v1498_v36 = vmul.f32 %v4688_v60, %v3665_v5  ;;  %v4732_v4 = vld [vmem:[#allocation103_spill] sm:$0xff]  ;;  %v4733_v56 = vld [vmem:[#allocation21_spill] sm:$0xff]  ;;  %v4738_v1 = vld [vmem:[#allocation22_spill] sm:$0xff] }
 0x1fb   : > { %v1126_v23 = vadd.f32 %v1118_v16, %v1109_v49  ;;  %v1298_v52 = vmul.f32 %v4733_v56, %v4732_v4  ;;  %v4734_v46 = vld [vmem:[#allocation41_spill] sm:$0xff]  ;;  %v978_v25 = vadd.f32 %v970_v55, %v961_v34  ;;  %v987_v49 = vmul.f32 %v4693_v7, %v876_v38 }
 0x1fc   : > { %4728 = vst [vmem:[#allocation47_spill] sm:$0xff] %v3783_v11  ;;  %v1679_v6 = vsel %vm684_vm5, %v3783_v11, 0.0  ;;  %v1289_v26 = vadd.f32 %v1281_v39, %v1258_v62  ;;  %v1059_v19 = vadd.f32 %v4734_v46, %v1042_v2  ;;  %v1489_v28 = vadd.f32 %v1481_v54, %v1472_v48  ;;  %v3799_v59 = vld [vmem:[#allocation3 + $0xc2] sm:$0xff]  ;;  %v4740_v48 = vld [vmem:[#allocation23_spill] sm:$0xff]  ;;  %v4742_v46 = vld [vmem:[#allocation134_spill] sm:$0xff] }
 0x1fd   : > { %1680 = vadd.xlane.f32.xlu2 %v1679_v6  ;;  %v1157_v24 = vadd.f32 %v4735_v18, %v1126_v23  ;;  %4736 = vst [vmem:[#allocation114_spill] sm:$0xff] %v3799_v59  ;;  %v4737_v27 = vld [vmem:[#allocation37_spill] sm:$0xff]  ;;  %v1102_v62 = vmul.f32 %v4713_v58, %v3766_v21  ;;  %v1515_v2 = vmul.f32 %v4676_v32, %v3793_v47  ;;  %v4741_v23 = vld [vmem:[#allocation62_spill] sm:$0xff] }
 0x1fe   : > { %v1306_v16 = vadd.f32 %v1298_v52, %v1289_v26  ;;  %v1315_v8 = vmul.f32 %v4738_v1, %v4737_v27  ;;  %v4739_v11 = vld [vmem:[#allocation89_spill] sm:$0xff]  ;;  %v1506_v4 = vadd.f32 %v1498_v36, %v1489_v28  ;;  %v1332_v54 = vmul.f32 %v4740_v48, %v3551_v9  ;;  %v2258_v26 = vld [vmem:[#allocation3 + $0x36] sm:$0xff] }
 0x1ff   : > { %v1076_v39 = vadd.f32 %v4739_v11, %v1059_v19  ;;  %v1174_v55 = vadd.f32 %v4741_v23, %v1157_v24  ;;  %v1349_v7 = vmul.f32 %v4698_v40, %v3598_v53  ;;  %v1119_v11 = vmul.f32 %v4726_v29, %v3799_v59  ;;  %v3818_v52 = vld [vmem:[#allocation3 + $0xa4] sm:$0xff] }
 0x200   : > { %v1323_v34 = vadd.f32 %v1315_v8, %v1306_v16  ;;  %v1523_v6 = vadd.f32 %v1515_v2, %v1506_v4  ;;  %v1546_v36 = vmul.f32 %v2258_v26, %v4665_v33  ;;  %v995_v28 = vadd.f32 %v987_v49, %v978_v25  ;;  %v4743_v4 = vld [vmem:[#allocation138_spill] sm:$0xff]  ;;  %v4744_v23 = vld [vmem:[#allocation121_spill] sm:$0xff]  ;;  %v4745_v33 = vld [vmem:[#allocation68_spill] sm:$0xff] }
 0x201   : > { %v1093_v38 = vadd.f32 %v3741_v45, %v1076_v39  ;;  %v1191_v19 = vadd.f32 %v4742_v46, %v1174_v55  ;;  %v1234_v18 = vmul.f32 %v4711_v30, %v3748_v15  ;;  %v1366_v16 = vmul.f32 %v4574_v41, %v3711_v17  ;;  %v3825_v45 = vld [vmem:[#allocation3 + $0xb3] sm:$0xff]  ;;  %v4746_v55 = vld [vmem:[#allocation80_spill] sm:$0xff] }
 0x202   : > { %v1340_v24 = vadd.f32 %v1332_v54, %v1323_v34  ;;  %v1554_v39 = vadd.f32 %v1546_v36, %v1523_v6  ;;  %v1563_v2 = vmul.f32 %v4657_v42, %v4743_v4  ;;  %v1026_v29 = vadd.f32 %v4745_v33, %v995_v28  ;;  %v4747_v25 = vld [vmem:[#allocation32_spill] sm:$0xff]  ;;  %v4750_v28 = vld [vmem:[#allocation54_spill] sm:$0xff] }
 0x203   : > { %v1110_v8 = vadd.f32 %v1102_v62, %v1093_v38  ;;  %v1208_v26 = vadd.f32 %v4744_v23, %v1191_v19  ;;  %v1580_v49 = vmul.f32 %v4747_v25, %v4746_v55  ;;  %v1383_v54 = vmul.f32 %v4653_v61, %v3818_v52  ;;  %v4748_v38 = vld [vmem:[#allocation113_spill] sm:$0xff] }
 0x204   : > { %v1357_v46 = vadd.f32 %v1349_v7, %v1340_v24  ;;  %v1571_v58 = vadd.f32 %v1563_v2, %v1554_v39  ;;  %v1251_v62 = vmul.f32 %v4720_v44, %v3825_v45  ;;  %v1043_v6 = vadd.f32 %v4748_v38, %v1026_v29  ;;  %v2259_v36 = vld [vmem:[#allocation3 + $0x83] sm:$0xff]  ;;  %v4751_v7 = vld [vmem:[#allocation35_spill] sm:$0xff] }
 0x205   : > { %v1127_v34 = vadd.f32 %v1119_v11, %v1110_v8  ;;  %v1225_v59 = vadd.f32 %v3735_v13, %v1208_v26  ;;  %v4749_v19 = vld [vmem:[#allocation9_spill] sm:$0xff]  ;;  %v1597_v24 = vmul.f32 %v4751_v7, %v4714_v43  ;;  %v4753_v13 = vld [vmem:[#allocation10_spill] sm:$0xff]  ;;  %v4754_v38 = vld [vmem:[#allocation132_spill] sm:$0xff] }
 0x206   : > { %v1184_v23 = vmul.f32 %v2259_v36, %v4749_v19  ;;  %v1374_v33 = vadd.f32 %v1366_v16, %v1357_v46  ;;  %v1588_v25 = vadd.f32 %v1580_v49, %v1571_v58  ;;  %v4752_v11 = vld [vmem:[#allocation125_spill] sm:$0xff]  ;;  %v1201_v39 = vmul.f32 %v4753_v13, %v4710_v22  ;;  %v3848_v36 = vld [vmem:[#allocation3 + $0x96] sm:$0xff] }
 0x207   : > { %v1158_v42 = vadd.f32 %v4750_v28, %v1127_v34  ;;  %v1242_v55 = vadd.f32 %v1234_v18, %v1225_v59  ;;  %v1060_v8 = vadd.f32 %v4752_v11, %v1043_v6  ;;  %v2260_v26 = vld [vmem:[#allocation3 + $0x45] sm:$0xff]  ;;  %4755 = vst [vmem:[#allocation96_spill] sm:$0xff] %v3848_v36  ;;  %v1614_v58 = vmul.f32 %v4715_v35, %v3658_v12  ;;  %v2261_v46 = vld [vmem:[#allocation3 + $0x54] sm:$0xff] }
 0x208   : > { %v1391_v2 = vadd.f32 %v1383_v54, %v1374_v33  ;;  %v1414_v29 = vmul.f32 %v2260_v26, %v4645_v51  ;;  %v1605_v16 = vadd.f32 %v1597_v24, %v1588_v25  ;;  %v1282_v59 = vmul.f32 %v2261_v46, %v4729_v0  ;;  %v4756_v18 = vld [vmem:[#allocation7_spill] sm:$0xff]  ;;  %v4759_v24 = vld [vmem:[#allocation28_spill] sm:$0xff]  ;;  %v4760_v46 = vld [vmem:[#allocation29_spill] sm:$0xff] }
 0x209   : > { %v1175_v4 = vadd.f32 %v4754_v38, %v1158_v42  ;;  %v1259_v49 = vadd.f32 %v1251_v62, %v1242_v55  ;;  %v1069_v34 = vmul.f32 %v4756_v18, %v3545_v63  ;;  %v1218_v22 = vmul.f32 %v4672_v10, %v3748_v15  ;;  %v4757_v62 = vld [vmem:[#allocation139_spill] sm:$0xff]  ;;  %v4758_v63 = vld [vmem:[#allocation141_spill] sm:$0xff] }
 0x20a   : > { %v1422_v54 = vadd.f32 %v1414_v29, %v1391_v2  ;;  %v1431_v42 = vmul.f32 %v4643_v14, %v4722_v20  ;;  %v1622_v6 = vadd.f32 %v1614_v58, %v1605_v16  ;;  %v1631_v25 = vmul.f32 %v4718_v3, %v3753_v37  ;;  %v3871_v16 = vld [vmem:[#allocation3 + $0xc3] sm:$0xff]  ;;  %v4763_v3 = vld [vmem:[#allocation114_spill] sm:$0xff] }
 0x20b   : > { %v1290_v19 = vadd.f32 %v1282_v59, %v1259_v49  ;;  %v1299_v55 = vmul.f32 %v4733_v56, %v4737_v27  ;;  %v1648_v33 = vmul.f32 %v4757_v62, %v3848_v36  ;;  %v1448_v11 = vmul.f32 %v4759_v24, %v4758_v63  ;;  %v3879_v62 = vld [vmem:[#allocation3 + $0xa5] sm:$0xff]  ;;  %v4764_v36 = vld [vmem:[#allocation18_spill] sm:$0xff] }
 0x20c   : > { %v1439_v28 = vadd.f32 %v1431_v42, %v1422_v54  ;;  %v1316_v2 = vmul.f32 %v4738_v1, %v3551_v9  ;;  %v1639_v26 = vadd.f32 %v1631_v25, %v1622_v6  ;;  %v1333_v38 = vmul.f32 %v4740_v48, %v3598_v53 }
 0x20d   : > { %v1307_v29 = vadd.f32 %v1299_v55, %v1290_v19  ;;  %v1192_v58 = vadd.f32 %v1184_v23, %v1175_v4  ;;  %v1465_v59 = vmul.f32 %v4760_v46, %v3641_v57  ;;  %v1482_v18 = vmul.f32 %v4731_v31, %v3665_v5  ;;  %v3885_v23 = vld [vmem:[#allocation3 + $0xb4] sm:$0xff] }
 0x20e   : > { %v1456_v49 = vadd.f32 %v1448_v11, %v1439_v28  ;;  %v1235_v54 = vmul.f32 %v4711_v30, %v3825_v45  ;;  %v1656_v42 = vadd.f32 %v1648_v33, %v1639_v26  ;;  %v1350_v25 = vmul.f32 %v4698_v40, %v3711_v17  ;;  %v4761_v11 = vld [vmem:[#allocation15_spill] sm:$0xff] }
 0x20f   : > { %v1324_v6 = vadd.f32 %v1316_v2, %v1307_v29  ;;  %v1209_v19 = vadd.f32 %v1201_v39, %v1192_v58  ;;  %v1499_v4 = vmul.f32 %v4688_v60, %v3793_v47  ;;  %v1252_v28 = vmul.f32 %v4720_v44, %v3871_v16  ;;  %v1009_v29 = vld [vmem:[#allocation3 + $0xd2] sm:$0xff] }
 0x210   : > { %v1473_v55 = vadd.f32 %v1465_v59, %v1456_v49  ;;  %v1086_v30 = vmul.f32 %v4761_v11, %v3766_v21  ;;  %v3892_v33 = vadd.f32 %v3688_v50, %v1656_v42  ;;  %v1367_v26 = vmul.f32 %v4574_v41, %v3818_v52  ;;  %v4767_v50 = vld [vmem:[#allocation8_spill] sm:$0xff] }
 0x211   : > { %v1341_v2 = vadd.f32 %v1333_v38, %v1324_v6  ;;  %v1226_v39 = vadd.f32 %v1218_v22, %v1209_v19  ;;  %v1516_v49 = vmul.f32 %v4676_v32, %v3879_v62  ;;  %v1077_v59 = vadd.f32 %v1069_v34, %v1060_v8  ;;  %v4765_v19 = vld [vmem:[#allocation33_spill] sm:$0xff] }
 0x212   : > { %4762 = vst [vmem:[#allocation84_spill] sm:$0xff] %v3892_v33  ;;  %v1490_v58 = vadd.f32 %v1482_v18, %v1473_v55  ;;  %v1103_v44 = vmul.f32 %v4764_v36, %v4763_v3  ;;  %v1682_v21 = vsel %vm684_vm5, %v3892_v33, 0.0  ;;  %v1384_v38 = vmul.f32 %v4653_v61, %v3885_v23  ;;  %v4766_v55 = vld [vmem:[#allocation131_spill] sm:$0xff]  ;;  %v4768_v33 = vld [vmem:[#allocation138_spill] sm:$0xff] }
 0x213   : > { %v1358_v11 = vadd.f32 %v1350_v25, %v1341_v2  ;;  %v1243_v42 = vadd.f32 %v1235_v54, %v1226_v39  ;;  %1683 = vadd.xlane.f32.xlu2 %v1682_v21  ;;  %v1094_v22 = vadd.f32 %v1086_v30, %v1077_v59  ;;  %v1120_v18 = vmul.f32 %v4765_v19, %v1009_v29  ;;  %v4769_v25 = vld [vmem:[#allocation30_spill] sm:$0xff] }
 0x214   : > { %v1507_v6 = vadd.f32 %v1499_v4, %v1490_v58  ;;  %v1151_v32 = vmul.f32 %v4767_v50, %v4766_v55  ;;  %v1283_v3 = vmul.f32 %v4729_v0, %v4737_v27  ;;  %v1547_v2 = vmul.f32 %v4769_v25, %v4768_v33  ;;  %v4771_v58 = vld [vmem:[#allocation31_spill] sm:$0xff] }
 0x215   : > { %v1375_v8 = vadd.f32 %v1367_v26, %v1358_v11  ;;  %v1260_v34 = vadd.f32 %v1252_v28, %v1243_v42  ;;  %v1415_v54 = vmul.f32 %v4645_v51, %v4722_v20  ;;  %v1111_v39 = vadd.f32 %v1103_v44, %v1094_v22  ;;  %v4770_v26 = vld [vmem:[#allocation80_spill] sm:$0xff] }
 0x216   : > { %v1524_v36 = vadd.f32 %v1516_v49, %v1507_v6  ;;  %v1300_v29 = vmul.f32 %v4733_v56, %v3551_v9  ;;  %v1317_v50 = vmul.f32 %v4738_v1, %v3598_v53  ;;  %v1564_v27 = vmul.f32 %v4771_v58, %v4770_v26 }
 0x217   : > { %v1392_v4 = vadd.f32 %v1384_v38, %v1375_v8  ;;  %v1291_v30 = vadd.f32 %v1283_v3, %v1260_v34  ;;  %v1128_v49 = vadd.f32 %v1120_v18, %v1111_v39  ;;  %v1432_v33 = vmul.f32 %v4643_v14, %v4758_v63  ;;  %v4772_v38 = vld [vmem:[#allocation32_spill] sm:$0xff]  ;;  %v4773_v34 = vld [vmem:[#allocation115_spill] sm:$0xff] }
 0x218   : > { %v1555_v28 = vadd.f32 %v1547_v2, %v1524_v36  ;;  %v1334_v44 = vmul.f32 %v4740_v48, %v3711_v17  ;;  %v1202_v20 = vmul.f32 %v4753_v13, %v3748_v15  ;;  %v1581_v42 = vmul.f32 %v4772_v38, %v4714_v43  ;;  %v3935_v13 = vld [vmem:[#allocation3 + $0xc4] sm:$0xff]  ;;  %v3942_v39 = vld [vmem:[#allocation3 + $0xb5] sm:$0xff] }
 0x219   : > { %v1423_v59 = vadd.f32 %v1415_v54, %v1392_v4  ;;  %v1308_v21 = vadd.f32 %v1300_v29, %v1291_v30  ;;  %v1159_v6 = vadd.f32 %v1151_v32, %v1128_v49  ;;  %v1449_v19 = vmul.f32 %v4759_v24, %v3641_v57  ;;  %v4774_v30 = vld [vmem:[#allocation128_spill] sm:$0xff] }
 0x21a   : > { %v1572_v11 = vadd.f32 %v1564_v27, %v1555_v28  ;;  %v1351_v63 = vmul.f32 %v4698_v40, %v3818_v52  ;;  %v1598_v8 = vmul.f32 %v4751_v7, %v3658_v12  ;;  %v1615_v15 = vmul.f32 %v4715_v35, %v3753_v37  ;;  %v3949_v28 = vld [vmem:[#allocation3 + $0xa6] sm:$0xff] }
 0x21b   : > { %v1440_v22 = vadd.f32 %v1432_v33, %v1423_v59  ;;  %v1325_v18 = vadd.f32 %v1317_v50, %v1308_v21  ;;  %v1176_v43 = vadd.f32 %v4773_v34, %v1159_v6  ;;  %v1466_v3 = vmul.f32 %v4760_v46, %v3665_v5  ;;  %v1142_v33 = vld [vmem:[#allocation3 + $0xd3] sm:$0xff] }
 0x21c   : > { %v1589_v55 = vadd.f32 %v1581_v42, %v1572_v11  ;;  %v1368_v2 = vmul.f32 %v4574_v41, %v3885_v23  ;;  %v1483_v4 = vmul.f32 %v4731_v31, %v3793_v47  ;;  %v1219_v50 = vmul.f32 %v4672_v10, %v3825_v45  ;;  %v4776_v11 = vld [vmem:[#allocation145_spill] sm:$0xff] }
 0x21d   : > { %v1457_v32 = vadd.f32 %v1449_v19, %v1440_v22  ;;  %v1342_v36 = vadd.f32 %v1334_v44, %v1325_v18  ;;  %v1193_v29 = vadd.f32 %v4774_v30, %v1176_v43  ;;  %v1500_v27 = vmul.f32 %v4688_v60, %v3879_v62  ;;  %v4775_v44 = vld [vmem:[#allocation96_spill] sm:$0xff]  ;;  %v4777_v22 = vld [vmem:[#allocation19_spill] sm:$0xff]  ;;  %v4778_v45 = vld [vmem:[#allocation137_spill] sm:$0xff] }
 0x21e   : > { %v1606_v54 = vadd.f32 %v1598_v8, %v1589_v55  ;;  %v1385_v59 = vmul.f32 %v4653_v61, %v3935_v13  ;;  %v1632_v42 = vmul.f32 %v4776_v11, %v4775_v44  ;;  %v1236_v19 = vmul.f32 %v4777_v22, %v3871_v16  ;;  %v4779_v43 = vld [vmem:[#allocation34_spill] sm:$0xff]  ;;  %v2263_v16 = vld [vmem:[#allocation3 + $0x65] sm:$0xff] }
 0x21f   : > { %v1474_v26 = vadd.f32 %v1466_v3, %v1457_v32  ;;  %v1359_v49 = vadd.f32 %v1351_v63, %v1342_v36  ;;  %v1210_v6 = vadd.f32 %v1202_v20, %v1193_v29  ;;  %v1517_v18 = vmul.f32 %v4778_v45, %v3942_v39  ;;  %v3964_v63 = vld [vmem:[%s4233_s3 + $0x30] ss:$0 sm:$0xff]  ;;  %v2264_v30 = vld [vmem:[#allocation3 + $0x56] sm:$0xff] }
 0x220   : > { %v1623_v21 = vadd.f32 %v1615_v15, %v1606_v54  ;;  %v1649_v15 = vmul.f32 %v3964_v63, %v3949_v28  ;;  %v1253_v20 = vmul.f32 %v4779_v43, %v1142_v33  ;;  %v1416_v36 = vmul.f32 %v2263_v16, %v4645_v51 }
 0x221   : > { %v1491_v10 = vadd.f32 %v1483_v4, %v1474_v26  ;;  %v1376_v55 = vadd.f32 %v1368_v2, %v1359_v49  ;;  %v1227_v34 = vadd.f32 %v1219_v50, %v1210_v6  ;;  %v1548_v29 = vmul.f32 %v2264_v30, %v4769_v25  ;;  %v2265_v6 = vld [vmem:[#allocation3 + $0x66] sm:$0xff] }
 0x222   : > { %v1640_v8 = vadd.f32 %v1632_v42, %v1623_v21  ;;  %v1433_v49 = vmul.f32 %v4643_v14, %v3641_v57  ;;  %v4780_v21 = vld [vmem:[#allocation74_spill] sm:$0xff]  ;;  %v1565_v22 = vmul.f32 %v2265_v6, %v4771_v58 }
 0x223   : > { %v1508_v32 = vadd.f32 %v1500_v27, %v1491_v10  ;;  %v1393_v3 = vadd.f32 %v1385_v59, %v1376_v55  ;;  %v1244_v4 = vadd.f32 %v1236_v19, %v1227_v34  ;;  %v1284_v27 = vmul.f32 %v4729_v0, %v3551_v9  ;;  %v1407_v34 = vld [vmem:[#allocation3 + $0xc5] sm:$0xff] }
 0x224   : > { %v1657_v54 = vadd.f32 %v1649_v15, %v1640_v8  ;;  %v1301_v59 = vmul.f32 %v4733_v56, %v3598_v53  ;;  %v1450_v10 = vmul.f32 %v4759_v24, %v3665_v5  ;;  %v1582_v55 = vmul.f32 %v4772_v38, %v3658_v12 }
 0x225   : > { %v1525_v2 = vadd.f32 %v1517_v18, %v1508_v32  ;;  %v1424_v26 = vadd.f32 %v1416_v36, %v1393_v3  ;;  %v1261_v50 = vadd.f32 %v1253_v20, %v1244_v4  ;;  %v1318_v9 = vmul.f32 %v4738_v1, %v3711_v17  ;;  %v3999_v1 = vld [vmem:[#allocation3 + $0xb6] sm:$0xff] }
 0x226   : > { %v3974_v42 = vadd.f32 %v4780_v21, %v1657_v54  ;;  %v1467_v56 = vmul.f32 %v4760_v46, %v3793_v47  ;;  %v1484_v15 = vmul.f32 %v4731_v31, %v3879_v62  ;;  %v1335_v20 = vmul.f32 %v4740_v48, %v3818_v52  ;;  %v1275_v52 = vld [vmem:[#allocation3 + $0xd4] sm:$0xff] }
 0x227   : > { %v1556_v33 = vadd.f32 %v1548_v29, %v1525_v2  ;;  %v1441_v19 = vadd.f32 %v1433_v49, %v1424_v26  ;;  %v1292_v8 = vadd.f32 %v1284_v27, %v1261_v50  ;;  %v1599_v3 = vmul.f32 %v4751_v7, %v3753_v37 }
 0x228   : > { %v1685_v18 = vsel %vm684_vm5, %v3974_v42, 0.0  ;;  %v1501_v17 = vmul.f32 %v4688_v60, %v3942_v39  ;;  %v1352_v54 = vmul.f32 %v4698_v40, %v3885_v23  ;;  %v1616_v2 = vmul.f32 %v4715_v35, %v4775_v44 }
 0x229   : > { %1686 = vadd.xlane.f32.xlu0 %v1685_v18  ;;  %v1573_v53 = vadd.f32 %v1565_v22, %v1556_v33  ;;  %v1458_v0 = vadd.f32 %v1450_v10, %v1441_v19  ;;  %v1309_v43 = vadd.f32 %v1301_v59, %v1292_v8  ;;  %v1518_v48 = vmul.f32 %v4778_v45, %v1407_v34 }
 0x22a   : > { %v1369_v26 = vmul.f32 %v4574_v41, %v3935_v13  ;;  %v1633_v50 = vmul.f32 %v4776_v11, %v3949_v28  ;;  %v1650_v27 = vmul.f32 %v3964_v63, %v3999_v1  ;;  %v1386_v59 = vmul.f32 %v4653_v61, %v1275_v52 }
 0x22b   : > { %v1590_v32 = vadd.f32 %v1582_v55, %v1573_v53  ;;  %v1475_v16 = vadd.f32 %v1467_v56, %v1458_v0  ;;  %v1326_v36 = vadd.f32 %v1318_v9, %v1309_v43  ;;  %v1549_v19 = vmul.f32 %v2265_v6, %v4769_v25 }
 0x22c   : > { %v1566_v41 = vmul.f32 %v4771_v58, %v3658_v12  ;;  %v1417_v8 = vmul.f32 %v4645_v51, %v3641_v57  ;;  %v1583_v61 = vmul.f32 %v4772_v38, %v3753_v37  ;;  %v1434_v6 = vmul.f32 %v4643_v14, %v3665_v5  ;;  %v1540_v51 = vld [vmem:[#allocation3 + $0xc6] sm:$0xff] }
 0x22d   : > { %v1607_v4 = vadd.f32 %v1599_v3, %v1590_v32  ;;  %v1492_v30 = vadd.f32 %v1484_v15, %v1475_v16  ;;  %v1343_v29 = vadd.f32 %v1335_v20, %v1326_v36  ;;  %v1600_v43 = vmul.f32 %v4751_v7, %v4775_v44 }
 0x22e   : > { %v1451_v20 = vmul.f32 %v4759_v24, %v3793_v47  ;;  %v1468_v32 = vmul.f32 %v4760_v46, %v3879_v62  ;;  %v1617_v14 = vmul.f32 %v4715_v35, %v3949_v28  ;;  %v1634_v5 = vmul.f32 %v4776_v11, %v3999_v1 }
 0x22f   : > { %v1624_v49 = vadd.f32 %v1616_v2, %v1607_v4  ;;  %v1509_v40 = vadd.f32 %v1501_v17, %v1492_v30  ;;  %v1360_v23 = vadd.f32 %v1352_v54, %v1343_v29  ;;  %v1485_v17 = vmul.f32 %v4731_v31, %v3942_v39  ;;  %v1408_v4 = vld [vmem:[#allocation3 + $0xd5] sm:$0xff] }
 0x230   : > { %v1651_v54 = vmul.f32 %v3964_v63, %v1540_v51  ;;  %v1502_v47 = vmul.f32 %v4688_v60, %v1407_v34  ;;  %v1519_v62 = vmul.f32 %v4778_v45, %v1408_v4  ;;  %v1550_v31 = vmul.f32 %v4769_v25, %v3658_v12 }
 0x231   : > { %v1641_v33 = vadd.f32 %v1633_v50, %v1624_v49  ;;  %v1526_v22 = vadd.f32 %v1518_v48, %v1509_v40  ;;  %v1377_v10 = vadd.f32 %v1369_v26, %v1360_v23  ;;  %v1567_v60 = vmul.f32 %v4771_v58, %v3753_v37 }
 0x232   : > { %v2278_v34 = vmov 8.0   ;;  %v1584_v49 = vmul.f32 %v4772_v38, %v4775_v44  ;;  %v1618_v37 = vmul.f32 %v4715_v35, %v3999_v1  ;;  %v1541_v44 = vld [vmem:[#allocation3 + $0xd6] sm:$0xff] }
 0x233   : > { %v1658_v18 = vadd.f32 %v1650_v27, %v1641_v33  ;;  %v1557_v55 = vadd.f32 %v1549_v19, %v1526_v22  ;;  %v1394_v13 = vadd.f32 %v1386_v59, %v1377_v10  ;;  %2222 = vrcp.f32 %v2278_v34 }
 0x234   : > { %v1601_v27 = vmul.f32 %v4751_v7, %v3949_v28  ;;  %v1635_v19 = vmul.f32 %v4776_v11, %v1540_v51  ;;  %v4781_v7 = vld [vmem:[#allocation107_spill] sm:$0xff] }
 0x235   : > { %v4019_v9 = vadd.f32 %v4780_v21, %v1658_v18  ;;  %v1574_v53 = vadd.f32 %v1566_v41, %v1557_v55  ;;  %v1425_v0 = vadd.f32 %v1417_v8, %v1394_v13  ;;  %v1652_v55 = vmul.f32 %v3964_v63, %v1541_v44  ;;  %v4782_v8 = vld [vmem:[#allocation97_spill] sm:$0xff] }
 0x237   : > { %v1688_v56 = vsel %vm684_vm5, %v4019_v9, 0.0  ;;  %v1591_v15 = vadd.f32 %v1583_v61, %v1574_v53  ;;  %v1442_v57 = vadd.f32 %v1434_v6, %v1425_v0 }
 0x238   : > { %1689 = vadd.xlane.f32.xlu1 %v1688_v56 }
 0x239   : > { %v1608_v3 = vadd.f32 %v1600_v43, %v1591_v15  ;;  %v1459_v16 = vadd.f32 %v1451_v20, %v1442_v57  ;;  %v2223_v12 = vpop.eup %2222  ;;  %v4783_v43 = vld [vmem:[#allocation47_spill] sm:$0xff] }
 0x23a   : > { %v1698_v25 = vmul.f32 8.0, %v2223_v12  ;;  %vm1702_vm7 = vweird.f32 %v2223_v12 }
 0x23b   : > { %v1625_v36 = vadd.f32 %v1617_v14, %v1608_v3  ;;  %v1476_v2 = vadd.f32 %v1468_v32, %v1459_v16  ;;  %v4784_v3 = vld [vmem:[#allocation84_spill] sm:$0xff] }
 0x23c   : > { %v1699_v23 = vsub.f32 1.0, %v1698_v25 }
 0x23d   : > { %v1642_v24 = vadd.f32 %v1634_v5, %v1625_v36  ;;  %v1493_v46 = vadd.f32 %v1485_v17, %v1476_v2 }
 0x23e   : > { %v1700_v59 = vmul.f32 %v2223_v12, %v1699_v23  ;;  %v1884_v23 = vld [vmem:[%s4237_s7] sm:$0xf] }
 0x23f   : > { %v1659_v30 = vadd.f32 %v1651_v54, %v1642_v24  ;;  %v1510_v48 = vadd.f32 %v1502_v47, %v1493_v46 }
 0x240   : > { %v1701_v33 = vadd.f32 %v2223_v12, %v1700_v59 }
 0x241   : > { %v4043_v52 = vadd.f32 %v4780_v21, %v1659_v30  ;;  %v1527_v29 = vadd.f32 %v1519_v62, %v1510_v48 }
 0x242   : > { %v4057_v58 = vsel %vm1702_vm7, %v2223_v12, %v1701_v33 }
 0x243   : > { %v1691_v39 = vsel %vm684_vm5, %v4043_v52, 0.0  ;;  %v1558_v26 = vadd.f32 %v1550_v31, %v1527_v29 }
 0x244   : > { %1692 = vadd.xlane.f32.xlu1 %v1691_v39 }
 0x245   : > { %v1575_v45 = vadd.f32 %v1567_v60, %v1558_v26 }
 0x247   : > { %v1592_v50 = vadd.f32 %v1584_v49, %v1575_v45 }
 0x249   : > { %v1609_v40 = vadd.f32 %v1601_v27, %v1592_v50 }
 0x24b   : > { %v1626_v22 = vadd.f32 %v1618_v37, %v1609_v40  ;;  %v1903_v37 = vsel %vm1901_vm8, %v1884_v23, 0 }
 0x24c   : > { %1912 = vmatpush.bf16.msra.mxu1 %v1903_v37 }
 0x24d   : > { %v1643_v18 = vadd.f32 %v1635_v19, %v1626_v22 }
 0x24f   : > { %v1660_v1 = vadd.f32 %v1652_v55, %v1643_v18 }
 0x251   : > { %v1672_v61 = vadd.f32 %v4780_v21, %v1660_v1 }
 0x253   : > { %v1694_v63 = vsel %vm684_vm5, %v1672_v61, 0.0 }
 0x260   : > { %v1675_v38 = vpop.xlane.xlu0 %1674 }
 0x261   : > { %v1704_v10 = vmul.f32 %v4057_v58, %v1675_v38 }
 0x263   : > { %v4062_v28 = vsub.f32 %v4781_v7, %v1704_v10 }
 0x265   : > { %v1720_v41 = vmul.f32 %v4062_v28, %v4062_v28 }
 0x267   : > { %v1728_v35 = vsel %vm684_vm5, %v1720_v41, 0.0 }
 0x268   : > { %1729 = vadd.xlane.f32.xlu2 %v1728_v35 }
 0x269   : > { %v1678_v13 = vpop.xlane.xlu1 %1677 }
 0x26a   : > { %v1705_v11 = vmul.f32 %v4057_v58, %v1678_v13 }
 0x26c   : > { %v4070_v53 = vsub.f32 %v4782_v8, %v1705_v11 }
 0x26e   : > { %v1721_v0 = vmul.f32 %v4070_v53, %v4070_v53 }
 0x270   : > { %v1731_v6 = vsel %vm684_vm5, %v1721_v0, 0.0  ;;  %v1681_v56 = vpop.xlane.xlu2 %1680  ;;  %1695 = vadd.xlane.f32.xlu2 %v1694_v63 }
 0x271   : > { %1732 = vadd.xlane.f32.xlu0 %v1731_v6  ;;  %v1706_v15 = vmul.f32 %v4057_v58, %v1681_v56 }
 0x273   : > { %v4079_v51 = vsub.f32 %v4783_v43, %v1706_v15 }
 0x275   : > { %v1722_v57 = vmul.f32 %v4079_v51, %v4079_v51 }
 0x277   : > { %v1734_v21 = vsel %vm684_vm5, %v1722_v57, 0.0 }
 0x279   : > { %1735 = vadd.xlane.f32.xlu0 %v1734_v21 }
 0x286   : > { %v1684_v20 = vpop.xlane.xlu2 %1683 }
 0x287   : > { %v1707_v32 = vmul.f32 %v4057_v58, %v1684_v20 }
 0x289   : > { %v4086_v14 = vsub.f32 %v4784_v3, %v1707_v32 }
 0x28b   : > { %v1723_v5 = vmul.f32 %v4086_v14, %v4086_v14 }
 0x28d   : > { %v1737_v16 = vsel %vm684_vm5, %v1723_v5, 0.0  ;;  %v4129_v5 = vld [vmem:[%s4235_s5] ss:$0 sm:$0xff] }
 0x28e   : > { %1738 = vadd.xlane.f32.xlu1 %v1737_v16 }
 0x29c   : > { %v1687_v17 = vpop.xlane.xlu0 %1686 }
 0x29d   : > { %v1708_v36 = vmul.f32 %v4057_v58, %v1687_v17 }
 0x29f   : > { %v4093_v54 = vsub.f32 %v3974_v42, %v1708_v36 }
 0x2a1   : > { %v1724_v4 = vmul.f32 %v4093_v54, %v4093_v54 }
 0x2a3   : > { %v1740_v2 = vsel %vm684_vm5, %v1724_v4, 0.0 }
 0x2a4   : > { %1741 = vadd.xlane.f32.xlu2 %v1740_v2 }
 0x2ab   : > { %v1690_v47 = vpop.xlane.xlu1 %1689 }
 0x2ac   : > { %v1709_v24 = vmul.f32 %v4057_v58, %v1690_v47 }
 0x2ae   : > { %v4100_v46 = vsub.f32 %v4019_v9, %v1709_v24 }
 0x2b0   : > { %v1725_v62 = vmul.f32 %v4100_v46, %v4100_v46 }
 0x2b2   : > { %v1743_v30 = vsel %vm684_vm5, %v1725_v62, 0.0 }
 0x2b3   : > { %1744 = vadd.xlane.f32.xlu0 %v1743_v30 }
 0x2b7   : > { %v1693_v42 = vpop.xlane.xlu1 %1692 }
 0x2b8   : > { %v1710_v48 = vmul.f32 %v4057_v58, %v1693_v42 }
 0x2ba   : > { %v4107_v29 = vsub.f32 %v4043_v52, %v1710_v48 }
 0x2bc   : > { %v1726_v31 = vmul.f32 %v4107_v29, %v4107_v29 }
 0x2be   : > { %v1746_v39 = vsel %vm684_vm5, %v1726_v31, 0.0 }
 0x2bf   : > { %1747 = vadd.xlane.f32.xlu1 %v1746_v39 }
 0x2db   : > { %v1730_v9 = vpop.xlane.xlu2 %1729 }
 0x2dc   : > { %v1752_v50 = vmul.f32 %v1730_v9, %v4057_v58 }
 0x2de   : > { %v1760_v40 = vadd.f32 1e-05, %v1752_v50 }
 0x2e0   : > { %2224 = vrsqrt.f32 %v1760_v40  ;;  %vm1774_vm10 = vweird.f32 %v1760_v40 }
 0x2e3   : > { %v1696_v26 = vpop.xlane.xlu2 %1695 }
 0x2e4   : > { %v1711_v60 = vmul.f32 %v4057_v58, %v1696_v26  ;;  %v1733_v52 = vpop.xlane.xlu0 %1732 }
 0x2e5   : > { %v1753_v27 = vmul.f32 %v1733_v52, %v4057_v58 }
 0x2e6   : > { %v4113_v34 = vsub.f32 %v1672_v61, %v1711_v60  ;;  %v2225_v59 = vpop.eup %2224 }
 0x2e7   : > { %v1761_v12 = vadd.f32 1e-05, %v1753_v27  ;;  %v1769_v19 = vmul.f32 %v2225_v59, %v1760_v40  ;;  %vm1775_vm9 = vweird.f32 %v2225_v59 }
 0x2e8   : > { %v1727_v45 = vmul.f32 %v4113_v34, %v4113_v34  ;;  %vm1776_vm12 = vmor %vm1774_vm10, %vm1775_vm9 }
 0x2e9   : > { %2226 = vrsqrt.f32 %v1761_v12  ;;  %v1770_v10 = vmul.f32 %v2225_v59, %v1769_v19  ;;  %vm1784_vm13 = vweird.f32 %v1761_v12 }
 0x2ea   : > { %v1749_v49 = vsel %vm684_vm5, %v1727_v45, 0.0 }
 0x2eb   : > { %1750 = vadd.xlane.f32.xlu2 %v1749_v49  ;;  %v1771_v41 = vmul.f32 0.5, %v1770_v10 }
 0x2ec   : > { %v1736_v25 = vpop.xlane.xlu0 %1735 }
 0x2ed   : > { %v1754_v33 = vmul.f32 %v1736_v25, %v4057_v58  ;;  %v1772_v11 = vsub.f32 1.5, %v1771_v41 }
 0x2ef   : > { %v2227_v22 = vpop.eup %2226  ;;  %v1762_v38 = vadd.f32 1e-05, %v1754_v33  ;;  %v1773_v63 = vmul.f32 %v2225_v59, %v1772_v11 }
 0x2f0   : > { %v1779_v44 = vmul.f32 %v2227_v22, %v1761_v12  ;;  %vm1785_vm11 = vweird.f32 %v2227_v22 }
 0x2f1   : > { %2228 = vrsqrt.f32 %v1762_v38  ;;  %v1777_v57 = vsel %vm1776_vm12, %v2225_v59, %v1773_v63  ;;  %vm1786_vm14 = vmor %vm1784_vm13, %vm1785_vm11  ;;  %vm1794_vm1 = vweird.f32 %v1762_v38 }
 0x2f2   : > { %v1780_v18 = vmul.f32 %v2227_v22, %v1779_v44  ;;  %v1848_v32 = vmul.f32 %v1777_v57, %v4062_v28  ;;  %v4137_v28 = vld [vmem:[%s4236_s6] ss:$0 sm:$0xff] }
 0x2f4   : > { %v1781_v1 = vmul.f32 0.5, %v1780_v18  ;;  %v1860_v24 = vmul.f32 %v4129_v5, %v1848_v32 }
 0x2f6   : > { %v1782_v8 = vsub.f32 1.5, %v1781_v1 }
 0x2f7   : > { %v2229_v13 = vpop.eup %2228 }
 0x2f8   : > { %v1789_v61 = vmul.f32 %v2229_v13, %v1762_v38  ;;  %v1783_v56 = vmul.f32 %v2227_v22, %v1782_v8  ;;  %vm1795_vm15 = vweird.f32 %v2229_v13 }
 0x2f9   : > { %vm1796_vm3 = vmor %vm1794_vm1, %vm1795_vm15 }
 0x2fa   : > { %v1790_v15 = vmul.f32 %v2229_v13, %v1789_v61  ;;  %v1787_v21 = vsel %vm1786_vm14, %v2227_v22, %v1783_v56 }
 0x2fb   : > { %v1849_v17 = vmul.f32 %v1787_v21, %v4070_v53  ;;  %v1872_v53 = vadd.f32 %v4137_v28, %v1860_v24 }
 0x2fc   : > { %v1791_v20 = vmul.f32 0.5, %v1790_v15 }
 0x2fd   : > { %v1861_v62 = vmul.f32 %v4129_v5, %v1849_v17 }
 0x2fe   : > { %v1792_v4 = vsub.f32 1.5, %v1791_v20 }
 0x2ff   : > { %v1873_v48 = vadd.f32 %v4137_v28, %v1861_v62 }
 0x300   : > { %v1793_v30 = vmul.f32 %v2229_v13, %v1792_v4 }
 0x301   : > { %v1739_v7 = vpop.xlane.xlu1 %1738  ;;  %v1880_v31 = vpack.c.bf16 %v1873_v48, %v1872_v53 }
 0x302   : > { %v1755_v55 = vmul.f32 %v1739_v7, %v4057_v58  ;;  %v1797_v9 = vsel %vm1796_vm3, %v2229_v13, %v1793_v30 }
 0x303   : > { %2171 = vmatmul.msk.bf16.vlgmr.msra.gmra.mxu1 %vm684_vm5, %v1880_v31  ;;  %v1850_v45 = vmul.f32 %v1797_v9, %v4079_v51 }
 0x304   : > { %v1763_v35 = vadd.f32 1e-05, %v1755_v55 }
 0x305   : > { %v1862_v12 = vmul.f32 %v4129_v5, %v1850_v45 }
 0x306   : > { %2230 = vrsqrt.f32 %v1763_v35  ;;  %vm1804_vm4 = vweird.f32 %v1763_v35 }
 0x307   : > { %v1874_v59 = vadd.f32 %v4137_v28, %v1862_v12 }
 0x30c   : > { %v2231_v0 = vpop.eup %2230 }
 0x30d   : > { %v1799_v6 = vmul.f32 %v2231_v0, %v1763_v35  ;;  %vm1805_vm0 = vweird.f32 %v2231_v0 }
 0x30e   : > { %vm1806_vm6 = vmor %vm1804_vm4, %vm1805_vm0 }
 0x30f   : > { %v1800_v43 = vmul.f32 %v2231_v0, %v1799_v6 }
 0x311   : > { %v1801_v3 = vmul.f32 0.5, %v1800_v43 }
 0x313   : > { %v1802_v2 = vsub.f32 1.5, %v1801_v3 }
 0x315   : > { %v1803_v42 = vmul.f32 %v2231_v0, %v1802_v2 }
 0x317   : > { %v1742_v16 = vpop.xlane.xlu2 %1741  ;;  %v1807_v26 = vsel %vm1806_vm6, %v2231_v0, %v1803_v42 }
 0x318   : > { %v1756_v36 = vmul.f32 %v1742_v16, %v4057_v58  ;;  %v1851_v49 = vmul.f32 %v1807_v26, %v4086_v14 }
 0x31a   : > { %v1764_v47 = vadd.f32 1e-05, %v1756_v36  ;;  %v1863_v25 = vmul.f32 %v4129_v5, %v1851_v49 }
 0x31c   : > { %2232 = vrsqrt.f32 %v1764_v47  ;;  %v1875_v33 = vadd.f32 %v4137_v28, %v1863_v25  ;;  %vm1814_vm8 = vweird.f32 %v1764_v47 }
 0x31e   : > { %v1881_v22 = vpack.c.bf16 %v1875_v33, %v1874_v59 }
 0x320   : > { %2172 = vmatmul.msk.bf16.gmra.mxu1 %vm684_vm5, %v1881_v22 }
 0x322   : > { %v2233_v39 = vpop.eup %2232 }
 0x323   : > { %v1809_v60 = vmul.f32 %v2233_v39, %v1764_v47  ;;  %vm1815_vm7 = vweird.f32 %v2233_v39 }
 0x324   : > { %vm1816_vm9 = vmor %vm1814_vm8, %vm1815_vm7 }
 0x325   : > { %v1810_v52 = vmul.f32 %v2233_v39, %v1809_v60 }
 0x326   : > { %v1745_v50 = vpop.xlane.xlu0 %1744 }
 0x327   : > { %v1757_v27 = vmul.f32 %v1745_v50, %v4057_v58  ;;  %v1811_v23 = vmul.f32 0.5, %v1810_v52 }
 0x329   : > { %v1765_v40 = vadd.f32 1e-05, %v1757_v27  ;;  %v1812_v37 = vsub.f32 1.5, %v1811_v23 }
 0x32b   : > { %2234 = vrsqrt.f32 %v1765_v40  ;;  %v1813_v19 = vmul.f32 %v2233_v39, %v1812_v37  ;;  %vm1824_vm11 = vweird.f32 %v1765_v40 }
 0x32d   : > { %v1817_v44 = vsel %vm1816_vm9, %v2233_v39, %v1813_v19 }
 0x32e   : > { %v1852_v18 = vmul.f32 %v1817_v44, %v4093_v54 }
 0x330   : > { %v1864_v1 = vmul.f32 %v4129_v5, %v1852_v18 }
 0x331   : > { %v2235_v51 = vpop.eup %2234 }
 0x332   : > { %v1819_v14 = vmul.f32 %v2235_v51, %v1765_v40  ;;  %vm1825_vm10 = vweird.f32 %v2235_v51  ;;  %v1876_v11 = vadd.f32 %v4137_v28, %v1864_v1  ;;  %v1748_v0 = vpop.xlane.xlu1 %1747 }
 0x333   : > { %vm1826_vm12 = vmor %vm1824_vm11, %vm1825_vm10  ;;  %v1758_v54 = vmul.f32 %v1748_v0, %v4057_v58 }
 0x334   : > { %v1820_v38 = vmul.f32 %v2235_v51, %v1819_v14 }
 0x335   : > { %v1766_v63 = vadd.f32 1e-05, %v1758_v54 }
 0x336   : > { %v1821_v10 = vmul.f32 0.5, %v1820_v38 }
 0x337   : > { %2236 = vrsqrt.f32 %v1766_v63  ;;  %vm1834_vm14 = vweird.f32 %v1766_v63 }
 0x338   : > { %v1822_v7 = vsub.f32 1.5, %v1821_v10 }
 0x33a   : > { %v1823_v55 = vmul.f32 %v2235_v51, %v1822_v7 }
 0x33c   : > { %v1827_v41 = vsel %vm1826_vm12, %v2235_v51, %v1823_v55 }
 0x33d   : > { %v1853_v35 = vmul.f32 %v1827_v41, %v4100_v46  ;;  %v2237_v6 = vpop.eup %2236 }
 0x33e   : > { %v1829_v56 = vmul.f32 %v2237_v6, %v1766_v63  ;;  %vm1835_vm13 = vweird.f32 %v2237_v6 }
 0x33f   : > { %v1865_v13 = vmul.f32 %v4129_v5, %v1853_v35  ;;  %vm1836_vm15 = vmor %vm1834_vm14, %vm1835_vm13 }
 0x340   : > { %v1830_v15 = vmul.f32 %v2237_v6, %v1829_v56 }
 0x341   : > { %v1877_v8 = vadd.f32 %v4137_v28, %v1865_v13 }
 0x342   : > { %v1831_v21 = vmul.f32 0.5, %v1830_v15 }
 0x343   : > { %v1882_v61 = vpack.c.bf16 %v1877_v8, %v1876_v11 }
 0x344   : > { %v1832_v20 = vsub.f32 1.5, %v1831_v21 }
 0x345   : > { %2173 = vmatmul.msk.bf16.gmra.mxu1 %vm684_vm5, %v1882_v61 }
 0x346   : > { %v1833_v3 = vmul.f32 %v2237_v6, %v1832_v20 }
 0x348   : > { %v1837_v36 = vsel %vm1836_vm15, %v2237_v6, %v1833_v3 }
 0x349   : > { %v1854_v47 = vmul.f32 %v1837_v36, %v4107_v29  ;;  %v2192_v29 = vld [vmem:[%s4239_s9 + $0x8] sm:$0xff] }
 0x34a   : > { %2048 = vmatpush.bf16.msra.mxu2 %v2192_v29 }
 0x34b   : > { %v1866_v30 = vmul.f32 %v4129_v5, %v1854_v47 }
 0x34d   : > { %v1878_v53 = vadd.f32 %v4137_v28, %v1866_v30 }
 0x35e   : > { %v1751_v46 = vpop.xlane.xlu2 %1750 }
 0x35f   : > { %v1759_v43 = vmul.f32 %v1751_v46, %v4057_v58 }
 0x361   : > { %v1767_v57 = vadd.f32 1e-05, %v1759_v43 }
 0x363   : > { %2238 = vrsqrt.f32 %v1767_v57  ;;  %vm1844_vm1 = vweird.f32 %v1767_v57 }
 0x369   : > { %v2239_v32 = vpop.eup %2238 }
 0x36a   : > { %v1839_v16 = vmul.f32 %v2239_v32, %v1767_v57  ;;  %vm1845_vm0 = vweird.f32 %v2239_v32 }
 0x36b   : > { %vm1846_vm3 = vmor %vm1844_vm1, %vm1845_vm0 }
 0x36c   : > { %v1840_v17 = vmul.f32 %v2239_v32, %v1839_v16 }
 0x36e   : > { %v1841_v4 = vmul.f32 0.5, %v1840_v17 }
 0x370   : > { %v1842_v2 = vsub.f32 1.5, %v1841_v4 }
 0x372   : > { %v1843_v24 = vmul.f32 %v2239_v32, %v1842_v2 }
 0x374   : > { %v1847_v58 = vsel %vm1846_vm3, %v2239_v32, %v1843_v24 }
 0x375   : > { %v1855_v62 = vmul.f32 %v1847_v58, %v4113_v34  ;;  %v4173_v34 = vld [vmem:[%s4238_s8] ss:$0 sm:$0xff] }
 0x377   : > { %v1867_v42 = vmul.f32 %v4129_v5, %v1855_v62  ;;  %v2191_v5 = vld [vmem:[%s4239_s9] sm:$0xff] }
 0x378   : > { %2049 = vmatpush.bf16.msra.mxu2 %v2191_v5 }
 0x379   : > { %v1879_v48 = vadd.f32 %v4137_v28, %v1867_v42 }
 0x37b   : > { %v1883_v31 = vpack.c.bf16 %v1879_v48, %v1878_v53 }
 0x37d   : > { %2174 = vmatmul.msk.bf16.gmra.mxu1 %vm684_vm5, %v1883_v31 }
 0x380   : > { %v1914_v39 = vpop.f32.mrf.mxu1 }
 0x381   : > { %v1915_v28 = vadd.f32 %v4173_v34, %v1914_v39 }
 0x383   : > { %v1942_v9 = vmul.f32 0.044715, %v1915_v28  ;;  %v1934_v55 = vmul.f32 0.5, %v1915_v28 }
 0x385   : > { %v1950_v26 = vmul.f32 %v1942_v9, %v1915_v28 }
 0x387   : > { %v1958_v60 = vmul.f32 %v1950_v26, %v1915_v28 }
 0x388   : > { %v1916_v45 = vpop.f32.mrf.mxu1 }
 0x389   : > { %v1917_v49 = vadd.f32 %v4173_v34, %v1916_v45  ;;  %v1966_v52 = vadd.f32 %v1958_v60, %v1915_v28 }
 0x38b   : > { %v1943_v50 = vmul.f32 0.044715, %v1917_v49  ;;  %v1974_v40 = vmul.f32 0.7978846, %v1966_v52  ;;  %v1935_v41 = vmul.f32 0.5, %v1917_v49 }
 0x38d   : > { %v1951_v27 = vmul.f32 %v1943_v50, %v1917_v49  ;;  %2240 = vtanh.f32 %v1974_v40 }
 0x38f   : > { %v1959_v12 = vmul.f32 %v1951_v27, %v1917_v49 }
 0x391   : > { %v1967_v59 = vadd.f32 %v1959_v12, %v1917_v49 }
 0x393   : > { %v1975_v37 = vmul.f32 0.7978846, %v1967_v59  ;;  %v2241_v51 = vpop.eup %2240 }
 0x394   : > { %v1990_v10 = vadd.f32 1.0, %v2241_v51 }
 0x395   : > { %2242 = vtanh.f32 %v1975_v37 }
 0x396   : > { %v1998_v11 = vmul.f32 %v1990_v10, %v1934_v55 }
 0x39b   : > { %v2243_v7 = vpop.eup %2242 }
 0x39c   : > { %v1991_v35 = vadd.f32 1.0, %v2243_v7 }
 0x39d   : > { %v1919_v25 = vpop.f32.mrf.mxu1 }
 0x39e   : > { %v1920_v23 = vadd.f32 %v4173_v34, %v1919_v25  ;;  %v1999_v8 = vmul.f32 %v1991_v35, %v1935_v41 }
 0x3a0   : > { %v1944_v33 = vmul.f32 0.044715, %v1920_v23  ;;  %v2006_v0 = vpack.c.bf16 %v1999_v8, %v1998_v11  ;;  %v1936_v3 = vmul.f32 0.5, %v1920_v23 }
 0x3a2   : > { %v1952_v22 = vmul.f32 %v1944_v33, %v1920_v23  ;;  %2183 = vmatmul.msk.bf16.vlgmr.msra.gmra.mxu2 %vm588_vm2, %v2006_v0 }
 0x3a4   : > { %v1960_v19 = vmul.f32 %v1952_v22, %v1920_v23 }
 0x3a5   : > { %v1921_v14 = vpop.f32.mrf.mxu1 }
 0x3a6   : > { %v1922_v38 = vadd.f32 %v4173_v34, %v1921_v14  ;;  %v1968_v44 = vadd.f32 %v1960_v19, %v1920_v23 }
 0x3a8   : > { %v1945_v18 = vmul.f32 0.044715, %v1922_v38  ;;  %v1976_v13 = vmul.f32 0.7978846, %v1968_v44  ;;  %v1937_v17 = vmul.f32 0.5, %v1922_v38 }
 0x3aa   : > { %v1953_v1 = vmul.f32 %v1945_v18, %v1922_v38  ;;  %2244 = vtanh.f32 %v1976_v13 }
 0x3ac   : > { %v1961_v61 = vmul.f32 %v1953_v1, %v1922_v38  ;;  %v2221_v1 = vld [vmem:[%s4241_s11] ss:$0 sm:$0xff] }
 0x3ae   : > { %v1969_v54 = vadd.f32 %v1961_v61, %v1922_v38  ;;  %v4785_v61 = vld [vmem:[#allocation4_spill] sm:$0xff] }
 0x3b0   : > { %v1977_v6 = vmul.f32 0.7978846, %v1969_v54  ;;  %v2245_v46 = vpop.eup %2244 }
 0x3b1   : > { %v1992_v57 = vadd.f32 1.0, %v2245_v46 }
 0x3b2   : > { %2246 = vtanh.f32 %v1977_v6 }
 0x3b3   : > { %v2000_v47 = vmul.f32 %v1992_v57, %v1936_v3 }
 0x3b8   : > { %v2247_v20 = vpop.eup %2246 }
 0x3b9   : > { %v1993_v36 = vadd.f32 1.0, %v2247_v20 }
 0x3bb   : > { %v2001_v24 = vmul.f32 %v1993_v36, %v1937_v17  ;;  %v4788_v17 = vld [vmem:[#allocation12_spill] sm:$0xff] }
 0x3bd   : > { %v2007_v62 = vpack.c.bf16 %v2001_v24, %v2000_v47  ;;  %v4789_v24 = vld [vmem:[#allocation39_spill] sm:$0xff] }
 0x3bf   : > { %2184 = vmatmul.msk.bf16.gmra.mxu2 %vm588_vm2, %v2007_v62 }
 0x3c2   : > { %v1924_v63 = vpop.f32.mrf.mxu1 }
 0x3c3   : > { %v1925_v56 = vadd.f32 %v4173_v34, %v1924_v63 }
 0x3c5   : > { %v1946_v15 = vmul.f32 0.044715, %v1925_v56  ;;  %v1938_v39 = vmul.f32 0.5, %v1925_v56 }
 0x3c7   : > { %v1954_v43 = vmul.f32 %v1946_v15, %v1925_v56 }
 0x3c9   : > { %v1962_v21 = vmul.f32 %v1954_v43, %v1925_v56 }
 0x3ca   : > { %v1926_v32 = vpop.f32.mrf.mxu1 }
 0x3cb   : > { %v1927_v16 = vadd.f32 %v4173_v34, %v1926_v32  ;;  %v1970_v4 = vadd.f32 %v1962_v21, %v1925_v56  ;;  %v4786_v56 = vld [vmem:[#allocation5_spill] sm:$0xff]  ;;  %v4787_v21 = vld [vmem:[#allocation6_spill] sm:$0xff] }
 0x3cd   : > { %v1947_v2 = vmul.f32 0.044715, %v1927_v16  ;;  %v1978_v30 = vmul.f32 0.7978846, %v1970_v4  ;;  %v1939_v28 = vmul.f32 0.5, %v1927_v16 }
 0x3cf   : > { %v1955_v58 = vmul.f32 %v1947_v2, %v1927_v16  ;;  %2248 = vtanh.f32 %v1978_v30 }
 0x3d1   : > { %v1963_v42 = vmul.f32 %v1955_v58, %v1927_v16 }
 0x3d3   : > { %v1971_v53 = vadd.f32 %v1963_v42, %v1927_v16 }
 0x3d5   : > { %v1979_v48 = vmul.f32 0.7978846, %v1971_v53  ;;  %v2249_v31 = vpop.eup %2248  ;;  %v4790_v53 = vld [vmem:[#allocation86_spill] sm:$0xff] }
 0x3d6   : > { %v1994_v29 = vadd.f32 1.0, %v2249_v31 }
 0x3d7   : > { %2250 = vtanh.f32 %v1979_v48 }
 0x3d8   : > { %v2002_v26 = vmul.f32 %v1994_v29, %v1938_v39  ;;  %v4791_v39 = vld [vmem:[#allocation87_spill] sm:$0xff] }
 0x3dd   : > { %v2251_v5 = vpop.eup %2250 }
 0x3de   : > { %v1995_v9 = vadd.f32 1.0, %v2251_v5 }
 0x3e0   : > { %v2003_v60 = vmul.f32 %v1995_v9, %v1939_v28 }
 0x3e2   : > { %v2008_v45 = vpack.c.bf16 %v2003_v60, %v2002_v26 }
 0x3e4   : > { %2185 = vmatmul.msk.bf16.gmra.mxu2 %vm588_vm2, %v2008_v45  ;;  %v4792_v45 = vld [vmem:[#allocation36_spill] sm:$0xff] }
 0x3fa   : > { %v1929_v49 = vpop.f32.mrf.mxu1 }
 0x3fb   : > { %v1930_v52 = vadd.f32 %v4173_v34, %v1929_v49 }
 0x3fd   : > { %v1948_v50 = vmul.f32 0.044715, %v1930_v52  ;;  %v1940_v10 = vmul.f32 0.5, %v1930_v52 }
 0x3ff   : > { %v1956_v27 = vmul.f32 %v1948_v50, %v1930_v52 }
 0x401   : > { %v1964_v40 = vmul.f32 %v1956_v27, %v1930_v52 }
 0x402   : > { %v1931_v12 = vpop.f32.mrf.mxu1 }
 0x403   : > { %v1932_v25 = vadd.f32 %v4173_v34, %v1931_v12  ;;  %v1972_v23 = vadd.f32 %v1964_v40, %v1930_v52  ;;  %v2220_v34 = vld [vmem:[%s4240_s10] ss:$0 sm:$0xff] }
 0x405   : > { %v1949_v59 = vmul.f32 0.044715, %v1932_v25  ;;  %v1980_v37 = vmul.f32 0.7978846, %v1972_v23  ;;  %v1941_v7 = vmul.f32 0.5, %v1932_v25 }
 0x407   : > { %v1957_v33 = vmul.f32 %v1949_v59, %v1932_v25  ;;  %2252 = vtanh.f32 %v1980_v37 }
 0x409   : > { %v1965_v22 = vmul.f32 %v1957_v33, %v1932_v25 }
 0x40b   : > { %v1973_v51 = vadd.f32 %v1965_v22, %v1932_v25 }
 0x40d   : > { %v1981_v19 = vmul.f32 0.7978846, %v1973_v51  ;;  %v2253_v14 = vpop.eup %2252 }
 0x40e   : > { %v1996_v38 = vadd.f32 1.0, %v2253_v14 }
 0x40f   : > { %2254 = vtanh.f32 %v1981_v19 }
 0x410   : > { %v2004_v55 = vmul.f32 %v1996_v38, %v1940_v10 }
 0x415   : > { %v2255_v44 = vpop.eup %2254 }
 0x416   : > { %v1997_v18 = vadd.f32 1.0, %v2255_v44 }
 0x418   : > { %v2005_v41 = vmul.f32 %v1997_v18, %v1941_v7 }
 0x41a   : > { %v2009_v35 = vpack.c.bf16 %v2005_v41, %v2004_v55 }
 0x41c   : > { %2186 = vmatmul.msk.bf16.gmra.mxu2 %vm588_vm2, %v2009_v35 }
 0x425   : > { %v2051_v13 = vpop.f32.mrf.mxu2 }
 0x426   : > { %v2052_v11 = vadd.f32 %v2220_v34, %v2051_v13 }
 0x428   : > { %v2075_v8 = vmul.f32 %v2221_v1, %v2052_v11 }
 0x42a   : > { %v2083_v0 = vadd.f32 %v2075_v8, %v4785_v61 }
 0x42c   : > { %2091 = vst.msk [vmem:[%s4201_s25] sm:$0xff] %vm684_vm5, %v2083_v0 }
 0x42d   : > { %v2053_v54 = vpop.f32.mrf.mxu2 }
 0x42e   : > { %v2054_v63 = vadd.f32 %v2220_v34, %v2053_v54 }
 0x430   : > { %v2076_v6 = vmul.f32 %v2221_v1, %v2054_v63 }
 0x432   : > { %v2084_v15 = vadd.f32 %v2076_v6, %v4786_v56 }
 0x434   : > { %2092 = vst.msk [vmem:[%s4201_s25 + $0x8] sm:$0xff] %vm684_vm5, %v2084_v15 }
 0x442   : > { %v2056_v46 = vpop.f32.mrf.mxu2 }
 0x443   : > { %v2057_v43 = vadd.f32 %v2220_v34, %v2056_v46 }
 0x445   : > { %v2077_v57 = vmul.f32 %v2221_v1, %v2057_v43 }
 0x447   : > { %v2085_v20 = vadd.f32 %v2077_v57, %v4787_v21 }
 0x449   : > { %2093 = vst.msk [vmem:[%s4201_s25 + $0x10] sm:$0xff] %vm684_vm5, %v2085_v20 }
 0x44a   : > { %v2058_v32 = vpop.f32.mrf.mxu2 }
 0x44b   : > { %v2059_v3 = vadd.f32 %v2220_v34, %v2058_v32 }
 0x44d   : > { %v2078_v16 = vmul.f32 %v2221_v1, %v2059_v3 }
 0x44f   : > { %v2086_v36 = vadd.f32 %v2078_v16, %v4788_v17 }
 0x451   : > { %2094 = vst.msk [vmem:[%s4201_s25 + $0x18] sm:$0xff] %vm684_vm5, %v2086_v36 }
 0x467   : > { %v2061_v4 = vpop.f32.mrf.mxu2 }
 0x468   : > { %v2062_v2 = vadd.f32 %v2220_v34, %v2061_v4 }
 0x46a   : > { %v2079_v47 = vmul.f32 %v2221_v1, %v2062_v2 }
 0x46c   : > { %v2087_v58 = vadd.f32 %v2079_v47, %v4789_v24 }
 0x46e   : > { %2095 = vst.msk [vmem:[%s4201_s25 + $0x20] sm:$0xff] %vm684_vm5, %v2087_v58 }
 0x46f   : > { %v2063_v62 = vpop.f32.mrf.mxu2 }
 0x470   : > { %v2064_v30 = vadd.f32 %v2220_v34, %v2063_v62 }
 0x472   : > { %v2080_v42 = vmul.f32 %v2221_v1, %v2064_v30 }
 0x474   : > { %v2088_v48 = vadd.f32 %v2080_v42, %v4790_v53 }
 0x476   : > { %2096 = vst.msk [vmem:[%s4201_s25 + $0x28] sm:$0xff] %vm684_vm5, %v2088_v48 }
 0x49f   : > { %v2066_v31 = vpop.f32.mrf.mxu2 }
 0x4a0   : > { %v2067_v29 = vadd.f32 %v2220_v34, %v2066_v31 }
 0x4a2   : > { %v2081_v5 = vmul.f32 %v2221_v1, %v2067_v29 }
 0x4a4   : > { %v2089_v28 = vadd.f32 %v2081_v5, %v4791_v39 }
 0x4a6   : > { %2097 = vst.msk [vmem:[%s4201_s25 + $0x30] sm:$0xff] %vm684_vm5, %v2089_v28 }
 0x4a7   : > { %v2068_v9 = vpop.f32.mrf.mxu2 }
 0x4a8   : > { %v2069_v26 = vadd.f32 %v2220_v34, %v2068_v9 }
 0x4aa   : > { %v2082_v60 = vmul.f32 %v2221_v1, %v2069_v26 }
 0x4ac   : > { %v2090_v49 = vadd.f32 %v2082_v60, %v4792_v45 }
 0x4ae   : > { %2098 = vst.msk [vmem:[%s4201_s25 + $0x38] sm:$0xff] %vm684_vm5, %v2090_v49 }
 0x4af PF: > { %s22_s21 = sadd.s32 1, %s2272_s21  }
 0x4b0   : > { %p19_p4 = scmp.ge.s32.totalorder %s22_s21, 4  }
 0x4b2   :  { %21 = sbr.rel (!%p19_p4) target bundleno = 1 (0x1), region = 100 }

// kernel: encoder_forward.3
= control target key start
LH: loop header
LB: loop body
LE: loop exit
PB: predicated region body
PF: predicated region fallthrough
CT: control target
= control target key end

     0   :  { %s2409_s0 = inlined_call_operand.vmem [shape: f32[2,4,4,32], index: 0, kind: input, shape index: {}]   ;;  %s2410_s1 = inlined_call_operand.vmem [shape: f32[128,16], index: 1, kind: input, shape index: {}]   ;;  %s2411_s2 = inlined_call_operand.vmem [shape: f32[1,16], index: 2, kind: input, shape index: {}]   ;;  %s2412_s3 = inlined_call_operand.vmem [shape: f32[1,49,16], index: 3, kind: input, shape index: {}]   ;;  %s2413_s4 = inlined_call_operand.vmem [shape: f32[1,1,16], index: 4, kind: input, shape index: {}]   ;;  %s2414_s5 = inlined_call_operand.vmem [shape: f32[1,1,16], index: 5, kind: input, shape index: {}]   ;;  %s2415_s6 = inlined_call_operand.vmem [shape: f32[1,1,16], index: 6, kind: input, shape index: {}]   ;;  %s2416_s7 = inlined_call_operand.vmem [shape: bf16[1,16,64], index: 7, kind: input, shape index: {}]   ;;  %s2417_s8 = inlined_call_operand.vmem [shape: f32[1,1,64], index: 8, kind: input, shape index: {}]   ;;  %s2418_s9 = inlined_call_operand.vmem [shape: bf16[1,64,16], index: 9, kind: input, shape index: {}]   ;;  %s2419_s10 = inlined_call_operand.vmem [shape: f32[1,1,16], index: 10, kind: input, shape index: {}]   ;;  %s2420_s11 = inlined_call_operand.vmem [shape: f32[1,1,16], index: 11, kind: input, shape index: {}]   ;;  %s2421_s12 = inlined_call_operand.hbm [shape: f32[2,4,4,16], index: 12, kind: output, shape index: {}]  }
   0x1   :  { %2441 = sst [smem:[#allocation24_spill]] %s2409_s0 }
   0x2   :  { %2442 = sst [smem:[#allocation25_spill]] %s2410_s1 }
   0x3   :  { %17 = vsyncpa [#allocation5], 0 }
   0x4   :  { %19 = vsyncpa [#allocation5 + $0x1], 0  ;;  %s1751_s21 = smov 0   ;;  %s1753_s22 = smov 0  }
   0x5   :  { %s1755_s23 = smov 0   ;;  %s1757_s24 = smov 0  }
   0x6 LB: > { %s1772_s25 = sadd.s32 4294967295, %s1676_s24   ;;  %s1492_s26 = sadd.s32 4294967294, %s1676_s24   ;;  %s1676_s24 = sphi %s1757_s24, %s2485_s24   ;;  %s1672_s23 = sphi %s1755_s23, %s2484_s23   ;;  %s1668_s22 = sphi %s1753_s22, %s2483_s22   ;;  %s1664_s21 = sphi %s1751_s21, %s2482_s21  }
   0x7   : > { %s1776_s27 = sadd.s32 1, %s1676_s24   ;;  %s289_s28 = sadd.s32 1, %s1672_s23 }
   0x8   : > { %s286_s29 = ssub.s32 %s1676_s24, %s1776_s27  ;;  %p299_p0 = scmp.ne.s32.totalorder %s1672_s23, %s1668_s22 }
   0x9   : > { %p287_p1 = scmp.eq.s32.totalorder %s286_s29, 0  ;;  %p300_p2 = scmp.eq.s32.totalorder %s1772_s25, 1 }
   0xa   : > { %p305_p3 = scmp.ne.s32.totalorder %s1668_s22, %s1664_s21  ;;  %p306_p4 = scmp.eq.s32.totalorder %s1492_s26, 1 }
   0xb   : > { %s1787_s30 = scalar_select %p287_p1, %s1672_s23, %s289_s28  }
   0xc   : > { %p1789_p5 = por %p300_p2, %p299_p0  ;;  %p1793_p6 = por %p306_p4, %p305_p3 }
   0xd   : > { %p1495_p7 = scmp.ge.s32.totalorder %s1676_s24, 1  ;;  %p365_p8 = scmp.lt.s32.totalorder %s1676_s24, 3 }
   0xf   : > { %p366_p9 = pnand %p1495_p7, %p365_p8 }
  0x11   : > { %369 = sbr.rel (%p366_p9) target bundleno = 1042 (0x412), region = 68 }
  0x16   : > { %p407_p10 = scmp.lt.s32.totalorder %s1772_s25, 1  ;;  %vm413_vm0 = vcmask 258048   ;;  %v1678_v0 = vmov 0.0   ;;  %vm424_vm1 = vcmask 257024   ;;  %s2445_s0 = sld [smem:[#allocation24_spill]]  ;;  %vm493_vm2 = vcmask 261120  }
  0x17   : > { %417 = vst.msk [vmem:[#allocation2 + $0x18] sm:$0x1f] %vm413_vm0, %v1678_v0  ;;  %s1679_s20 = smov 32   ;;  %s2440_s26 = smov 64   ;;  %vm498_vm3 = vcmask 523264   ;;  %vm503_vm4 = vcmask 785408  }
  0x18   : > { %s408_s15 = scalar_select %p407_p10, %s1772_s25, 1  ;;  %414 = vst.msk [vmem:[#allocation2] sm:$0x1f] %vm413_vm0, %v1678_v0  ;;  %vm566_vm5 = vcmask 130048   ;;  %vm568_vm6 = vcmask 123904   ;;  %vm595_vm7 = vcmask 125952  }
  0x19   : > { %415 = vst.msk [vmem:[#allocation2 + $0x8] sm:$0x1f] %vm413_vm0, %v1678_v0  ;;  %s1681_s28 = smov 96   ;;  %s2446_s1 = sld [smem:[#allocation25_spill]]  ;;  %v1596_v63 = vld [vmem:[%s2411_s2] ss:$0 sm:$0xff] }
  0x1a   : > { %s1526_s16 = sshll.u32 %s408_s15, 4  ;;  %416 = vst.msk [vmem:[#allocation2 + $0x10] sm:$0x1f] %vm413_vm0, %v1678_v0  ;;  %s404_s29 = sand.u32 1, %s1668_s22  }
  0x1b   : > { %418 = vst.msk [vmem:[#allocation2 + $0x20] sm:$0x1f] %vm413_vm0, %v1678_v0  ;;  %s1496_s17 = sshll.u32 %s404_s29, 4  ;;  %s1532_s18 = sshll.u32 %s1772_s25, 4 }
  0x1c   : > { %s411_s19 = scalar_lea.vmem %s2445_s0, %s1526_s16  ;;  %578 = vst.msk [vmem:[#allocation3 + $0x50] sm:$0xff] %vm566_vm5, %v1678_v0  ;;  %s1426_s0 = scalar_lea.hbm %s2421_s12, %s1532_s18 }
  0x1d   : > { %v421_v1 = vld [vmem:[%s411_s19 + $0x8] sm:$0xf]  ;;  %v420_v2 = vld [vmem:[%s411_s19 + $0x4] sm:$0xf]  ;;  %v422_v3 = vld [vmem:[%s411_s19 + $0xc] sm:$0xf] }
  0x1e   : > { %427 = vst.msk [vmem:[#allocation2 + $0x19] sm:$0xf] %vm424_vm1, %v421_v1  ;;  %v419_v4 = vld [vmem:[%s411_s19] sm:$0xf]  ;;  %s406_s19 = scalar_lea.vmem [#allocation4], %s1496_s17  ;;  %s1429_s15 = sshll.u32 %s1426_s0, 4  ;;  %s1430_s15 = int_to_ptr.hbm [resolvable:$true] %s1429_s15 }
  0x1f   : > { %426 = vst.msk [vmem:[#allocation2 + $0x11] sm:$0xf] %vm424_vm1, %v420_v2  ;;  %v433_v5 = vld [vmem:[#allocation2 + $0x1] sm:$0xf]  ;;  %v523_v17 = vld [vmem:[%s2446_s1 + $0x78] sm:$0xff]  ;;  %v522_v18 = vld [vmem:[%s2446_s1 + $0x70] sm:$0xff] }
  0x20   : > { %428 = vst.msk [vmem:[#allocation2 + $0x21] sm:$0xf] %vm424_vm1, %v422_v3  ;;  %449 = vrot.lane.b32.xlu2 %v433_v5, %s1679_s20  ;;  %1533 = vmatpush.msra.mxu3 %v523_v17  ;;  %v521_v19 = vld [vmem:[%s2446_s1 + $0x68] sm:$0xff]  ;;  %v520_v20 = vld [vmem:[%s2446_s1 + $0x60] sm:$0xff]  ;;  %v519_v21 = vld [vmem:[%s2446_s1 + $0x58] sm:$0xff]  ;;  %s1415_s25 = scalar_lea.sflag [#allocation5], %s404_s29 }
  0x21   : > { %425 = vst.msk [vmem:[#allocation2 + $0x9] sm:$0xf] %vm424_vm1, %v419_v4  ;;  %543 = vmatpush.msra.mxu0 %v523_v17  ;;  %v518_v22 = vld [vmem:[%s2446_s1 + $0x50] sm:$0xff]  ;;  %v517_v23 = vld [vmem:[%s2446_s1 + $0x48] sm:$0xff]  ;;  %v516_v24 = vld [vmem:[%s2446_s1 + $0x40] sm:$0xff]  ;;  %s1628_s16 = sshra.s32 %s1430_s15, 4  ;;  %s1629_s16 = int_to_ptr.hbm [resolvable:$true] %s1628_s16 }
  0x22   : > { %1534 = vmatpush.msra.mxu3 %v522_v18  ;;  %v515_v25 = vld [vmem:[%s2446_s1 + $0x38] sm:$0xff]  ;;  %v514_v26 = vld [vmem:[%s2446_s1 + $0x30] sm:$0xff]  ;;  %v513_v27 = vld [vmem:[%s2446_s1 + $0x28] sm:$0xff]  ;;  %579 = vst.msk [vmem:[#allocation3 + $0x58] sm:$0x3] %vm568_vm6, %v1678_v0  ;;  %s1630_s17 = scalar_lea.hbm %s1629_s16, 16  ;;  %p1635_p0 = scmp.lt.s32.totalorder %s1629_s16, %s2421_s12 }
  0x23   : > { %544 = vmatpush.msra.mxu0 %v522_v18  ;;  %v512_v28 = vld [vmem:[%s2446_s1 + $0x20] sm:$0xff]  ;;  %v511_v29 = vld [vmem:[%s2446_s1 + $0x18] sm:$0xff]  ;;  %v510_v30 = vld [vmem:[%s2446_s1 + $0x10] sm:$0xff]  ;;  %580 = vst.msk [vmem:[#allocation3 + $0x60] sm:$0xff] %vm566_vm5, %v1678_v0  ;;  %p1631_p11 = scmp.ne.s32.totalorder %s1629_s16, %s1630_s17 }
  0x24   : > { %1535 = vmatpush.msra.mxu3 %v521_v19  ;;  %v509_v31 = vld [vmem:[%s2446_s1 + $0x8] sm:$0xff]  ;;  %v508_v32 = vld [vmem:[%s2446_s1] sm:$0xff]  ;;  %581 = vst.msk [vmem:[#allocation3 + $0x68] sm:$0x3] %vm568_vm6, %v1678_v0 }
  0x25   : > { %v439_v6 = vld [vmem:[#allocation2 + $0x18] sm:$0xf]  ;;  %545 = vmatpush.msra.mxu0 %v521_v19  ;;  %v429_v49 = vld [vmem:[#allocation2] sm:$0xf]  ;;  %567 = vst.msk [vmem:[#allocation3] sm:$0xff] %vm566_vm5, %v1678_v0  ;;  %p1632_p12 = pnand %p1631_p11, %p1789_p5 }
  0x26   : > { %469 = vrot.lane.b32.xlu1 %v439_v6, %s2440_s26  ;;  %v435_v7 = vld [vmem:[#allocation2 + $0x11] sm:$0xf]  ;;  %v436_v10 = vld [vmem:[#allocation2 + $0x19] sm:$0xf]  ;;  %1536 = vmatpush.msra.mxu3 %v520_v20  ;;  %569 = vst.msk [vmem:[#allocation3 + $0x8] sm:$0x3] %vm568_vm6, %v1678_v0 }
  0x27   : > { %453 = vrot.lane.b32.xlu0 %v435_v7, %s1679_s20  ;;  %v440_v9 = vld [vmem:[#allocation2 + $0x20] sm:$0xf]  ;;  %v443_v13 = vld [vmem:[#allocation2 + $0x19] sm:$0xf]  ;;  %v442_v14 = vld [vmem:[#allocation2 + $0x11] sm:$0xf]  ;;  %546 = vmatpush.msra.mxu0 %v520_v20  ;;  %p1633_p13 = pneg %p1632_p12 }
  0x28   : > { %v434_v8 = vld [vmem:[#allocation2 + $0x9] sm:$0xf]  ;;  %v444_v12 = vld [vmem:[#allocation2 + $0x21] sm:$0xf]  ;;  %v438_v16 = vld [vmem:[#allocation2 + $0x10] sm:$0xf]  ;;  %1537 = vmatpush.msra.mxu3 %v519_v21 }
  0x29   : > { %451 = vrot.lane.b32.xlu2 %v434_v8, %s1679_s20  ;;  %v437_v11 = vld [vmem:[#allocation2 + $0x8] sm:$0xf]  ;;  %547 = vmatpush.msra.mxu0 %v519_v21  ;;  %v432_v39 = vld [vmem:[#allocation2 + $0x18] sm:$0xf]  ;;  %v431_v40 = vld [vmem:[#allocation2 + $0x10] sm:$0xf] }
  0x2a   : > { %v441_v15 = vld [vmem:[#allocation2 + $0x9] sm:$0xf]  ;;  %1538 = vmatpush.msra.mxu3 %v518_v22  ;;  %570 = vst.msk [vmem:[#allocation3 + $0x10] sm:$0xff] %vm566_vm5, %v1678_v0  ;;  %v1938_v8 = vld [vmem:[%s2412_s3] sm:$0xff]  ;;  %v1965_v19 = vld [vmem:[%s2412_s3 + $0x28] sm:$0xff] }
  0x2b   : > { %548 = vmatpush.msra.mxu0 %v518_v22  ;;  %v430_v52 = vld [vmem:[#allocation2 + $0x8] sm:$0xf]  ;;  %571 = vst.msk [vmem:[#allocation3 + $0x18] sm:$0x3] %vm568_vm6, %v1678_v0 }
  0x2c   : > { %1539 = vmatpush.msra.mxu3 %v517_v23  ;;  %572 = vst.msk [vmem:[#allocation3 + $0x20] sm:$0xff] %vm566_vm5, %v1678_v0  ;;  %v602_v6 = vld [vmem:[%s2412_s3 + $0x10] sm:$0xff] }
  0x2d   : > { %549 = vmatpush.msra.mxu0 %v517_v23  ;;  %573 = vst.msk [vmem:[#allocation3 + $0x28] sm:$0x3] %vm568_vm6, %v1678_v0  ;;  %v607_v17 = vld [vmem:[#allocation3] sm:$0xf]  ;;  %v1970_v21 = vperm.slane %v602_v6, 6 }
  0x2e   : > { %471 = vrot.lane.b32.xlu1 %v440_v9, %s2440_s26  ;;  %1540 = vmatpush.msra.mxu3 %v516_v24  ;;  %574 = vst.msk [vmem:[#allocation3 + $0x30] sm:$0xff] %vm566_vm5, %v1678_v0  ;;  %v603_v9 = vld [vmem:[%s2412_s3 + $0x18] sm:$0xff] }
  0x2f   : > { %455 = vrot.lane.b32.xlu0 %v436_v10, %s1679_s20  ;;  %550 = vmatpush.msra.mxu0 %v516_v24  ;;  %575 = vst.msk [vmem:[#allocation3 + $0x38] sm:$0x3] %vm568_vm6, %v1678_v0  ;;  %v604_v10 = vld [vmem:[%s2412_s3 + $0x20] sm:$0xff]  ;;  %v1972_v22 = vperm.slane %v603_v9, 5  ;;  %v1977_v24 = vperm.slane %v1965_v19, 2 }
  0x30   : > { %1541 = vmatpush.msra.mxu3 %v515_v25  ;;  %576 = vst.msk [vmem:[#allocation3 + $0x40] sm:$0xff] %vm566_vm5, %v1678_v0  ;;  %v1974_v23 = vperm.slane %v604_v10, 4 }
  0x31   : > { %465 = vrot.lane.b32.xlu2 %v437_v11, %s2440_s26  ;;  %551 = vmatpush.msra.mxu0 %v515_v25  ;;  %577 = vst.msk [vmem:[#allocation3 + $0x48] sm:$0x3] %vm568_vm6, %v1678_v0  ;;  %v608_v18 = vld [vmem:[#allocation3 + $0x10] sm:$0xf]  ;;  %v1980_v25 = vperm.slane %v1965_v19, 3 }
  0x32   : > { %1542 = vmatpush.msra.mxu3 %v514_v26  ;;  %582 = vst.msk [vmem:[#allocation3 + $0x70] sm:$0xff] %vm566_vm5, %v1678_v0 }
  0x33   : > { %552 = vmatpush.msra.mxu0 %v514_v26  ;;  %583 = vst.msk [vmem:[#allocation3 + $0x78] sm:$0x3] %vm568_vm6, %v1678_v0  ;;  %v1982_v26 = vperm.slane %v602_v6, 0 }
  0x34   : > { %1543 = vmatpush.msra.mxu3 %v513_v27  ;;  %584 = vst.msk [vmem:[#allocation3 + $0x80] sm:$0xff] %vm566_vm5, %v1678_v0 }
  0x35   : > { %553 = vmatpush.msra.mxu0 %v513_v27  ;;  %585 = vst.msk [vmem:[#allocation3 + $0x88] sm:$0x3] %vm568_vm6, %v1678_v0  ;;  %v1984_v27 = vperm.slane %v602_v6, 7 }
  0x36   : > { %487 = vrot.lane.b32.xlu1 %v444_v12, %s1681_s28  ;;  %1544 = vmatpush.msra.mxu3 %v512_v28  ;;  %586 = vst.msk [vmem:[#allocation3 + $0x90] sm:$0xff] %vm566_vm5, %v1678_v0  ;;  %v1950_v12 = vperm.slane %v602_v6, 5 }
  0x37   : > { %485 = vrot.lane.b32.xlu0 %v443_v13, %s1681_s28  ;;  %554 = vmatpush.msra.mxu0 %v512_v28  ;;  %587 = vst.msk [vmem:[#allocation3 + $0x98] sm:$0x3] %vm568_vm6, %v1678_v0  ;;  %v1927_v0 = vld [vmem:[%s2412_s3 + $0x8] sm:$0xff]  ;;  %v1953_v13 = vperm.slane %v1938_v8, 0  ;;  %v1986_v28 = vperm.slane %v603_v9, 6 }
  0x38   : > { %1545 = vmatpush.msra.mxu3 %v511_v29  ;;  %2449 = vst [vmem:[#allocation9_spill] sm:$0xff] %v1938_v8  ;;  %v1948_v11 = vperm.slane %v1927_v0, 6  ;;  %v1968_v20 = vperm.slane %v1927_v0, 7 }
  0x39   : > { %483 = vrot.lane.b32.xlu2 %v442_v14, %s1681_s28  ;;  %555 = vmatpush.msra.mxu0 %v511_v29  ;;  %v1956_v14 = vperm.slane %v1938_v8, 7  ;;  %2450 = vst [vmem:[#allocation10_spill] sm:$0xff] %v1965_v19  ;;  %v1988_v29 = vperm.slane %v604_v10, 5 }
  0x3a   : > { %1546 = vmatpush.msra.mxu3 %v510_v30 }
  0x3b   : > { %556 = vmatpush.msra.mxu0 %v510_v30  ;;  %v618_v30 = vmul.f32 %v1953_v13, %v607_v17 }
  0x3c   : > { %1547 = vmatpush.msra.mxu3 %v509_v31 }
  0x3d   : > { %557 = vmatpush.msra.mxu0 %v509_v31  ;;  %v627_v31 = vmul.f32 %v1956_v14, %v608_v18 }
  0x3e   : > { %481 = vrot.lane.b32.xlu1 %v441_v15, %s1681_s28  ;;  %1548 = vmatpush.msra.mxu3 %v508_v32  ;;  %v1958_v15 = vperm.slane %v603_v9, 4  ;;  %s1634_s28 = scalar_lea.hbm %s2421_s12, 32 }
  0x3f   : > { %467 = vrot.lane.b32.xlu0 %v438_v16, %s2440_s26  ;;  %558 = vmatpush.msra.mxu0 %v508_v32  ;;  %v1960_v16 = vperm.slane %v604_v10, 3  ;;  %v1992_v32 = vperm.slane %v602_v6, 1  ;;  %s1427_s26 = sshll.u32 %s406_s19, 4  ;;  %p1636_p1 = scmp.lt.s32.totalorder %s1634_s28, %s1630_s17  ;;  %s1428_s26 = int_to_ptr.vmem [resolvable:$true] %s1427_s26 }
  0x41   : > { %p1637_p2 = por %p1636_p1, %p1635_p0 }
  0x43   : > { %p1638_p3 = pnand %p1637_p2, %p1633_p13 }
  0x7a   : > { %v450_v33 = vpop.permute.xlu2 %449 }
  0x7b   : > { %v494_v51 = vsel %vm493_vm2, %v429_v49, %v450_v33  ;;  %v1994_v33 = vperm.slane %v603_v9, 0  ;;  %v2022_v49 = vperm.slane %v1965_v19, 6 }
  0x7d   : > { %2457 = vst [vmem:[#allocation17_spill] sm:$0xff] %v2022_v49 }
  0x83   : > { %v452_v36 = vpop.permute.xlu2 %451 }
  0x84   : > { %v495_v56 = vsel %vm493_vm2, %v430_v52, %v452_v36  ;;  %v609_v36 = vld [vmem:[#allocation3 + $0x20] sm:$0xf]  ;;  %v2029_v52 = vperm.slane %v602_v6, 4 }
  0x86   : > { %2460 = vst [vmem:[#allocation20_spill] sm:$0xff] %v2029_v52 }
  0x8b   : > { %v466_v43 = vpop.permute.xlu2 %465 }
  0x8c   : > { %v499_v53 = vsel %vm498_vm3, %v494_v51, %v466_v43  ;;  %v2014_v43 = vperm.slane %v602_v6, 3  ;;  %v2027_v51 = vperm.slane %v1965_v19, 0 }
  0x8e   : > { %2455 = vst [vmem:[#allocation15_spill] sm:$0xff] %v2014_v43 }
  0x8f   : > { %2459 = vst [vmem:[#allocation19_spill] sm:$0xff] %v2027_v51 }
  0x93   : > { %v484_v55 = vpop.permute.xlu2 %483 }
  0x98   : > { %v470_v34 = vpop.permute.xlu1 %469 }
  0x99   : > { %v454_v35 = vpop.permute.xlu0 %453 }
  0x9a   : > { %v496_v42 = vsel %vm493_vm2, %v431_v40, %v454_v35  ;;  %v1998_v35 = vperm.slane %v604_v10, 6  ;;  %v2007_v40 = vperm.slane %v604_v10, 0 }
  0x9b   : > { %v501_v48 = vsel %vm498_vm3, %v496_v42, %v470_v34  ;;  %v1996_v34 = vperm.slane %v603_v9, 7  ;;  %v2012_v42 = vperm.slane %v604_v10, 7 }
  0x9c   : > { %2453 = vst [vmem:[#allocation13_spill] sm:$0xff] %v2007_v40 }
  0x9d   : > { %2454 = vst [vmem:[#allocation14_spill] sm:$0xff] %v2012_v42 }
  0xa0   : > { %v472_v37 = vpop.permute.xlu1 %471 }
  0xa1   : > { %v456_v38 = vpop.permute.xlu0 %455 }
  0xa2   : > { %v497_v41 = vsel %vm493_vm2, %v432_v39, %v456_v38  ;;  %v2003_v38 = vperm.slane %v602_v6, 2  ;;  %v2005_v39 = vperm.slane %v603_v9, 1  ;;  %v2046_v6 = vperm.slane %v1938_v8, 2 }
  0xa3   : > { %v502_v45 = vsel %vm498_vm3, %v497_v41, %v472_v37  ;;  %v2001_v37 = vperm.slane %v1965_v19, 4  ;;  %v2010_v41 = vperm.slane %v1965_v19, 5 }
  0xa4   : > { %2451 = vst [vmem:[#allocation11_spill] sm:$0xff] %v2003_v38 }
  0xa5   : > { %2452 = vst [vmem:[#allocation12_spill] sm:$0xff] %v2005_v39 }
  0xa8   : > { %v488_v44 = vpop.permute.xlu1 %487 }
  0xa9   : > { %v507_v46 = vsel %vm503_vm4, %v502_v45, %v488_v44  ;;  %v486_v47 = vpop.permute.xlu0 %485  ;;  %v2016_v44 = vperm.slane %v603_v9, 2  ;;  %v619_v45 = vmul.f32 %v1953_v13, %v608_v18 }
  0xaa   : > { %538 = vst [vmem:[#allocation1 + $0x11] ss:$2 sm:$0xff] %v507_v46  ;;  %v506_v50 = vsel %vm503_vm4, %v501_v48, %v486_v47  ;;  %v628_v46 = vmul.f32 %v1956_v14, %v609_v36  ;;  %v631_v47 = vadd.f32 %v627_v31, %v618_v30  ;;  %v636_v48 = vmul.f32 %v1948_v11, %v609_v36 }
  0xab   : > { %536 = vst [vmem:[#allocation1 + $0x10] ss:$2 sm:$0xff] %v506_v50  ;;  %v2024_v50 = vperm.slane %v604_v10, 1  ;;  %v2052_v30 = vperm.slane %v1927_v0, 1 }
  0xac   : > { %2456 = vst [vmem:[#allocation16_spill] sm:$0xff] %v2016_v44 }
  0xad   : > { %2458 = vst [vmem:[#allocation18_spill] sm:$0xff] %v2024_v50 }
  0xb0   : > { %v482_v54 = vpop.permute.xlu1 %481 }
  0xb1   : > { %v468_v57 = vpop.permute.xlu0 %467  ;;  %v504_v58 = vsel %vm503_vm4, %v499_v53, %v482_v54  ;;  %v2031_v53 = vperm.slane %v603_v9, 3  ;;  %v2033_v54 = vperm.slane %v604_v10, 2 }
  0xb2   : > { %v500_v59 = vsel %vm498_vm3, %v495_v56, %v468_v57  ;;  %532 = vst [vmem:[#allocation1] ss:$2 sm:$0xff] %v504_v58  ;;  %v540_v60 = vld.sshfl [vmem:[#allocation1 + $0x10] sm:$0xff pattern:$0x75316420]  ;;  %v2036_v57 = vperm.slane %v1965_v19, 7 }
  0xb3   : > { %v505_v61 = vsel %vm503_vm4, %v500_v59, %v484_v55  ;;  %562 = vmatmul.f32.vlgmr.msra.gmra.mxu3 %v540_v60  ;;  %2461 = vst [vmem:[#allocation21_spill] sm:$0xff] %v2031_v53  ;;  %v614_v55 = vld [vmem:[#allocation3 + $0x70] sm:$0xf]  ;;  %v615_v56 = vld [vmem:[#allocation3 + $0x80] sm:$0xf]  ;;  %v620_v59 = vmul.f32 %v1953_v13, %v609_v36 }
  0xb4   : > { %534 = vst [vmem:[#allocation1 + $0x1] ss:$2 sm:$0xff] %v505_v61  ;;  %v616_v58 = vld [vmem:[#allocation3 + $0x90] sm:$0xf]  ;;  %v680_v60 = vld [vmem:[#allocation3 + $0x1] sm:$0xf]  ;;  %v657_v10 = vmul.f32 %v1958_v15, %v614_v55  ;;  %v665_v17 = vmul.f32 %v1960_v16, %v614_v55  ;;  %v666_v18 = vmul.f32 %v1960_v16, %v615_v56  ;;  %v673_v31 = vmul.f32 %v1977_v24, %v614_v55 }
  0xb5   : > { %2462 = vst [vmem:[#allocation22_spill] sm:$0xff] %v2033_v54  ;;  %v2040_v61 = vperm.slane %v1938_v8, 1  ;;  %v2056_v36 = vmul.f32 %v1977_v24, %v615_v56  ;;  %v2070_v54 = vperm.slane %v1938_v8, 3 }
  0xb6   : > { %2463 = vst [vmem:[#allocation23_spill] sm:$0xff] %v2036_v57 }
  0xbb   : > { %v539_v62 = vld.sshfl [vmem:[#allocation1] sm:$0xff pattern:$0x75316420] }
  0xbc   : > { %559 = vmatmul.f32.vlgmr.msra.gmra.mxu0 %v539_v62  ;;  %v632_v62 = vadd.f32 %v628_v46, %v619_v45  ;;  %v2059_v45 = vmul.f32 %v1977_v24, %v616_v58  ;;  %v691_v46 = vmul.f32 %v2040_v61, %v680_v60 }
 0x136   : > { %v563_v1 = vpop.f32.mrf.mxu3 }
 0x137   : > { %v1916_v2 = vadd.f32 %v1596_v63, %v563_v1  ;;  %v681_v1 = vld [vmem:[#allocation3 + $0x11] sm:$0xf] }
 0x139   : > { %2447 = vst [vmem:[#allocation7_spill] sm:$0xff] %v1916_v2  ;;  %v591_v3 = vrot.slane %v1916_v2, 4  ;;  %v560_v4 = vpop.f32.mrf.mxu0 }
 0x13a   : > { %598 = vst.msk [vmem:[#allocation3 + $0x53] sm:$0xf] %vm595_vm7, %v1916_v2  ;;  %v1921_v5 = vadd.f32 %v1596_v63, %v560_v4  ;;  %v640_v63 = vadd.f32 %v636_v48, %v631_v47  ;;  %v2043_v4 = vperm.slane %v1927_v0, 0  ;;  %v692_v48 = vmul.f32 %v2040_v61, %v681_v1 }
 0x13b   : > { %599 = vst.msk [vmem:[#allocation3 + $0x63] sm:$0xf] %vm595_vm7, %v591_v3  ;;  %v682_v3 = vld [vmem:[#allocation3 + $0x21] sm:$0xf] }
 0x13c   : > { %2448 = vst [vmem:[#allocation8_spill] sm:$0xff] %v1921_v5  ;;  %v590_v7 = vrot.slane %v1921_v5, 4  ;;  %v2064_v2 = vmul.f32 %v2040_v61, %v682_v3  ;;  %v701_v42 = vmul.f32 %v2043_v4, %v682_v3 }
 0x13d   : > { %596 = vst.msk [vmem:[#allocation3 + $0x33] sm:$0xf] %vm595_vm7, %v1921_v5  ;;  %v2067_v5 = vmul.f32 %v2043_v4, %v681_v1 }
 0x13e   : > { %597 = vst.msk [vmem:[#allocation3 + $0x43] sm:$0xf] %vm595_vm7, %v590_v7 }
 0x141   : > { %v612_v47 = vld [vmem:[#allocation3 + $0x50] sm:$0xf] }
 0x142   : > { %v613_v53 = vld [vmem:[#allocation3 + $0x60] sm:$0xf]  ;;  %v639_v51 = vmul.f32 %v1948_v11, %v612_v47  ;;  %v647_v43 = vmul.f32 %v1950_v12, %v612_v47  ;;  %v685_v40 = vld [vmem:[#allocation3 + $0x51] sm:$0xf] }
 0x143   : > { %v648_v8 = vmul.f32 %v1950_v12, %v613_v53 }
 0x144   : > { %v610_v7 = vld [vmem:[#allocation3 + $0x30] sm:$0xf] }
 0x145   : > { %v611_v9 = vld [vmem:[#allocation3 + $0x40] sm:$0xf]  ;;  %v621_v55 = vmul.f32 %v1953_v13, %v610_v7  ;;  %v629_v56 = vmul.f32 %v1956_v14, %v610_v7  ;;  %v637_v60 = vmul.f32 %v1948_v11, %v610_v7  ;;  %v645_v19 = vmul.f32 %v1950_v12, %v610_v7 }
 0x146   : > { %v630_v58 = vmul.f32 %v1956_v14, %v611_v9  ;;  %v638_v52 = vmul.f32 %v1948_v11, %v611_v9  ;;  %v646_v57 = vmul.f32 %v1950_v12, %v611_v9  ;;  %v654_v1 = vmul.f32 %v1958_v15, %v611_v9 }
 0x147   : > { %v633_v50 = vadd.f32 %v629_v56, %v620_v59  ;;  %v641_v13 = vadd.f32 %v637_v60, %v632_v62  ;;  %v655_v14 = vmul.f32 %v1958_v15, %v612_v47  ;;  %v649_v49 = vadd.f32 %v645_v19, %v640_v63  ;;  %v686_v56 = vld [vmem:[#allocation3 + $0x61] sm:$0xf] }
 0x148   : > { %v634_v44 = vadd.f32 %v630_v58, %v621_v55  ;;  %v656_v9 = vmul.f32 %v1958_v15, %v613_v53  ;;  %v663_v11 = vmul.f32 %v1960_v16, %v612_v47  ;;  %v709_v62 = vmul.f32 %v1968_v20, %v682_v3 }
 0x149   : > { %v642_v7 = vadd.f32 %v638_v52, %v633_v50  ;;  %v650_v38 = vadd.f32 %v646_v57, %v641_v13  ;;  %v658_v59 = vadd.f32 %v654_v1, %v649_v49  ;;  %v664_v55 = vmul.f32 %v1960_v16, %v613_v53  ;;  %v684_v13 = vld [vmem:[#allocation3 + $0x41] sm:$0xf] }
 0x14a   : > { %v643_v39 = vadd.f32 %v639_v51, %v634_v44  ;;  %v672_v60 = vmul.f32 %v1977_v24, %v613_v53  ;;  %v712_v12 = vmul.f32 %v1968_v20, %v685_v40  ;;  %v720_v44 = vmul.f32 %v1970_v21, %v685_v40  ;;  %v758_v51 = vld [vmem:[#allocation3 + $0x52] sm:$0xf] }
 0x14b   : > { %v651_v58 = vadd.f32 %v647_v43, %v642_v7  ;;  %v659_v63 = vadd.f32 %v655_v14, %v650_v38  ;;  %v667_v50 = vadd.f32 %v663_v11, %v658_v59  ;;  %v728_v15 = vmul.f32 %v1972_v22, %v685_v40  ;;  %v759_v43 = vld [vmem:[#allocation3 + $0x62] sm:$0xf] }
 0x14c   : > { %v652_v19 = vadd.f32 %v648_v8, %v643_v39  ;;  %v721_v3 = vmul.f32 %v1970_v21, %v686_v56  ;;  %v729_v16 = vmul.f32 %v1972_v22, %v686_v56  ;;  %v736_v8 = vmul.f32 %v1974_v23, %v685_v40  ;;  %v683_v39 = vld [vmem:[#allocation3 + $0x31] sm:$0xf] }
 0x14d   : > { %v660_v52 = vadd.f32 %v656_v9, %v651_v58  ;;  %v668_v57 = vadd.f32 %v664_v55, %v659_v63  ;;  %v676_v38 = vadd.f32 %v672_v60, %v667_v50  ;;  %v737_v24 = vmul.f32 %v1974_v23, %v686_v56  ;;  %v688_v50 = vld [vmem:[#allocation3 + $0x81] sm:$0xf] }
 0x14e   : > { %v661_v49 = vadd.f32 %v657_v10, %v652_v19  ;;  %v745_v14 = vmul.f32 %v1980_v25, %v686_v56  ;;  %v2099_v10 = vmul.f32 %v1982_v26, %v758_v51  ;;  %v2102_v7 = vmul.f32 %v1984_v27, %v758_v51 }
 0x14f   : > { %v669_v53 = vadd.f32 %v665_v17, %v660_v52  ;;  %v677_v1 = vadd.f32 %v673_v31, %v668_v57  ;;  %v695_v9 = vadd.f32 %v691_v46, %v676_v38  ;;  %v694_v59 = vmul.f32 %v2040_v61, %v683_v39  ;;  %v687_v61 = vld [vmem:[#allocation3 + $0x71] sm:$0xf] }
 0x150   : > { %v670_v47 = vadd.f32 %v666_v18, %v661_v49  ;;  %v2108_v17 = vmul.f32 %v1984_v27, %v759_v43  ;;  %v702_v18 = vmul.f32 %v2043_v4, %v683_v39  ;;  %v703_v31 = vmul.f32 %v2043_v4, %v684_v13 }
 0x151   : > { %v678_v40 = vadd.f32 %v2056_v36, %v669_v53  ;;  %v696_v55 = vadd.f32 %v692_v48, %v677_v1  ;;  %v704_v56 = vadd.f32 %v2067_v5, %v695_v9  ;;  %v710_v36 = vmul.f32 %v1968_v20, %v683_v39  ;;  %v689_v53 = vld [vmem:[#allocation3 + $0x91] sm:$0xf]  ;;  %v753_v1 = vld [vmem:[#allocation3 + $0x2] sm:$0xf] }
 0x152   : > { %v679_v11 = vadd.f32 %v2059_v45, %v670_v47  ;;  %v2116_v45 = vmul.f32 %v1986_v28, %v758_v51  ;;  %v711_v48 = vmul.f32 %v1968_v20, %v684_v13  ;;  %v718_v60 = vmul.f32 %v1970_v21, %v683_v39 }
 0x153   : > { %v697_v58 = vadd.f32 %v2064_v2, %v678_v40  ;;  %v705_v46 = vadd.f32 %v701_v42, %v696_v55  ;;  %v713_v63 = vadd.f32 %v709_v62, %v704_v56  ;;  %v719_v5 = vmul.f32 %v1970_v21, %v684_v13 }
 0x154   : > { %v698_v19 = vadd.f32 %v694_v59, %v679_v11  ;;  %v2122_v2 = vmul.f32 %v1986_v28, %v759_v43  ;;  %v2125_v42 = vmul.f32 %v1988_v29, %v758_v51  ;;  %v727_v38 = vmul.f32 %v1972_v22, %v684_v13  ;;  %v754_v51 = vld [vmem:[#allocation3 + $0x12] sm:$0xf] }
 0x155   : > { %v706_v52 = vadd.f32 %v702_v18, %v697_v58  ;;  %v714_v49 = vadd.f32 %v710_v36, %v705_v46  ;;  %v722_v57 = vadd.f32 %v718_v60, %v713_v63  ;;  %v730_v39 = vmul.f32 %v1972_v22, %v687_v61  ;;  %v2144_v63 = vld [vmem:[#allocation3 + $0x63] sm:$0xf] }
 0x156   : > { %v707_v4 = vadd.f32 %v703_v31, %v698_v19  ;;  %v2130_v9 = vmul.f32 %v1988_v29, %v759_v43  ;;  %v738_v40 = vmul.f32 %v1974_v23, %v687_v61  ;;  %v739_v11 = vmul.f32 %v1974_v23, %v688_v50  ;;  %v755_v31 = vld [vmem:[#allocation3 + $0x22] sm:$0xf]  ;;  %v831_v19 = vld [vmem:[#allocation3 + $0x53] sm:$0xf] }
 0x157   : > { %v715_v20 = vadd.f32 %v711_v48, %v706_v52  ;;  %v723_v47 = vadd.f32 %v719_v5, %v714_v49  ;;  %v731_v21 = vadd.f32 %v727_v38, %v722_v57  ;;  %v746_v13 = vmul.f32 %v1980_v25, %v687_v61  ;;  %v757_v52 = vld [vmem:[#allocation3 + $0x42] sm:$0xf] }
 0x158   : > { %v716_v62 = vadd.f32 %v712_v12, %v707_v4  ;;  %v747_v56 = vmul.f32 %v1980_v25, %v688_v50  ;;  %v748_v22 = vmul.f32 %v1980_v25, %v689_v53  ;;  %v764_v58 = vmul.f32 %v2046_v6, %v753_v1 }
 0x159   : > { %v724_v59 = vadd.f32 %v720_v44, %v715_v20  ;;  %v732_v18 = vadd.f32 %v728_v15, %v723_v47  ;;  %v740_v12 = vadd.f32 %v736_v8, %v731_v21  ;;  %v765_v23 = vmul.f32 %v2046_v6, %v754_v51 }
 0x15a   : > { %v725_v55 = vadd.f32 %v721_v3, %v716_v62  ;;  %v2140_v44 = vmul.f32 %v2001_v37, %v759_v43  ;;  %v756_v3 = vld [vmem:[#allocation3 + $0x32] sm:$0xf]  ;;  %v766_v61 = vmul.f32 %v2046_v6, %v755_v31  ;;  %v773_v8 = vmul.f32 %v2052_v30, %v754_v51 }
 0x15b   : > { %v733_v46 = vadd.f32 %v729_v16, %v724_v59  ;;  %v741_v48 = vadd.f32 %v737_v24, %v732_v18  ;;  %v749_v15 = vadd.f32 %v745_v14, %v740_v12  ;;  %v774_v16 = vmul.f32 %v2052_v30, %v755_v31  ;;  %v760_v51 = vld [vmem:[#allocation3 + $0x72] sm:$0xf]  ;;  %v761_v18 = vld [vmem:[#allocation3 + $0x82] sm:$0xf] }
 0x15c   : > { %v734_v36 = vadd.f32 %v730_v39, %v725_v55  ;;  %v2148_v24 = vmul.f32 %v1992_v32, %v831_v19  ;;  %v2151_v43 = vmul.f32 %v1994_v33, %v831_v19  ;;  %v782_v4 = vmul.f32 %v1982_v26, %v755_v31 }
 0x15d   : > { %v742_v25 = vadd.f32 %v738_v40, %v733_v46  ;;  %v750_v50 = vadd.f32 %v746_v13, %v741_v48  ;;  %v768_v14 = vadd.f32 %v764_v58, %v749_v15  ;;  %v767_v57 = vmul.f32 %v2046_v6, %v756_v3 }
 0x15e   : > { %v743_v60 = vadd.f32 %v739_v11, %v734_v36  ;;  %v2157_v53 = vmul.f32 %v1994_v33, %v2144_v63  ;;  %v775_v20 = vmul.f32 %v2052_v30, %v756_v3  ;;  %v776_v62 = vmul.f32 %v2052_v30, %v757_v52 }
 0x15f   : > { %v751_v49 = vadd.f32 %v747_v56, %v742_v25  ;;  %v769_v38 = vadd.f32 %v765_v23, %v750_v50  ;;  %v777_v47 = vadd.f32 %v773_v8, %v768_v14  ;;  %v783_v40 = vmul.f32 %v1982_v26, %v756_v3 }
 0x160   : > { %v752_v5 = vadd.f32 %v748_v22, %v743_v60  ;;  %v2163_v11 = vmul.f32 %v1996_v34, %v831_v19  ;;  %v784_v6 = vmul.f32 %v1982_v26, %v757_v52  ;;  %v791_v55 = vmul.f32 %v1984_v27, %v756_v3  ;;  %v762_v26 = vld [vmem:[#allocation3 + $0x92] sm:$0xf]  ;;  %v826_v3 = vld [vmem:[#allocation3 + $0x3] sm:$0xf] }
 0x161   : > { %v770_v39 = vadd.f32 %v766_v61, %v751_v49  ;;  %v778_v21 = vadd.f32 %v774_v16, %v769_v38  ;;  %v786_v59 = vadd.f32 %v782_v4, %v777_v47  ;;  %v792_v30 = vmul.f32 %v1984_v27, %v757_v52  ;;  %v828_v16 = vld [vmem:[#allocation3 + $0x23] sm:$0xf]  ;;  %v2189_v49 = vld [vmem:[#allocation3 + $0x54] sm:$0xf] }
 0x162   : > { %v771_v1 = vadd.f32 %v767_v57, %v752_v5  ;;  %v2170_v56 = vmul.f32 %v1996_v34, %v2144_v63  ;;  %v2173_v22 = vmul.f32 %v1998_v35, %v831_v19  ;;  %v800_v46 = vmul.f32 %v1986_v28, %v757_v52  ;;  %v827_v19 = vld [vmem:[#allocation3 + $0x13] sm:$0xf] }
 0x163   : > { %v779_v13 = vadd.f32 %v775_v20, %v770_v39  ;;  %v787_v12 = vadd.f32 %v783_v40, %v778_v21  ;;  %v795_v58 = vadd.f32 %v791_v55, %v786_v59  ;;  %v803_v15 = vmul.f32 %v1986_v28, %v760_v51  ;;  %v830_v40 = vld [vmem:[#allocation3 + $0x43] sm:$0xf] }
 0x164   : > { %v780_v31 = vadd.f32 %v776_v62, %v771_v1  ;;  %v811_v27 = vmul.f32 %v1988_v29, %v760_v51  ;;  %v812_v8 = vmul.f32 %v1988_v29, %v761_v18  ;;  %v819_v25 = vmul.f32 %v2001_v37, %v760_v51 }
 0x165   : > { %v788_v36 = vadd.f32 %v784_v6, %v779_v13  ;;  %v796_v23 = vadd.f32 %v792_v30, %v787_v12  ;;  %v804_v61 = vadd.f32 %v800_v46, %v795_v58  ;;  %v821_v14 = vmul.f32 %v2001_v37, %v762_v26  ;;  %v833_v46 = vld [vmem:[#allocation3 + $0x73] sm:$0xf] }
 0x166   : > { %v789_v48 = vadd.f32 %v2099_v10, %v780_v31  ;;  %v820_v10 = vmul.f32 %v2001_v37, %v761_v18  ;;  %v837_v4 = vmul.f32 %v2070_v54, %v826_v3  ;;  %v845_v29 = vperm.slane %v1927_v0, 2  ;;  %v829_v37 = vld [vmem:[#allocation3 + $0x33] sm:$0xf]  ;;  %v2465_v31 = vld [vmem:[#allocation12_spill] sm:$0xff] }
 0x167   : > { %v797_v60 = vadd.f32 %v2102_v7, %v788_v36  ;;  %v805_v52 = vadd.f32 %v2116_v45, %v796_v23  ;;  %v813_v28 = vadd.f32 %v2125_v42, %v804_v61  ;;  %v838_v45 = vmul.f32 %v2070_v54, %v827_v19 }
 0x168   : > { %v798_v50 = vadd.f32 %v2108_v17, %v789_v48  ;;  %v2196_v57 = vmul.f32 %v1998_v35, %v2144_v63  ;;  %v839_v38 = vmul.f32 %v2070_v54, %v828_v16  ;;  %v846_v20 = vmul.f32 %v845_v29, %v827_v19 }
 0x169   : > { %v806_v5 = vadd.f32 %v2122_v2, %v797_v60  ;;  %v814_v17 = vadd.f32 %v2130_v9, %v805_v52  ;;  %v822_v42 = vadd.f32 %v2140_v44, %v813_v28  ;;  %v847_v1 = vmul.f32 %v845_v29, %v828_v16  ;;  %v2464_v9 = vld [vmem:[#allocation11_spill] sm:$0xff] }
 0x16a   : > { %v807_v7 = vadd.f32 %v803_v15, %v798_v50  ;;  %v891_v2 = vmul.f32 %v2010_v41, %v2144_v63  ;;  %v2204_v21 = vmul.f32 %v2464_v9, %v2189_v49  ;;  %v855_v6 = vmul.f32 %v1992_v32, %v828_v16  ;;  %v2207_v44 = vld [vmem:[#allocation3 + $0x64] sm:$0xf]  ;;  %v2466_v50 = vld [vmem:[#allocation13_spill] sm:$0xff] }
 0x16b   : > { %v815_v62 = vadd.f32 %v811_v27, %v806_v5  ;;  %v823_v39 = vadd.f32 %v819_v25, %v814_v17  ;;  %v841_v51 = vadd.f32 %v837_v4, %v822_v42  ;;  %v840_v18 = vmul.f32 %v2070_v54, %v829_v37  ;;  %v834_v27 = vld [vmem:[#allocation3 + $0x83] sm:$0xf]  ;;  %v900_v42 = vld [vmem:[#allocation3 + $0x14] sm:$0xf] }
 0x16c   : > { %v816_v47 = vadd.f32 %v812_v8, %v807_v7  ;;  %v2212_v12 = vmul.f32 %v2465_v31, %v2189_v49  ;;  %v848_v63 = vmul.f32 %v845_v29, %v829_v37  ;;  %v856_v58 = vmul.f32 %v1992_v32, %v829_v37  ;;  %v899_v7 = vld [vmem:[#allocation3 + $0x4] sm:$0xf] }
 0x16d   : > { %v824_v59 = vadd.f32 %v820_v10, %v815_v62  ;;  %v842_v13 = vadd.f32 %v838_v45, %v823_v39  ;;  %v850_v30 = vadd.f32 %v846_v20, %v841_v51  ;;  %v849_v48 = vmul.f32 %v845_v29, %v830_v40 }
 0x16e   : > { %v825_v55 = vadd.f32 %v821_v14, %v816_v47  ;;  %v2217_v15 = vmul.f32 %v2465_v31, %v2207_v44  ;;  %v857_v54 = vmul.f32 %v1992_v32, %v830_v40  ;;  %v864_v61 = vmul.f32 %v1994_v33, %v829_v37  ;;  %v835_v14 = vld [vmem:[#allocation3 + $0x93] sm:$0xf]  ;;  %v901_v47 = vld [vmem:[#allocation3 + $0x24] sm:$0xf] }
 0x16f   : > { %v843_v26 = vadd.f32 %v839_v38, %v824_v59  ;;  %v851_v23 = vadd.f32 %v847_v1, %v842_v13  ;;  %v859_v3 = vadd.f32 %v855_v6, %v850_v30  ;;  %v865_v60 = vmul.f32 %v1994_v33, %v830_v40  ;;  %v2467_v37 = vld [vmem:[#allocation9_spill] sm:$0xff] }
 0x170   : > { %v844_v36 = vadd.f32 %v840_v18, %v825_v55  ;;  %v2224_v52 = vmul.f32 %v2466_v50, %v2189_v49  ;;  %v873_v16 = vmul.f32 %v1996_v34, %v830_v40  ;;  %v876_v28 = vmul.f32 %v1996_v34, %v833_v46  ;;  %v902_v55 = vld [vmem:[#allocation3 + $0x34] sm:$0xf] }
 0x171   : > { %v852_v8 = vadd.f32 %v848_v63, %v843_v26  ;;  %v860_v19 = vadd.f32 %v856_v58, %v851_v23  ;;  %v868_v10 = vadd.f32 %v864_v61, %v859_v3  ;;  %v884_v5 = vmul.f32 %v1998_v35, %v833_v46  ;;  %v2469_v61 = vld [vmem:[#allocation17_spill] sm:$0xff] }
 0x172   : > { %v853_v25 = vadd.f32 %v849_v48, %v844_v36  ;;  %v885_v33 = vmul.f32 %v1998_v35, %v834_v27  ;;  %v892_v45 = vmul.f32 %v2010_v41, %v833_v46  ;;  %v909_v38 = vperm.slane %v2467_v37, 4  ;;  %v2468_v46 = vld [vmem:[#allocation14_spill] sm:$0xff] }
 0x173   : > { %v861_v32 = vadd.f32 %v857_v54, %v852_v8  ;;  %v869_v29 = vadd.f32 %v865_v60, %v860_v19  ;;  %v877_v17 = vadd.f32 %v873_v16, %v868_v10  ;;  %v894_v1 = vmul.f32 %v2010_v41, %v835_v14  ;;  %v2249_v48 = vld [vmem:[#allocation3 + $0x55] sm:$0xf]  ;;  %v2470_v14 = vld [vmem:[#allocation15_spill] sm:$0xff] }
 0x174   : > { %v862_v4 = vadd.f32 %v2148_v24, %v853_v25  ;;  %v893_v24 = vmul.f32 %v2010_v41, %v834_v27  ;;  %v910_v40 = vmul.f32 %v909_v38, %v899_v7  ;;  %v918_v35 = vperm.slane %v1927_v0, 3  ;;  %v903_v41 = vld [vmem:[#allocation3 + $0x44] sm:$0xf]  ;;  %v906_v60 = vld [vmem:[#allocation3 + $0x74] sm:$0xf] }
 0x175   : > { %v870_v20 = vadd.f32 %v2151_v43, %v861_v32  ;;  %v878_v62 = vadd.f32 %v2163_v11, %v869_v29  ;;  %v886_v39 = vadd.f32 %v2173_v22, %v877_v17  ;;  %v911_v43 = vmul.f32 %v909_v38, %v900_v42  ;;  %v907_v7 = vld [vmem:[#allocation3 + $0x84] sm:$0xf] }
 0x176   : > { %v871_v34 = vadd.f32 %v2157_v53, %v862_v4  ;;  %v948_v53 = vmul.f32 %v2466_v50, %v2207_v44  ;;  %v912_v18 = vmul.f32 %v909_v38, %v901_v47  ;;  %v919_v13 = vmul.f32 %v918_v35, %v900_v42  ;;  %v2471_v42 = vld [vmem:[#allocation16_spill] sm:$0xff] }
 0x177   : > { %v879_v51 = vadd.f32 %v2170_v56, %v870_v20  ;;  %v887_v59 = vadd.f32 %v2196_v57, %v878_v62  ;;  %v895_v11 = vadd.f32 %v891_v2, %v886_v39  ;;  %v920_v58 = vmul.f32 %v918_v35, %v901_v47 }
 0x178   : > { %v880_v6 = vadd.f32 %v876_v28, %v871_v34  ;;  %v955_v26 = vmul.f32 %v2468_v46, %v2189_v49  ;;  %v956_v56 = vmul.f32 %v2468_v46, %v2207_v44  ;;  %v928_v36 = vmul.f32 %v2464_v9, %v901_v47 }
 0x179   : > { %v888_v63 = vadd.f32 %v884_v5, %v879_v51  ;;  %v896_v30 = vadd.f32 %v892_v45, %v887_v59  ;;  %v914_v57 = vadd.f32 %v910_v40, %v895_v11  ;;  %v913_v54 = vmul.f32 %v909_v38, %v902_v55  ;;  %v972_v40 = vld [vmem:[#allocation3 + $0x5] sm:$0xf] }
 0x17a   : > { %v889_v22 = vadd.f32 %v885_v33, %v880_v6  ;;  %v964_v27 = vmul.f32 %v2469_v61, %v2207_v44  ;;  %v921_v8 = vmul.f32 %v918_v35, %v902_v55  ;;  %v922_v25 = vmul.f32 %v918_v35, %v903_v41  ;;  %v973_v6 = vld [vmem:[#allocation3 + $0x15] sm:$0xf] }
 0x17b   : > { %v897_v2 = vadd.f32 %v893_v24, %v888_v63  ;;  %v915_v3 = vadd.f32 %v911_v43, %v896_v30  ;;  %v923_v19 = vadd.f32 %v919_v13, %v914_v57  ;;  %v929_v28 = vmul.f32 %v2464_v9, %v902_v55  ;;  %v908_v24 = vld [vmem:[#allocation3 + $0x94] sm:$0xf]  ;;  %v978_v43 = vld [vmem:[#allocation3 + $0x65] sm:$0xf] }
 0x17c   : > { %v898_v23 = vadd.f32 %v894_v1, %v889_v22  ;;  %v2256_v32 = vmul.f32 %v2470_v14, %v2249_v48  ;;  %v930_v4 = vmul.f32 %v2464_v9, %v903_v41  ;;  %v937_v5 = vmul.f32 %v2465_v31, %v902_v55 }
 0x17d   : > { %v916_v49 = vadd.f32 %v912_v18, %v897_v2  ;;  %v924_v16 = vadd.f32 %v920_v58, %v915_v3  ;;  %v932_v29 = vadd.f32 %v928_v36, %v923_v19  ;;  %v938_v45 = vmul.f32 %v2465_v31, %v903_v41  ;;  %v974_v18 = vld [vmem:[#allocation3 + $0x25] sm:$0xf]  ;;  %v975_v2 = vld [vmem:[#allocation3 + $0x35] sm:$0xf] }
 0x17e   : > { %v917_v10 = vadd.f32 %v913_v54, %v898_v23  ;;  %v2263_v38 = vmul.f32 %v2471_v42, %v2249_v48  ;;  %v946_v34 = vmul.f32 %v2466_v50, %v903_v41  ;;  %v949_v62 = vmul.f32 %v2466_v50, %v906_v60  ;;  %v976_v19 = vld [vmem:[#allocation3 + $0x45] sm:$0xf] }
 0x17f   : > { %v925_v44 = vadd.f32 %v921_v8, %v916_v49  ;;  %v933_v33 = vadd.f32 %v929_v28, %v924_v16  ;;  %v941_v20 = vadd.f32 %v937_v5, %v932_v29  ;;  %v957_v1 = vmul.f32 %v2468_v46, %v906_v60  ;;  %v2473_v16 = vld [vmem:[#allocation19_spill] sm:$0xff] }
 0x180   : > { %v926_v17 = vadd.f32 %v922_v25, %v917_v10  ;;  %v958_v31 = vmul.f32 %v2468_v46, %v907_v7  ;;  %v965_v51 = vmul.f32 %v2469_v61, %v906_v60  ;;  %v982_v59 = vperm.slane %v2467_v37, 5 }
 0x181   : > { %v934_v9 = vadd.f32 %v930_v4, %v925_v44  ;;  %v942_v39 = vadd.f32 %v938_v45, %v933_v33  ;;  %v950_v35 = vadd.f32 %v946_v34, %v941_v20  ;;  %v967_v63 = vmul.f32 %v2469_v61, %v908_v24 }
 0x182   : > { %v935_v47 = vadd.f32 %v2204_v21, %v926_v17  ;;  %v966_v21 = vmul.f32 %v2469_v61, %v907_v7  ;;  %v983_v22 = vmul.f32 %v982_v59, %v972_v40  ;;  %v991_v30 = vperm.slane %v1927_v0, 4  ;;  %v979_v7 = vld [vmem:[#allocation3 + $0x75] sm:$0xf]  ;;  %v2474_v40 = vld [vmem:[#allocation23_spill] sm:$0xff] }
 0x183   : > { %v943_v11 = vadd.f32 %v2212_v12, %v934_v9  ;;  %v951_v55 = vadd.f32 %v2224_v52, %v942_v39  ;;  %v959_v13 = vadd.f32 %v955_v26, %v950_v35  ;;  %v984_v57 = vmul.f32 %v982_v59, %v973_v6  ;;  %v2472_v26 = vld [vmem:[#allocation18_spill] sm:$0xff]  ;;  %v980_v9 = vld [vmem:[#allocation3 + $0x85] sm:$0xf] }
 0x184   : > { %v944_v50 = vadd.f32 %v2217_v15, %v935_v47  ;;  %v1013_v36 = vmul.f32 %v2471_v42, %v978_v43  ;;  %v985_v15 = vmul.f32 %v982_v59, %v974_v18  ;;  %v992_v23 = vmul.f32 %v991_v30, %v973_v6 }
 0x185   : > { %v952_v41 = vadd.f32 %v948_v53, %v943_v11  ;;  %v960_v46 = vadd.f32 %v956_v56, %v951_v55  ;;  %v968_v12 = vadd.f32 %v964_v27, %v959_v13  ;;  %v993_v8 = vmul.f32 %v991_v30, %v974_v18 }
 0x186   : > { %v953_v58 = vadd.f32 %v949_v62, %v944_v50  ;;  %v1020_v61 = vmul.f32 %v2472_v26, %v2249_v48  ;;  %v1021_v25 = vmul.f32 %v2472_v26, %v978_v43  ;;  %v1001_v56 = vmul.f32 %v2470_v14, %v974_v18 }
 0x187   : > { %v961_v52 = vadd.f32 %v957_v1, %v952_v41  ;;  %v969_v3 = vadd.f32 %v965_v51, %v960_v46  ;;  %v987_v53 = vadd.f32 %v983_v22, %v968_v12  ;;  %v986_v10 = vmul.f32 %v982_v59, %v975_v2  ;;  %v981_v59 = vld [vmem:[#allocation3 + $0x95] sm:$0xf]  ;;  %v1047_v46 = vld [vmem:[#allocation3 + $0x26] sm:$0xf] }
 0x188   : > { %v962_v54 = vadd.f32 %v958_v31, %v953_v58  ;;  %v1028_v28 = vmul.f32 %v2473_v16, %v2249_v48  ;;  %v994_v4 = vmul.f32 %v991_v30, %v975_v2  ;;  %v1002_v5 = vmul.f32 %v2470_v14, %v975_v2 }
 0x189   : > { %v970_v60 = vadd.f32 %v966_v21, %v961_v52  ;;  %v988_v27 = vadd.f32 %v984_v57, %v969_v3  ;;  %v996_v29 = vadd.f32 %v992_v23, %v987_v53  ;;  %v995_v33 = vmul.f32 %v991_v30, %v976_v19  ;;  %v1045_v21 = vld [vmem:[#allocation3 + $0x6] sm:$0xf] }
 0x18a   : > { %v971_v49 = vadd.f32 %v967_v63, %v962_v54  ;;  %v1029_v20 = vmul.f32 %v2473_v16, %v978_v43  ;;  %v1003_v34 = vmul.f32 %v2470_v14, %v976_v19  ;;  %v1010_v24 = vmul.f32 %v2471_v42, %v975_v2  ;;  %v1046_v63 = vld [vmem:[#allocation3 + $0x16] sm:$0xf] }
 0x18b   : > { %v989_v44 = vadd.f32 %v985_v15, %v970_v60  ;;  %v997_v45 = vadd.f32 %v993_v8, %v988_v27  ;;  %v1005_v62 = vadd.f32 %v1001_v56, %v996_v29  ;;  %v1011_v1 = vmul.f32 %v2471_v42, %v976_v19  ;;  %v1050_v15 = vld [vmem:[#allocation3 + $0x56] sm:$0xf]  ;;  %v2476_v27 = vld [vmem:[#allocation20_spill] sm:$0xff] }
 0x18c   : > { %v990_v17 = vadd.f32 %v986_v10, %v971_v49  ;;  %v1037_v35 = vmul.f32 %v2474_v40, %v978_v43  ;;  %v1019_v51 = vmul.f32 %v2472_v26, %v976_v19  ;;  %v1022_v6 = vmul.f32 %v2472_v26, %v979_v7  ;;  %v2475_v8 = vld [vmem:[#allocation10_spill] sm:$0xff]  ;;  %v1051_v19 = vld [vmem:[#allocation3 + $0x66] sm:$0xf] }
 0x18d   : > { %v998_v47 = vadd.f32 %v994_v4, %v989_v44  ;;  %v1006_v48 = vadd.f32 %v1002_v5, %v997_v45  ;;  %v1014_v31 = vadd.f32 %v1010_v24, %v1005_v62  ;;  %v1030_v55 = vmul.f32 %v2473_v16, %v979_v7  ;;  %v1049_v49 = vld [vmem:[#allocation3 + $0x46] sm:$0xf] }
 0x18e   : > { %v999_v39 = vadd.f32 %v995_v33, %v990_v17  ;;  %v1031_v13 = vmul.f32 %v2473_v16, %v980_v9  ;;  %v1038_v42 = vmul.f32 %v2474_v40, %v979_v7  ;;  %v1055_v43 = vperm.slane %v2467_v37, 6 }
 0x18f   : > { %v1007_v11 = vadd.f32 %v1003_v34, %v998_v47  ;;  %v1015_v50 = vadd.f32 %v1011_v1, %v1006_v48  ;;  %v1023_v18 = vadd.f32 %v1019_v51, %v1014_v31  ;;  %v1039_v58 = vmul.f32 %v2474_v40, %v980_v9  ;;  %v2478_v47 = vld [vmem:[#allocation22_spill] sm:$0xff] }
 0x190   : > { %v1008_v14 = vadd.f32 %v2256_v32, %v999_v39  ;;  %v1040_v57 = vmul.f32 %v2474_v40, %v981_v59  ;;  %v1056_v12 = vmul.f32 %v1055_v43, %v1045_v21  ;;  %v1064_v2 = vperm.slane %v1927_v0, 5  ;;  %v2477_v0 = vld [vmem:[#allocation21_spill] sm:$0xff] }
 0x191   : > { %v1016_v22 = vadd.f32 %v2263_v38, %v1007_v11  ;;  %v1024_v41 = vadd.f32 %v1020_v61, %v1015_v50  ;;  %v1032_v32 = vadd.f32 %v1028_v28, %v1023_v18  ;;  %v1057_v3 = vmul.f32 %v1055_v43, %v1046_v63  ;;  %v1048_v38 = vld [vmem:[#allocation3 + $0x36] sm:$0xf]  ;;  %v1597_v50 = vld [vmem:[%s2412_s3 + $0x30] ss:$0 sm:$0xff]  ;;  %v1598_v18 = vld [vmem:[%s2413_s4] ss:$0 sm:$0xff] }
 0x192   : > { %v1017_v30 = vadd.f32 %v1013_v36, %v1008_v14  ;;  %v1100_v37 = vperm.slane %v2475_v8, 1  ;;  %v1058_v36 = vmul.f32 %v1055_v43, %v1047_v46  ;;  %v1065_v61 = vmul.f32 %v1064_v2, %v1046_v63 }
 0x193   : > { %v1025_v23 = vadd.f32 %v1021_v25, %v1016_v22  ;;  %v1033_v54 = vadd.f32 %v1029_v20, %v1024_v41  ;;  %v1041_v26 = vadd.f32 %v1037_v35, %v1032_v32  ;;  %v1066_v10 = vmul.f32 %v1064_v2, %v1047_v46  ;;  %v1052_v35 = vld [vmem:[#allocation3 + $0x76] sm:$0xf] }
 0x194   : > { %v1026_v52 = vadd.f32 %v1022_v6, %v1017_v30  ;;  %v1077_v16 = vmul.f32 %v2476_v27, %v1050_v15  ;;  %v1085_v28 = vmul.f32 %v2477_v0, %v1050_v15  ;;  %v1074_v4 = vmul.f32 %v2476_v27, %v1047_v46  ;;  %v1054_v46 = vld [vmem:[#allocation3 + $0x96] sm:$0xf] }
 0x195   : > { %v1034_v53 = vadd.f32 %v1030_v55, %v1025_v23  ;;  %v1042_v60 = vadd.f32 %v1038_v42, %v1033_v54  ;;  %v1060_v25 = vadd.f32 %v1056_v12, %v1041_v26  ;;  %v1059_v7 = vmul.f32 %v1055_v43, %v1048_v38 }
 0x196   : > { %v1035_v56 = vadd.f32 %v1031_v13, %v1026_v52  ;;  %v1086_v17 = vmul.f32 %v2477_v0, %v1051_v19  ;;  %v1067_v33 = vmul.f32 %v1064_v2, %v1048_v38  ;;  %v1068_v45 = vmul.f32 %v1064_v2, %v1049_v49  ;;  %v1053_v13 = vld [vmem:[#allocation3 + $0x86] sm:$0xf] }
 0x197   : > { %v1043_v29 = vadd.f32 %v1039_v58, %v1034_v53  ;;  %v1061_v44 = vadd.f32 %v1057_v3, %v1042_v60  ;;  %v1069_v20 = vadd.f32 %v1065_v61, %v1060_v25  ;;  %v1075_v9 = vmul.f32 %v2476_v27, %v1048_v38 }
 0x198   : > { %v1044_v5 = vadd.f32 %v1040_v57, %v1035_v56  ;;  %v1093_v39 = vmul.f32 %v2478_v47, %v1050_v15  ;;  %v1076_v48 = vmul.f32 %v2476_v27, %v1049_v49  ;;  %v1083_v40 = vmul.f32 %v2477_v0, %v1048_v38 }
 0x199   : > { %v1062_v34 = vadd.f32 %v1058_v36, %v1043_v29  ;;  %v1070_v24 = vadd.f32 %v1066_v10, %v1061_v44  ;;  %v1078_v1 = vadd.f32 %v1074_v4, %v1069_v20  ;;  %v1084_v59 = vmul.f32 %v2477_v0, %v1049_v49 }
 0x19a   : > { %v1063_v62 = vadd.f32 %v1059_v7, %v1044_v5  ;;  %v1094_v11 = vmul.f32 %v2478_v47, %v1051_v19  ;;  %v1101_v14 = vmul.f32 %v1100_v37, %v1050_v15  ;;  %v1092_v21 = vmul.f32 %v2478_v47, %v1049_v49 }
 0x19b   : > { %v1071_v31 = vadd.f32 %v1067_v33, %v1062_v34  ;;  %v1079_v6 = vadd.f32 %v1075_v9, %v1070_v24  ;;  %v1087_v55 = vadd.f32 %v1083_v40, %v1078_v1  ;;  %v1095_v22 = vmul.f32 %v2478_v47, %v1052_v35 }
 0x19c   : > { %v1072_v51 = vadd.f32 %v1068_v45, %v1063_v62  ;;  %v1102_v30 = vmul.f32 %v1100_v37, %v1051_v19  ;;  %v1111_v58 = vmul.f32 %v1597_v50, %v1052_v35  ;;  %v1103_v32 = vmul.f32 %v1100_v37, %v1052_v35 }
 0x19d   : > { %v1080_v42 = vadd.f32 %v1076_v48, %v1071_v31  ;;  %v1088_v43 = vadd.f32 %v1084_v59, %v1079_v6  ;;  %v1096_v41 = vadd.f32 %v1092_v21, %v1087_v55  ;;  %v1104_v15 = vmul.f32 %v1100_v37, %v1053_v13 }
 0x19e   : > { %v1081_v63 = vadd.f32 %v1077_v16, %v1072_v51  ;;  %v1110_v23 = vmul.f32 %v1597_v50, %v1051_v19  ;;  %v1122_v54 = vrot.slane %v1598_v18, 4  ;;  %v1112_v3 = vmul.f32 %v1597_v50, %v1053_v13 }
 0x19f   : > { %v1089_v57 = vadd.f32 %v1085_v28, %v1080_v42  ;;  %v1097_v2 = vadd.f32 %v1093_v39, %v1088_v43  ;;  %v1105_v52 = vadd.f32 %v1101_v14, %v1096_v41  ;;  %v1113_v36 = vmul.f32 %v1597_v50, %v1054_v46 }
 0x1a0   : > { %v1090_v12 = vadd.f32 %v1086_v17, %v1081_v63  ;;  %v1682_v29 = vmov 16.0   ;;  %v1683_v45 = vmov 839922192   ;;  %v1684_v34 = vmov 1985246804  }
 0x1a1   : > { %v1098_v8 = vadd.f32 %v1094_v11, %v1089_v57  ;;  %v1106_v26 = vadd.f32 %v1102_v30, %v1097_v2  ;;  %v1114_v61 = vadd.f32 %v1110_v23, %v1105_v52  ;;  %1604 = vrcp.f32 %v1682_v29 }
 0x1a2   : > { %v1099_v38 = vadd.f32 %v1095_v22, %v1090_v12  ;;  %v1161_v20 = vunpack.c.l.s4 %v1683_v45  ;;  %v1165_v62 = vunpack.c.l.s4 %v1684_v34 }
 0x1a3   : > { %v1115_v53 = vadd.f32 %v1111_v58, %v1106_v26  ;;  %v1107_v56 = vadd.f32 %v1103_v32, %v1098_v8  ;;  %v1124_v49 = vadd.f32 %v1598_v18, %v1114_v61  ;;  %v1527_v32 = vld [vmem:[%s2416_s7] sm:$0xff] }
 0x1a4   : > { %v1108_v60 = vadd.f32 %v1104_v15, %v1099_v38  ;;  %v2323_v9 = vunpack.c.0.s8 %v1161_v20  ;;  %v2325_v47 = vunpack.c.0.s8 %v1165_v62  ;;  %1317 = vmatpush.bf16.msra.mxu1 %v1527_v32  ;;  %v1599_v8 = vld [vmem:[%s2414_s5] ss:$0 sm:$0xff] }
 0x1a5   : > { %v1125_v10 = vadd.f32 %v1122_v54, %v1115_v53  ;;  %v1116_v27 = vadd.f32 %v1112_v3, %v1107_v56  ;;  %1132 = vst [vmem:[#allocation1] ss:$2 sm:$0xff] %v1124_v49  ;;  %v1263_v56 = vrot.slane %v1599_v8, 4 }
 0x1a6   : > { %v1117_v16 = vadd.f32 %v1113_v36, %v1108_v60  ;;  %v1600_v36 = vld [vmem:[%s2415_s6] ss:$0 sm:$0xff] }
 0x1a7   : > { %1134 = vst [vmem:[#allocation1 + $0x1] ss:$2 sm:$0xff] %v1125_v10  ;;  %v1126_v0 = vadd.f32 %v1598_v18, %v1116_v27  ;;  %v1605_v5 = vpop.eup %1604  ;;  %v1273_v27 = vrot.slane %v1600_v36, 4 }
 0x1a8   : > { %v1127_v37 = vadd.f32 %v1122_v54, %v1117_v16  ;;  %v1150_v7 = vmul.f32 16.0, %v1605_v5  ;;  %vm1154_vm8 = vweird.f32 %v1605_v5 }
 0x1a9   : > { %1136 = vst [vmem:[#allocation1 + $0x10] ss:$2 sm:$0xff] %v1126_v0 }
 0x1aa   : > { %1138 = vst [vmem:[#allocation1 + $0x11] ss:$2 sm:$0xff] %v1127_v37  ;;  %v1151_v44 = vsub.f32 1.0, %v1150_v7 }
 0x1ac   : > { %v1152_v17 = vmul.f32 %v1605_v5, %v1151_v44 }
 0x1ae   : > { %v1139_v19 = vld.sshfl [vmem:[#allocation1] sm:$0xff pattern:$0x75316420]  ;;  %v1153_v33 = vadd.f32 %v1605_v5, %v1152_v17 }
 0x1af   : > { %v1143_v28 = vsel %vm566_vm5, %v1139_v19, 0.0 }
 0x1b0   : > { %1144 = vadd.xlane.f32.xlu0 %v1143_v28  ;;  %v1155_v24 = vsel %vm1154_vm8, %v1605_v5, %v1153_v33 }
 0x1b1   : > { %v1140_v25 = vld.sshfl [vmem:[#allocation1 + $0x10] sm:$0xff pattern:$0x75316420] }
 0x1b2   : > { %v1146_v4 = vsel %vm566_vm5, %v1140_v25, 0.0 }
 0x1b3   : > { %1147 = vadd.xlane.f32.xlu1 %v1146_v4 }
 0x223   : > { %v1145_v39 = vpop.xlane.xlu0 %1144 }
 0x224   : > { %v1156_v48 = vmul.f32 %v1155_v24, %v1145_v39 }
 0x226   : > { %v1163_v1 = vperm.slane %v1156_v48, %v2323_v9  ;;  %v1167_v40 = vperm.slane %v1156_v48, %v2325_v47  ;;  %v1148_v35 = vpop.xlane.xlu1 %1147 }
 0x227   : > { %v1157_v31 = vmul.f32 %v1155_v24, %v1148_v35  ;;  %v1601_v35 = vld [vmem:[%s2417_s8] ss:$0 sm:$0xff] }
 0x228   : > { %v1180_v51 = vsub.f32 %v1124_v49, %v1163_v1  ;;  %v1181_v6 = vsub.f32 %v1125_v10, %v1167_v40  ;;  %v1529_v1 = vld [vmem:[%s2418_s9 + $0x8] sm:$0xff]  ;;  %v1528_v40 = vld [vmem:[%s2418_s9] sm:$0xff] }
 0x229   : > { %v1171_v59 = vperm.slane %v1157_v31, %v2323_v9  ;;  %v1175_v11 = vperm.slane %v1157_v31, %v2325_v47 }
 0x22a   : > { %v1184_v14 = vmul.f32 %v1180_v51, %v1180_v51  ;;  %v1185_v50 = vmul.f32 %v1181_v6, %v1181_v6 }
 0x22b   : > { %v1182_v55 = vsub.f32 %v1126_v0, %v1171_v59  ;;  %v1183_v21 = vsub.f32 %v1127_v37, %v1175_v11 }
 0x22c   : > { %1192 = vst [vmem:[#allocation1] ss:$2 sm:$0xff] %v1184_v14 }
 0x22d   : > { %1194 = vst [vmem:[#allocation1 + $0x1] ss:$2 sm:$0xff] %v1185_v50  ;;  %v1186_v18 = vmul.f32 %v1182_v55, %v1182_v55  ;;  %v1187_v13 = vmul.f32 %v1183_v21, %v1183_v21 }
 0x22f   : > { %1196 = vst [vmem:[#allocation1 + $0x10] ss:$2 sm:$0xff] %v1186_v18 }
 0x230   : > { %1198 = vst [vmem:[#allocation1 + $0x11] ss:$2 sm:$0xff] %v1187_v13 }
 0x234   : > { %v1199_v42 = vld.sshfl [vmem:[#allocation1] sm:$0xff pattern:$0x75316420] }
 0x235   : > { %v1203_v63 = vsel %vm566_vm5, %v1199_v42, 0.0 }
 0x236   : > { %1204 = vadd.xlane.f32.xlu2 %v1203_v63 }
 0x237   : > { %v1200_v43 = vld.sshfl [vmem:[#allocation1 + $0x10] sm:$0xff pattern:$0x75316420] }
 0x238   : > { %v1206_v22 = vsel %vm566_vm5, %v1200_v43, 0.0 }
 0x23e   : > { %1207 = vadd.xlane.f32.xlu2 %v1206_v22 }
 0x2a9   : > { %v1205_v30 = vpop.xlane.xlu2 %1204 }
 0x2aa   : > { %v1209_v41 = vmul.f32 %v1205_v30, %v1155_v24 }
 0x2ac   : > { %v1211_v58 = vadd.f32 1e-05, %v1209_v41 }
 0x2ae   : > { %1606 = vrsqrt.f32 %v1211_v58  ;;  %vm1219_vm10 = vweird.f32 %v1211_v58 }
 0x2b1   : > { %v1208_v46 = vpop.xlane.xlu2 %1207 }
 0x2b2   : > { %v1210_v57 = vmul.f32 %v1208_v46, %v1155_v24 }
 0x2b4   : > { %v1607_v12 = vpop.eup %1606  ;;  %v1212_v2 = vadd.f32 1e-05, %v1210_v57 }
 0x2b5   : > { %v1214_v15 = vmul.f32 %v1607_v12, %v1211_v58  ;;  %vm1220_vm9 = vweird.f32 %v1607_v12 }
 0x2b6   : > { %1608 = vrsqrt.f32 %v1212_v2  ;;  %vm1221_vm11 = vmor %vm1219_vm10, %vm1220_vm9  ;;  %vm1229_vm13 = vweird.f32 %v1212_v2 }
 0x2b7   : > { %v1215_v23 = vmul.f32 %v1607_v12, %v1214_v15  ;;  %v1602_v15 = vld [vmem:[%s2419_s10] ss:$0 sm:$0xff] }
 0x2b9   : > { %v1216_v52 = vmul.f32 0.5, %v1215_v23  ;;  %v1603_v23 = vld [vmem:[%s2420_s11] ss:$0 sm:$0xff] }
 0x2bb   : > { %v1217_v54 = vsub.f32 1.5, %v1216_v52 }
 0x2bc   : > { %v1609_v3 = vpop.eup %1608 }
 0x2bd   : > { %v1218_v26 = vmul.f32 %v1607_v12, %v1217_v54  ;;  %v1224_v38 = vmul.f32 %v1609_v3, %v1212_v2  ;;  %vm1230_vm12 = vweird.f32 %v1609_v3 }
 0x2be   : > { %vm1231_vm14 = vmor %vm1229_vm13, %vm1230_vm12 }
 0x2bf   : > { %v1222_v61 = vsel %vm1221_vm11, %v1607_v12, %v1218_v26  ;;  %v1225_v53 = vmul.f32 %v1609_v3, %v1224_v38 }
 0x2c0   : > { %v1238_v60 = vperm.slane %v1222_v61, %v2323_v9  ;;  %v1242_v49 = vperm.slane %v1222_v61, %v2325_v47 }
 0x2c1   : > { %v1226_v10 = vmul.f32 0.5, %v1225_v53 }
 0x2c2   : > { %v1255_v16 = vmul.f32 %v1238_v60, %v1180_v51  ;;  %v1256_v0 = vmul.f32 %v1242_v49, %v1181_v6 }
 0x2c3   : > { %v1227_v37 = vsub.f32 1.5, %v1226_v10 }
 0x2c4   : > { %v1265_v19 = vmul.f32 %v1599_v8, %v1255_v16  ;;  %v1266_v28 = vmul.f32 %v1263_v56, %v1256_v0 }
 0x2c5   : > { %v1228_v25 = vmul.f32 %v1609_v3, %v1227_v37 }
 0x2c6   : > { %v1275_v4 = vadd.f32 %v1600_v36, %v1265_v19  ;;  %v1276_v29 = vadd.f32 %v1273_v27, %v1266_v28 }
 0x2c7   : > { %v1232_v5 = vsel %vm1231_vm14, %v1609_v3, %v1228_v25 }
 0x2c8   : > { %1283 = vst [vmem:[#allocation1] ss:$2 sm:$0xff] %v1275_v4  ;;  %v1246_v7 = vperm.slane %v1232_v5, %v2323_v9  ;;  %v1250_v44 = vperm.slane %v1232_v5, %v2325_v47  ;;  %v1531_v9 = vld [vmem:[%s2418_s9 + $0x18] sm:$0xff]  ;;  %v1530_v47 = vld [vmem:[%s2418_s9 + $0x10] sm:$0xff] }
 0x2c9   : > { %1285 = vst [vmem:[#allocation1 + $0x1] ss:$2 sm:$0xff] %v1276_v29  ;;  %1386 = vmatpush.bf16.msra.mxu2 %v1531_v9 }
 0x2ca   : > { %v1257_v17 = vmul.f32 %v1246_v7, %v1182_v55  ;;  %v1258_v33 = vmul.f32 %v1250_v44, %v1183_v21 }
 0x2cc   : > { %v1267_v45 = vmul.f32 %v1599_v8, %v1257_v17  ;;  %v1268_v20 = vmul.f32 %v1263_v56, %v1258_v33  ;;  %v2479_v8 = vld [vmem:[#allocation8_spill] sm:$0xff]  ;;  %v2480_v56 = vld [vmem:[#allocation7_spill] sm:$0xff] }
 0x2cd   : > { %1387 = vmatpush.bf16.msra.mxu2 %v1530_v47 }
 0x2ce   : > { %v1277_v34 = vadd.f32 %v1600_v36, %v1267_v45  ;;  %v1278_v62 = vadd.f32 %v1273_v27, %v1268_v20 }
 0x2d0   : > { %1287 = vst [vmem:[#allocation1 + $0x10] ss:$2 sm:$0xff] %v1277_v34  ;;  %v1290_v24 = vld.sshfl [vmem:[#allocation1] sm:$0xff pattern:$0x75316420] }
 0x2d1   : > { %1289 = vst [vmem:[#allocation1 + $0x11] ss:$2 sm:$0xff] %v1278_v62  ;;  %1388 = vmatpush.bf16.msra.mxu2 %v1529_v1 }
 0x2d5   : > { %1389 = vmatpush.bf16.msra.mxu2 %v1528_v40 }
 0x2d8   : > { %v1291_v39 = vld.sshfl [vmem:[#allocation1 + $0x10] sm:$0xff pattern:$0x75316420] }
 0x2d9   : > { %v1294_v48 = vpack.c.bf16 %v1291_v39, %v1290_v24 }
 0x2db   : > { %1503 = vmatmul.msk.bf16.vlgmr.msra.gmra.mxu1 %vm566_vm5, %v1294_v48 }
 0x358   : > { %v1319_v31 = vpop.f32.mrf.mxu1 }
 0x359   : > { %v1320_v51 = vadd.f32 %v1601_v35, %v1319_v31 }
 0x35b   : > { %v1326_v6 = vmul.f32 0.044715, %v1320_v51  ;;  %v1324_v58 = vmul.f32 0.5, %v1320_v51 }
 0x35d   : > { %v1328_v59 = vmul.f32 %v1326_v6, %v1320_v51 }
 0x35f   : > { %v1330_v11 = vmul.f32 %v1328_v59, %v1320_v51 }
 0x360   : > { %v1321_v14 = vpop.f32.mrf.mxu1 }
 0x361   : > { %v1322_v50 = vadd.f32 %v1601_v35, %v1321_v14  ;;  %v1332_v55 = vadd.f32 %v1330_v11, %v1320_v51 }
 0x363   : > { %v1327_v21 = vmul.f32 0.044715, %v1322_v50  ;;  %v1334_v13 = vmul.f32 0.7978846, %v1332_v55  ;;  %v1325_v46 = vmul.f32 0.5, %v1322_v50 }
 0x365   : > { %v1329_v18 = vmul.f32 %v1327_v21, %v1322_v50  ;;  %1610 = vtanh.f32 %v1334_v13 }
 0x367   : > { %v1331_v42 = vmul.f32 %v1329_v18, %v1322_v50 }
 0x369   : > { %v1333_v63 = vadd.f32 %v1331_v42, %v1322_v50 }
 0x36b   : > { %v1335_v43 = vmul.f32 0.7978846, %v1333_v63  ;;  %v1611_v22 = vpop.eup %1610 }
 0x36c   : > { %v1338_v30 = vadd.f32 1.0, %v1611_v22 }
 0x36d   : > { %1612 = vtanh.f32 %v1335_v43 }
 0x36e   : > { %v1340_v57 = vmul.f32 %v1338_v30, %v1324_v58 }
 0x373   : > { %v1613_v41 = vpop.eup %1612 }
 0x374   : > { %v1339_v32 = vadd.f32 1.0, %v1613_v41 }
 0x376   : > { %v1341_v12 = vmul.f32 %v1339_v32, %v1325_v46 }
 0x378   : > { %v1342_v2 = vpack.c.bf16 %v1341_v12, %v1340_v57 }
 0x37a   : > { %1520 = vmatmul.msk.bf16.vlgmr.msra.gmra.mxu2 %vm498_vm3, %v1342_v2 }
 0x3fd   : > { %v1391_v52 = vpop.f32.mrf.mxu2 }
 0x3fe   : > { %v1392_v54 = vadd.f32 %v1602_v15, %v1391_v52 }
 0x400   : > { %v1400_v3 = vmul.f32 %v1603_v23, %v1392_v54 }
 0x402   : > { %v1402_v26 = vadd.f32 %v1400_v3, %v2479_v8 }
 0x404   : > { %v1406_v38 = vrot.slane %v1402_v26, 4  ;;  %1410 = vst.msk [vmem:[%s406_s19] sm:$0xf] %vm595_vm7, %v1402_v26 }
 0x405   : > { %v1393_v36 = vpop.f32.mrf.mxu2 }
 0x406   : > { %1411 = vst.msk [vmem:[%s406_s19 + $0x4] sm:$0xf] %vm595_vm7, %v1406_v38  ;;  %v1394_v61 = vadd.f32 %v1602_v15, %v1393_v36 }
 0x408   : > { %v1401_v53 = vmul.f32 %v1603_v23, %v1394_v61 }
 0x40a   : > { %v1403_v60 = vadd.f32 %v1401_v53, %v2480_v56 }
 0x40c   : > { %v1407_v49 = vrot.slane %v1403_v60, 4  ;;  %1412 = vst.msk [vmem:[%s406_s19 + $0x8] sm:$0xf] %vm595_vm7, %v1403_v60 }
 0x40e   : > { %1413 = vst.msk [vmem:[%s406_s19 + $0xc] sm:$0xf] %vm595_vm7, %v1407_v49 }
 0x40f   : > { %1641 = shalt.err (!%p1638_p3)
}
 0x410   : > { %s1685_s29 = smov 4   ;;  %s2481_s19 = smov 64  }
 0x411   : > { %1549 = dma.vmem_to_hbm [thread:$0]  (%p1789_p5), %s1428_s26, 256, %s1430_s15, %s1415_s25, %s2481_s19, %s2481_s19, %s1685_s29  }
 0x412 PF: > { %p1555_p4 = scmp.ge.s32.totalorder %s1676_s24, 2  ;;  %s1444_s18 = sand.u32 1, %s1664_s21  }
 0x413   : > { %s1445_s1 = scalar_lea.sflag [#allocation5], %s1444_s18 }
 0x414   : > { %p1552_p7 = pnand %p1555_p4, %p1793_p6 }
 0x416   : > { %p1553_p8 = pneg %p1552_p7 }
 0x418   : > { %1659 = dma.done.wait (%p1553_p8), %s1445_s1, 256  }
 0x419   : > { %1661 = vsyncadd (%p1553_p8), %s1445_s1, 4294967040  ;;  %p22_p9 = scmp.ge.s32.totalorder %s1776_s27, 4   ;;  %s2482_s21 = smov %s1668_s22 }
 0x41a   : > { %s2483_s22 = smov %s1672_s23  ;;  %s2484_s23 = smov %s1787_s30 }
 0x41b   : > { %s2485_s24 = smov %s1776_s27  ;;  %24 = sbr.rel (!%p22_p9) target bundleno = 6 (0x6), region = 117 }
 0x420   :  { %1451 = vsyncpa [#allocation5], 1 }
 0x421   :  { %1453 = vsyncpa [#allocation5 + $0x1], 1 }

</bundles_post_ra>
